<compile_context>
chip_gen: v7x
topology: tpu7x:2x2x1
jax: 0.10.0
libtpu: 0.0.40
codegen_flags: <defaults>
</compile_context>

<pallas_src>
import functools

import jax
import jax.numpy as jnp
import numpy as np
from jax.experimental import pallas as pl
from jax.experimental.pallas import tpu as pltpu


def _round_up(x, m):
    return (x + m - 1) // m * m


def _fused_regression_kernel(x_ref, w_ref, b_ref, o_ref, act0_ref, act1_ref, *,
                             H, W, MR, Cin_p, Cout_p, n_layers):
    """All conv layers for one batch element; activations ping-pong in VMEM.

    x_ref   : (1, H, W, Cin_p)            channel-padded input tile
    w_ref   : (L, 9, Cin_p, Cout_p)       per-tap weights (Cin padded to 8,
                                          Cout lane-padded to 128)
    b_ref   : (L, 1, Cout_p)              zero-padded biases
    o_ref   : (1, H, W, Cout_p)           channel-padded output tile
    act0/1  : (H+2, W+2, Cin_p)           SAME-padded activation ping-pong bufs
    """
    bufs = (act0_ref, act1_ref)

    # --- SAME padding: zero ONLY the 1-px halo, every grid step (cheap). ---
    # Re-zeroing per step keeps this correct when the batch axis is sharded
    # across TensorCores (per-core scratch never sees program_id == 0).
    zrow = jnp.zeros((1, W + 2, Cin_p), jnp.float32)
    zcol = jnp.zeros((H, 1, Cin_p), jnp.float32)
    for buf in bufs:
        buf[0:1, :, :] = zrow
        buf[H + 1:H + 2, :, :] = zrow
        buf[1:H + 1, 0:1, :] = zcol
        buf[1:H + 1, W + 1:W + 2, :] = zcol
    # NOTE: no code below may write the halo; SAME padding relies on it.

    # Stage the (channel-padded) input into buffer 0's interior.
    bufs[0][1:H + 1, 1:W + 1, :] = x_ref[0]

    n_row_blocks = H // MR
    for l in range(n_layers):
        src, dst = bufs[l % 2], bufs[(l + 1) % 2]
        last = l == n_layers - 1
        for rb in range(n_row_blocks):
            h0 = rb * MR
            acc = None
            # 9 accumulating per-tap dots (no im2col materialization).
            for ky in range(3):
                for kx in range(3):
                    lhs = src[ky + h0:ky + h0 + MR, kx:kx + W, :]
                    lhs = lhs.reshape(MR * W, Cin_p)
                    part = jnp.dot(lhs, w_ref[l, 3 * ky + kx],
                                   preferred_element_type=jnp.float32)
                    acc = part if acc is None else acc + part
            acc = acc + b_ref[l]                          # (1, Cout_p) bias
            if last:
                o_ref[0, h0:h0 + MR, :, :] = (
                    acc.reshape(MR, W, Cout_p).astype(o_ref.dtype))
            else:
                a = jnp.maximum(acc[:, :Cin_p], 0.0)      # ReLU, keep real chans
                dst[1 + h0:1 + h0 + MR, 1:W + 1, :] = a.reshape(MR, W, Cin_p)


def _resident_spec(shape, index_map):
    """Constant-index weights/bias: request single buffering (halves their
    VMEM footprint); fall back gracefully if the API isn't available."""
    try:
        return pl.BlockSpec(shape, index_map, pipeline_mode=pl.Buffered(1))
    except (AttributeError, TypeError):
        return pl.BlockSpec(shape, index_map)


def regression_model_forward(x_nchw, params):
    """Full RegressionModel forward. x_nchw: (B, Cin, H, W) like the PyTorch
    module. Returns (B, H*W*num_anchors, 4)."""
    x_nhwc = jnp.transpose(x_nchw, (0, 2, 3, 1)).astype(jnp.float32)
    B, H, W, Cin = x_nhwc.shape
    n_layers = len(params)
    cout_real = params[-1][0].shape[-1]
    assert cout_real % 4 == 0

    # Channel padding: contraction (K) channels only to the sublane quantum,
    # output (N) channels lane-padded to 128 (and >= Cin_p so the intermediate
    # write-back slice is always valid).
    Cin_p = _round_up(max(w.shape[2] for w, _ in params), 8)
    Cout_p = _round_up(max([Cin_p] + [w.shape[3] for w, _ in params]), 128)

    xp = jnp.pad(x_nhwc, ((0, 0), (0, 0), (0, 0), (0, Cin_p - Cin)))

    # Per-tap weights: (L, 9, Cin_p, Cout_p), tap index t = ky*3 + kx.
    w_list, b_list = [], []
    for w, b in params:
        _, _, ci, co = w.shape
        wp = jnp.pad(w.astype(jnp.float32),
                     ((0, 0), (0, 0), (0, Cin_p - ci), (0, Cout_p - co)))
        w_list.append(wp.reshape(9, Cin_p, Cout_p))
        b_list.append(jnp.pad(b.astype(jnp.float32),
                              (0, Cout_p - co)).reshape(1, Cout_p))
    w_all = jnp.stack(w_list)          # (L, 9, Cin_p, Cout_p)
    b_all = jnp.stack(b_list)          # (L, 1, Cout_p)

    # Row-block size: keep each matmul's M near 128 rows so the f32 accumulator
    # (~16 vregs) stays register-resident.
    MR = max(1, min(H, max(1, 128 // W)))
    while H % MR:
        MR -= 1

    kernel = functools.partial(_fused_regression_kernel, H=H, W=W, MR=MR,
                               Cin_p=Cin_p, Cout_p=Cout_p, n_layers=n_layers)

    # Cost estimate with *real* (unpadded) channel counts.
    flops = sum(2 * B * H * W * 9 * w.shape[2] * w.shape[3] for w, _ in params)
    bytes_accessed = 4 * (x_nhwc.size + B * H * W * cout_real
                          + sum(w.size + b.size for w, b in params))

    # Explicit VMEM budget (v5e default scoped limit is only 16 MiB).
    lane_c = max(Cin_p, 128)
    vmem_need = 4 * (w_all.size + b_all.size)                    # resident weights
    vmem_need += 2 * 4 * (H + 2) * (W + 2) * lane_c              # 2 act buffers
    vmem_need += 2 * 4 * H * W * (lane_c + Cout_p)               # dbl-buffered i/o tiles
    vmem_limit = int(min(96 << 20, max(8 << 20, 2 * vmem_need)))

    out = pl.pallas_call(
        kernel,
        out_shape=jax.ShapeDtypeStruct((B, H, W, Cout_p), jnp.float32),
        grid=(B,),
        in_specs=[
            pl.BlockSpec((1, H, W, Cin_p), lambda i: (i, 0, 0, 0)),
            _resident_spec((n_layers, 9, Cin_p, Cout_p),
                           lambda i: (0, 0, 0, 0)),
            _resident_spec((n_layers, 1, Cout_p), lambda i: (0, 0, 0)),
        ],
        out_specs=pl.BlockSpec((1, H, W, Cout_p), lambda i: (i, 0, 0, 0)),
        scratch_shapes=[
            pltpu.VMEM((H + 2, W + 2, Cin_p), jnp.float32),
            pltpu.VMEM((H + 2, W + 2, Cin_p), jnp.float32),
        ],
        compiler_params=pltpu.CompilerParams(
            dimension_semantics=("parallel",),
            vmem_limit_bytes=vmem_limit),
        cost_estimate=pl.CostEstimate(flops=flops, transcendentals=0,
                                      bytes_accessed=bytes_accessed),
    )(xp, w_all, b_all)

    # Drop the lane padding; NHWC == permute(0,2,3,1) of NCHW, then view(B,-1,4)
    out = out[..., :cout_real]
    return out.reshape(B, H * W * (cout_real // 4), 4)


def init_params(key, num_features_in, num_anchors, feature_size):
    """Deterministic synthetic weights (HWIO) + biases for the 5 convs."""
    dims = [
        (num_features_in, feature_size),
        (feature_size, feature_size),
        (feature_size, feature_size),
        (feature_size, feature_size),
        (feature_size, num_anchors * 4),
    ]
    params = []
    for cin, cout in dims:
        key, kw, kb = jax.random.split(key, 3)
        scale = 1.0 / np.sqrt(9.0 * cin)
        w = jax.random.normal(kw, (3, 3, cin, cout), jnp.float32) * scale
        bb = jax.random.normal(kb, (cout,), jnp.float32) * 0.01
        params.append((w, bb))
    return params


def _reference_forward(x_nchw, params):
    """Pure-JAX reference (lax conv) for correctness checking."""
    x_nhwc = jnp.transpose(x_nchw, (0, 2, 3, 1)).astype(jnp.float32)
    dn = jax.lax.conv_dimension_numbers(x_nhwc.shape, params[0][0].shape,
                                        ("NHWC", "HWIO", "NHWC"))
    out = x_nhwc
    for idx, (w, b) in enumerate(params):
        out = jax.lax.conv_general_dilated(out, w, (1, 1), "SAME",
                                           dimension_numbers=dn)
        out = out + b[None, None, None, :]
        if idx < len(params) - 1:
            out = jnp.maximum(out, 0.0)
    B, H, W, C = out.shape
    return out.reshape(B, H * W * (C // 4), 4)


if __name__ == "__main__":
    # Small shapes consistent with the module:
    #   num_features_in=4, feature_size=32, num_anchors=5*3=15 -> output C=60
    B, H, W = 2, 16, 16
    num_features_in = 4
    feature_size = 32
    num_anchors = 5 * 3

    key = jax.random.PRNGKey(0)
    key, kx = jax.random.split(key)
    x_nchw = jax.random.normal(kx, (B, num_features_in, H, W), jnp.float32)

    params = init_params(key, num_features_in, num_anchors, feature_size)

    out = regression_model_forward(x_nchw, params)
    out = jax.block_until_ready(out)

    assert out.shape == (B, H * W * num_anchors, 4), out.shape

    ref = jax.block_until_ready(_reference_forward(x_nchw, params))
    np.testing.assert_allclose(np.asarray(out), np.asarray(ref),
                               rtol=1e-4, atol=2e-4)

    print("KERNEL_OK")
</pallas_src>

<mosaic_0001>
module attributes {stable_mosaic.version = 11 : i64} {
  func.func @_fused_regression_kernel(%arg0: i32, %arg1: memref<1x16x16x32xf32, #tpu.memory_space<vmem>>, %arg2: memref<5x9x32x128xf32, #tpu.memory_space<vmem>>, %arg3: memref<5x1x128xf32, #tpu.memory_space<vmem>>, %arg4: memref<1x16x16x128xf32, #tpu.memory_space<vmem>>, %arg5: memref<18x18x32xf32, #tpu.memory_space<vmem>>, %arg6: memref<18x18x32xf32, #tpu.memory_space<vmem>>) attributes {dimension_semantics = [#tpu.dimension_semantics<parallel>], iteration_bounds = array<i64: 2>, scalar_prefetch = 0 : i64, scratch_operands = 2 : i64, tpu.core_type = #tpu.core_type<tc>, window_params = [{transform_indices = @transform_0, window_bounds = array<i64: 1, 16, 16, 32>}, {pipeline_mode = #tpu.pipeline_mode<synchronous>, transform_indices = @transform_1, window_bounds = array<i64: 5, 9, 32, 128>}, {pipeline_mode = #tpu.pipeline_mode<synchronous>, transform_indices = @transform_2, window_bounds = array<i64: 5, 1, 128>}, {transform_indices = @transform_3, window_bounds = array<i64: 1, 16, 16, 128>}]} {
    %cst = arith.constant 0.000000e+00 : f32
    %0 = vector.broadcast %cst : f32 to vector<1x18x32xf32>
    %cst_0 = arith.constant 0.000000e+00 : f32
    %1 = vector.broadcast %cst_0 : f32 to vector<16x1x32xf32>
    %c0 = arith.constant 0 : index
    %c0_1 = arith.constant 0 : index
    %c0_2 = arith.constant 0 : index
    %2 = vector.load %arg5[%c0, %c0_1, %c0_2] : memref<18x18x32xf32, #tpu.memory_space<vmem>>, vector<1x18x32xf32>
    tpu.vector_store %arg5[%c0, %c0_1, %c0_2], %0 {strides = array<i32>} : memref<18x18x32xf32, #tpu.memory_space<vmem>>, vector<1x18x32xf32>,
    %c17 = arith.constant 17 : index
    %c0_3 = arith.constant 0 : index
    %c0_4 = arith.constant 0 : index
    %3 = vector.load %arg5[%c17, %c0_3, %c0_4] : memref<18x18x32xf32, #tpu.memory_space<vmem>>, vector<1x18x32xf32>
    tpu.vector_store %arg5[%c17, %c0_3, %c0_4], %0 {strides = array<i32>} : memref<18x18x32xf32, #tpu.memory_space<vmem>>, vector<1x18x32xf32>,
    %c1 = arith.constant 1 : index
    %c0_5 = arith.constant 0 : index
    %c0_6 = arith.constant 0 : index
    %4 = vector.load %arg5[%c1, %c0_5, %c0_6] : memref<18x18x32xf32, #tpu.memory_space<vmem>>, vector<16x1x32xf32>
    tpu.vector_store %arg5[%c1, %c0_5, %c0_6], %1 {strides = array<i32>} : memref<18x18x32xf32, #tpu.memory_space<vmem>>, vector<16x1x32xf32>,
    %c1_7 = arith.constant 1 : index
    %c17_8 = arith.constant 17 : index
    %c0_9 = arith.constant 0 : index
    %5 = vector.load %arg5[%c1_7, %c17_8, %c0_9] : memref<18x18x32xf32, #tpu.memory_space<vmem>>, vector<16x1x32xf32>
    tpu.vector_store %arg5[%c1_7, %c17_8, %c0_9], %1 {strides = array<i32>} : memref<18x18x32xf32, #tpu.memory_space<vmem>>, vector<16x1x32xf32>,
    %c0_10 = arith.constant 0 : index
    %c0_11 = arith.constant 0 : index
    %c0_12 = arith.constant 0 : index
    %6 = vector.load %arg6[%c0_10, %c0_11, %c0_12] : memref<18x18x32xf32, #tpu.memory_space<vmem>>, vector<1x18x32xf32>
    tpu.vector_store %arg6[%c0_10, %c0_11, %c0_12], %0 {strides = array<i32>} : memref<18x18x32xf32, #tpu.memory_space<vmem>>, vector<1x18x32xf32>,
    %c17_13 = arith.constant 17 : index
    %c0_14 = arith.constant 0 : index
    %c0_15 = arith.constant 0 : index
    %7 = vector.load %arg6[%c17_13, %c0_14, %c0_15] : memref<18x18x32xf32, #tpu.memory_space<vmem>>, vector<1x18x32xf32>
    tpu.vector_store %arg6[%c17_13, %c0_14, %c0_15], %0 {strides = array<i32>} : memref<18x18x32xf32, #tpu.memory_space<vmem>>, vector<1x18x32xf32>,
    %c1_16 = arith.constant 1 : index
    %c0_17 = arith.constant 0 : index
    %c0_18 = arith.constant 0 : index
    %8 = vector.load %arg6[%c1_16, %c0_17, %c0_18] : memref<18x18x32xf32, #tpu.memory_space<vmem>>, vector<16x1x32xf32>
    tpu.vector_store %arg6[%c1_16, %c0_17, %c0_18], %1 {strides = array<i32>} : memref<18x18x32xf32, #tpu.memory_space<vmem>>, vector<16x1x32xf32>,
    %c1_19 = arith.constant 1 : index
    %c17_20 = arith.constant 17 : index
    %c0_21 = arith.constant 0 : index
    %9 = vector.load %arg6[%c1_19, %c17_20, %c0_21] : memref<18x18x32xf32, #tpu.memory_space<vmem>>, vector<16x1x32xf32>
    tpu.vector_store %arg6[%c1_19, %c17_20, %c0_21], %1 {strides = array<i32>} : memref<18x18x32xf32, #tpu.memory_space<vmem>>, vector<16x1x32xf32>,
    %c0_22 = arith.constant 0 : index
    %c0_23 = arith.constant 0 : index
    %c0_24 = arith.constant 0 : index
    %c0_25 = arith.constant 0 : index
    %10 = vector.load %arg1[%c0_22, %c0_23, %c0_24, %c0_25] : memref<1x16x16x32xf32, #tpu.memory_space<vmem>>, vector<1x16x16x32xf32>
    %11 = vector.shape_cast %10 : vector<1x16x16x32xf32> to vector<16x16x32xf32>
    %c1_26 = arith.constant 1 : index
    %c1_27 = arith.constant 1 : index
    %c0_28 = arith.constant 0 : index
    %12 = vector.load %arg5[%c1_26, %c1_27, %c0_28] : memref<18x18x32xf32, #tpu.memory_space<vmem>>, vector<16x16x32xf32>
    tpu.vector_store %arg5[%c1_26, %c1_27, %c0_28], %11 {strides = array<i32>} : memref<18x18x32xf32, #tpu.memory_space<vmem>>, vector<16x16x32xf32>,
    %c0_29 = arith.constant 0 : index
    %c0_30 = arith.constant 0 : index
    %c0_31 = arith.constant 0 : index
    %13 = vector.load %arg5[%c0_29, %c0_30, %c0_31] : memref<18x18x32xf32, #tpu.memory_space<vmem>>, vector<8x16x32xf32>
    %14 = vector.shape_cast %13 : vector<8x16x32xf32> to vector<128x32xf32>
    %c0_32 = arith.constant 0 : index
    %c0_33 = arith.constant 0 : index
    %c0_34 = arith.constant 0 : index
    %c0_35 = arith.constant 0 : index
    %15 = vector.load %arg2[%c0_32, %c0_33, %c0_34, %c0_35] : memref<5x9x32x128xf32, #tpu.memory_space<vmem>>, vector<1x1x32x128xf32>
    %16 = vector.shape_cast %15 : vector<1x1x32x128xf32> to vector<32x128xf32>
    %cst_36 = arith.constant dense<0.000000e+00> : vector<128x128xf32>
    %17 = tpu.matmul %14, %16, %cst_36 {dimension_numbers = #tpu.dot_dimension_numbers<[1], [0], [0], [1], [0, 0, 1, 1], [], []>} : vector<128x32xf32>, vector<32x128xf32>, vector<128x128xf32> -> vector<128x128xf32>
    %c0_37 = arith.constant 0 : index
    %c1_38 = arith.constant 1 : index
    %c0_39 = arith.constant 0 : index
    %18 = vector.load %arg5[%c0_37, %c1_38, %c0_39] : memref<18x18x32xf32, #tpu.memory_space<vmem>>, vector<8x16x32xf32>
    %19 = vector.shape_cast %18 : vector<8x16x32xf32> to vector<128x32xf32>
    %c0_40 = arith.constant 0 : index
    %c1_41 = arith.constant 1 : index
    %c0_42 = arith.constant 0 : index
    %c0_43 = arith.constant 0 : index
    %20 = vector.load %arg2[%c0_40, %c1_41, %c0_42, %c0_43] : memref<5x9x32x128xf32, #tpu.memory_space<vmem>>, vector<1x1x32x128xf32>
    %21 = vector.shape_cast %20 : vector<1x1x32x128xf32> to vector<32x128xf32>
    %cst_44 = arith.constant dense<0.000000e+00> : vector<128x128xf32>
    %22 = tpu.matmul %19, %21, %cst_44 {dimension_numbers = #tpu.dot_dimension_numbers<[1], [0], [0], [1], [0, 0, 1, 1], [], []>} : vector<128x32xf32>, vector<32x128xf32>, vector<128x128xf32> -> vector<128x128xf32>
    %23 = arith.addf %17, %22 : vector<128x128xf32>
    %c0_45 = arith.constant 0 : index
    %c2 = arith.constant 2 : index
    %c0_46 = arith.constant 0 : index
    %24 = vector.load %arg5[%c0_45, %c2, %c0_46] : memref<18x18x32xf32, #tpu.memory_space<vmem>>, vector<8x16x32xf32>
    %25 = vector.shape_cast %24 : vector<8x16x32xf32> to vector<128x32xf32>
    %c0_47 = arith.constant 0 : index
    %c2_48 = arith.constant 2 : index
    %c0_49 = arith.constant 0 : index
    %c0_50 = arith.constant 0 : index
    %26 = vector.load %arg2[%c0_47, %c2_48, %c0_49, %c0_50] : memref<5x9x32x128xf32, #tpu.memory_space<vmem>>, vector<1x1x32x128xf32>
    %27 = vector.shape_cast %26 : vector<1x1x32x128xf32> to vector<32x128xf32>
    %cst_51 = arith.constant dense<0.000000e+00> : vector<128x128xf32>
    %28 = tpu.matmul %25, %27, %cst_51 {dimension_numbers = #tpu.dot_dimension_numbers<[1], [0], [0], [1], [0, 0, 1, 1], [], []>} : vector<128x32xf32>, vector<32x128xf32>, vector<128x128xf32> -> vector<128x128xf32>
    %29 = arith.addf %23, %28 : vector<128x128xf32>
    %c1_52 = arith.constant 1 : index
    %c0_53 = arith.constant 0 : index
    %c0_54 = arith.constant 0 : index
    %30 = vector.load %arg5[%c1_52, %c0_53, %c0_54] : memref<18x18x32xf32, #tpu.memory_space<vmem>>, vector<8x16x32xf32>
    %31 = vector.shape_cast %30 : vector<8x16x32xf32> to vector<128x32xf32>
    %c0_55 = arith.constant 0 : index
    %c3 = arith.constant 3 : index
    %c0_56 = arith.constant 0 : index
    %c0_57 = arith.constant 0 : index
    %32 = vector.load %arg2[%c0_55, %c3, %c0_56, %c0_57] : memref<5x9x32x128xf32, #tpu.memory_space<vmem>>, vector<1x1x32x128xf32>
    %33 = vector.shape_cast %32 : vector<1x1x32x128xf32> to vector<32x128xf32>
    %cst_58 = arith.constant dense<0.000000e+00> : vector<128x128xf32>
    %34 = tpu.matmul %31, %33, %cst_58 {dimension_numbers = #tpu.dot_dimension_numbers<[1], [0], [0], [1], [0, 0, 1, 1], [], []>} : vector<128x32xf32>, vector<32x128xf32>, vector<128x128xf32> -> vector<128x128xf32>
    %35 = arith.addf %29, %34 : vector<128x128xf32>
    %c1_59 = arith.constant 1 : index
    %c1_60 = arith.constant 1 : index
    %c0_61 = arith.constant 0 : index
    %36 = vector.load %arg5[%c1_59, %c1_60, %c0_61] : memref<18x18x32xf32, #tpu.memory_space<vmem>>, vector<8x16x32xf32>
    %37 = vector.shape_cast %36 : vector<8x16x32xf32> to vector<128x32xf32>
    %c0_62 = arith.constant 0 : index
    %c4 = arith.constant 4 : index
    %c0_63 = arith.constant 0 : index
    %c0_64 = arith.constant 0 : index
    %38 = vector.load %arg2[%c0_62, %c4, %c0_63, %c0_64] : memref<5x9x32x128xf32, #tpu.memory_space<vmem>>, vector<1x1x32x128xf32>
    %39 = vector.shape_cast %38 : vector<1x1x32x128xf32> to vector<32x128xf32>
    %cst_65 = arith.constant dense<0.000000e+00> : vector<128x128xf32>
    %40 = tpu.matmul %37, %39, %cst_65 {dimension_numbers = #tpu.dot_dimension_numbers<[1], [0], [0], [1], [0, 0, 1, 1], [], []>} : vector<128x32xf32>, vector<32x128xf32>, vector<128x128xf32> -> vector<128x128xf32>
    %41 = arith.addf %35, %40 : vector<128x128xf32>
    %c1_66 = arith.constant 1 : index
    %c2_67 = arith.constant 2 : index
    %c0_68 = arith.constant 0 : index
    %42 = vector.load %arg5[%c1_66, %c2_67, %c0_68] : memref<18x18x32xf32, #tpu.memory_space<vmem>>, vector<8x16x32xf32>
    %43 = vector.shape_cast %42 : vector<8x16x32xf32> to vector<128x32xf32>
    %c0_69 = arith.constant 0 : index
    %c5 = arith.constant 5 : index
    %c0_70 = arith.constant 0 : index
    %c0_71 = arith.constant 0 : index
    %44 = vector.load %arg2[%c0_69, %c5, %c0_70, %c0_71] : memref<5x9x32x128xf32, #tpu.memory_space<vmem>>, vector<1x1x32x128xf32>
    %45 = vector.shape_cast %44 : vector<1x1x32x128xf32> to vector<32x128xf32>
    %cst_72 = arith.constant dense<0.000000e+00> : vector<128x128xf32>
    %46 = tpu.matmul %43, %45, %cst_72 {dimension_numbers = #tpu.dot_dimension_numbers<[1], [0], [0], [1], [0, 0, 1, 1], [], []>} : vector<128x32xf32>, vector<32x128xf32>, vector<128x128xf32> -> vector<128x128xf32>
    %47 = arith.addf %41, %46 : vector<128x128xf32>
    %c2_73 = arith.constant 2 : index
    %c0_74 = arith.constant 0 : index
    %c0_75 = arith.constant 0 : index
    %48 = vector.load %arg5[%c2_73, %c0_74, %c0_75] : memref<18x18x32xf32, #tpu.memory_space<vmem>>, vector<8x16x32xf32>
    %49 = vector.shape_cast %48 : vector<8x16x32xf32> to vector<128x32xf32>
    %c0_76 = arith.constant 0 : index
    %c6 = arith.constant 6 : index
    %c0_77 = arith.constant 0 : index
    %c0_78 = arith.constant 0 : index
    %50 = vector.load %arg2[%c0_76, %c6, %c0_77, %c0_78] : memref<5x9x32x128xf32, #tpu.memory_space<vmem>>, vector<1x1x32x128xf32>
    %51 = vector.shape_cast %50 : vector<1x1x32x128xf32> to vector<32x128xf32>
    %cst_79 = arith.constant dense<0.000000e+00> : vector<128x128xf32>
    %52 = tpu.matmul %49, %51, %cst_79 {dimension_numbers = #tpu.dot_dimension_numbers<[1], [0], [0], [1], [0, 0, 1, 1], [], []>} : vector<128x32xf32>, vector<32x128xf32>, vector<128x128xf32> -> vector<128x128xf32>
    %53 = arith.addf %47, %52 : vector<128x128xf32>
    %c2_80 = arith.constant 2 : index
    %c1_81 = arith.constant 1 : index
    %c0_82 = arith.constant 0 : index
    %54 = vector.load %arg5[%c2_80, %c1_81, %c0_82] : memref<18x18x32xf32, #tpu.memory_space<vmem>>, vector<8x16x32xf32>
    %55 = vector.shape_cast %54 : vector<8x16x32xf32> to vector<128x32xf32>
    %c0_83 = arith.constant 0 : index
    %c7 = arith.constant 7 : index
    %c0_84 = arith.constant 0 : index
    %c0_85 = arith.constant 0 : index
    %56 = vector.load %arg2[%c0_83, %c7, %c0_84, %c0_85] : memref<5x9x32x128xf32, #tpu.memory_space<vmem>>, vector<1x1x32x128xf32>
    %57 = vector.shape_cast %56 : vector<1x1x32x128xf32> to vector<32x128xf32>
    %cst_86 = arith.constant dense<0.000000e+00> : vector<128x128xf32>
    %58 = tpu.matmul %55, %57, %cst_86 {dimension_numbers = #tpu.dot_dimension_numbers<[1], [0], [0], [1], [0, 0, 1, 1], [], []>} : vector<128x32xf32>, vector<32x128xf32>, vector<128x128xf32> -> vector<128x128xf32>
    %59 = arith.addf %53, %58 : vector<128x128xf32>
    %c2_87 = arith.constant 2 : index
    %c2_88 = arith.constant 2 : index
    %c0_89 = arith.constant 0 : index
    %60 = vector.load %arg5[%c2_87, %c2_88, %c0_89] : memref<18x18x32xf32, #tpu.memory_space<vmem>>, vector<8x16x32xf32>
    %61 = vector.shape_cast %60 : vector<8x16x32xf32> to vector<128x32xf32>
    %c0_90 = arith.constant 0 : index
    %c8 = arith.constant 8 : index
    %c0_91 = arith.constant 0 : index
    %c0_92 = arith.constant 0 : index
    %62 = vector.load %arg2[%c0_90, %c8, %c0_91, %c0_92] : memref<5x9x32x128xf32, #tpu.memory_space<vmem>>, vector<1x1x32x128xf32>
    %63 = vector.shape_cast %62 : vector<1x1x32x128xf32> to vector<32x128xf32>
    %cst_93 = arith.constant dense<0.000000e+00> : vector<128x128xf32>
    %64 = tpu.matmul %61, %63, %cst_93 {dimension_numbers = #tpu.dot_dimension_numbers<[1], [0], [0], [1], [0, 0, 1, 1], [], []>} : vector<128x32xf32>, vector<32x128xf32>, vector<128x128xf32> -> vector<128x128xf32>
    %65 = arith.addf %59, %64 : vector<128x128xf32>
    %c0_94 = arith.constant 0 : index
    %c0_95 = arith.constant 0 : index
    %c0_96 = arith.constant 0 : index
    %66 = vector.load %arg3[%c0_94, %c0_95, %c0_96] : memref<5x1x128xf32, #tpu.memory_space<vmem>>, vector<1x1x128xf32>
    %67 = vector.shape_cast %66 : vector<1x1x128xf32> to vector<1x128xf32>
    %68 = vector.broadcast %67 : vector<1x128xf32> to vector<128x128xf32>
    %69 = arith.addf %65, %68 : vector<128x128xf32>
    %70 = vector.extract_strided_slice %69 {offsets = [0, 0], sizes = [128, 32], strides = [1, 1]} : vector<128x128xf32> to vector<128x32xf32>
    %cst_97 = arith.constant 0.000000e+00 : f32
    %71 = vector.broadcast %cst_97 : f32 to vector<128x32xf32>
    %72 = arith.maximumf %70, %71 : vector<128x32xf32>
    %73 = vector.shape_cast %72 : vector<128x32xf32> to vector<8x16x32xf32>
    %c1_98 = arith.constant 1 : index
    %c1_99 = arith.constant 1 : index
    %c0_100 = arith.constant 0 : index
    %74 = vector.load %arg6[%c1_98, %c1_99, %c0_100] : memref<18x18x32xf32, #tpu.memory_space<vmem>>, vector<8x16x32xf32>
    tpu.vector_store %arg6[%c1_98, %c1_99, %c0_100], %73 {strides = array<i32>} : memref<18x18x32xf32, #tpu.memory_space<vmem>>, vector<8x16x32xf32>,
    %c8_101 = arith.constant 8 : index
    %c0_102 = arith.constant 0 : index
    %c0_103 = arith.constant 0 : index
    %75 = vector.load %arg5[%c8_101, %c0_102, %c0_103] : memref<18x18x32xf32, #tpu.memory_space<vmem>>, vector<8x16x32xf32>
    %76 = vector.shape_cast %75 : vector<8x16x32xf32> to vector<128x32xf32>
    %c0_104 = arith.constant 0 : index
    %c0_105 = arith.constant 0 : index
    %c0_106 = arith.constant 0 : index
    %c0_107 = arith.constant 0 : index
    %77 = vector.load %arg2[%c0_104, %c0_105, %c0_106, %c0_107] : memref<5x9x32x128xf32, #tpu.memory_space<vmem>>, vector<1x1x32x128xf32>
    %78 = vector.shape_cast %77 : vector<1x1x32x128xf32> to vector<32x128xf32>
    %cst_108 = arith.constant dense<0.000000e+00> : vector<128x128xf32>
    %79 = tpu.matmul %76, %78, %cst_108 {dimension_numbers = #tpu.dot_dimension_numbers<[1], [0], [0], [1], [0, 0, 1, 1], [], []>} : vector<128x32xf32>, vector<32x128xf32>, vector<128x128xf32> -> vector<128x128xf32>
    %c8_109 = arith.constant 8 : index
    %c1_110 = arith.constant 1 : index
    %c0_111 = arith.constant 0 : index
    %80 = vector.load %arg5[%c8_109, %c1_110, %c0_111] : memref<18x18x32xf32, #tpu.memory_space<vmem>>, vector<8x16x32xf32>
    %81 = vector.shape_cast %80 : vector<8x16x32xf32> to vector<128x32xf32>
    %c0_112 = arith.constant 0 : index
    %c1_113 = arith.constant 1 : index
    %c0_114 = arith.constant 0 : index
    %c0_115 = arith.constant 0 : index
    %82 = vector.load %arg2[%c0_112, %c1_113, %c0_114, %c0_115] : memref<5x9x32x128xf32, #tpu.memory_space<vmem>>, vector<1x1x32x128xf32>
    %83 = vector.shape_cast %82 : vector<1x1x32x128xf32> to vector<32x128xf32>
    %cst_116 = arith.constant dense<0.000000e+00> : vector<128x128xf32>
    %84 = tpu.matmul %81, %83, %cst_116 {dimension_numbers = #tpu.dot_dimension_numbers<[1], [0], [0], [1], [0, 0, 1, 1], [], []>} : vector<128x32xf32>, vector<32x128xf32>, vector<128x128xf32> -> vector<128x128xf32>
    %85 = arith.addf %79, %84 : vector<128x128xf32>
    %c8_117 = arith.constant 8 : index
    %c2_118 = arith.constant 2 : index
    %c0_119 = arith.constant 0 : index
    %86 = vector.load %arg5[%c8_117, %c2_118, %c0_119] : memref<18x18x32xf32, #tpu.memory_space<vmem>>, vector<8x16x32xf32>
    %87 = vector.shape_cast %86 : vector<8x16x32xf32> to vector<128x32xf32>
    %c0_120 = arith.constant 0 : index
    %c2_121 = arith.constant 2 : index
    %c0_122 = arith.constant 0 : index
    %c0_123 = arith.constant 0 : index
    %88 = vector.load %arg2[%c0_120, %c2_121, %c0_122, %c0_123] : memref<5x9x32x128xf32, #tpu.memory_space<vmem>>, vector<1x1x32x128xf32>
    %89 = vector.shape_cast %88 : vector<1x1x32x128xf32> to vector<32x128xf32>
    %cst_124 = arith.constant dense<0.000000e+00> : vector<128x128xf32>
    %90 = tpu.matmul %87, %89, %cst_124 {dimension_numbers = #tpu.dot_dimension_numbers<[1], [0], [0], [1], [0, 0, 1, 1], [], []>} : vector<128x32xf32>, vector<32x128xf32>, vector<128x128xf32> -> vector<128x128xf32>
    %91 = arith.addf %85, %90 : vector<128x128xf32>
    %c9 = arith.constant 9 : index
    %c0_125 = arith.constant 0 : index
    %c0_126 = arith.constant 0 : index
    %92 = vector.load %arg5[%c9, %c0_125, %c0_126] : memref<18x18x32xf32, #tpu.memory_space<vmem>>, vector<8x16x32xf32>
    %93 = vector.shape_cast %92 : vector<8x16x32xf32> to vector<128x32xf32>
    %c0_127 = arith.constant 0 : index
    %c3_128 = arith.constant 3 : index
    %c0_129 = arith.constant 0 : index
    %c0_130 = arith.constant 0 : index
    %94 = vector.load %arg2[%c0_127, %c3_128, %c0_129, %c0_130] : memref<5x9x32x128xf32, #tpu.memory_space<vmem>>, vector<1x1x32x128xf32>
    %95 = vector.shape_cast %94 : vector<1x1x32x128xf32> to vector<32x128xf32>
    %cst_131 = arith.constant dense<0.000000e+00> : vector<128x128xf32>
    %96 = tpu.matmul %93, %95, %cst_131 {dimension_numbers = #tpu.dot_dimension_numbers<[1], [0], [0], [1], [0, 0, 1, 1], [], []>} : vector<128x32xf32>, vector<32x128xf32>, vector<128x128xf32> -> vector<128x128xf32>
    %97 = arith.addf %91, %96 : vector<128x128xf32>
    %c9_132 = arith.constant 9 : index
    %c1_133 = arith.constant 1 : index
    %c0_134 = arith.constant 0 : index
    %98 = vector.load %arg5[%c9_132, %c1_133, %c0_134] : memref<18x18x32xf32, #tpu.memory_space<vmem>>, vector<8x16x32xf32>
    %99 = vector.shape_cast %98 : vector<8x16x32xf32> to vector<128x32xf32>
    %c0_135 = arith.constant 0 : index
    %c4_136 = arith.constant 4 : index
    %c0_137 = arith.constant 0 : index
    %c0_138 = arith.constant 0 : index
    %100 = vector.load %arg2[%c0_135, %c4_136, %c0_137, %c0_138] : memref<5x9x32x128xf32, #tpu.memory_space<vmem>>, vector<1x1x32x128xf32>
    %101 = vector.shape_cast %100 : vector<1x1x32x128xf32> to vector<32x128xf32>
    %cst_139 = arith.constant dense<0.000000e+00> : vector<128x128xf32>
    %102 = tpu.matmul %99, %101, %cst_139 {dimension_numbers = #tpu.dot_dimension_numbers<[1], [0], [0], [1], [0, 0, 1, 1], [], []>} : vector<128x32xf32>, vector<32x128xf32>, vector<128x128xf32> -> vector<128x128xf32>
    %103 = arith.addf %97, %102 : vector<128x128xf32>
    %c9_140 = arith.constant 9 : index
    %c2_141 = arith.constant 2 : index
    %c0_142 = arith.constant 0 : index
    %104 = vector.load %arg5[%c9_140, %c2_141, %c0_142] : memref<18x18x32xf32, #tpu.memory_space<vmem>>, vector<8x16x32xf32>
    %105 = vector.shape_cast %104 : vector<8x16x32xf32> to vector<128x32xf32>
    %c0_143 = arith.constant 0 : index
    %c5_144 = arith.constant 5 : index
    %c0_145 = arith.constant 0 : index
    %c0_146 = arith.constant 0 : index
    %106 = vector.load %arg2[%c0_143, %c5_144, %c0_145, %c0_146] : memref<5x9x32x128xf32, #tpu.memory_space<vmem>>, vector<1x1x32x128xf32>
    %107 = vector.shape_cast %106 : vector<1x1x32x128xf32> to vector<32x128xf32>
    %cst_147 = arith.constant dense<0.000000e+00> : vector<128x128xf32>
    %108 = tpu.matmul %105, %107, %cst_147 {dimension_numbers = #tpu.dot_dimension_numbers<[1], [0], [0], [1], [0, 0, 1, 1], [], []>} : vector<128x32xf32>, vector<32x128xf32>, vector<128x128xf32> -> vector<128x128xf32>
    %109 = arith.addf %103, %108 : vector<128x128xf32>
    %c10 = arith.constant 10 : index
    %c0_148 = arith.constant 0 : index
    %c0_149 = arith.constant 0 : index
    %110 = vector.load %arg5[%c10, %c0_148, %c0_149] : memref<18x18x32xf32, #tpu.memory_space<vmem>>, vector<8x16x32xf32>
    %111 = vector.shape_cast %110 : vector<8x16x32xf32> to vector<128x32xf32>
    %c0_150 = arith.constant 0 : index
    %c6_151 = arith.constant 6 : index
    %c0_152 = arith.constant 0 : index
    %c0_153 = arith.constant 0 : index
    %112 = vector.load %arg2[%c0_150, %c6_151, %c0_152, %c0_153] : memref<5x9x32x128xf32, #tpu.memory_space<vmem>>, vector<1x1x32x128xf32>
    %113 = vector.shape_cast %112 : vector<1x1x32x128xf32> to vector<32x128xf32>
    %cst_154 = arith.constant dense<0.000000e+00> : vector<128x128xf32>
    %114 = tpu.matmul %111, %113, %cst_154 {dimension_numbers = #tpu.dot_dimension_numbers<[1], [0], [0], [1], [0, 0, 1, 1], [], []>} : vector<128x32xf32>, vector<32x128xf32>, vector<128x128xf32> -> vector<128x128xf32>
    %115 = arith.addf %109, %114 : vector<128x128xf32>
    %c10_155 = arith.constant 10 : index
    %c1_156 = arith.constant 1 : index
    %c0_157 = arith.constant 0 : index
    %116 = vector.load %arg5[%c10_155, %c1_156, %c0_157] : memref<18x18x32xf32, #tpu.memory_space<vmem>>, vector<8x16x32xf32>
    %117 = vector.shape_cast %116 : vector<8x16x32xf32> to vector<128x32xf32>
    %c0_158 = arith.constant 0 : index
    %c7_159 = arith.constant 7 : index
    %c0_160 = arith.constant 0 : index
    %c0_161 = arith.constant 0 : index
    %118 = vector.load %arg2[%c0_158, %c7_159, %c0_160, %c0_161] : memref<5x9x32x128xf32, #tpu.memory_space<vmem>>, vector<1x1x32x128xf32>
    %119 = vector.shape_cast %118 : vector<1x1x32x128xf32> to vector<32x128xf32>
    %cst_162 = arith.constant dense<0.000000e+00> : vector<128x128xf32>
    %120 = tpu.matmul %117, %119, %cst_162 {dimension_numbers = #tpu.dot_dimension_numbers<[1], [0], [0], [1], [0, 0, 1, 1], [], []>} : vector<128x32xf32>, vector<32x128xf32>, vector<128x128xf32> -> vector<128x128xf32>
    %121 = arith.addf %115, %120 : vector<128x128xf32>
    %c10_163 = arith.constant 10 : index
    %c2_164 = arith.constant 2 : index
    %c0_165 = arith.constant 0 : index
    %122 = vector.load %arg5[%c10_163, %c2_164, %c0_165] : memref<18x18x32xf32, #tpu.memory_space<vmem>>, vector<8x16x32xf32>
    %123 = vector.shape_cast %122 : vector<8x16x32xf32> to vector<128x32xf32>
    %c0_166 = arith.constant 0 : index
    %c8_167 = arith.constant 8 : index
    %c0_168 = arith.constant 0 : index
    %c0_169 = arith.constant 0 : index
    %124 = vector.load %arg2[%c0_166, %c8_167, %c0_168, %c0_169] : memref<5x9x32x128xf32, #tpu.memory_space<vmem>>, vector<1x1x32x128xf32>
    %125 = vector.shape_cast %124 : vector<1x1x32x128xf32> to vector<32x128xf32>
    %cst_170 = arith.constant dense<0.000000e+00> : vector<128x128xf32>
    %126 = tpu.matmul %123, %125, %cst_170 {dimension_numbers = #tpu.dot_dimension_numbers<[1], [0], [0], [1], [0, 0, 1, 1], [], []>} : vector<128x32xf32>, vector<32x128xf32>, vector<128x128xf32> -> vector<128x128xf32>
    %127 = arith.addf %121, %126 : vector<128x128xf32>
    %c0_171 = arith.constant 0 : index
    %c0_172 = arith.constant 0 : index
    %c0_173 = arith.constant 0 : index
    %128 = vector.load %arg3[%c0_171, %c0_172, %c0_173] : memref<5x1x128xf32, #tpu.memory_space<vmem>>, vector<1x1x128xf32>
    %129 = vector.shape_cast %128 : vector<1x1x128xf32> to vector<1x128xf32>
    %130 = vector.broadcast %129 : vector<1x128xf32> to vector<128x128xf32>
    %131 = arith.addf %127, %130 : vector<128x128xf32>
    %132 = vector.extract_strided_slice %131 {offsets = [0, 0], sizes = [128, 32], strides = [1, 1]} : vector<128x128xf32> to vector<128x32xf32>
    %cst_174 = arith.constant 0.000000e+00 : f32
    %133 = vector.broadcast %cst_174 : f32 to vector<128x32xf32>
    %134 = arith.maximumf %132, %133 : vector<128x32xf32>
    %135 = vector.shape_cast %134 : vector<128x32xf32> to vector<8x16x32xf32>
    %c9_175 = arith.constant 9 : index
    %c1_176 = arith.constant 1 : index
    %c0_177 = arith.constant 0 : index
    %136 = vector.load %arg6[%c9_175, %c1_176, %c0_177] : memref<18x18x32xf32, #tpu.memory_space<vmem>>, vector<8x16x32xf32>
    tpu.vector_store %arg6[%c9_175, %c1_176, %c0_177], %135 {strides = array<i32>} : memref<18x18x32xf32, #tpu.memory_space<vmem>>, vector<8x16x32xf32>,
    %c0_178 = arith.constant 0 : index
    %c0_179 = arith.constant 0 : index
    %c0_180 = arith.constant 0 : index
    %137 = vector.load %arg6[%c0_178, %c0_179, %c0_180] : memref<18x18x32xf32, #tpu.memory_space<vmem>>, vector<8x16x32xf32>
    %138 = vector.shape_cast %137 : vector<8x16x32xf32> to vector<128x32xf32>
    %c1_181 = arith.constant 1 : index
    %c0_182 = arith.constant 0 : index
    %c0_183 = arith.constant 0 : index
    %c0_184 = arith.constant 0 : index
    %139 = vector.load %arg2[%c1_181, %c0_182, %c0_183, %c0_184] : memref<5x9x32x128xf32, #tpu.memory_space<vmem>>, vector<1x1x32x128xf32>
    %140 = vector.shape_cast %139 : vector<1x1x32x128xf32> to vector<32x128xf32>
    %cst_185 = arith.constant dense<0.000000e+00> : vector<128x128xf32>
    %141 = tpu.matmul %138, %140, %cst_185 {dimension_numbers = #tpu.dot_dimension_numbers<[1], [0], [0], [1], [0, 0, 1, 1], [], []>} : vector<128x32xf32>, vector<32x128xf32>, vector<128x128xf32> -> vector<128x128xf32>
    %c0_186 = arith.constant 0 : index
    %c1_187 = arith.constant 1 : index
    %c0_188 = arith.constant 0 : index
    %142 = vector.load %arg6[%c0_186, %c1_187, %c0_188] : memref<18x18x32xf32, #tpu.memory_space<vmem>>, vector<8x16x32xf32>
    %143 = vector.shape_cast %142 : vector<8x16x32xf32> to vector<128x32xf32>
    %c1_189 = arith.constant 1 : index
    %c1_190 = arith.constant 1 : index
    %c0_191 = arith.constant 0 : index
    %c0_192 = arith.constant 0 : index
    %144 = vector.load %arg2[%c1_189, %c1_190, %c0_191, %c0_192] : memref<5x9x32x128xf32, #tpu.memory_space<vmem>>, vector<1x1x32x128xf32>
    %145 = vector.shape_cast %144 : vector<1x1x32x128xf32> to vector<32x128xf32>
    %cst_193 = arith.constant dense<0.000000e+00> : vector<128x128xf32>
    %146 = tpu.matmul %143, %145, %cst_193 {dimension_numbers = #tpu.dot_dimension_numbers<[1], [0], [0], [1], [0, 0, 1, 1], [], []>} : vector<128x32xf32>, vector<32x128xf32>, vector<128x128xf32> -> vector<128x128xf32>
    %147 = arith.addf %141, %146 : vector<128x128xf32>
    %c0_194 = arith.constant 0 : index
    %c2_195 = arith.constant 2 : index
    %c0_196 = arith.constant 0 : index
    %148 = vector.load %arg6[%c0_194, %c2_195, %c0_196] : memref<18x18x32xf32, #tpu.memory_space<vmem>>, vector<8x16x32xf32>
    %149 = vector.shape_cast %148 : vector<8x16x32xf32> to vector<128x32xf32>
    %c1_197 = arith.constant 1 : index
    %c2_198 = arith.constant 2 : index
    %c0_199 = arith.constant 0 : index
    %c0_200 = arith.constant 0 : index
    %150 = vector.load %arg2[%c1_197, %c2_198, %c0_199, %c0_200] : memref<5x9x32x128xf32, #tpu.memory_space<vmem>>, vector<1x1x32x128xf32>
    %151 = vector.shape_cast %150 : vector<1x1x32x128xf32> to vector<32x128xf32>
    %cst_201 = arith.constant dense<0.000000e+00> : vector<128x128xf32>
    %152 = tpu.matmul %149, %151, %cst_201 {dimension_numbers = #tpu.dot_dimension_numbers<[1], [0], [0], [1], [0, 0, 1, 1], [], []>} : vector<128x32xf32>, vector<32x128xf32>, vector<128x128xf32> -> vector<128x128xf32>
    %153 = arith.addf %147, %152 : vector<128x128xf32>
    %c1_202 = arith.constant 1 : index
    %c0_203 = arith.constant 0 : index
    %c0_204 = arith.constant 0 : index
    %154 = vector.load %arg6[%c1_202, %c0_203, %c0_204] : memref<18x18x32xf32, #tpu.memory_space<vmem>>, vector<8x16x32xf32>
    %155 = vector.shape_cast %154 : vector<8x16x32xf32> to vector<128x32xf32>
    %c1_205 = arith.constant 1 : index
    %c3_206 = arith.constant 3 : index
    %c0_207 = arith.constant 0 : index
    %c0_208 = arith.constant 0 : index
    %156 = vector.load %arg2[%c1_205, %c3_206, %c0_207, %c0_208] : memref<5x9x32x128xf32, #tpu.memory_space<vmem>>, vector<1x1x32x128xf32>
    %157 = vector.shape_cast %156 : vector<1x1x32x128xf32> to vector<32x128xf32>
    %cst_209 = arith.constant dense<0.000000e+00> : vector<128x128xf32>
    %158 = tpu.matmul %155, %157, %cst_209 {dimension_numbers = #tpu.dot_dimension_numbers<[1], [0], [0], [1], [0, 0, 1, 1], [], []>} : vector<128x32xf32>, vector<32x128xf32>, vector<128x128xf32> -> vector<128x128xf32>
    %159 = arith.addf %153, %158 : vector<128x128xf32>
    %c1_210 = arith.constant 1 : index
    %c1_211 = arith.constant 1 : index
    %c0_212 = arith.constant 0 : index
    %160 = vector.load %arg6[%c1_210, %c1_211, %c0_212] : memref<18x18x32xf32, #tpu.memory_space<vmem>>, vector<8x16x32xf32>
    %161 = vector.shape_cast %160 : vector<8x16x32xf32> to vector<128x32xf32>
    %c1_213 = arith.constant 1 : index
    %c4_214 = arith.constant 4 : index
    %c0_215 = arith.constant 0 : index
    %c0_216 = arith.constant 0 : index
    %162 = vector.load %arg2[%c1_213, %c4_214, %c0_215, %c0_216] : memref<5x9x32x128xf32, #tpu.memory_space<vmem>>, vector<1x1x32x128xf32>
    %163 = vector.shape_cast %162 : vector<1x1x32x128xf32> to vector<32x128xf32>
    %cst_217 = arith.constant dense<0.000000e+00> : vector<128x128xf32>
    %164 = tpu.matmul %161, %163, %cst_217 {dimension_numbers = #tpu.dot_dimension_numbers<[1], [0], [0], [1], [0, 0, 1, 1], [], []>} : vector<128x32xf32>, vector<32x128xf32>, vector<128x128xf32> -> vector<128x128xf32>
    %165 = arith.addf %159, %164 : vector<128x128xf32>
    %c1_218 = arith.constant 1 : index
    %c2_219 = arith.constant 2 : index
    %c0_220 = arith.constant 0 : index
    %166 = vector.load %arg6[%c1_218, %c2_219, %c0_220] : memref<18x18x32xf32, #tpu.memory_space<vmem>>, vector<8x16x32xf32>
    %167 = vector.shape_cast %166 : vector<8x16x32xf32> to vector<128x32xf32>
    %c1_221 = arith.constant 1 : index
    %c5_222 = arith.constant 5 : index
    %c0_223 = arith.constant 0 : index
    %c0_224 = arith.constant 0 : index
    %168 = vector.load %arg2[%c1_221, %c5_222, %c0_223, %c0_224] : memref<5x9x32x128xf32, #tpu.memory_space<vmem>>, vector<1x1x32x128xf32>
    %169 = vector.shape_cast %168 : vector<1x1x32x128xf32> to vector<32x128xf32>
    %cst_225 = arith.constant dense<0.000000e+00> : vector<128x128xf32>
    %170 = tpu.matmul %167, %169, %cst_225 {dimension_numbers = #tpu.dot_dimension_numbers<[1], [0], [0], [1], [0, 0, 1, 1], [], []>} : vector<128x32xf32>, vector<32x128xf32>, vector<128x128xf32> -> vector<128x128xf32>
    %171 = arith.addf %165, %170 : vector<128x128xf32>
    %c2_226 = arith.constant 2 : index
    %c0_227 = arith.constant 0 : index
    %c0_228 = arith.constant 0 : index
    %172 = vector.load %arg6[%c2_226, %c0_227, %c0_228] : memref<18x18x32xf32, #tpu.memory_space<vmem>>, vector<8x16x32xf32>
    %173 = vector.shape_cast %172 : vector<8x16x32xf32> to vector<128x32xf32>
    %c1_229 = arith.constant 1 : index
    %c6_230 = arith.constant 6 : index
    %c0_231 = arith.constant 0 : index
    %c0_232 = arith.constant 0 : index
    %174 = vector.load %arg2[%c1_229, %c6_230, %c0_231, %c0_232] : memref<5x9x32x128xf32, #tpu.memory_space<vmem>>, vector<1x1x32x128xf32>
    %175 = vector.shape_cast %174 : vector<1x1x32x128xf32> to vector<32x128xf32>
    %cst_233 = arith.constant dense<0.000000e+00> : vector<128x128xf32>
    %176 = tpu.matmul %173, %175, %cst_233 {dimension_numbers = #tpu.dot_dimension_numbers<[1], [0], [0], [1], [0, 0, 1, 1], [], []>} : vector<128x32xf32>, vector<32x128xf32>, vector<128x128xf32> -> vector<128x128xf32>
    %177 = arith.addf %171, %176 : vector<128x128xf32>
    %c2_234 = arith.constant 2 : index
    %c1_235 = arith.constant 1 : index
    %c0_236 = arith.constant 0 : index
    %178 = vector.load %arg6[%c2_234, %c1_235, %c0_236] : memref<18x18x32xf32, #tpu.memory_space<vmem>>, vector<8x16x32xf32>
    %179 = vector.shape_cast %178 : vector<8x16x32xf32> to vector<128x32xf32>
    %c1_237 = arith.constant 1 : index
    %c7_238 = arith.constant 7 : index
    %c0_239 = arith.constant 0 : index
    %c0_240 = arith.constant 0 : index
    %180 = vector.load %arg2[%c1_237, %c7_238, %c0_239, %c0_240] : memref<5x9x32x128xf32, #tpu.memory_space<vmem>>, vector<1x1x32x128xf32>
    %181 = vector.shape_cast %180 : vector<1x1x32x128xf32> to vector<32x128xf32>
    %cst_241 = arith.constant dense<0.000000e+00> : vector<128x128xf32>
    %182 = tpu.matmul %179, %181, %cst_241 {dimension_numbers = #tpu.dot_dimension_numbers<[1], [0], [0], [1], [0, 0, 1, 1], [], []>} : vector<128x32xf32>, vector<32x128xf32>, vector<128x128xf32> -> vector<128x128xf32>
    %183 = arith.addf %177, %182 : vector<128x128xf32>
    %c2_242 = arith.constant 2 : index
    %c2_243 = arith.constant 2 : index
    %c0_244 = arith.constant 0 : index
    %184 = vector.load %arg6[%c2_242, %c2_243, %c0_244] : memref<18x18x32xf32, #tpu.memory_space<vmem>>, vector<8x16x32xf32>
    %185 = vector.shape_cast %184 : vector<8x16x32xf32> to vector<128x32xf32>
    %c1_245 = arith.constant 1 : index
    %c8_246 = arith.constant 8 : index
    %c0_247 = arith.constant 0 : index
    %c0_248 = arith.constant 0 : index
    %186 = vector.load %arg2[%c1_245, %c8_246, %c0_247, %c0_248] : memref<5x9x32x128xf32, #tpu.memory_space<vmem>>, vector<1x1x32x128xf32>
    %187 = vector.shape_cast %186 : vector<1x1x32x128xf32> to vector<32x128xf32>
    %cst_249 = arith.constant dense<0.000000e+00> : vector<128x128xf32>
    %188 = tpu.matmul %185, %187, %cst_249 {dimension_numbers = #tpu.dot_dimension_numbers<[1], [0], [0], [1], [0, 0, 1, 1], [], []>} : vector<128x32xf32>, vector<32x128xf32>, vector<128x128xf32> -> vector<128x128xf32>
    %189 = arith.addf %183, %188 : vector<128x128xf32>
    %c1_250 = arith.constant 1 : index
    %c0_251 = arith.constant 0 : index
    %c0_252 = arith.constant 0 : index
    %190 = vector.load %arg3[%c1_250, %c0_251, %c0_252] : memref<5x1x128xf32, #tpu.memory_space<vmem>>, vector<1x1x128xf32>
    %191 = vector.shape_cast %190 : vector<1x1x128xf32> to vector<1x128xf32>
    %192 = vector.broadcast %191 : vector<1x128xf32> to vector<128x128xf32>
    %193 = arith.addf %189, %192 : vector<128x128xf32>
    %194 = vector.extract_strided_slice %193 {offsets = [0, 0], sizes = [128, 32], strides = [1, 1]} : vector<128x128xf32> to vector<128x32xf32>
    %cst_253 = arith.constant 0.000000e+00 : f32
    %195 = vector.broadcast %cst_253 : f32 to vector<128x32xf32>
    %196 = arith.maximumf %194, %195 : vector<128x32xf32>
    %197 = vector.shape_cast %196 : vector<128x32xf32> to vector<8x16x32xf32>
    %c1_254 = arith.constant 1 : index
    %c1_255 = arith.constant 1 : index
    %c0_256 = arith.constant 0 : index
    %198 = vector.load %arg5[%c1_254, %c1_255, %c0_256] : memref<18x18x32xf32, #tpu.memory_space<vmem>>, vector<8x16x32xf32>
    tpu.vector_store %arg5[%c1_254, %c1_255, %c0_256], %197 {strides = array<i32>} : memref<18x18x32xf32, #tpu.memory_space<vmem>>, vector<8x16x32xf32>,
    %c8_257 = arith.constant 8 : index
    %c0_258 = arith.constant 0 : index
    %c0_259 = arith.constant 0 : index
    %199 = vector.load %arg6[%c8_257, %c0_258, %c0_259] : memref<18x18x32xf32, #tpu.memory_space<vmem>>, vector<8x16x32xf32>
    %200 = vector.shape_cast %199 : vector<8x16x32xf32> to vector<128x32xf32>
    %c1_260 = arith.constant 1 : index
    %c0_261 = arith.constant 0 : index
    %c0_262 = arith.constant 0 : index
    %c0_263 = arith.constant 0 : index
    %201 = vector.load %arg2[%c1_260, %c0_261, %c0_262, %c0_263] : memref<5x9x32x128xf32, #tpu.memory_space<vmem>>, vector<1x1x32x128xf32>
    %202 = vector.shape_cast %201 : vector<1x1x32x128xf32> to vector<32x128xf32>
    %cst_264 = arith.constant dense<0.000000e+00> : vector<128x128xf32>
    %203 = tpu.matmul %200, %202, %cst_264 {dimension_numbers = #tpu.dot_dimension_numbers<[1], [0], [0], [1], [0, 0, 1, 1], [], []>} : vector<128x32xf32>, vector<32x128xf32>, vector<128x128xf32> -> vector<128x128xf32>
    %c8_265 = arith.constant 8 : index
    %c1_266 = arith.constant 1 : index
    %c0_267 = arith.constant 0 : index
    %204 = vector.load %arg6[%c8_265, %c1_266, %c0_267] : memref<18x18x32xf32, #tpu.memory_space<vmem>>, vector<8x16x32xf32>
    %205 = vector.shape_cast %204 : vector<8x16x32xf32> to vector<128x32xf32>
    %c1_268 = arith.constant 1 : index
    %c1_269 = arith.constant 1 : index
    %c0_270 = arith.constant 0 : index
    %c0_271 = arith.constant 0 : index
    %206 = vector.load %arg2[%c1_268, %c1_269, %c0_270, %c0_271] : memref<5x9x32x128xf32, #tpu.memory_space<vmem>>, vector<1x1x32x128xf32>
    %207 = vector.shape_cast %206 : vector<1x1x32x128xf32> to vector<32x128xf32>
    %cst_272 = arith.constant dense<0.000000e+00> : vector<128x128xf32>
    %208 = tpu.matmul %205, %207, %cst_272 {dimension_numbers = #tpu.dot_dimension_numbers<[1], [0], [0], [1], [0, 0, 1, 1], [], []>} : vector<128x32xf32>, vector<32x128xf32>, vector<128x128xf32> -> vector<128x128xf32>
    %209 = arith.addf %203, %208 : vector<128x128xf32>
    %c8_273 = arith.constant 8 : index
    %c2_274 = arith.constant 2 : index
    %c0_275 = arith.constant 0 : index
    %210 = vector.load %arg6[%c8_273, %c2_274, %c0_275] : memref<18x18x32xf32, #tpu.memory_space<vmem>>, vector<8x16x32xf32>
    %211 = vector.shape_cast %210 : vector<8x16x32xf32> to vector<128x32xf32>
    %c1_276 = arith.constant 1 : index
    %c2_277 = arith.constant 2 : index
    %c0_278 = arith.constant 0 : index
    %c0_279 = arith.constant 0 : index
    %212 = vector.load %arg2[%c1_276, %c2_277, %c0_278, %c0_279] : memref<5x9x32x128xf32, #tpu.memory_space<vmem>>, vector<1x1x32x128xf32>
    %213 = vector.shape_cast %212 : vector<1x1x32x128xf32> to vector<32x128xf32>
    %cst_280 = arith.constant dense<0.000000e+00> : vector<128x128xf32>
    %214 = tpu.matmul %211, %213, %cst_280 {dimension_numbers = #tpu.dot_dimension_numbers<[1], [0], [0], [1], [0, 0, 1, 1], [], []>} : vector<128x32xf32>, vector<32x128xf32>, vector<128x128xf32> -> vector<128x128xf32>
    %215 = arith.addf %209, %214 : vector<128x128xf32>
    %c9_281 = arith.constant 9 : index
    %c0_282 = arith.constant 0 : index
    %c0_283 = arith.constant 0 : index
    %216 = vector.load %arg6[%c9_281, %c0_282, %c0_283] : memref<18x18x32xf32, #tpu.memory_space<vmem>>, vector<8x16x32xf32>
    %217 = vector.shape_cast %216 : vector<8x16x32xf32> to vector<128x32xf32>
    %c1_284 = arith.constant 1 : index
    %c3_285 = arith.constant 3 : index
    %c0_286 = arith.constant 0 : index
    %c0_287 = arith.constant 0 : index
    %218 = vector.load %arg2[%c1_284, %c3_285, %c0_286, %c0_287] : memref<5x9x32x128xf32, #tpu.memory_space<vmem>>, vector<1x1x32x128xf32>
    %219 = vector.shape_cast %218 : vector<1x1x32x128xf32> to vector<32x128xf32>
    %cst_288 = arith.constant dense<0.000000e+00> : vector<128x128xf32>
    %220 = tpu.matmul %217, %219, %cst_288 {dimension_numbers = #tpu.dot_dimension_numbers<[1], [0], [0], [1], [0, 0, 1, 1], [], []>} : vector<128x32xf32>, vector<32x128xf32>, vector<128x128xf32> -> vector<128x128xf32>
    %221 = arith.addf %215, %220 : vector<128x128xf32>
    %c9_289 = arith.constant 9 : index
    %c1_290 = arith.constant 1 : index
    %c0_291 = arith.constant 0 : index
    %222 = vector.load %arg6[%c9_289, %c1_290, %c0_291] : memref<18x18x32xf32, #tpu.memory_space<vmem>>, vector<8x16x32xf32>
    %223 = vector.shape_cast %222 : vector<8x16x32xf32> to vector<128x32xf32>
    %c1_292 = arith.constant 1 : index
    %c4_293 = arith.constant 4 : index
    %c0_294 = arith.constant 0 : index
    %c0_295 = arith.constant 0 : index
    %224 = vector.load %arg2[%c1_292, %c4_293, %c0_294, %c0_295] : memref<5x9x32x128xf32, #tpu.memory_space<vmem>>, vector<1x1x32x128xf32>
    %225 = vector.shape_cast %224 : vector<1x1x32x128xf32> to vector<32x128xf32>
    %cst_296 = arith.constant dense<0.000000e+00> : vector<128x128xf32>
    %226 = tpu.matmul %223, %225, %cst_296 {dimension_numbers = #tpu.dot_dimension_numbers<[1], [0], [0], [1], [0, 0, 1, 1], [], []>} : vector<128x32xf32>, vector<32x128xf32>, vector<128x128xf32> -> vector<128x128xf32>
    %227 = arith.addf %221, %226 : vector<128x128xf32>
    %c9_297 = arith.constant 9 : index
    %c2_298 = arith.constant 2 : index
    %c0_299 = arith.constant 0 : index
    %228 = vector.load %arg6[%c9_297, %c2_298, %c0_299] : memref<18x18x32xf32, #tpu.memory_space<vmem>>, vector<8x16x32xf32>
    %229 = vector.shape_cast %228 : vector<8x16x32xf32> to vector<128x32xf32>
    %c1_300 = arith.constant 1 : index
    %c5_301 = arith.constant 5 : index
    %c0_302 = arith.constant 0 : index
    %c0_303 = arith.constant 0 : index
    %230 = vector.load %arg2[%c1_300, %c5_301, %c0_302, %c0_303] : memref<5x9x32x128xf32, #tpu.memory_space<vmem>>, vector<1x1x32x128xf32>
    %231 = vector.shape_cast %230 : vector<1x1x32x128xf32> to vector<32x128xf32>
    %cst_304 = arith.constant dense<0.000000e+00> : vector<128x128xf32>
    %232 = tpu.matmul %229, %231, %cst_304 {dimension_numbers = #tpu.dot_dimension_numbers<[1], [0], [0], [1], [0, 0, 1, 1], [], []>} : vector<128x32xf32>, vector<32x128xf32>, vector<128x128xf32> -> vector<128x128xf32>
    %233 = arith.addf %227, %232 : vector<128x128xf32>
    %c10_305 = arith.constant 10 : index
    %c0_306 = arith.constant 0 : index
    %c0_307 = arith.constant 0 : index
    %234 = vector.load %arg6[%c10_305, %c0_306, %c0_307] : memref<18x18x32xf32, #tpu.memory_space<vmem>>, vector<8x16x32xf32>
    %235 = vector.shape_cast %234 : vector<8x16x32xf32> to vector<128x32xf32>
    %c1_308 = arith.constant 1 : index
    %c6_309 = arith.constant 6 : index
    %c0_310 = arith.constant 0 : index
    %c0_311 = arith.constant 0 : index
    %236 = vector.load %arg2[%c1_308, %c6_309, %c0_310, %c0_311] : memref<5x9x32x128xf32, #tpu.memory_space<vmem>>, vector<1x1x32x128xf32>
    %237 = vector.shape_cast %236 : vector<1x1x32x128xf32> to vector<32x128xf32>
    %cst_312 = arith.constant dense<0.000000e+00> : vector<128x128xf32>
    %238 = tpu.matmul %235, %237, %cst_312 {dimension_numbers = #tpu.dot_dimension_numbers<[1], [0], [0], [1], [0, 0, 1, 1], [], []>} : vector<128x32xf32>, vector<32x128xf32>, vector<128x128xf32> -> vector<128x128xf32>
    %239 = arith.addf %233, %238 : vector<128x128xf32>
    %c10_313 = arith.constant 10 : index
    %c1_314 = arith.constant 1 : index
    %c0_315 = arith.constant 0 : index
    %240 = vector.load %arg6[%c10_313, %c1_314, %c0_315] : memref<18x18x32xf32, #tpu.memory_space<vmem>>, vector<8x16x32xf32>
    %241 = vector.shape_cast %240 : vector<8x16x32xf32> to vector<128x32xf32>
    %c1_316 = arith.constant 1 : index
    %c7_317 = arith.constant 7 : index
    %c0_318 = arith.constant 0 : index
    %c0_319 = arith.constant 0 : index
    %242 = vector.load %arg2[%c1_316, %c7_317, %c0_318, %c0_319] : memref<5x9x32x128xf32, #tpu.memory_space<vmem>>, vector<1x1x32x128xf32>
    %243 = vector.shape_cast %242 : vector<1x1x32x128xf32> to vector<32x128xf32>
    %cst_320 = arith.constant dense<0.000000e+00> : vector<128x128xf32>
    %244 = tpu.matmul %241, %243, %cst_320 {dimension_numbers = #tpu.dot_dimension_numbers<[1], [0], [0], [1], [0, 0, 1, 1], [], []>} : vector<128x32xf32>, vector<32x128xf32>, vector<128x128xf32> -> vector<128x128xf32>
    %245 = arith.addf %239, %244 : vector<128x128xf32>
    %c10_321 = arith.constant 10 : index
    %c2_322 = arith.constant 2 : index
    %c0_323 = arith.constant 0 : index
    %246 = vector.load %arg6[%c10_321, %c2_322, %c0_323] : memref<18x18x32xf32, #tpu.memory_space<vmem>>, vector<8x16x32xf32>
    %247 = vector.shape_cast %246 : vector<8x16x32xf32> to vector<128x32xf32>
    %c1_324 = arith.constant 1 : index
    %c8_325 = arith.constant 8 : index
    %c0_326 = arith.constant 0 : index
    %c0_327 = arith.constant 0 : index
    %248 = vector.load %arg2[%c1_324, %c8_325, %c0_326, %c0_327] : memref<5x9x32x128xf32, #tpu.memory_space<vmem>>, vector<1x1x32x128xf32>
    %249 = vector.shape_cast %248 : vector<1x1x32x128xf32> to vector<32x128xf32>
    %cst_328 = arith.constant dense<0.000000e+00> : vector<128x128xf32>
    %250 = tpu.matmul %247, %249, %cst_328 {dimension_numbers = #tpu.dot_dimension_numbers<[1], [0], [0], [1], [0, 0, 1, 1], [], []>} : vector<128x32xf32>, vector<32x128xf32>, vector<128x128xf32> -> vector<128x128xf32>
    %251 = arith.addf %245, %250 : vector<128x128xf32>
    %c1_329 = arith.constant 1 : index
    %c0_330 = arith.constant 0 : index
    %c0_331 = arith.constant 0 : index
    %252 = vector.load %arg3[%c1_329, %c0_330, %c0_331] : memref<5x1x128xf32, #tpu.memory_space<vmem>>, vector<1x1x128xf32>
    %253 = vector.shape_cast %252 : vector<1x1x128xf32> to vector<1x128xf32>
    %254 = vector.broadcast %253 : vector<1x128xf32> to vector<128x128xf32>
    %255 = arith.addf %251, %254 : vector<128x128xf32>
    %256 = vector.extract_strided_slice %255 {offsets = [0, 0], sizes = [128, 32], strides = [1, 1]} : vector<128x128xf32> to vector<128x32xf32>
    %cst_332 = arith.constant 0.000000e+00 : f32
    %257 = vector.broadcast %cst_332 : f32 to vector<128x32xf32>
    %258 = arith.maximumf %256, %257 : vector<128x32xf32>
    %259 = vector.shape_cast %258 : vector<128x32xf32> to vector<8x16x32xf32>
    %c9_333 = arith.constant 9 : index
    %c1_334 = arith.constant 1 : index
    %c0_335 = arith.constant 0 : index
    %260 = vector.load %arg5[%c9_333, %c1_334, %c0_335] : memref<18x18x32xf32, #tpu.memory_space<vmem>>, vector<8x16x32xf32>
    tpu.vector_store %arg5[%c9_333, %c1_334, %c0_335], %259 {strides = array<i32>} : memref<18x18x32xf32, #tpu.memory_space<vmem>>, vector<8x16x32xf32>,
    %c0_336 = arith.constant 0 : index
    %c0_337 = arith.constant 0 : index
    %c0_338 = arith.constant 0 : index
    %261 = vector.load %arg5[%c0_336, %c0_337, %c0_338] : memref<18x18x32xf32, #tpu.memory_space<vmem>>, vector<8x16x32xf32>
    %262 = vector.shape_cast %261 : vector<8x16x32xf32> to vector<128x32xf32>
    %c2_339 = arith.constant 2 : index
    %c0_340 = arith.constant 0 : index
    %c0_341 = arith.constant 0 : index
    %c0_342 = arith.constant 0 : index
    %263 = vector.load %arg2[%c2_339, %c0_340, %c0_341, %c0_342] : memref<5x9x32x128xf32, #tpu.memory_space<vmem>>, vector<1x1x32x128xf32>
    %264 = vector.shape_cast %263 : vector<1x1x32x128xf32> to vector<32x128xf32>
    %cst_343 = arith.constant dense<0.000000e+00> : vector<128x128xf32>
    %265 = tpu.matmul %262, %264, %cst_343 {dimension_numbers = #tpu.dot_dimension_numbers<[1], [0], [0], [1], [0, 0, 1, 1], [], []>} : vector<128x32xf32>, vector<32x128xf32>, vector<128x128xf32> -> vector<128x128xf32>
    %c0_344 = arith.constant 0 : index
    %c1_345 = arith.constant 1 : index
    %c0_346 = arith.constant 0 : index
    %266 = vector.load %arg5[%c0_344, %c1_345, %c0_346] : memref<18x18x32xf32, #tpu.memory_space<vmem>>, vector<8x16x32xf32>
    %267 = vector.shape_cast %266 : vector<8x16x32xf32> to vector<128x32xf32>
    %c2_347 = arith.constant 2 : index
    %c1_348 = arith.constant 1 : index
    %c0_349 = arith.constant 0 : index
    %c0_350 = arith.constant 0 : index
    %268 = vector.load %arg2[%c2_347, %c1_348, %c0_349, %c0_350] : memref<5x9x32x128xf32, #tpu.memory_space<vmem>>, vector<1x1x32x128xf32>
    %269 = vector.shape_cast %268 : vector<1x1x32x128xf32> to vector<32x128xf32>
    %cst_351 = arith.constant dense<0.000000e+00> : vector<128x128xf32>
    %270 = tpu.matmul %267, %269, %cst_351 {dimension_numbers = #tpu.dot_dimension_numbers<[1], [0], [0], [1], [0, 0, 1, 1], [], []>} : vector<128x32xf32>, vector<32x128xf32>, vector<128x128xf32> -> vector<128x128xf32>
    %271 = arith.addf %265, %270 : vector<128x128xf32>
    %c0_352 = arith.constant 0 : index
    %c2_353 = arith.constant 2 : index
    %c0_354 = arith.constant 0 : index
    %272 = vector.load %arg5[%c0_352, %c2_353, %c0_354] : memref<18x18x32xf32, #tpu.memory_space<vmem>>, vector<8x16x32xf32>
    %273 = vector.shape_cast %272 : vector<8x16x32xf32> to vector<128x32xf32>
    %c2_355 = arith.constant 2 : index
    %c2_356 = arith.constant 2 : index
    %c0_357 = arith.constant 0 : index
    %c0_358 = arith.constant 0 : index
    %274 = vector.load %arg2[%c2_355, %c2_356, %c0_357, %c0_358] : memref<5x9x32x128xf32, #tpu.memory_space<vmem>>, vector<1x1x32x128xf32>
    %275 = vector.shape_cast %274 : vector<1x1x32x128xf32> to vector<32x128xf32>
    %cst_359 = arith.constant dense<0.000000e+00> : vector<128x128xf32>
    %276 = tpu.matmul %273, %275, %cst_359 {dimension_numbers = #tpu.dot_dimension_numbers<[1], [0], [0], [1], [0, 0, 1, 1], [], []>} : vector<128x32xf32>, vector<32x128xf32>, vector<128x128xf32> -> vector<128x128xf32>
    %277 = arith.addf %271, %276 : vector<128x128xf32>
    %c1_360 = arith.constant 1 : index
    %c0_361 = arith.constant 0 : index
    %c0_362 = arith.constant 0 : index
    %278 = vector.load %arg5[%c1_360, %c0_361, %c0_362] : memref<18x18x32xf32, #tpu.memory_space<vmem>>, vector<8x16x32xf32>
    %279 = vector.shape_cast %278 : vector<8x16x32xf32> to vector<128x32xf32>
    %c2_363 = arith.constant 2 : index
    %c3_364 = arith.constant 3 : index
    %c0_365 = arith.constant 0 : index
    %c0_366 = arith.constant 0 : index
    %280 = vector.load %arg2[%c2_363, %c3_364, %c0_365, %c0_366] : memref<5x9x32x128xf32, #tpu.memory_space<vmem>>, vector<1x1x32x128xf32>
    %281 = vector.shape_cast %280 : vector<1x1x32x128xf32> to vector<32x128xf32>
    %cst_367 = arith.constant dense<0.000000e+00> : vector<128x128xf32>
    %282 = tpu.matmul %279, %281, %cst_367 {dimension_numbers = #tpu.dot_dimension_numbers<[1], [0], [0], [1], [0, 0, 1, 1], [], []>} : vector<128x32xf32>, vector<32x128xf32>, vector<128x128xf32> -> vector<128x128xf32>
    %283 = arith.addf %277, %282 : vector<128x128xf32>
    %c1_368 = arith.constant 1 : index
    %c1_369 = arith.constant 1 : index
    %c0_370 = arith.constant 0 : index
    %284 = vector.load %arg5[%c1_368, %c1_369, %c0_370] : memref<18x18x32xf32, #tpu.memory_space<vmem>>, vector<8x16x32xf32>
    %285 = vector.shape_cast %284 : vector<8x16x32xf32> to vector<128x32xf32>
    %c2_371 = arith.constant 2 : index
    %c4_372 = arith.constant 4 : index
    %c0_373 = arith.constant 0 : index
    %c0_374 = arith.constant 0 : index
    %286 = vector.load %arg2[%c2_371, %c4_372, %c0_373, %c0_374] : memref<5x9x32x128xf32, #tpu.memory_space<vmem>>, vector<1x1x32x128xf32>
    %287 = vector.shape_cast %286 : vector<1x1x32x128xf32> to vector<32x128xf32>
    %cst_375 = arith.constant dense<0.000000e+00> : vector<128x128xf32>
    %288 = tpu.matmul %285, %287, %cst_375 {dimension_numbers = #tpu.dot_dimension_numbers<[1], [0], [0], [1], [0, 0, 1, 1], [], []>} : vector<128x32xf32>, vector<32x128xf32>, vector<128x128xf32> -> vector<128x128xf32>
    %289 = arith.addf %283, %288 : vector<128x128xf32>
    %c1_376 = arith.constant 1 : index
    %c2_377 = arith.constant 2 : index
    %c0_378 = arith.constant 0 : index
    %290 = vector.load %arg5[%c1_376, %c2_377, %c0_378] : memref<18x18x32xf32, #tpu.memory_space<vmem>>, vector<8x16x32xf32>
    %291 = vector.shape_cast %290 : vector<8x16x32xf32> to vector<128x32xf32>
    %c2_379 = arith.constant 2 : index
    %c5_380 = arith.constant 5 : index
    %c0_381 = arith.constant 0 : index
    %c0_382 = arith.constant 0 : index
    %292 = vector.load %arg2[%c2_379, %c5_380, %c0_381, %c0_382] : memref<5x9x32x128xf32, #tpu.memory_space<vmem>>, vector<1x1x32x128xf32>
    %293 = vector.shape_cast %292 : vector<1x1x32x128xf32> to vector<32x128xf32>
    %cst_383 = arith.constant dense<0.000000e+00> : vector<128x128xf32>
    %294 = tpu.matmul %291, %293, %cst_383 {dimension_numbers = #tpu.dot_dimension_numbers<[1], [0], [0], [1], [0, 0, 1, 1], [], []>} : vector<128x32xf32>, vector<32x128xf32>, vector<128x128xf32> -> vector<128x128xf32>
    %295 = arith.addf %289, %294 : vector<128x128xf32>
    %c2_384 = arith.constant 2 : index
    %c0_385 = arith.constant 0 : index
    %c0_386 = arith.constant 0 : index
    %296 = vector.load %arg5[%c2_384, %c0_385, %c0_386] : memref<18x18x32xf32, #tpu.memory_space<vmem>>, vector<8x16x32xf32>
    %297 = vector.shape_cast %296 : vector<8x16x32xf32> to vector<128x32xf32>
    %c2_387 = arith.constant 2 : index
    %c6_388 = arith.constant 6 : index
    %c0_389 = arith.constant 0 : index
    %c0_390 = arith.constant 0 : index
    %298 = vector.load %arg2[%c2_387, %c6_388, %c0_389, %c0_390] : memref<5x9x32x128xf32, #tpu.memory_space<vmem>>, vector<1x1x32x128xf32>
    %299 = vector.shape_cast %298 : vector<1x1x32x128xf32> to vector<32x128xf32>
    %cst_391 = arith.constant dense<0.000000e+00> : vector<128x128xf32>
    %300 = tpu.matmul %297, %299, %cst_391 {dimension_numbers = #tpu.dot_dimension_numbers<[1], [0], [0], [1], [0, 0, 1, 1], [], []>} : vector<128x32xf32>, vector<32x128xf32>, vector<128x128xf32> -> vector<128x128xf32>
    %301 = arith.addf %295, %300 : vector<128x128xf32>
    %c2_392 = arith.constant 2 : index
    %c1_393 = arith.constant 1 : index
    %c0_394 = arith.constant 0 : index
    %302 = vector.load %arg5[%c2_392, %c1_393, %c0_394] : memref<18x18x32xf32, #tpu.memory_space<vmem>>, vector<8x16x32xf32>
    %303 = vector.shape_cast %302 : vector<8x16x32xf32> to vector<128x32xf32>
    %c2_395 = arith.constant 2 : index
    %c7_396 = arith.constant 7 : index
    %c0_397 = arith.constant 0 : index
    %c0_398 = arith.constant 0 : index
    %304 = vector.load %arg2[%c2_395, %c7_396, %c0_397, %c0_398] : memref<5x9x32x128xf32, #tpu.memory_space<vmem>>, vector<1x1x32x128xf32>
    %305 = vector.shape_cast %304 : vector<1x1x32x128xf32> to vector<32x128xf32>
    %cst_399 = arith.constant dense<0.000000e+00> : vector<128x128xf32>
    %306 = tpu.matmul %303, %305, %cst_399 {dimension_numbers = #tpu.dot_dimension_numbers<[1], [0], [0], [1], [0, 0, 1, 1], [], []>} : vector<128x32xf32>, vector<32x128xf32>, vector<128x128xf32> -> vector<128x128xf32>
    %307 = arith.addf %301, %306 : vector<128x128xf32>
    %c2_400 = arith.constant 2 : index
    %c2_401 = arith.constant 2 : index
    %c0_402 = arith.constant 0 : index
    %308 = vector.load %arg5[%c2_400, %c2_401, %c0_402] : memref<18x18x32xf32, #tpu.memory_space<vmem>>, vector<8x16x32xf32>
    %309 = vector.shape_cast %308 : vector<8x16x32xf32> to vector<128x32xf32>
    %c2_403 = arith.constant 2 : index
    %c8_404 = arith.constant 8 : index
    %c0_405 = arith.constant 0 : index
    %c0_406 = arith.constant 0 : index
    %310 = vector.load %arg2[%c2_403, %c8_404, %c0_405, %c0_406] : memref<5x9x32x128xf32, #tpu.memory_space<vmem>>, vector<1x1x32x128xf32>
    %311 = vector.shape_cast %310 : vector<1x1x32x128xf32> to vector<32x128xf32>
    %cst_407 = arith.constant dense<0.000000e+00> : vector<128x128xf32>
    %312 = tpu.matmul %309, %311, %cst_407 {dimension_numbers = #tpu.dot_dimension_numbers<[1], [0], [0], [1], [0, 0, 1, 1], [], []>} : vector<128x32xf32>, vector<32x128xf32>, vector<128x128xf32> -> vector<128x128xf32>
    %313 = arith.addf %307, %312 : vector<128x128xf32>
    %c2_408 = arith.constant 2 : index
    %c0_409 = arith.constant 0 : index
    %c0_410 = arith.constant 0 : index
    %314 = vector.load %arg3[%c2_408, %c0_409, %c0_410] : memref<5x1x128xf32, #tpu.memory_space<vmem>>, vector<1x1x128xf32>
    %315 = vector.shape_cast %314 : vector<1x1x128xf32> to vector<1x128xf32>
    %316 = vector.broadcast %315 : vector<1x128xf32> to vector<128x128xf32>
    %317 = arith.addf %313, %316 : vector<128x128xf32>
    %318 = vector.extract_strided_slice %317 {offsets = [0, 0], sizes = [128, 32], strides = [1, 1]} : vector<128x128xf32> to vector<128x32xf32>
    %cst_411 = arith.constant 0.000000e+00 : f32
    %319 = vector.broadcast %cst_411 : f32 to vector<128x32xf32>
    %320 = arith.maximumf %318, %319 : vector<128x32xf32>
    %321 = vector.shape_cast %320 : vector<128x32xf32> to vector<8x16x32xf32>
    %c1_412 = arith.constant 1 : index
    %c1_413 = arith.constant 1 : index
    %c0_414 = arith.constant 0 : index
    %322 = vector.load %arg6[%c1_412, %c1_413, %c0_414] : memref<18x18x32xf32, #tpu.memory_space<vmem>>, vector<8x16x32xf32>
    tpu.vector_store %arg6[%c1_412, %c1_413, %c0_414], %321 {strides = array<i32>} : memref<18x18x32xf32, #tpu.memory_space<vmem>>, vector<8x16x32xf32>,
    %c8_415 = arith.constant 8 : index
    %c0_416 = arith.constant 0 : index
    %c0_417 = arith.constant 0 : index
    %323 = vector.load %arg5[%c8_415, %c0_416, %c0_417] : memref<18x18x32xf32, #tpu.memory_space<vmem>>, vector<8x16x32xf32>
    %324 = vector.shape_cast %323 : vector<8x16x32xf32> to vector<128x32xf32>
    %c2_418 = arith.constant 2 : index
    %c0_419 = arith.constant 0 : index
    %c0_420 = arith.constant 0 : index
    %c0_421 = arith.constant 0 : index
    %325 = vector.load %arg2[%c2_418, %c0_419, %c0_420, %c0_421] : memref<5x9x32x128xf32, #tpu.memory_space<vmem>>, vector<1x1x32x128xf32>
    %326 = vector.shape_cast %325 : vector<1x1x32x128xf32> to vector<32x128xf32>
    %cst_422 = arith.constant dense<0.000000e+00> : vector<128x128xf32>
    %327 = tpu.matmul %324, %326, %cst_422 {dimension_numbers = #tpu.dot_dimension_numbers<[1], [0], [0], [1], [0, 0, 1, 1], [], []>} : vector<128x32xf32>, vector<32x128xf32>, vector<128x128xf32> -> vector<128x128xf32>
    %c8_423 = arith.constant 8 : index
    %c1_424 = arith.constant 1 : index
    %c0_425 = arith.constant 0 : index
    %328 = vector.load %arg5[%c8_423, %c1_424, %c0_425] : memref<18x18x32xf32, #tpu.memory_space<vmem>>, vector<8x16x32xf32>
    %329 = vector.shape_cast %328 : vector<8x16x32xf32> to vector<128x32xf32>
    %c2_426 = arith.constant 2 : index
    %c1_427 = arith.constant 1 : index
    %c0_428 = arith.constant 0 : index
    %c0_429 = arith.constant 0 : index
    %330 = vector.load %arg2[%c2_426, %c1_427, %c0_428, %c0_429] : memref<5x9x32x128xf32, #tpu.memory_space<vmem>>, vector<1x1x32x128xf32>
    %331 = vector.shape_cast %330 : vector<1x1x32x128xf32> to vector<32x128xf32>
    %cst_430 = arith.constant dense<0.000000e+00> : vector<128x128xf32>
    %332 = tpu.matmul %329, %331, %cst_430 {dimension_numbers = #tpu.dot_dimension_numbers<[1], [0], [0], [1], [0, 0, 1, 1], [], []>} : vector<128x32xf32>, vector<32x128xf32>, vector<128x128xf32> -> vector<128x128xf32>
    %333 = arith.addf %327, %332 : vector<128x128xf32>
    %c8_431 = arith.constant 8 : index
    %c2_432 = arith.constant 2 : index
    %c0_433 = arith.constant 0 : index
    %334 = vector.load %arg5[%c8_431, %c2_432, %c0_433] : memref<18x18x32xf32, #tpu.memory_space<vmem>>, vector<8x16x32xf32>
    %335 = vector.shape_cast %334 : vector<8x16x32xf32> to vector<128x32xf32>
    %c2_434 = arith.constant 2 : index
    %c2_435 = arith.constant 2 : index
    %c0_436 = arith.constant 0 : index
    %c0_437 = arith.constant 0 : index
    %336 = vector.load %arg2[%c2_434, %c2_435, %c0_436, %c0_437] : memref<5x9x32x128xf32, #tpu.memory_space<vmem>>, vector<1x1x32x128xf32>
    %337 = vector.shape_cast %336 : vector<1x1x32x128xf32> to vector<32x128xf32>
    %cst_438 = arith.constant dense<0.000000e+00> : vector<128x128xf32>
    %338 = tpu.matmul %335, %337, %cst_438 {dimension_numbers = #tpu.dot_dimension_numbers<[1], [0], [0], [1], [0, 0, 1, 1], [], []>} : vector<128x32xf32>, vector<32x128xf32>, vector<128x128xf32> -> vector<128x128xf32>
    %339 = arith.addf %333, %338 : vector<128x128xf32>
    %c9_439 = arith.constant 9 : index
    %c0_440 = arith.constant 0 : index
    %c0_441 = arith.constant 0 : index
    %340 = vector.load %arg5[%c9_439, %c0_440, %c0_441] : memref<18x18x32xf32, #tpu.memory_space<vmem>>, vector<8x16x32xf32>
    %341 = vector.shape_cast %340 : vector<8x16x32xf32> to vector<128x32xf32>
    %c2_442 = arith.constant 2 : index
    %c3_443 = arith.constant 3 : index
    %c0_444 = arith.constant 0 : index
    %c0_445 = arith.constant 0 : index
    %342 = vector.load %arg2[%c2_442, %c3_443, %c0_444, %c0_445] : memref<5x9x32x128xf32, #tpu.memory_space<vmem>>, vector<1x1x32x128xf32>
    %343 = vector.shape_cast %342 : vector<1x1x32x128xf32> to vector<32x128xf32>
    %cst_446 = arith.constant dense<0.000000e+00> : vector<128x128xf32>
    %344 = tpu.matmul %341, %343, %cst_446 {dimension_numbers = #tpu.dot_dimension_numbers<[1], [0], [0], [1], [0, 0, 1, 1], [], []>} : vector<128x32xf32>, vector<32x128xf32>, vector<128x128xf32> -> vector<128x128xf32>
    %345 = arith.addf %339, %344 : vector<128x128xf32>
    %c9_447 = arith.constant 9 : index
    %c1_448 = arith.constant 1 : index
    %c0_449 = arith.constant 0 : index
    %346 = vector.load %arg5[%c9_447, %c1_448, %c0_449] : memref<18x18x32xf32, #tpu.memory_space<vmem>>, vector<8x16x32xf32>
    %347 = vector.shape_cast %346 : vector<8x16x32xf32> to vector<128x32xf32>
    %c2_450 = arith.constant 2 : index
    %c4_451 = arith.constant 4 : index
    %c0_452 = arith.constant 0 : index
    %c0_453 = arith.constant 0 : index
    %348 = vector.load %arg2[%c2_450, %c4_451, %c0_452, %c0_453] : memref<5x9x32x128xf32, #tpu.memory_space<vmem>>, vector<1x1x32x128xf32>
    %349 = vector.shape_cast %348 : vector<1x1x32x128xf32> to vector<32x128xf32>
    %cst_454 = arith.constant dense<0.000000e+00> : vector<128x128xf32>
    %350 = tpu.matmul %347, %349, %cst_454 {dimension_numbers = #tpu.dot_dimension_numbers<[1], [0], [0], [1], [0, 0, 1, 1], [], []>} : vector<128x32xf32>, vector<32x128xf32>, vector<128x128xf32> -> vector<128x128xf32>
    %351 = arith.addf %345, %350 : vector<128x128xf32>
    %c9_455 = arith.constant 9 : index
    %c2_456 = arith.constant 2 : index
    %c0_457 = arith.constant 0 : index
    %352 = vector.load %arg5[%c9_455, %c2_456, %c0_457] : memref<18x18x32xf32, #tpu.memory_space<vmem>>, vector<8x16x32xf32>
    %353 = vector.shape_cast %352 : vector<8x16x32xf32> to vector<128x32xf32>
    %c2_458 = arith.constant 2 : index
    %c5_459 = arith.constant 5 : index
    %c0_460 = arith.constant 0 : index
    %c0_461 = arith.constant 0 : index
    %354 = vector.load %arg2[%c2_458, %c5_459, %c0_460, %c0_461] : memref<5x9x32x128xf32, #tpu.memory_space<vmem>>, vector<1x1x32x128xf32>
    %355 = vector.shape_cast %354 : vector<1x1x32x128xf32> to vector<32x128xf32>
    %cst_462 = arith.constant dense<0.000000e+00> : vector<128x128xf32>
    %356 = tpu.matmul %353, %355, %cst_462 {dimension_numbers = #tpu.dot_dimension_numbers<[1], [0], [0], [1], [0, 0, 1, 1], [], []>} : vector<128x32xf32>, vector<32x128xf32>, vector<128x128xf32> -> vector<128x128xf32>
    %357 = arith.addf %351, %356 : vector<128x128xf32>
    %c10_463 = arith.constant 10 : index
    %c0_464 = arith.constant 0 : index
    %c0_465 = arith.constant 0 : index
    %358 = vector.load %arg5[%c10_463, %c0_464, %c0_465] : memref<18x18x32xf32, #tpu.memory_space<vmem>>, vector<8x16x32xf32>
    %359 = vector.shape_cast %358 : vector<8x16x32xf32> to vector<128x32xf32>
    %c2_466 = arith.constant 2 : index
    %c6_467 = arith.constant 6 : index
    %c0_468 = arith.constant 0 : index
    %c0_469 = arith.constant 0 : index
    %360 = vector.load %arg2[%c2_466, %c6_467, %c0_468, %c0_469] : memref<5x9x32x128xf32, #tpu.memory_space<vmem>>, vector<1x1x32x128xf32>
    %361 = vector.shape_cast %360 : vector<1x1x32x128xf32> to vector<32x128xf32>
    %cst_470 = arith.constant dense<0.000000e+00> : vector<128x128xf32>
    %362 = tpu.matmul %359, %361, %cst_470 {dimension_numbers = #tpu.dot_dimension_numbers<[1], [0], [0], [1], [0, 0, 1, 1], [], []>} : vector<128x32xf32>, vector<32x128xf32>, vector<128x128xf32> -> vector<128x128xf32>
    %363 = arith.addf %357, %362 : vector<128x128xf32>
    %c10_471 = arith.constant 10 : index
    %c1_472 = arith.constant 1 : index
    %c0_473 = arith.constant 0 : index
    %364 = vector.load %arg5[%c10_471, %c1_472, %c0_473] : memref<18x18x32xf32, #tpu.memory_space<vmem>>, vector<8x16x32xf32>
    %365 = vector.shape_cast %364 : vector<8x16x32xf32> to vector<128x32xf32>
    %c2_474 = arith.constant 2 : index
    %c7_475 = arith.constant 7 : index
    %c0_476 = arith.constant 0 : index
    %c0_477 = arith.constant 0 : index
    %366 = vector.load %arg2[%c2_474, %c7_475, %c0_476, %c0_477] : memref<5x9x32x128xf32, #tpu.memory_space<vmem>>, vector<1x1x32x128xf32>
    %367 = vector.shape_cast %366 : vector<1x1x32x128xf32> to vector<32x128xf32>
    %cst_478 = arith.constant dense<0.000000e+00> : vector<128x128xf32>
    %368 = tpu.matmul %365, %367, %cst_478 {dimension_numbers = #tpu.dot_dimension_numbers<[1], [0], [0], [1], [0, 0, 1, 1], [], []>} : vector<128x32xf32>, vector<32x128xf32>, vector<128x128xf32> -> vector<128x128xf32>
    %369 = arith.addf %363, %368 : vector<128x128xf32>
    %c10_479 = arith.constant 10 : index
    %c2_480 = arith.constant 2 : index
    %c0_481 = arith.constant 0 : index
    %370 = vector.load %arg5[%c10_479, %c2_480, %c0_481] : memref<18x18x32xf32, #tpu.memory_space<vmem>>, vector<8x16x32xf32>
    %371 = vector.shape_cast %370 : vector<8x16x32xf32> to vector<128x32xf32>
    %c2_482 = arith.constant 2 : index
    %c8_483 = arith.constant 8 : index
    %c0_484 = arith.constant 0 : index
    %c0_485 = arith.constant 0 : index
    %372 = vector.load %arg2[%c2_482, %c8_483, %c0_484, %c0_485] : memref<5x9x32x128xf32, #tpu.memory_space<vmem>>, vector<1x1x32x128xf32>
    %373 = vector.shape_cast %372 : vector<1x1x32x128xf32> to vector<32x128xf32>
    %cst_486 = arith.constant dense<0.000000e+00> : vector<128x128xf32>
    %374 = tpu.matmul %371, %373, %cst_486 {dimension_numbers = #tpu.dot_dimension_numbers<[1], [0], [0], [1], [0, 0, 1, 1], [], []>} : vector<128x32xf32>, vector<32x128xf32>, vector<128x128xf32> -> vector<128x128xf32>
    %375 = arith.addf %369, %374 : vector<128x128xf32>
    %c2_487 = arith.constant 2 : index
    %c0_488 = arith.constant 0 : index
    %c0_489 = arith.constant 0 : index
    %376 = vector.load %arg3[%c2_487, %c0_488, %c0_489] : memref<5x1x128xf32, #tpu.memory_space<vmem>>, vector<1x1x128xf32>
    %377 = vector.shape_cast %376 : vector<1x1x128xf32> to vector<1x128xf32>
    %378 = vector.broadcast %377 : vector<1x128xf32> to vector<128x128xf32>
    %379 = arith.addf %375, %378 : vector<128x128xf32>
    %380 = vector.extract_strided_slice %379 {offsets = [0, 0], sizes = [128, 32], strides = [1, 1]} : vector<128x128xf32> to vector<128x32xf32>
    %cst_490 = arith.constant 0.000000e+00 : f32
    %381 = vector.broadcast %cst_490 : f32 to vector<128x32xf32>
    %382 = arith.maximumf %380, %381 : vector<128x32xf32>
    %383 = vector.shape_cast %382 : vector<128x32xf32> to vector<8x16x32xf32>
    %c9_491 = arith.constant 9 : index
    %c1_492 = arith.constant 1 : index
    %c0_493 = arith.constant 0 : index
    %384 = vector.load %arg6[%c9_491, %c1_492, %c0_493] : memref<18x18x32xf32, #tpu.memory_space<vmem>>, vector<8x16x32xf32>
    tpu.vector_store %arg6[%c9_491, %c1_492, %c0_493], %383 {strides = array<i32>} : memref<18x18x32xf32, #tpu.memory_space<vmem>>, vector<8x16x32xf32>,
    %c0_494 = arith.constant 0 : index
    %c0_495 = arith.constant 0 : index
    %c0_496 = arith.constant 0 : index
    %385 = vector.load %arg6[%c0_494, %c0_495, %c0_496] : memref<18x18x32xf32, #tpu.memory_space<vmem>>, vector<8x16x32xf32>
    %386 = vector.shape_cast %385 : vector<8x16x32xf32> to vector<128x32xf32>
    %c3_497 = arith.constant 3 : index
    %c0_498 = arith.constant 0 : index
    %c0_499 = arith.constant 0 : index
    %c0_500 = arith.constant 0 : index
    %387 = vector.load %arg2[%c3_497, %c0_498, %c0_499, %c0_500] : memref<5x9x32x128xf32, #tpu.memory_space<vmem>>, vector<1x1x32x128xf32>
    %388 = vector.shape_cast %387 : vector<1x1x32x128xf32> to vector<32x128xf32>
    %cst_501 = arith.constant dense<0.000000e+00> : vector<128x128xf32>
    %389 = tpu.matmul %386, %388, %cst_501 {dimension_numbers = #tpu.dot_dimension_numbers<[1], [0], [0], [1], [0, 0, 1, 1], [], []>} : vector<128x32xf32>, vector<32x128xf32>, vector<128x128xf32> -> vector<128x128xf32>
    %c0_502 = arith.constant 0 : index
    %c1_503 = arith.constant 1 : index
    %c0_504 = arith.constant 0 : index
    %390 = vector.load %arg6[%c0_502, %c1_503, %c0_504] : memref<18x18x32xf32, #tpu.memory_space<vmem>>, vector<8x16x32xf32>
    %391 = vector.shape_cast %390 : vector<8x16x32xf32> to vector<128x32xf32>
    %c3_505 = arith.constant 3 : index
    %c1_506 = arith.constant 1 : index
    %c0_507 = arith.constant 0 : index
    %c0_508 = arith.constant 0 : index
    %392 = vector.load %arg2[%c3_505, %c1_506, %c0_507, %c0_508] : memref<5x9x32x128xf32, #tpu.memory_space<vmem>>, vector<1x1x32x128xf32>
    %393 = vector.shape_cast %392 : vector<1x1x32x128xf32> to vector<32x128xf32>
    %cst_509 = arith.constant dense<0.000000e+00> : vector<128x128xf32>
    %394 = tpu.matmul %391, %393, %cst_509 {dimension_numbers = #tpu.dot_dimension_numbers<[1], [0], [0], [1], [0, 0, 1, 1], [], []>} : vector<128x32xf32>, vector<32x128xf32>, vector<128x128xf32> -> vector<128x128xf32>
    %395 = arith.addf %389, %394 : vector<128x128xf32>
    %c0_510 = arith.constant 0 : index
    %c2_511 = arith.constant 2 : index
    %c0_512 = arith.constant 0 : index
    %396 = vector.load %arg6[%c0_510, %c2_511, %c0_512] : memref<18x18x32xf32, #tpu.memory_space<vmem>>, vector<8x16x32xf32>
    %397 = vector.shape_cast %396 : vector<8x16x32xf32> to vector<128x32xf32>
    %c3_513 = arith.constant 3 : index
    %c2_514 = arith.constant 2 : index
    %c0_515 = arith.constant 0 : index
    %c0_516 = arith.constant 0 : index
    %398 = vector.load %arg2[%c3_513, %c2_514, %c0_515, %c0_516] : memref<5x9x32x128xf32, #tpu.memory_space<vmem>>, vector<1x1x32x128xf32>
    %399 = vector.shape_cast %398 : vector<1x1x32x128xf32> to vector<32x128xf32>
    %cst_517 = arith.constant dense<0.000000e+00> : vector<128x128xf32>
    %400 = tpu.matmul %397, %399, %cst_517 {dimension_numbers = #tpu.dot_dimension_numbers<[1], [0], [0], [1], [0, 0, 1, 1], [], []>} : vector<128x32xf32>, vector<32x128xf32>, vector<128x128xf32> -> vector<128x128xf32>
    %401 = arith.addf %395, %400 : vector<128x128xf32>
    %c1_518 = arith.constant 1 : index
    %c0_519 = arith.constant 0 : index
    %c0_520 = arith.constant 0 : index
    %402 = vector.load %arg6[%c1_518, %c0_519, %c0_520] : memref<18x18x32xf32, #tpu.memory_space<vmem>>, vector<8x16x32xf32>
    %403 = vector.shape_cast %402 : vector<8x16x32xf32> to vector<128x32xf32>
    %c3_521 = arith.constant 3 : index
    %c3_522 = arith.constant 3 : index
    %c0_523 = arith.constant 0 : index
    %c0_524 = arith.constant 0 : index
    %404 = vector.load %arg2[%c3_521, %c3_522, %c0_523, %c0_524] : memref<5x9x32x128xf32, #tpu.memory_space<vmem>>, vector<1x1x32x128xf32>
    %405 = vector.shape_cast %404 : vector<1x1x32x128xf32> to vector<32x128xf32>
    %cst_525 = arith.constant dense<0.000000e+00> : vector<128x128xf32>
    %406 = tpu.matmul %403, %405, %cst_525 {dimension_numbers = #tpu.dot_dimension_numbers<[1], [0], [0], [1], [0, 0, 1, 1], [], []>} : vector<128x32xf32>, vector<32x128xf32>, vector<128x128xf32> -> vector<128x128xf32>
    %407 = arith.addf %401, %406 : vector<128x128xf32>
    %c1_526 = arith.constant 1 : index
    %c1_527 = arith.constant 1 : index
    %c0_528 = arith.constant 0 : index
    %408 = vector.load %arg6[%c1_526, %c1_527, %c0_528] : memref<18x18x32xf32, #tpu.memory_space<vmem>>, vector<8x16x32xf32>
    %409 = vector.shape_cast %408 : vector<8x16x32xf32> to vector<128x32xf32>
    %c3_529 = arith.constant 3 : index
    %c4_530 = arith.constant 4 : index
    %c0_531 = arith.constant 0 : index
    %c0_532 = arith.constant 0 : index
    %410 = vector.load %arg2[%c3_529, %c4_530, %c0_531, %c0_532] : memref<5x9x32x128xf32, #tpu.memory_space<vmem>>, vector<1x1x32x128xf32>
    %411 = vector.shape_cast %410 : vector<1x1x32x128xf32> to vector<32x128xf32>
    %cst_533 = arith.constant dense<0.000000e+00> : vector<128x128xf32>
    %412 = tpu.matmul %409, %411, %cst_533 {dimension_numbers = #tpu.dot_dimension_numbers<[1], [0], [0], [1], [0, 0, 1, 1], [], []>} : vector<128x32xf32>, vector<32x128xf32>, vector<128x128xf32> -> vector<128x128xf32>
    %413 = arith.addf %407, %412 : vector<128x128xf32>
    %c1_534 = arith.constant 1 : index
    %c2_535 = arith.constant 2 : index
    %c0_536 = arith.constant 0 : index
    %414 = vector.load %arg6[%c1_534, %c2_535, %c0_536] : memref<18x18x32xf32, #tpu.memory_space<vmem>>, vector<8x16x32xf32>
    %415 = vector.shape_cast %414 : vector<8x16x32xf32> to vector<128x32xf32>
    %c3_537 = arith.constant 3 : index
    %c5_538 = arith.constant 5 : index
    %c0_539 = arith.constant 0 : index
    %c0_540 = arith.constant 0 : index
    %416 = vector.load %arg2[%c3_537, %c5_538, %c0_539, %c0_540] : memref<5x9x32x128xf32, #tpu.memory_space<vmem>>, vector<1x1x32x128xf32>
    %417 = vector.shape_cast %416 : vector<1x1x32x128xf32> to vector<32x128xf32>
    %cst_541 = arith.constant dense<0.000000e+00> : vector<128x128xf32>
    %418 = tpu.matmul %415, %417, %cst_541 {dimension_numbers = #tpu.dot_dimension_numbers<[1], [0], [0], [1], [0, 0, 1, 1], [], []>} : vector<128x32xf32>, vector<32x128xf32>, vector<128x128xf32> -> vector<128x128xf32>
    %419 = arith.addf %413, %418 : vector<128x128xf32>
    %c2_542 = arith.constant 2 : index
    %c0_543 = arith.constant 0 : index
    %c0_544 = arith.constant 0 : index
    %420 = vector.load %arg6[%c2_542, %c0_543, %c0_544] : memref<18x18x32xf32, #tpu.memory_space<vmem>>, vector<8x16x32xf32>
    %421 = vector.shape_cast %420 : vector<8x16x32xf32> to vector<128x32xf32>
    %c3_545 = arith.constant 3 : index
    %c6_546 = arith.constant 6 : index
    %c0_547 = arith.constant 0 : index
    %c0_548 = arith.constant 0 : index
    %422 = vector.load %arg2[%c3_545, %c6_546, %c0_547, %c0_548] : memref<5x9x32x128xf32, #tpu.memory_space<vmem>>, vector<1x1x32x128xf32>
    %423 = vector.shape_cast %422 : vector<1x1x32x128xf32> to vector<32x128xf32>
    %cst_549 = arith.constant dense<0.000000e+00> : vector<128x128xf32>
    %424 = tpu.matmul %421, %423, %cst_549 {dimension_numbers = #tpu.dot_dimension_numbers<[1], [0], [0], [1], [0, 0, 1, 1], [], []>} : vector<128x32xf32>, vector<32x128xf32>, vector<128x128xf32> -> vector<128x128xf32>
    %425 = arith.addf %419, %424 : vector<128x128xf32>
    %c2_550 = arith.constant 2 : index
    %c1_551 = arith.constant 1 : index
    %c0_552 = arith.constant 0 : index
    %426 = vector.load %arg6[%c2_550, %c1_551, %c0_552] : memref<18x18x32xf32, #tpu.memory_space<vmem>>, vector<8x16x32xf32>
    %427 = vector.shape_cast %426 : vector<8x16x32xf32> to vector<128x32xf32>
    %c3_553 = arith.constant 3 : index
    %c7_554 = arith.constant 7 : index
    %c0_555 = arith.constant 0 : index
    %c0_556 = arith.constant 0 : index
    %428 = vector.load %arg2[%c3_553, %c7_554, %c0_555, %c0_556] : memref<5x9x32x128xf32, #tpu.memory_space<vmem>>, vector<1x1x32x128xf32>
    %429 = vector.shape_cast %428 : vector<1x1x32x128xf32> to vector<32x128xf32>
    %cst_557 = arith.constant dense<0.000000e+00> : vector<128x128xf32>
    %430 = tpu.matmul %427, %429, %cst_557 {dimension_numbers = #tpu.dot_dimension_numbers<[1], [0], [0], [1], [0, 0, 1, 1], [], []>} : vector<128x32xf32>, vector<32x128xf32>, vector<128x128xf32> -> vector<128x128xf32>
    %431 = arith.addf %425, %430 : vector<128x128xf32>
    %c2_558 = arith.constant 2 : index
    %c2_559 = arith.constant 2 : index
    %c0_560 = arith.constant 0 : index
    %432 = vector.load %arg6[%c2_558, %c2_559, %c0_560] : memref<18x18x32xf32, #tpu.memory_space<vmem>>, vector<8x16x32xf32>
    %433 = vector.shape_cast %432 : vector<8x16x32xf32> to vector<128x32xf32>
    %c3_561 = arith.constant 3 : index
    %c8_562 = arith.constant 8 : index
    %c0_563 = arith.constant 0 : index
    %c0_564 = arith.constant 0 : index
    %434 = vector.load %arg2[%c3_561, %c8_562, %c0_563, %c0_564] : memref<5x9x32x128xf32, #tpu.memory_space<vmem>>, vector<1x1x32x128xf32>
    %435 = vector.shape_cast %434 : vector<1x1x32x128xf32> to vector<32x128xf32>
    %cst_565 = arith.constant dense<0.000000e+00> : vector<128x128xf32>
    %436 = tpu.matmul %433, %435, %cst_565 {dimension_numbers = #tpu.dot_dimension_numbers<[1], [0], [0], [1], [0, 0, 1, 1], [], []>} : vector<128x32xf32>, vector<32x128xf32>, vector<128x128xf32> -> vector<128x128xf32>
    %437 = arith.addf %431, %436 : vector<128x128xf32>
    %c3_566 = arith.constant 3 : index
    %c0_567 = arith.constant 0 : index
    %c0_568 = arith.constant 0 : index
    %438 = vector.load %arg3[%c3_566, %c0_567, %c0_568] : memref<5x1x128xf32, #tpu.memory_space<vmem>>, vector<1x1x128xf32>
    %439 = vector.shape_cast %438 : vector<1x1x128xf32> to vector<1x128xf32>
    %440 = vector.broadcast %439 : vector<1x128xf32> to vector<128x128xf32>
    %441 = arith.addf %437, %440 : vector<128x128xf32>
    %442 = vector.extract_strided_slice %441 {offsets = [0, 0], sizes = [128, 32], strides = [1, 1]} : vector<128x128xf32> to vector<128x32xf32>
    %cst_569 = arith.constant 0.000000e+00 : f32
    %443 = vector.broadcast %cst_569 : f32 to vector<128x32xf32>
    %444 = arith.maximumf %442, %443 : vector<128x32xf32>
    %445 = vector.shape_cast %444 : vector<128x32xf32> to vector<8x16x32xf32>
    %c1_570 = arith.constant 1 : index
    %c1_571 = arith.constant 1 : index
    %c0_572 = arith.constant 0 : index
    %446 = vector.load %arg5[%c1_570, %c1_571, %c0_572] : memref<18x18x32xf32, #tpu.memory_space<vmem>>, vector<8x16x32xf32>
    tpu.vector_store %arg5[%c1_570, %c1_571, %c0_572], %445 {strides = array<i32>} : memref<18x18x32xf32, #tpu.memory_space<vmem>>, vector<8x16x32xf32>,
    %c8_573 = arith.constant 8 : index
    %c0_574 = arith.constant 0 : index
    %c0_575 = arith.constant 0 : index
    %447 = vector.load %arg6[%c8_573, %c0_574, %c0_575] : memref<18x18x32xf32, #tpu.memory_space<vmem>>, vector<8x16x32xf32>
    %448 = vector.shape_cast %447 : vector<8x16x32xf32> to vector<128x32xf32>
    %c3_576 = arith.constant 3 : index
    %c0_577 = arith.constant 0 : index
    %c0_578 = arith.constant 0 : index
    %c0_579 = arith.constant 0 : index
    %449 = vector.load %arg2[%c3_576, %c0_577, %c0_578, %c0_579] : memref<5x9x32x128xf32, #tpu.memory_space<vmem>>, vector<1x1x32x128xf32>
    %450 = vector.shape_cast %449 : vector<1x1x32x128xf32> to vector<32x128xf32>
    %cst_580 = arith.constant dense<0.000000e+00> : vector<128x128xf32>
    %451 = tpu.matmul %448, %450, %cst_580 {dimension_numbers = #tpu.dot_dimension_numbers<[1], [0], [0], [1], [0, 0, 1, 1], [], []>} : vector<128x32xf32>, vector<32x128xf32>, vector<128x128xf32> -> vector<128x128xf32>
    %c8_581 = arith.constant 8 : index
    %c1_582 = arith.constant 1 : index
    %c0_583 = arith.constant 0 : index
    %452 = vector.load %arg6[%c8_581, %c1_582, %c0_583] : memref<18x18x32xf32, #tpu.memory_space<vmem>>, vector<8x16x32xf32>
    %453 = vector.shape_cast %452 : vector<8x16x32xf32> to vector<128x32xf32>
    %c3_584 = arith.constant 3 : index
    %c1_585 = arith.constant 1 : index
    %c0_586 = arith.constant 0 : index
    %c0_587 = arith.constant 0 : index
    %454 = vector.load %arg2[%c3_584, %c1_585, %c0_586, %c0_587] : memref<5x9x32x128xf32, #tpu.memory_space<vmem>>, vector<1x1x32x128xf32>
    %455 = vector.shape_cast %454 : vector<1x1x32x128xf32> to vector<32x128xf32>
    %cst_588 = arith.constant dense<0.000000e+00> : vector<128x128xf32>
    %456 = tpu.matmul %453, %455, %cst_588 {dimension_numbers = #tpu.dot_dimension_numbers<[1], [0], [0], [1], [0, 0, 1, 1], [], []>} : vector<128x32xf32>, vector<32x128xf32>, vector<128x128xf32> -> vector<128x128xf32>
    %457 = arith.addf %451, %456 : vector<128x128xf32>
    %c8_589 = arith.constant 8 : index
    %c2_590 = arith.constant 2 : index
    %c0_591 = arith.constant 0 : index
    %458 = vector.load %arg6[%c8_589, %c2_590, %c0_591] : memref<18x18x32xf32, #tpu.memory_space<vmem>>, vector<8x16x32xf32>
    %459 = vector.shape_cast %458 : vector<8x16x32xf32> to vector<128x32xf32>
    %c3_592 = arith.constant 3 : index
    %c2_593 = arith.constant 2 : index
    %c0_594 = arith.constant 0 : index
    %c0_595 = arith.constant 0 : index
    %460 = vector.load %arg2[%c3_592, %c2_593, %c0_594, %c0_595] : memref<5x9x32x128xf32, #tpu.memory_space<vmem>>, vector<1x1x32x128xf32>
    %461 = vector.shape_cast %460 : vector<1x1x32x128xf32> to vector<32x128xf32>
    %cst_596 = arith.constant dense<0.000000e+00> : vector<128x128xf32>
    %462 = tpu.matmul %459, %461, %cst_596 {dimension_numbers = #tpu.dot_dimension_numbers<[1], [0], [0], [1], [0, 0, 1, 1], [], []>} : vector<128x32xf32>, vector<32x128xf32>, vector<128x128xf32> -> vector<128x128xf32>
    %463 = arith.addf %457, %462 : vector<128x128xf32>
    %c9_597 = arith.constant 9 : index
    %c0_598 = arith.constant 0 : index
    %c0_599 = arith.constant 0 : index
    %464 = vector.load %arg6[%c9_597, %c0_598, %c0_599] : memref<18x18x32xf32, #tpu.memory_space<vmem>>, vector<8x16x32xf32>
    %465 = vector.shape_cast %464 : vector<8x16x32xf32> to vector<128x32xf32>
    %c3_600 = arith.constant 3 : index
    %c3_601 = arith.constant 3 : index
    %c0_602 = arith.constant 0 : index
    %c0_603 = arith.constant 0 : index
    %466 = vector.load %arg2[%c3_600, %c3_601, %c0_602, %c0_603] : memref<5x9x32x128xf32, #tpu.memory_space<vmem>>, vector<1x1x32x128xf32>
    %467 = vector.shape_cast %466 : vector<1x1x32x128xf32> to vector<32x128xf32>
    %cst_604 = arith.constant dense<0.000000e+00> : vector<128x128xf32>
    %468 = tpu.matmul %465, %467, %cst_604 {dimension_numbers = #tpu.dot_dimension_numbers<[1], [0], [0], [1], [0, 0, 1, 1], [], []>} : vector<128x32xf32>, vector<32x128xf32>, vector<128x128xf32> -> vector<128x128xf32>
    %469 = arith.addf %463, %468 : vector<128x128xf32>
    %c9_605 = arith.constant 9 : index
    %c1_606 = arith.constant 1 : index
    %c0_607 = arith.constant 0 : index
    %470 = vector.load %arg6[%c9_605, %c1_606, %c0_607] : memref<18x18x32xf32, #tpu.memory_space<vmem>>, vector<8x16x32xf32>
    %471 = vector.shape_cast %470 : vector<8x16x32xf32> to vector<128x32xf32>
    %c3_608 = arith.constant 3 : index
    %c4_609 = arith.constant 4 : index
    %c0_610 = arith.constant 0 : index
    %c0_611 = arith.constant 0 : index
    %472 = vector.load %arg2[%c3_608, %c4_609, %c0_610, %c0_611] : memref<5x9x32x128xf32, #tpu.memory_space<vmem>>, vector<1x1x32x128xf32>
    %473 = vector.shape_cast %472 : vector<1x1x32x128xf32> to vector<32x128xf32>
    %cst_612 = arith.constant dense<0.000000e+00> : vector<128x128xf32>
    %474 = tpu.matmul %471, %473, %cst_612 {dimension_numbers = #tpu.dot_dimension_numbers<[1], [0], [0], [1], [0, 0, 1, 1], [], []>} : vector<128x32xf32>, vector<32x128xf32>, vector<128x128xf32> -> vector<128x128xf32>
    %475 = arith.addf %469, %474 : vector<128x128xf32>
    %c9_613 = arith.constant 9 : index
    %c2_614 = arith.constant 2 : index
    %c0_615 = arith.constant 0 : index
    %476 = vector.load %arg6[%c9_613, %c2_614, %c0_615] : memref<18x18x32xf32, #tpu.memory_space<vmem>>, vector<8x16x32xf32>
    %477 = vector.shape_cast %476 : vector<8x16x32xf32> to vector<128x32xf32>
    %c3_616 = arith.constant 3 : index
    %c5_617 = arith.constant 5 : index
    %c0_618 = arith.constant 0 : index
    %c0_619 = arith.constant 0 : index
    %478 = vector.load %arg2[%c3_616, %c5_617, %c0_618, %c0_619] : memref<5x9x32x128xf32, #tpu.memory_space<vmem>>, vector<1x1x32x128xf32>
    %479 = vector.shape_cast %478 : vector<1x1x32x128xf32> to vector<32x128xf32>
    %cst_620 = arith.constant dense<0.000000e+00> : vector<128x128xf32>
    %480 = tpu.matmul %477, %479, %cst_620 {dimension_numbers = #tpu.dot_dimension_numbers<[1], [0], [0], [1], [0, 0, 1, 1], [], []>} : vector<128x32xf32>, vector<32x128xf32>, vector<128x128xf32> -> vector<128x128xf32>
    %481 = arith.addf %475, %480 : vector<128x128xf32>
    %c10_621 = arith.constant 10 : index
    %c0_622 = arith.constant 0 : index
    %c0_623 = arith.constant 0 : index
    %482 = vector.load %arg6[%c10_621, %c0_622, %c0_623] : memref<18x18x32xf32, #tpu.memory_space<vmem>>, vector<8x16x32xf32>
    %483 = vector.shape_cast %482 : vector<8x16x32xf32> to vector<128x32xf32>
    %c3_624 = arith.constant 3 : index
    %c6_625 = arith.constant 6 : index
    %c0_626 = arith.constant 0 : index
    %c0_627 = arith.constant 0 : index
    %484 = vector.load %arg2[%c3_624, %c6_625, %c0_626, %c0_627] : memref<5x9x32x128xf32, #tpu.memory_space<vmem>>, vector<1x1x32x128xf32>
    %485 = vector.shape_cast %484 : vector<1x1x32x128xf32> to vector<32x128xf32>
    %cst_628 = arith.constant dense<0.000000e+00> : vector<128x128xf32>
    %486 = tpu.matmul %483, %485, %cst_628 {dimension_numbers = #tpu.dot_dimension_numbers<[1], [0], [0], [1], [0, 0, 1, 1], [], []>} : vector<128x32xf32>, vector<32x128xf32>, vector<128x128xf32> -> vector<128x128xf32>
    %487 = arith.addf %481, %486 : vector<128x128xf32>
    %c10_629 = arith.constant 10 : index
    %c1_630 = arith.constant 1 : index
    %c0_631 = arith.constant 0 : index
    %488 = vector.load %arg6[%c10_629, %c1_630, %c0_631] : memref<18x18x32xf32, #tpu.memory_space<vmem>>, vector<8x16x32xf32>
    %489 = vector.shape_cast %488 : vector<8x16x32xf32> to vector<128x32xf32>
    %c3_632 = arith.constant 3 : index
    %c7_633 = arith.constant 7 : index
    %c0_634 = arith.constant 0 : index
    %c0_635 = arith.constant 0 : index
    %490 = vector.load %arg2[%c3_632, %c7_633, %c0_634, %c0_635] : memref<5x9x32x128xf32, #tpu.memory_space<vmem>>, vector<1x1x32x128xf32>
    %491 = vector.shape_cast %490 : vector<1x1x32x128xf32> to vector<32x128xf32>
    %cst_636 = arith.constant dense<0.000000e+00> : vector<128x128xf32>
    %492 = tpu.matmul %489, %491, %cst_636 {dimension_numbers = #tpu.dot_dimension_numbers<[1], [0], [0], [1], [0, 0, 1, 1], [], []>} : vector<128x32xf32>, vector<32x128xf32>, vector<128x128xf32> -> vector<128x128xf32>
    %493 = arith.addf %487, %492 : vector<128x128xf32>
    %c10_637 = arith.constant 10 : index
    %c2_638 = arith.constant 2 : index
    %c0_639 = arith.constant 0 : index
    %494 = vector.load %arg6[%c10_637, %c2_638, %c0_639] : memref<18x18x32xf32, #tpu.memory_space<vmem>>, vector<8x16x32xf32>
    %495 = vector.shape_cast %494 : vector<8x16x32xf32> to vector<128x32xf32>
    %c3_640 = arith.constant 3 : index
    %c8_641 = arith.constant 8 : index
    %c0_642 = arith.constant 0 : index
    %c0_643 = arith.constant 0 : index
    %496 = vector.load %arg2[%c3_640, %c8_641, %c0_642, %c0_643] : memref<5x9x32x128xf32, #tpu.memory_space<vmem>>, vector<1x1x32x128xf32>
    %497 = vector.shape_cast %496 : vector<1x1x32x128xf32> to vector<32x128xf32>
    %cst_644 = arith.constant dense<0.000000e+00> : vector<128x128xf32>
    %498 = tpu.matmul %495, %497, %cst_644 {dimension_numbers = #tpu.dot_dimension_numbers<[1], [0], [0], [1], [0, 0, 1, 1], [], []>} : vector<128x32xf32>, vector<32x128xf32>, vector<128x128xf32> -> vector<128x128xf32>
    %499 = arith.addf %493, %498 : vector<128x128xf32>
    %c3_645 = arith.constant 3 : index
    %c0_646 = arith.constant 0 : index
    %c0_647 = arith.constant 0 : index
    %500 = vector.load %arg3[%c3_645, %c0_646, %c0_647] : memref<5x1x128xf32, #tpu.memory_space<vmem>>, vector<1x1x128xf32>
    %501 = vector.shape_cast %500 : vector<1x1x128xf32> to vector<1x128xf32>
    %502 = vector.broadcast %501 : vector<1x128xf32> to vector<128x128xf32>
    %503 = arith.addf %499, %502 : vector<128x128xf32>
    %504 = vector.extract_strided_slice %503 {offsets = [0, 0], sizes = [128, 32], strides = [1, 1]} : vector<128x128xf32> to vector<128x32xf32>
    %cst_648 = arith.constant 0.000000e+00 : f32
    %505 = vector.broadcast %cst_648 : f32 to vector<128x32xf32>
    %506 = arith.maximumf %504, %505 : vector<128x32xf32>
    %507 = vector.shape_cast %506 : vector<128x32xf32> to vector<8x16x32xf32>
    %c9_649 = arith.constant 9 : index
    %c1_650 = arith.constant 1 : index
    %c0_651 = arith.constant 0 : index
    %508 = vector.load %arg5[%c9_649, %c1_650, %c0_651] : memref<18x18x32xf32, #tpu.memory_space<vmem>>, vector<8x16x32xf32>
    tpu.vector_store %arg5[%c9_649, %c1_650, %c0_651], %507 {strides = array<i32>} : memref<18x18x32xf32, #tpu.memory_space<vmem>>, vector<8x16x32xf32>,
    %c0_652 = arith.constant 0 : index
    %c0_653 = arith.constant 0 : index
    %c0_654 = arith.constant 0 : index
    %509 = vector.load %arg5[%c0_652, %c0_653, %c0_654] : memref<18x18x32xf32, #tpu.memory_space<vmem>>, vector<8x16x32xf32>
    %510 = vector.shape_cast %509 : vector<8x16x32xf32> to vector<128x32xf32>
    %c4_655 = arith.constant 4 : index
    %c0_656 = arith.constant 0 : index
    %c0_657 = arith.constant 0 : index
    %c0_658 = arith.constant 0 : index
    %511 = vector.load %arg2[%c4_655, %c0_656, %c0_657, %c0_658] : memref<5x9x32x128xf32, #tpu.memory_space<vmem>>, vector<1x1x32x128xf32>
    %512 = vector.shape_cast %511 : vector<1x1x32x128xf32> to vector<32x128xf32>
    %cst_659 = arith.constant dense<0.000000e+00> : vector<128x128xf32>
    %513 = tpu.matmul %510, %512, %cst_659 {dimension_numbers = #tpu.dot_dimension_numbers<[1], [0], [0], [1], [0, 0, 1, 1], [], []>} : vector<128x32xf32>, vector<32x128xf32>, vector<128x128xf32> -> vector<128x128xf32>
    %c0_660 = arith.constant 0 : index
    %c1_661 = arith.constant 1 : index
    %c0_662 = arith.constant 0 : index
    %514 = vector.load %arg5[%c0_660, %c1_661, %c0_662] : memref<18x18x32xf32, #tpu.memory_space<vmem>>, vector<8x16x32xf32>
    %515 = vector.shape_cast %514 : vector<8x16x32xf32> to vector<128x32xf32>
    %c4_663 = arith.constant 4 : index
    %c1_664 = arith.constant 1 : index
    %c0_665 = arith.constant 0 : index
    %c0_666 = arith.constant 0 : index
    %516 = vector.load %arg2[%c4_663, %c1_664, %c0_665, %c0_666] : memref<5x9x32x128xf32, #tpu.memory_space<vmem>>, vector<1x1x32x128xf32>
    %517 = vector.shape_cast %516 : vector<1x1x32x128xf32> to vector<32x128xf32>
    %cst_667 = arith.constant dense<0.000000e+00> : vector<128x128xf32>
    %518 = tpu.matmul %515, %517, %cst_667 {dimension_numbers = #tpu.dot_dimension_numbers<[1], [0], [0], [1], [0, 0, 1, 1], [], []>} : vector<128x32xf32>, vector<32x128xf32>, vector<128x128xf32> -> vector<128x128xf32>
    %519 = arith.addf %513, %518 : vector<128x128xf32>
    %c0_668 = arith.constant 0 : index
    %c2_669 = arith.constant 2 : index
    %c0_670 = arith.constant 0 : index
    %520 = vector.load %arg5[%c0_668, %c2_669, %c0_670] : memref<18x18x32xf32, #tpu.memory_space<vmem>>, vector<8x16x32xf32>
    %521 = vector.shape_cast %520 : vector<8x16x32xf32> to vector<128x32xf32>
    %c4_671 = arith.constant 4 : index
    %c2_672 = arith.constant 2 : index
    %c0_673 = arith.constant 0 : index
    %c0_674 = arith.constant 0 : index
    %522 = vector.load %arg2[%c4_671, %c2_672, %c0_673, %c0_674] : memref<5x9x32x128xf32, #tpu.memory_space<vmem>>, vector<1x1x32x128xf32>
    %523 = vector.shape_cast %522 : vector<1x1x32x128xf32> to vector<32x128xf32>
    %cst_675 = arith.constant dense<0.000000e+00> : vector<128x128xf32>
    %524 = tpu.matmul %521, %523, %cst_675 {dimension_numbers = #tpu.dot_dimension_numbers<[1], [0], [0], [1], [0, 0, 1, 1], [], []>} : vector<128x32xf32>, vector<32x128xf32>, vector<128x128xf32> -> vector<128x128xf32>
    %525 = arith.addf %519, %524 : vector<128x128xf32>
    %c1_676 = arith.constant 1 : index
    %c0_677 = arith.constant 0 : index
    %c0_678 = arith.constant 0 : index
    %526 = vector.load %arg5[%c1_676, %c0_677, %c0_678] : memref<18x18x32xf32, #tpu.memory_space<vmem>>, vector<8x16x32xf32>
    %527 = vector.shape_cast %526 : vector<8x16x32xf32> to vector<128x32xf32>
    %c4_679 = arith.constant 4 : index
    %c3_680 = arith.constant 3 : index
    %c0_681 = arith.constant 0 : index
    %c0_682 = arith.constant 0 : index
    %528 = vector.load %arg2[%c4_679, %c3_680, %c0_681, %c0_682] : memref<5x9x32x128xf32, #tpu.memory_space<vmem>>, vector<1x1x32x128xf32>
    %529 = vector.shape_cast %528 : vector<1x1x32x128xf32> to vector<32x128xf32>
    %cst_683 = arith.constant dense<0.000000e+00> : vector<128x128xf32>
    %530 = tpu.matmul %527, %529, %cst_683 {dimension_numbers = #tpu.dot_dimension_numbers<[1], [0], [0], [1], [0, 0, 1, 1], [], []>} : vector<128x32xf32>, vector<32x128xf32>, vector<128x128xf32> -> vector<128x128xf32>
    %531 = arith.addf %525, %530 : vector<128x128xf32>
    %c1_684 = arith.constant 1 : index
    %c1_685 = arith.constant 1 : index
    %c0_686 = arith.constant 0 : index
    %532 = vector.load %arg5[%c1_684, %c1_685, %c0_686] : memref<18x18x32xf32, #tpu.memory_space<vmem>>, vector<8x16x32xf32>
    %533 = vector.shape_cast %532 : vector<8x16x32xf32> to vector<128x32xf32>
    %c4_687 = arith.constant 4 : index
    %c4_688 = arith.constant 4 : index
    %c0_689 = arith.constant 0 : index
    %c0_690 = arith.constant 0 : index
    %534 = vector.load %arg2[%c4_687, %c4_688, %c0_689, %c0_690] : memref<5x9x32x128xf32, #tpu.memory_space<vmem>>, vector<1x1x32x128xf32>
    %535 = vector.shape_cast %534 : vector<1x1x32x128xf32> to vector<32x128xf32>
    %cst_691 = arith.constant dense<0.000000e+00> : vector<128x128xf32>
    %536 = tpu.matmul %533, %535, %cst_691 {dimension_numbers = #tpu.dot_dimension_numbers<[1], [0], [0], [1], [0, 0, 1, 1], [], []>} : vector<128x32xf32>, vector<32x128xf32>, vector<128x128xf32> -> vector<128x128xf32>
    %537 = arith.addf %531, %536 : vector<128x128xf32>
    %c1_692 = arith.constant 1 : index
    %c2_693 = arith.constant 2 : index
    %c0_694 = arith.constant 0 : index
    %538 = vector.load %arg5[%c1_692, %c2_693, %c0_694] : memref<18x18x32xf32, #tpu.memory_space<vmem>>, vector<8x16x32xf32>
    %539 = vector.shape_cast %538 : vector<8x16x32xf32> to vector<128x32xf32>
    %c4_695 = arith.constant 4 : index
    %c5_696 = arith.constant 5 : index
    %c0_697 = arith.constant 0 : index
    %c0_698 = arith.constant 0 : index
    %540 = vector.load %arg2[%c4_695, %c5_696, %c0_697, %c0_698] : memref<5x9x32x128xf32, #tpu.memory_space<vmem>>, vector<1x1x32x128xf32>
    %541 = vector.shape_cast %540 : vector<1x1x32x128xf32> to vector<32x128xf32>
    %cst_699 = arith.constant dense<0.000000e+00> : vector<128x128xf32>
    %542 = tpu.matmul %539, %541, %cst_699 {dimension_numbers = #tpu.dot_dimension_numbers<[1], [0], [0], [1], [0, 0, 1, 1], [], []>} : vector<128x32xf32>, vector<32x128xf32>, vector<128x128xf32> -> vector<128x128xf32>
    %543 = arith.addf %537, %542 : vector<128x128xf32>
    %c2_700 = arith.constant 2 : index
    %c0_701 = arith.constant 0 : index
    %c0_702 = arith.constant 0 : index
    %544 = vector.load %arg5[%c2_700, %c0_701, %c0_702] : memref<18x18x32xf32, #tpu.memory_space<vmem>>, vector<8x16x32xf32>
    %545 = vector.shape_cast %544 : vector<8x16x32xf32> to vector<128x32xf32>
    %c4_703 = arith.constant 4 : index
    %c6_704 = arith.constant 6 : index
    %c0_705 = arith.constant 0 : index
    %c0_706 = arith.constant 0 : index
    %546 = vector.load %arg2[%c4_703, %c6_704, %c0_705, %c0_706] : memref<5x9x32x128xf32, #tpu.memory_space<vmem>>, vector<1x1x32x128xf32>
    %547 = vector.shape_cast %546 : vector<1x1x32x128xf32> to vector<32x128xf32>
    %cst_707 = arith.constant dense<0.000000e+00> : vector<128x128xf32>
    %548 = tpu.matmul %545, %547, %cst_707 {dimension_numbers = #tpu.dot_dimension_numbers<[1], [0], [0], [1], [0, 0, 1, 1], [], []>} : vector<128x32xf32>, vector<32x128xf32>, vector<128x128xf32> -> vector<128x128xf32>
    %549 = arith.addf %543, %548 : vector<128x128xf32>
    %c2_708 = arith.constant 2 : index
    %c1_709 = arith.constant 1 : index
    %c0_710 = arith.constant 0 : index
    %550 = vector.load %arg5[%c2_708, %c1_709, %c0_710] : memref<18x18x32xf32, #tpu.memory_space<vmem>>, vector<8x16x32xf32>
    %551 = vector.shape_cast %550 : vector<8x16x32xf32> to vector<128x32xf32>
    %c4_711 = arith.constant 4 : index
    %c7_712 = arith.constant 7 : index
    %c0_713 = arith.constant 0 : index
    %c0_714 = arith.constant 0 : index
    %552 = vector.load %arg2[%c4_711, %c7_712, %c0_713, %c0_714] : memref<5x9x32x128xf32, #tpu.memory_space<vmem>>, vector<1x1x32x128xf32>
    %553 = vector.shape_cast %552 : vector<1x1x32x128xf32> to vector<32x128xf32>
    %cst_715 = arith.constant dense<0.000000e+00> : vector<128x128xf32>
    %554 = tpu.matmul %551, %553, %cst_715 {dimension_numbers = #tpu.dot_dimension_numbers<[1], [0], [0], [1], [0, 0, 1, 1], [], []>} : vector<128x32xf32>, vector<32x128xf32>, vector<128x128xf32> -> vector<128x128xf32>
    %555 = arith.addf %549, %554 : vector<128x128xf32>
    %c2_716 = arith.constant 2 : index
    %c2_717 = arith.constant 2 : index
    %c0_718 = arith.constant 0 : index
    %556 = vector.load %arg5[%c2_716, %c2_717, %c0_718] : memref<18x18x32xf32, #tpu.memory_space<vmem>>, vector<8x16x32xf32>
    %557 = vector.shape_cast %556 : vector<8x16x32xf32> to vector<128x32xf32>
    %c4_719 = arith.constant 4 : index
    %c8_720 = arith.constant 8 : index
    %c0_721 = arith.constant 0 : index
    %c0_722 = arith.constant 0 : index
    %558 = vector.load %arg2[%c4_719, %c8_720, %c0_721, %c0_722] : memref<5x9x32x128xf32, #tpu.memory_space<vmem>>, vector<1x1x32x128xf32>
    %559 = vector.shape_cast %558 : vector<1x1x32x128xf32> to vector<32x128xf32>
    %cst_723 = arith.constant dense<0.000000e+00> : vector<128x128xf32>
    %560 = tpu.matmul %557, %559, %cst_723 {dimension_numbers = #tpu.dot_dimension_numbers<[1], [0], [0], [1], [0, 0, 1, 1], [], []>} : vector<128x32xf32>, vector<32x128xf32>, vector<128x128xf32> -> vector<128x128xf32>
    %561 = arith.addf %555, %560 : vector<128x128xf32>
    %c4_724 = arith.constant 4 : index
    %c0_725 = arith.constant 0 : index
    %c0_726 = arith.constant 0 : index
    %562 = vector.load %arg3[%c4_724, %c0_725, %c0_726] : memref<5x1x128xf32, #tpu.memory_space<vmem>>, vector<1x1x128xf32>
    %563 = vector.shape_cast %562 : vector<1x1x128xf32> to vector<1x128xf32>
    %564 = vector.broadcast %563 : vector<1x128xf32> to vector<128x128xf32>
    %565 = arith.addf %561, %564 : vector<128x128xf32>
    %566 = vector.shape_cast %565 : vector<128x128xf32> to vector<8x16x128xf32>
    %c0_727 = arith.constant 0 : index
    %c0_728 = arith.constant 0 : index
    %c0_729 = arith.constant 0 : index
    %c0_730 = arith.constant 0 : index
    %567 = vector.load %arg4[%c0_727, %c0_728, %c0_729, %c0_730] : memref<1x16x16x128xf32, #tpu.memory_space<vmem>>, vector<1x8x16x128xf32>
    %568 = vector.shape_cast %567 : vector<1x8x16x128xf32> to vector<8x16x128xf32>
    %569 = vector.shape_cast %566 : vector<8x16x128xf32> to vector<1x8x16x128xf32>
    tpu.vector_store %arg4[%c0_727, %c0_728, %c0_729, %c0_730], %569 {strides = array<i32>} : memref<1x16x16x128xf32, #tpu.memory_space<vmem>>, vector<1x8x16x128xf32>,
    %c8_731 = arith.constant 8 : index
    %c0_732 = arith.constant 0 : index
    %c0_733 = arith.constant 0 : index
    %570 = vector.load %arg5[%c8_731, %c0_732, %c0_733] : memref<18x18x32xf32, #tpu.memory_space<vmem>>, vector<8x16x32xf32>
    %571 = vector.shape_cast %570 : vector<8x16x32xf32> to vector<128x32xf32>
    %c4_734 = arith.constant 4 : index
    %c0_735 = arith.constant 0 : index
    %c0_736 = arith.constant 0 : index
    %c0_737 = arith.constant 0 : index
    %572 = vector.load %arg2[%c4_734, %c0_735, %c0_736, %c0_737] : memref<5x9x32x128xf32, #tpu.memory_space<vmem>>, vector<1x1x32x128xf32>
    %573 = vector.shape_cast %572 : vector<1x1x32x128xf32> to vector<32x128xf32>
    %cst_738 = arith.constant dense<0.000000e+00> : vector<128x128xf32>
    %574 = tpu.matmul %571, %573, %cst_738 {dimension_numbers = #tpu.dot_dimension_numbers<[1], [0], [0], [1], [0, 0, 1, 1], [], []>} : vector<128x32xf32>, vector<32x128xf32>, vector<128x128xf32> -> vector<128x128xf32>
    %c8_739 = arith.constant 8 : index
    %c1_740 = arith.constant 1 : index
    %c0_741 = arith.constant 0 : index
    %575 = vector.load %arg5[%c8_739, %c1_740, %c0_741] : memref<18x18x32xf32, #tpu.memory_space<vmem>>, vector<8x16x32xf32>
    %576 = vector.shape_cast %575 : vector<8x16x32xf32> to vector<128x32xf32>
    %c4_742 = arith.constant 4 : index
    %c1_743 = arith.constant 1 : index
    %c0_744 = arith.constant 0 : index
    %c0_745 = arith.constant 0 : index
    %577 = vector.load %arg2[%c4_742, %c1_743, %c0_744, %c0_745] : memref<5x9x32x128xf32, #tpu.memory_space<vmem>>, vector<1x1x32x128xf32>
    %578 = vector.shape_cast %577 : vector<1x1x32x128xf32> to vector<32x128xf32>
    %cst_746 = arith.constant dense<0.000000e+00> : vector<128x128xf32>
    %579 = tpu.matmul %576, %578, %cst_746 {dimension_numbers = #tpu.dot_dimension_numbers<[1], [0], [0], [1], [0, 0, 1, 1], [], []>} : vector<128x32xf32>, vector<32x128xf32>, vector<128x128xf32> -> vector<128x128xf32>
    %580 = arith.addf %574, %579 : vector<128x128xf32>
    %c8_747 = arith.constant 8 : index
    %c2_748 = arith.constant 2 : index
    %c0_749 = arith.constant 0 : index
    %581 = vector.load %arg5[%c8_747, %c2_748, %c0_749] : memref<18x18x32xf32, #tpu.memory_space<vmem>>, vector<8x16x32xf32>
    %582 = vector.shape_cast %581 : vector<8x16x32xf32> to vector<128x32xf32>
    %c4_750 = arith.constant 4 : index
    %c2_751 = arith.constant 2 : index
    %c0_752 = arith.constant 0 : index
    %c0_753 = arith.constant 0 : index
    %583 = vector.load %arg2[%c4_750, %c2_751, %c0_752, %c0_753] : memref<5x9x32x128xf32, #tpu.memory_space<vmem>>, vector<1x1x32x128xf32>
    %584 = vector.shape_cast %583 : vector<1x1x32x128xf32> to vector<32x128xf32>
    %cst_754 = arith.constant dense<0.000000e+00> : vector<128x128xf32>
    %585 = tpu.matmul %582, %584, %cst_754 {dimension_numbers = #tpu.dot_dimension_numbers<[1], [0], [0], [1], [0, 0, 1, 1], [], []>} : vector<128x32xf32>, vector<32x128xf32>, vector<128x128xf32> -> vector<128x128xf32>
    %586 = arith.addf %580, %585 : vector<128x128xf32>
    %c9_755 = arith.constant 9 : index
    %c0_756 = arith.constant 0 : index
    %c0_757 = arith.constant 0 : index
    %587 = vector.load %arg5[%c9_755, %c0_756, %c0_757] : memref<18x18x32xf32, #tpu.memory_space<vmem>>, vector<8x16x32xf32>
    %588 = vector.shape_cast %587 : vector<8x16x32xf32> to vector<128x32xf32>
    %c4_758 = arith.constant 4 : index
    %c3_759 = arith.constant 3 : index
    %c0_760 = arith.constant 0 : index
    %c0_761 = arith.constant 0 : index
    %589 = vector.load %arg2[%c4_758, %c3_759, %c0_760, %c0_761] : memref<5x9x32x128xf32, #tpu.memory_space<vmem>>, vector<1x1x32x128xf32>
    %590 = vector.shape_cast %589 : vector<1x1x32x128xf32> to vector<32x128xf32>
    %cst_762 = arith.constant dense<0.000000e+00> : vector<128x128xf32>
    %591 = tpu.matmul %588, %590, %cst_762 {dimension_numbers = #tpu.dot_dimension_numbers<[1], [0], [0], [1], [0, 0, 1, 1], [], []>} : vector<128x32xf32>, vector<32x128xf32>, vector<128x128xf32> -> vector<128x128xf32>
    %592 = arith.addf %586, %591 : vector<128x128xf32>
    %c9_763 = arith.constant 9 : index
    %c1_764 = arith.constant 1 : index
    %c0_765 = arith.constant 0 : index
    %593 = vector.load %arg5[%c9_763, %c1_764, %c0_765] : memref<18x18x32xf32, #tpu.memory_space<vmem>>, vector<8x16x32xf32>
    %594 = vector.shape_cast %593 : vector<8x16x32xf32> to vector<128x32xf32>
    %c4_766 = arith.constant 4 : index
    %c4_767 = arith.constant 4 : index
    %c0_768 = arith.constant 0 : index
    %c0_769 = arith.constant 0 : index
    %595 = vector.load %arg2[%c4_766, %c4_767, %c0_768, %c0_769] : memref<5x9x32x128xf32, #tpu.memory_space<vmem>>, vector<1x1x32x128xf32>
    %596 = vector.shape_cast %595 : vector<1x1x32x128xf32> to vector<32x128xf32>
    %cst_770 = arith.constant dense<0.000000e+00> : vector<128x128xf32>
    %597 = tpu.matmul %594, %596, %cst_770 {dimension_numbers = #tpu.dot_dimension_numbers<[1], [0], [0], [1], [0, 0, 1, 1], [], []>} : vector<128x32xf32>, vector<32x128xf32>, vector<128x128xf32> -> vector<128x128xf32>
    %598 = arith.addf %592, %597 : vector<128x128xf32>
    %c9_771 = arith.constant 9 : index
    %c2_772 = arith.constant 2 : index
    %c0_773 = arith.constant 0 : index
    %599 = vector.load %arg5[%c9_771, %c2_772, %c0_773] : memref<18x18x32xf32, #tpu.memory_space<vmem>>, vector<8x16x32xf32>
    %600 = vector.shape_cast %599 : vector<8x16x32xf32> to vector<128x32xf32>
    %c4_774 = arith.constant 4 : index
    %c5_775 = arith.constant 5 : index
    %c0_776 = arith.constant 0 : index
    %c0_777 = arith.constant 0 : index
    %601 = vector.load %arg2[%c4_774, %c5_775, %c0_776, %c0_777] : memref<5x9x32x128xf32, #tpu.memory_space<vmem>>, vector<1x1x32x128xf32>
    %602 = vector.shape_cast %601 : vector<1x1x32x128xf32> to vector<32x128xf32>
    %cst_778 = arith.constant dense<0.000000e+00> : vector<128x128xf32>
    %603 = tpu.matmul %600, %602, %cst_778 {dimension_numbers = #tpu.dot_dimension_numbers<[1], [0], [0], [1], [0, 0, 1, 1], [], []>} : vector<128x32xf32>, vector<32x128xf32>, vector<128x128xf32> -> vector<128x128xf32>
    %604 = arith.addf %598, %603 : vector<128x128xf32>
    %c10_779 = arith.constant 10 : index
    %c0_780 = arith.constant 0 : index
    %c0_781 = arith.constant 0 : index
    %605 = vector.load %arg5[%c10_779, %c0_780, %c0_781] : memref<18x18x32xf32, #tpu.memory_space<vmem>>, vector<8x16x32xf32>
    %606 = vector.shape_cast %605 : vector<8x16x32xf32> to vector<128x32xf32>
    %c4_782 = arith.constant 4 : index
    %c6_783 = arith.constant 6 : index
    %c0_784 = arith.constant 0 : index
    %c0_785 = arith.constant 0 : index
    %607 = vector.load %arg2[%c4_782, %c6_783, %c0_784, %c0_785] : memref<5x9x32x128xf32, #tpu.memory_space<vmem>>, vector<1x1x32x128xf32>
    %608 = vector.shape_cast %607 : vector<1x1x32x128xf32> to vector<32x128xf32>
    %cst_786 = arith.constant dense<0.000000e+00> : vector<128x128xf32>
    %609 = tpu.matmul %606, %608, %cst_786 {dimension_numbers = #tpu.dot_dimension_numbers<[1], [0], [0], [1], [0, 0, 1, 1], [], []>} : vector<128x32xf32>, vector<32x128xf32>, vector<128x128xf32> -> vector<128x128xf32>
    %610 = arith.addf %604, %609 : vector<128x128xf32>
    %c10_787 = arith.constant 10 : index
    %c1_788 = arith.constant 1 : index
    %c0_789 = arith.constant 0 : index
    %611 = vector.load %arg5[%c10_787, %c1_788, %c0_789] : memref<18x18x32xf32, #tpu.memory_space<vmem>>, vector<8x16x32xf32>
    %612 = vector.shape_cast %611 : vector<8x16x32xf32> to vector<128x32xf32>
    %c4_790 = arith.constant 4 : index
    %c7_791 = arith.constant 7 : index
    %c0_792 = arith.constant 0 : index
    %c0_793 = arith.constant 0 : index
    %613 = vector.load %arg2[%c4_790, %c7_791, %c0_792, %c0_793] : memref<5x9x32x128xf32, #tpu.memory_space<vmem>>, vector<1x1x32x128xf32>
    %614 = vector.shape_cast %613 : vector<1x1x32x128xf32> to vector<32x128xf32>
    %cst_794 = arith.constant dense<0.000000e+00> : vector<128x128xf32>
    %615 = tpu.matmul %612, %614, %cst_794 {dimension_numbers = #tpu.dot_dimension_numbers<[1], [0], [0], [1], [0, 0, 1, 1], [], []>} : vector<128x32xf32>, vector<32x128xf32>, vector<128x128xf32> -> vector<128x128xf32>
    %616 = arith.addf %610, %615 : vector<128x128xf32>
    %c10_795 = arith.constant 10 : index
    %c2_796 = arith.constant 2 : index
    %c0_797 = arith.constant 0 : index
    %617 = vector.load %arg5[%c10_795, %c2_796, %c0_797] : memref<18x18x32xf32, #tpu.memory_space<vmem>>, vector<8x16x32xf32>
    %618 = vector.shape_cast %617 : vector<8x16x32xf32> to vector<128x32xf32>
    %c4_798 = arith.constant 4 : index
    %c8_799 = arith.constant 8 : index
    %c0_800 = arith.constant 0 : index
    %c0_801 = arith.constant 0 : index
    %619 = vector.load %arg2[%c4_798, %c8_799, %c0_800, %c0_801] : memref<5x9x32x128xf32, #tpu.memory_space<vmem>>, vector<1x1x32x128xf32>
    %620 = vector.shape_cast %619 : vector<1x1x32x128xf32> to vector<32x128xf32>
    %cst_802 = arith.constant dense<0.000000e+00> : vector<128x128xf32>
    %621 = tpu.matmul %618, %620, %cst_802 {dimension_numbers = #tpu.dot_dimension_numbers<[1], [0], [0], [1], [0, 0, 1, 1], [], []>} : vector<128x32xf32>, vector<32x128xf32>, vector<128x128xf32> -> vector<128x128xf32>
    %622 = arith.addf %616, %621 : vector<128x128xf32>
    %c4_803 = arith.constant 4 : index
    %c0_804 = arith.constant 0 : index
    %c0_805 = arith.constant 0 : index
    %623 = vector.load %arg3[%c4_803, %c0_804, %c0_805] : memref<5x1x128xf32, #tpu.memory_space<vmem>>, vector<1x1x128xf32>
    %624 = vector.shape_cast %623 : vector<1x1x128xf32> to vector<1x128xf32>
    %625 = vector.broadcast %624 : vector<1x128xf32> to vector<128x128xf32>
    %626 = arith.addf %622, %625 : vector<128x128xf32>
    %627 = vector.shape_cast %626 : vector<128x128xf32> to vector<8x16x128xf32>
    %c0_806 = arith.constant 0 : index
    %c8_807 = arith.constant 8 : index
    %c0_808 = arith.constant 0 : index
    %c0_809 = arith.constant 0 : index
    %628 = vector.load %arg4[%c0_806, %c8_807, %c0_808, %c0_809] : memref<1x16x16x128xf32, #tpu.memory_space<vmem>>, vector<1x8x16x128xf32>
    %629 = vector.shape_cast %628 : vector<1x8x16x128xf32> to vector<8x16x128xf32>
    %630 = vector.shape_cast %627 : vector<8x16x128xf32> to vector<1x8x16x128xf32>
    tpu.vector_store %arg4[%c0_806, %c8_807, %c0_808, %c0_809], %630 {strides = array<i32>} : memref<1x16x16x128xf32, #tpu.memory_space<vmem>>, vector<1x8x16x128xf32>,
    return
  }
  func.func @transform_0(%arg0: i32) -> (i32, i32, i32, i32) {
    %c0_i32 = arith.constant 0 : i32
    %c0_i32_0 = arith.constant 0 : i32
    %c0_i32_1 = arith.constant 0 : i32
    %c0_i32_2 = arith.constant 0 : i32
    return %arg0, %c0_i32, %c0_i32_0, %c0_i32_1 : i32, i32, i32, i32
  }
  func.func @transform_1(%arg0: i32) -> (i32, i32, i32, i32) {
    %c0_i32 = arith.constant 0 : i32
    %c0_i32_0 = arith.constant 0 : i32
    %c0_i32_1 = arith.constant 0 : i32
    %c0_i32_2 = arith.constant 0 : i32
    %c0_i32_3 = arith.constant 0 : i32
    return %c0_i32, %c0_i32_0, %c0_i32_1, %c0_i32_2 : i32, i32, i32, i32
  }
  func.func @transform_2(%arg0: i32) -> (i32, i32, i32) {
    %c0_i32 = arith.constant 0 : i32
    %c0_i32_0 = arith.constant 0 : i32
    %c0_i32_1 = arith.constant 0 : i32
    %c0_i32_2 = arith.constant 0 : i32
    return %c0_i32, %c0_i32_0, %c0_i32_1 : i32, i32, i32
  }
  func.func @transform_3(%arg0: i32) -> (i32, i32, i32, i32) {
    %c0_i32 = arith.constant 0 : i32
    %c0_i32_0 = arith.constant 0 : i32
    %c0_i32_1 = arith.constant 0 : i32
    %c0_i32_2 = arith.constant 0 : i32
    return %arg0, %c0_i32, %c0_i32_0, %c0_i32_1 : i32, i32, i32, i32
  }
}

</mosaic_0001>

<bundles_post_ra>
// kernel: tpu_custom_call.1
= control target key start
LH: loop header
LB: loop body
LE: loop exit
PB: predicated region body
PF: predicated region fallthrough
CT: control target
= control target key end

     0   :  { %8 = vsyncpa [#allocation5], 0  ;;  %s34521_s0 = inlined_call_operand.hbm [shape: f32[2,16,16,32], index: 0, kind: input, shape index: {}]   ;;  %s34522_s1 = inlined_call_operand.hbm [shape: f32[5,9,32,128], index: 1, kind: input, shape index: {}]   ;;  %s34523_s2 = inlined_call_operand.vmem [shape: f32[5,1,128], index: 2, kind: input, shape index: {}]   ;;  %s34524_s3 = inlined_call_operand.hbm [shape: f32[2,16,16,128], index: 3, kind: output, shape index: {}]  }
   0x1   :  { %10 = vsyncpa [#allocation5 + $0x1], 0 }
   0x2   :  { %11 = vsyncpa [#allocation8], 0 }
   0x3   :  { %12 = vsyncpa [#allocation6], 0 }
   0x4   :  { %14 = vsyncpa [#allocation6 + $0x1], 0  ;;  %s29705_s12 = smov 0   ;;  %s29707_s13 = smov 0  }
   0x5   :  { %s29709_s14 = smov 0   ;;  %s29711_s15 = smov 0  }
   0x6 LB: > { %s29726_s16 = sadd.s32 4294967295, %s29675_s15   ;;  %s21313_s17 = sadd.s32 4294967294, %s29675_s15   ;;  %s29675_s15 = sphi %s29711_s15, %s35093_s15   ;;  %s29671_s14 = sphi %s29709_s14, %s35092_s14   ;;  %s29667_s13 = sphi %s29707_s13, %s35091_s13   ;;  %s29663_s12 = sphi %s29705_s12, %s35090_s12  }
   0x7   : > { %p40_p0 = scmp.ne.s32.totalorder %s29667_s13, %s29663_s12  ;;  %p34525_p1 = scmp.eq.s32.totalorder %s29726_s16, 0 }
   0x8   : > { %p112_p3 = scmp.eq.s32.totalorder %s21313_s17, 1  ;;  %p21314_p5 = scmp.ge.s32.totalorder %s29675_s15, 1 }
   0x9   : > { %p29735_p4 = por %p34525_p1, %p40_p0  ;;  %p119_p7 = scmp.lt.s32.totalorder %s29675_s15, 3 }
   0xa   : > { %p29740_p6 = por %p112_p3, %p40_p0  ;;  %s29677_s21 = smov [#allocation7]  }
   0xb   : > { %s34757_s18 = scalar_select %p29735_p4, 1, 0 }
   0xc   : > { %s34758_s19 = scalar_select %p29740_p6, 1, 0 }
   0xd   : > { %p29745_p8 = pnand %p21314_p5, %p119_p7  ;;  %s131_s22 = sshll.u32 %s29677_s21, 4  ;;  %s29749_s22 = int_to_ptr.vmem [resolvable:$true] %s131_s22 }
   0xe   : > { %s29761_s24 = sadd.s32 1, %s29675_s15   ;;  %s27_s25 = sadd.s32 1, %s29671_s14 }
   0xf   : > { %s34759_s20 = scalar_select %p29745_p8, 1, 0 }
  0x10   : > { %p29493_p9 = pneg %p29745_p8  ;;  %s24_s26 = ssub.s32 %s29675_s15, %s29761_s24 }
  0x11   : > { %s29547_s29 = scalar_lea.hbm %s34522_s1, 23040 }
  0x12   : > { %p29756_p11 = pnand %p29493_p9, %p34525_p1  ;;  %p29548_p12 = scmp.ne.s32.totalorder %s34522_s1, %s29547_s29 }
  0x13   : > { %p29554_p5 = scmp.lt.u32.totalorder %s29547_s29, %s34522_s1 }
  0x14   : > { %p29549_p13 = pneg %p29756_p11 }
  0x16   : > { %p29550_p0 = pnand %p29549_p13, %p29548_p12 }
  0x18   : > { %p29551_p3 = pneg %p29550_p0 }
  0x1a   : > { %p29556_p7 = pnand %p29554_p5, %p29551_p3 }
  0x1c   : > { %29559 = shalt.err (!%p29556_p7)
}
  0x1d   : > { %s29560_s7 = scalar_lea.vmem %s29749_s22, 23040  ;;  %p29568_p2 = scmp.lt.s32.totalorder %s29749_s22, %s29749_s22 }
  0x1e   : > { %p29561_p9 = scmp.ne.s32.totalorder %s29749_s22, %s29560_s7  ;;  %p29569_p6 = scmp.lt.s32.totalorder %s29560_s7, %s29560_s7 }
  0x20   : > { %p29563_p10 = pnand %p29561_p9, %p29549_p13  ;;  %p29570_p4 = por %p29569_p6, %p29568_p2 }
  0x22   : > { %p29564_p1 = pneg %p29563_p10 }
  0x24   : > { %p29571_p8 = pnand %p29570_p4, %p29564_p1 }
  0x26   : > { %29574 = shalt.err (!%p29571_p8)
}
  0x27   : > { %s29678_s8 = smov 128   ;;  %s29679_s9 = smov 8  }
  0x28   : > { %29496 = dma.hbm_to_vmem [thread:$0]  (!%p29756_p11), %s34522_s1, 23040, %s29749_s22, [#allocation8], %s29678_s8, %s29678_s8, %s29679_s9  }
  0x29   : > { %p25_p1 = scmp.eq.s32.totalorder %s24_s26, 0  ;;  %p34_p2 = scmp.ne.s32.totalorder %s29671_s14, %s29667_s13 }
  0x2a   : > { %p35_p4 = scmp.eq.s32.totalorder %s29675_s15, 0  ;;  %p29506_p6 = scmp.lt.s32.totalorder %s29675_s15, 2 }
  0x2b   : > { %s29795_s17 = scalar_select %p25_p1, %s29671_s14, %s27_s25  }
  0x2c   : > { %p36_p8 = por %p35_p4, %p34_p2  ;;  %p34761_p10 = scmp.eq.s32.totalorder %s29726_s16, 1 }
  0x2d   : > { %s148_s23 = sand.u32 1, %s29671_s14   ;;  %s22803_s27 = sshll.u32 %s29675_s15, 12 }
  0x2e   : > { %p29799_p12 = por %p34761_p10, %p34_p2  ;;  %s21317_s28 = sshll.u32 %s148_s23, 8 }
  0x2f   : > { %s29808_s4 = scalar_lea.hbm %s34521_s0, %s22803_s27  ;;  %s152_s22 = scalar_lea.vmem [#allocation4], %s21317_s28 }
  0x30   : > { %s159_s25 = sshll.u32 %s152_s22, 4  ;;  %p29810_p11 = pnand %p29506_p6, %p36_p8  ;;  %s29814_s25 = int_to_ptr.vmem [resolvable:$true] %s159_s25 }
  0x31   : > { %s29816_s5 = scalar_lea.sflag [#allocation5], %s148_s23  ;;  %s29575_s6 = scalar_lea.hbm %s29808_s4, 4096 }
  0x32   : > { %p29576_p13 = scmp.ne.s32.totalorder %s29808_s4, %s29575_s6  ;;  %p29577_p0 = pneg %p29810_p11 }
  0x33   : > { %s29580_s11 = scalar_lea.hbm %s34521_s0, 8192  ;;  %p29581_p7 = scmp.lt.u32.totalorder %s29808_s4, %s34521_s0 }
  0x34   : > { %p29578_p3 = pnand %p29577_p0, %p29576_p13  ;;  %p29582_p9 = scmp.lt.u32.totalorder %s29580_s11, %s29575_s6 }
  0x35   : > { %p29584_p2 = scmp.lt.u32.totalorder %s29575_s6, %s29808_s4 }
  0x36   : > { %p29579_p5 = pneg %p29578_p3  ;;  %p29583_p1 = por %p29582_p9, %p29581_p7 }
  0x38   : > { %p29585_p4 = por %p29584_p2, %p29583_p1 }
  0x3a   : > { %p29586_p6 = pnand %p29585_p4, %p29579_p5 }
  0x3c   : > { %29589 = shalt.err (!%p29586_p6)
}
  0x3d   : > { %s29590_s23 = scalar_lea.vmem %s29814_s25, 4096  ;;  %s29680_s29 = smov [#allocation4]  }
  0x3e   : > { %p29591_p8 = scmp.ne.s32.totalorder %s29814_s25, %s29590_s23  ;;  %s29595_s30 = sshll.u32 %s29680_s29, 4  ;;  %s29596_s30 = int_to_ptr.vmem [resolvable:$false] %s29595_s30 }
  0x3f   : > { %s29597_s22 = scalar_lea.vmem %s29596_s30, 8192  ;;  %p29598_p3 = scmp.lt.s32.totalorder %s29814_s25, %s29596_s30 }
  0x40   : > { %p29593_p10 = pnand %p29591_p8, %p29577_p0  ;;  %p29599_p7 = scmp.lt.s32.totalorder %s29597_s22, %s29590_s23 }
  0x42   : > { %p29594_p13 = pneg %p29593_p10  ;;  %p29600_p9 = por %p29599_p7, %p29598_p3 }
  0x44   : > { %p29601_p1 = pnand %p29600_p9, %p29594_p13 }
  0x46   : > { %29604 = shalt.err (!%p29601_p1)
}
  0x47   : > { %29500 = dma.hbm_to_vmem [thread:$0]  (!%p29810_p11), %s29808_s4, 4096, %s29814_s25, %s29816_s5, %s29678_s8, %s29678_s8, %s29679_s9  }
  0x48   : > { %p34764_p0 = scmp.ne.s32.totalorder %s34759_s20, 0 }
  0x4a   : > { %171 = sbr.rel (%p34764_p0) target bundleno = 2592 (0xa20), region = 32 }
  0x51   : > { %s29850_s6 = sand.u32 1, %s29667_s13   ;;  %p34765_p5 = scmp.ne.s32.totalorder %s34757_s18, 0 }
  0x52   : > { %s21321_s7 = sshll.u32 %s29850_s6, 8  ;;  %s174_s10 = scalar_lea.sflag [#allocation5], %s29850_s6 }
  0x53   : > { %s29856_s26 = scalar_lea.vmem [#allocation4], %s21321_s7 }
  0x54   : > { %29650 = dma.done.wait (%p34765_p5), %s174_s10, 4096  }
  0x55   : > { %29652 = vsyncadd (%p34765_p5), %s174_s10, 4294963200  ;;  %p34766_p11 = scmp.eq.s32.totalorder %s29726_s16, 0 }
  0x57   : > { %29654 = dma.done.wait (%p34766_p11), [#allocation8], 23040   ;;  %p34767_p2 = pmov %p34766_p11 }
  0x58   : > { %vm204_vm0 = vcmask 261120   ;;  %vm207_vm1 = vcmask 254976   ;;  %vm214_vm2 = vcmask 253952   ;;  %v29681_v0 = vmov 0.0   ;;  %v388_v1 = vld [vmem:[#allocation7 + $0x20] sm:$0xff]  ;;  %v389_v2 = vld [vmem:[#allocation7 + $0x28] sm:$0xff] }
  0x59   : > { %29656 = vsyncadd (%p34767_p2), [#allocation8], 4294944256  ;;  %205 = vst.msk [vmem:[#allocation2] sm:$0xff] %vm204_vm0, %v29681_v0  ;;  %v390_v3 = vld [vmem:[#allocation7 + $0x30] sm:$0xff]  ;;  %v27485_v4 = vpack.c.bf16 %v389_v2, %v388_v1  ;;  %v391_v5 = vld [vmem:[#allocation7 + $0x38] sm:$0xff]  ;;  %s34406_s23 = scalar_lea.vmem [#allocation9], %s21321_s7 }
  0x5a   : > { %206 = vst.msk [vmem:[#allocation2 + $0x8] sm:$0xff] %vm204_vm0, %v29681_v0  ;;  %210 = vst.msk [vmem:[#allocation2 + $0x198] sm:$0xff] %vm204_vm0, %v29681_v0  ;;  %v301_v7 = vld [vmem:[%s29856_s26 + $0x70] sm:$0xff]  ;;  %v27489_v8 = vpack.c.bf16 %v391_v5, %v390_v3  ;;  %v367_v9 = vld [vmem:[#allocation7] sm:$0xff]  ;;  %s22804_s29 = sshll.u32 %s29726_s16, 12  ;;  %s21230_s30 = sshll.u32 %s34406_s23, 4  ;;  %s34474_s30 = int_to_ptr.vmem [resolvable:$true] %s21230_s30 }
  0x5b   : > { %211 = vst.msk [vmem:[#allocation2 + $0x1a0] sm:$0xff] %vm204_vm0, %v29681_v0  ;;  %247 = vst.msk [vmem:[#allocation3] sm:$0xff] %vm204_vm0, %v29681_v0  ;;  %v368_v10 = vld [vmem:[#allocation7 + $0x8] sm:$0xff]  ;;  %27486 = vmatprep.subr.bf16.mxu0 %v27485_v4  ;;  %27558 = vmatprep.subr.bf16.mxu1 %v27485_v4  ;;  %v302_v11 = vld [vmem:[%s29856_s26 + $0x78] sm:$0xff]  ;;  %s34472_s10 = scalar_lea.hbm %s34524_s3, %s22804_s29  ;;  %s21217_s16 = scalar_lea.sflag [#allocation6], %s29850_s6 }
  0x5c   : > { %248 = vst.msk [vmem:[#allocation3 + $0x8] sm:$0xff] %vm204_vm0, %v29681_v0  ;;  %251 = vst.msk [vmem:[#allocation3 + $0x198] sm:$0xff] %vm204_vm0, %v29681_v0  ;;  %v287_v12 = vld [vmem:[%s29856_s26] sm:$0xff]  ;;  %27488 = vmatpush3.bf16.msra.mxu0 %v27485_v4  ;;  %27560 = vmatpush3.bf16.msra.mxu1 %v27485_v4  ;;  %v288_v14 = vld [vmem:[%s29856_s26 + $0x8] sm:$0xff]  ;;  %v27493_v17 = vpack.c.bf16 %v368_v10, %v367_v9  ;;  %s29682_s18 = smov [#allocation9]  }
  0x5d   : > { %252 = vst.msk [vmem:[#allocation3 + $0x1a0] sm:$0xff] %vm204_vm0, %v29681_v0  ;;  %333 = vst.msk [vmem:[#allocation2 + $0xc1] sm:$0xff] %vm204_vm0, %v301_v7  ;;  %v303_v13 = vld [vmem:[%s29856_s26 + $0x80] sm:$0xff]  ;;  %v304_v15 = vld [vmem:[%s29856_s26 + $0x88] sm:$0xff]  ;;  %27490 = vmatprep.subr.bf16.mxu0 %v27489_v8  ;;  %27562 = vmatprep.subr.bf16.mxu1 %v27489_v8  ;;  %s29609_s20 = sshll.u32 %s29682_s18, 4  ;;  %s29610_s20 = int_to_ptr.vmem [resolvable:$false] %s29609_s20 }
  0x5e   : > { %208 = vst.msk [vmem:[#allocation2 + $0x10] sm:$0x3] %vm207_vm1, %v29681_v0  ;;  %212 = vst.msk [vmem:[#allocation2 + $0x1a8] sm:$0x3] %vm207_vm1, %v29681_v0  ;;  %v289_v16 = vld [vmem:[%s29856_s26 + $0x10] sm:$0xff]  ;;  %v290_v19 = vld [vmem:[%s29856_s26 + $0x18] sm:$0xff]  ;;  %p29612_p10 = scmp.lt.s32.totalorder %s34474_s30, %s29610_s20 }
  0x5f   : > { %249 = vst.msk [vmem:[#allocation3 + $0x10] sm:$0x3] %vm207_vm1, %v29681_v0  ;;  %253 = vst.msk [vmem:[#allocation3 + $0x1a8] sm:$0x3] %vm207_vm1, %v29681_v0  ;;  %v305_v18 = vld [vmem:[%s29856_s26 + $0x90] sm:$0xff]  ;;  %v306_v20 = vld [vmem:[%s29856_s26 + $0x98] sm:$0xff] }
  0x60   : > { %222 = vst.msk [vmem:[#allocation2 + $0xc0] sm:$0x1] %vm214_vm2, %v29681_v0  ;;  %215 = vst.msk [vmem:[#allocation2 + $0x18] sm:$0x1] %vm214_vm2, %v29681_v0  ;;  %v291_v22 = vld [vmem:[%s29856_s26 + $0x20] sm:$0xff]  ;;  %v292_v24 = vld [vmem:[%s29856_s26 + $0x28] sm:$0xff]  ;;  %27492 = vmatpush3.bf16.msra.mxu0 %v27489_v8  ;;  %27564 = vmatpush3.bf16.msra.mxu1 %v27489_v8 }
  0x61   : > { %216 = vst.msk [vmem:[#allocation2 + $0x30] sm:$0x1] %vm214_vm2, %v29681_v0  ;;  %217 = vst.msk [vmem:[#allocation2 + $0x48] sm:$0x1] %vm214_vm2, %v29681_v0  ;;  %v371_v6 = vld [vmem:[#allocation2 + $0x1] sm:$0xff]  ;;  %v293_v26 = vld [vmem:[%s29856_s26 + $0x30] sm:$0xff]  ;;  %27494 = vmatprep.subr.bf16.mxu0 %v27493_v17  ;;  %27566 = vmatprep.subr.bf16.mxu1 %v27493_v17 }
  0x62   : > { %218 = vst.msk [vmem:[#allocation2 + $0x60] sm:$0x1] %vm214_vm2, %v29681_v0  ;;  %219 = vst.msk [vmem:[#allocation2 + $0x78] sm:$0x1] %vm214_vm2, %v29681_v0  ;;  %24613 = vmatprep.mubr.msk.f32.mxu0 %vm204_vm0, %v371_v6  ;;  %v307_v23 = vld [vmem:[%s29856_s26 + $0xa0] sm:$0xff]  ;;  %v308_v25 = vld [vmem:[%s29856_s26 + $0xa8] sm:$0xff] }
  0x63   : > { %220 = vst.msk [vmem:[#allocation2 + $0x90] sm:$0x1] %vm214_vm2, %v29681_v0  ;;  %221 = vst.msk [vmem:[#allocation2 + $0xa8] sm:$0x1] %vm214_vm2, %v29681_v0  ;;  %v309_v27 = vld [vmem:[%s29856_s26 + $0xb0] sm:$0xff]  ;;  %v294_v28 = vld [vmem:[%s29856_s26 + $0x38] sm:$0xff] }
  0x64   : > { %223 = vst.msk [vmem:[#allocation2 + $0xd8] sm:$0x1] %vm214_vm2, %v29681_v0  ;;  %224 = vst.msk [vmem:[#allocation2 + $0xf0] sm:$0x1] %vm214_vm2, %v29681_v0  ;;  %v369_v29 = vld [vmem:[#allocation7 + $0x10] sm:$0xff]  ;;  %v370_v30 = vld [vmem:[#allocation7 + $0x18] sm:$0xff] }
  0x65   : > { %225 = vst.msk [vmem:[#allocation2 + $0x108] sm:$0x1] %vm214_vm2, %v29681_v0  ;;  %226 = vst.msk [vmem:[#allocation2 + $0x120] sm:$0x1] %vm214_vm2, %v29681_v0  ;;  %v372_v21 = vld [vmem:[#allocation2 + $0x9] sm:$0xff]  ;;  %v2465_v31 = vld [vmem:[#allocation2 + $0xc1] sm:$0xff]  ;;  %v27497_v34 = vpack.c.bf16 %v370_v30, %v369_v29 }
  0x66   : > { %227 = vst.msk [vmem:[#allocation2 + $0x138] sm:$0x1] %vm214_vm2, %v29681_v0  ;;  %228 = vst.msk [vmem:[#allocation2 + $0x150] sm:$0x1] %vm214_vm2, %v29681_v0  ;;  %v310_v32 = vld [vmem:[%s29856_s26 + $0xb8] sm:$0xff]  ;;  %v295_v33 = vld [vmem:[%s29856_s26 + $0x40] sm:$0xff]  ;;  %24901 = vmatprep.mubr.msk.f32.mxu1 %vm204_vm0, %v2465_v31  ;;  %24614 = vmatmul.mubr.msk.f32.vlgmr.msra.gmra.mrb[0].mxu0 %vm204_vm0, %v372_v21 }
  0x67   : > { %229 = vst.msk [vmem:[#allocation2 + $0x168] sm:$0x1] %vm214_vm2, %v29681_v0  ;;  %230 = vst.msk [vmem:[#allocation2 + $0x180] sm:$0x1] %vm214_vm2, %v29681_v0  ;;  %v311_v35 = vld [vmem:[%s29856_s26 + $0xc0] sm:$0xff]  ;;  %v296_v36 = vld [vmem:[%s29856_s26 + $0x48] sm:$0xff]  ;;  %27496 = vmatpush3.bf16.msra.mxu0 %v27493_v17 }
  0x68   : > { %231 = vst.msk [vmem:[#allocation2 + $0x29] sm:$0x1] %vm214_vm2, %v29681_v0  ;;  %232 = vst.msk [vmem:[#allocation2 + $0x41] sm:$0x1] %vm214_vm2, %v29681_v0  ;;  %v312_v37 = vld [vmem:[%s29856_s26 + $0xc8] sm:$0xff]  ;;  %27498 = vmatprep.subr.bf16.mxu0 %v27497_v34  ;;  %v297_v46 = vld [vmem:[%s29856_s26 + $0x50] sm:$0xff] }
  0x69   : > { %233 = vst.msk [vmem:[#allocation2 + $0x59] sm:$0x1] %vm214_vm2, %v29681_v0  ;;  %234 = vst.msk [vmem:[#allocation2 + $0x71] sm:$0x1] %vm214_vm2, %v29681_v0  ;;  %v313_v47 = vld [vmem:[%s29856_s26 + $0xd0] sm:$0xff]  ;;  %v298_v50 = vld [vmem:[%s29856_s26 + $0x58] sm:$0xff] }
  0x6a   : > { %235 = vst.msk [vmem:[#allocation2 + $0x89] sm:$0x1] %vm214_vm2, %v29681_v0  ;;  %236 = vst.msk [vmem:[#allocation2 + $0xa1] sm:$0x1] %vm214_vm2, %v29681_v0  ;;  %v314_v52 = vld [vmem:[%s29856_s26 + $0xd8] sm:$0xff]  ;;  %v299_v53 = vld [vmem:[%s29856_s26 + $0x60] sm:$0xff] }
  0x6b   : > { %237 = vst.msk [vmem:[#allocation2 + $0xb9] sm:$0x1] %vm214_vm2, %v29681_v0  ;;  %238 = vst.msk [vmem:[#allocation2 + $0xd1] sm:$0x1] %vm214_vm2, %v29681_v0  ;;  %27500 = vmatpush3.bf16.msra.mxu0 %v27497_v34  ;;  %v315_v54 = vld [vmem:[%s29856_s26 + $0xe0] sm:$0xff]  ;;  %v300_v56 = vld [vmem:[%s29856_s26 + $0x68] sm:$0xff] }
  0x6c   : > { %239 = vst.msk [vmem:[#allocation2 + $0xe9] sm:$0x1] %vm214_vm2, %v29681_v0  ;;  %240 = vst.msk [vmem:[#allocation2 + $0x101] sm:$0x1] %vm214_vm2, %v29681_v0  ;;  %v316_v57 = vld [vmem:[%s29856_s26 + $0xe8] sm:$0xff]  ;;  %v795_v60 = vld [vmem:[#allocation7 + $0x40] sm:$0xff] }
  0x6d   : > { %241 = vst.msk [vmem:[#allocation2 + $0x119] sm:$0x1] %vm214_vm2, %v29681_v0  ;;  %242 = vst.msk [vmem:[#allocation2 + $0x131] sm:$0x1] %vm214_vm2, %v29681_v0  ;;  %v796_v62 = vld [vmem:[#allocation7 + $0x48] sm:$0xff]  ;;  %v317_v31 = vld [vmem:[%s29856_s26 + $0xf0] sm:$0xff] }
  0x6e   : > { %243 = vst.msk [vmem:[#allocation2 + $0x149] sm:$0x1] %vm214_vm2, %v29681_v0  ;;  %244 = vst.msk [vmem:[#allocation2 + $0x161] sm:$0x1] %vm214_vm2, %v29681_v0  ;;  %v27501_v63 = vpack.c.bf16 %v796_v62, %v795_v60  ;;  %s29611_s8 = scalar_lea.vmem %s29610_s20, 8192 }
  0x6f   : > { %245 = vst.msk [vmem:[#allocation2 + $0x179] sm:$0x1] %vm214_vm2, %v29681_v0  ;;  %246 = vst.msk [vmem:[#allocation2 + $0x191] sm:$0x1] %vm214_vm2, %v29681_v0 }
  0x70   : > { %255 = vst.msk [vmem:[#allocation3 + $0x18] sm:$0x1] %vm214_vm2, %v29681_v0  ;;  %256 = vst.msk [vmem:[#allocation3 + $0x30] sm:$0x1] %vm214_vm2, %v29681_v0  ;;  %27502 = vmatprep.subr.bf16.mxu0 %v27501_v63 }
  0x71   : > { %257 = vst.msk [vmem:[#allocation3 + $0x48] sm:$0x1] %vm214_vm2, %v29681_v0  ;;  %258 = vst.msk [vmem:[#allocation3 + $0x60] sm:$0x1] %vm214_vm2, %v29681_v0 }
  0x72   : > { %259 = vst.msk [vmem:[#allocation3 + $0x78] sm:$0x1] %vm214_vm2, %v29681_v0  ;;  %260 = vst.msk [vmem:[#allocation3 + $0x90] sm:$0x1] %vm214_vm2, %v29681_v0 }
  0x73   : > { %261 = vst.msk [vmem:[#allocation3 + $0xa8] sm:$0x1] %vm214_vm2, %v29681_v0  ;;  %262 = vst.msk [vmem:[#allocation3 + $0xc0] sm:$0x1] %vm214_vm2, %v29681_v0 }
  0x74   : > { %263 = vst.msk [vmem:[#allocation3 + $0xd8] sm:$0x1] %vm214_vm2, %v29681_v0  ;;  %264 = vst.msk [vmem:[#allocation3 + $0xf0] sm:$0x1] %vm214_vm2, %v29681_v0 }
  0x75   : > { %265 = vst.msk [vmem:[#allocation3 + $0x108] sm:$0x1] %vm214_vm2, %v29681_v0  ;;  %266 = vst.msk [vmem:[#allocation3 + $0x120] sm:$0x1] %vm214_vm2, %v29681_v0 }
  0x76   : > { %267 = vst.msk [vmem:[#allocation3 + $0x138] sm:$0x1] %vm214_vm2, %v29681_v0  ;;  %268 = vst.msk [vmem:[#allocation3 + $0x150] sm:$0x1] %vm214_vm2, %v29681_v0 }
  0x77   : > { %269 = vst.msk [vmem:[#allocation3 + $0x168] sm:$0x1] %vm214_vm2, %v29681_v0  ;;  %270 = vst.msk [vmem:[#allocation3 + $0x180] sm:$0x1] %vm214_vm2, %v29681_v0 }
  0x78   : > { %271 = vst.msk [vmem:[#allocation3 + $0x29] sm:$0x1] %vm214_vm2, %v29681_v0  ;;  %272 = vst.msk [vmem:[#allocation3 + $0x41] sm:$0x1] %vm214_vm2, %v29681_v0 }
  0x79   : > { %273 = vst.msk [vmem:[#allocation3 + $0x59] sm:$0x1] %vm214_vm2, %v29681_v0  ;;  %274 = vst.msk [vmem:[#allocation3 + $0x71] sm:$0x1] %vm214_vm2, %v29681_v0 }
  0x7a   : > { %275 = vst.msk [vmem:[#allocation3 + $0x89] sm:$0x1] %vm214_vm2, %v29681_v0  ;;  %276 = vst.msk [vmem:[#allocation3 + $0xa1] sm:$0x1] %vm214_vm2, %v29681_v0 }
  0x7b   : > { %277 = vst.msk [vmem:[#allocation3 + $0xb9] sm:$0x1] %vm214_vm2, %v29681_v0  ;;  %278 = vst.msk [vmem:[#allocation3 + $0xd1] sm:$0x1] %vm214_vm2, %v29681_v0 }
  0x7c   : > { %279 = vst.msk [vmem:[#allocation3 + $0xe9] sm:$0x1] %vm214_vm2, %v29681_v0  ;;  %280 = vst.msk [vmem:[#allocation3 + $0x101] sm:$0x1] %vm214_vm2, %v29681_v0 }
  0x7d   : > { %281 = vst.msk [vmem:[#allocation3 + $0x119] sm:$0x1] %vm214_vm2, %v29681_v0  ;;  %282 = vst.msk [vmem:[#allocation3 + $0x131] sm:$0x1] %vm214_vm2, %v29681_v0 }
  0x7e   : > { %283 = vst.msk [vmem:[#allocation3 + $0x149] sm:$0x1] %vm214_vm2, %v29681_v0  ;;  %284 = vst.msk [vmem:[#allocation3 + $0x161] sm:$0x1] %vm214_vm2, %v29681_v0 }
  0x7f   : > { %285 = vst.msk [vmem:[#allocation3 + $0x179] sm:$0x1] %vm214_vm2, %v29681_v0  ;;  %286 = vst.msk [vmem:[#allocation3 + $0x191] sm:$0x1] %vm214_vm2, %v29681_v0 }
  0x80   : > { %334 = vst.msk [vmem:[#allocation2 + $0xc9] sm:$0xff] %vm204_vm0, %v302_v11  ;;  %319 = vst.msk [vmem:[#allocation2 + $0x19] sm:$0xff] %vm204_vm0, %v287_v12 }
  0x81   : > { %335 = vst.msk [vmem:[#allocation2 + $0xd9] sm:$0xff] %vm204_vm0, %v303_v13  ;;  %320 = vst.msk [vmem:[#allocation2 + $0x21] sm:$0xff] %vm204_vm0, %v288_v14  ;;  %v351_v14 = vld [vmem:[#allocation2] sm:$0xff] }
  0x82   : > { %336 = vst.msk [vmem:[#allocation2 + $0xe1] sm:$0xff] %vm204_vm0, %v304_v15  ;;  %321 = vst.msk [vmem:[#allocation2 + $0x31] sm:$0xff] %vm204_vm0, %v289_v16  ;;  %v30186_v15 = vld [vmem:[#allocation2 + $0xc0] sm:$0xff]  ;;  %v797_v16 = vld [vmem:[#allocation7 + $0x50] sm:$0xff] }
  0x83   : > { %337 = vst.msk [vmem:[#allocation2 + $0xf1] sm:$0xff] %vm204_vm0, %v305_v18  ;;  %322 = vst.msk [vmem:[#allocation2 + $0x39] sm:$0xff] %vm204_vm0, %v290_v19  ;;  %v352_v18 = vld [vmem:[#allocation2 + $0x8] sm:$0xff] }
  0x84   : > { %338 = vst.msk [vmem:[#allocation2 + $0xf9] sm:$0xff] %vm204_vm0, %v306_v20  ;;  %323 = vst.msk [vmem:[#allocation2 + $0x49] sm:$0xff] %vm204_vm0, %v291_v22 }
  0x85   : > { %339 = vst.msk [vmem:[#allocation2 + $0x109] sm:$0xff] %vm204_vm0, %v307_v23  ;;  %324 = vst.msk [vmem:[#allocation2 + $0x51] sm:$0xff] %vm204_vm0, %v292_v24  ;;  %v1025_v23 = vld [vmem:[#allocation7 + $0x60] sm:$0xff]  ;;  %v1026_v24 = vld [vmem:[#allocation7 + $0x68] sm:$0xff] }
  0x86   : > { %340 = vst.msk [vmem:[#allocation2 + $0x111] sm:$0xff] %vm204_vm0, %v308_v25  ;;  %325 = vst.msk [vmem:[#allocation2 + $0x61] sm:$0xff] %vm204_vm0, %v293_v26  ;;  %v30216_v29 = vpack.c.bf16 %v1026_v24, %v1025_v23  ;;  %v1027_v24 = vld [vmem:[#allocation7 + $0x70] sm:$0xff] }
  0x87   : > { %341 = vst.msk [vmem:[#allocation2 + $0x121] sm:$0xff] %vm204_vm0, %v309_v27  ;;  %326 = vst.msk [vmem:[#allocation2 + $0x69] sm:$0xff] %vm204_vm0, %v294_v28  ;;  %v2466_v38 = vld [vmem:[#allocation2 + $0xc9] sm:$0xff]  ;;  %v30058_v39 = vld [vmem:[#allocation2 + $0x19] sm:$0xff] }
  0x88   : > { %342 = vst.msk [vmem:[#allocation2 + $0x129] sm:$0xff] %vm204_vm0, %v310_v32  ;;  %327 = vst.msk [vmem:[#allocation2 + $0x79] sm:$0xff] %vm204_vm0, %v295_v33  ;;  %v30060_v40 = vld [vmem:[#allocation2 + $0xd9] sm:$0xff]  ;;  %24902 = vmatmul.mubr.msk.f32.vlgmr.msra.gmra.mrb[0].mxu1 %vm204_vm0, %v2466_v38  ;;  %v30066_v41 = vld [vmem:[#allocation2 + $0x21] sm:$0xff]  ;;  %24616 = vmatprep.mubr.msk.f32.mxu0 %vm204_vm0, %v30058_v39 }
  0x89   : > { %343 = vst.msk [vmem:[#allocation2 + $0x139] sm:$0xff] %vm204_vm0, %v311_v35  ;;  %328 = vst.msk [vmem:[#allocation2 + $0x81] sm:$0xff] %vm204_vm0, %v296_v36  ;;  %24904 = vmatprep.mubr.msk.f32.mxu1 %vm204_vm0, %v30060_v40  ;;  %v30072_v42 = vld [vmem:[#allocation2 + $0xe1] sm:$0xff]  ;;  %v30074_v43 = vld [vmem:[#allocation2 + $0x31] sm:$0xff]  ;;  %27568 = vmatpush3.bf16.msra.mxu1 %v27493_v17 }
  0x8a   : > { %344 = vst.msk [vmem:[#allocation2 + $0x141] sm:$0xff] %vm204_vm0, %v312_v37  ;;  %v30076_v44 = vld [vmem:[#allocation2 + $0xf1] sm:$0xff]  ;;  %24617 = vmatmul.mubr.msk.f32.gmra.mrb[2].mxu0 %vm204_vm0, %v30066_v41  ;;  %27570 = vmatprep.subr.bf16.mxu1 %v27497_v34  ;;  %v30084_v45 = vld [vmem:[#allocation2 + $0x39] sm:$0xff]  ;;  %329 = vst.msk [vmem:[#allocation2 + $0x91] sm:$0xff] %vm204_vm0, %v297_v46 }
  0x8b   : > { %24619 = vmatprep.mubr.msk.f32.mxu0 %vm204_vm0, %v30074_v43  ;;  %v30090_v48 = vld [vmem:[#allocation2 + $0xf9] sm:$0xff]  ;;  %v30092_v49 = vld [vmem:[#allocation2 + $0x49] sm:$0xff]  ;;  %345 = vst.msk [vmem:[#allocation2 + $0x151] sm:$0xff] %vm204_vm0, %v313_v47  ;;  %330 = vst.msk [vmem:[#allocation2 + $0x99] sm:$0xff] %vm204_vm0, %v298_v50 }
  0x8c   : > { %24905 = vmatmul.mubr.msk.f32.gmra.mrb[2].mxu1 %vm204_vm0, %v30072_v42  ;;  %v30097_v51 = vld [vmem:[#allocation2 + $0x109] sm:$0xff]  ;;  %v30109_v55 = vld [vmem:[#allocation2 + $0x51] sm:$0xff]  ;;  %346 = vst.msk [vmem:[#allocation2 + $0x159] sm:$0xff] %vm204_vm0, %v314_v52  ;;  %331 = vst.msk [vmem:[#allocation2 + $0xa9] sm:$0xff] %vm204_vm0, %v299_v53 }
  0x8d   : > { %24907 = vmatprep.mubr.msk.f32.mxu1 %vm204_vm0, %v30076_v44  ;;  %27572 = vmatpush3.bf16.msra.mxu1 %v27497_v34  ;;  %347 = vst.msk [vmem:[#allocation2 + $0x169] sm:$0xff] %vm204_vm0, %v315_v54  ;;  %v30118_v58 = vld [vmem:[#allocation2 + $0x111] sm:$0xff]  ;;  %v30120_v59 = vld [vmem:[#allocation2 + $0x61] sm:$0xff]  ;;  %332 = vst.msk [vmem:[#allocation2 + $0xb1] sm:$0xff] %vm204_vm0, %v300_v56 }
  0x8e   : > { %24620 = vmatmul.mubr.msk.f32.gmra.mrb[4].mxu0 %vm204_vm0, %v30084_v45  ;;  %348 = vst.msk [vmem:[#allocation2 + $0x171] sm:$0xff] %vm204_vm0, %v316_v57  ;;  %v30124_v61 = vld [vmem:[#allocation2 + $0x121] sm:$0xff]  ;;  %v30132_v0 = vld [vmem:[#allocation2 + $0x69] sm:$0xff]  ;;  %27574 = vmatprep.subr.bf16.mxu1 %v27501_v63  ;;  %v798_v17 = vld [vmem:[#allocation7 + $0x58] sm:$0xff] }
  0x8f   : > { %24622 = vmatprep.mubr.msk.f32.mxu0 %vm204_vm0, %v30092_v49  ;;  %v30136_v1 = vld [vmem:[#allocation2 + $0x129] sm:$0xff]  ;;  %v30138_v2 = vld [vmem:[#allocation2 + $0x79] sm:$0xff]  ;;  %v27505_v22 = vpack.c.bf16 %v798_v17, %v797_v16  ;;  %349 = vst.msk [vmem:[#allocation2 + $0x181] sm:$0xff] %vm204_vm0, %v317_v31 }
  0x90   : > { %24908 = vmatmul.mubr.msk.f32.gmra.mrb[4].mxu1 %vm204_vm0, %v30090_v48  ;;  %v30140_v3 = vld [vmem:[#allocation2 + $0x139] sm:$0xff]  ;;  %v30148_v4 = vld [vmem:[#allocation2 + $0x81] sm:$0xff]  ;;  %v30212_v27 = vld [vmem:[#allocation2 + $0x30] sm:$0xff] }
  0x91   : > { %24910 = vmatprep.mubr.msk.f32.mxu1 %vm204_vm0, %v30097_v51  ;;  %v30152_v5 = vld [vmem:[#allocation2 + $0x141] sm:$0xff]  ;;  %v30154_v6 = vld [vmem:[#allocation2 + $0x91] sm:$0xff] }
  0x92   : > { %24623 = vmatmul.mubr.msk.f32.gmra.mrb[6].mxu0 %vm204_vm0, %v30109_v55  ;;  %v30156_v7 = vld [vmem:[#allocation2 + $0x151] sm:$0xff]  ;;  %v30164_v8 = vld [vmem:[#allocation2 + $0x99] sm:$0xff]  ;;  %v30195_v19 = vld [vmem:[#allocation2 + $0xc8] sm:$0xff] }
  0x93   : > { %24625 = vmatprep.mubr.msk.f32.mxu0 %vm204_vm0, %v30120_v59  ;;  %34768 = vst [vmem:[#allocation13_spill] sm:$0xff] %v30164_v8  ;;  %v30168_v9 = vld [vmem:[#allocation2 + $0x159] sm:$0xff]  ;;  %v30170_v10 = vld [vmem:[#allocation2 + $0xa9] sm:$0xff] }
  0x94   : > { %24911 = vmatmul.mubr.msk.f32.gmra.mrb[6].mxu1 %vm204_vm0, %v30118_v58  ;;  %34769 = vst [vmem:[#allocation14_spill] sm:$0xff] %v30168_v9  ;;  %34770 = vst [vmem:[#allocation15_spill] sm:$0xff] %v30170_v10  ;;  %v30172_v11 = vld [vmem:[#allocation2 + $0x169] sm:$0xff]  ;;  %v30180_v12 = vld [vmem:[#allocation2 + $0xb1] sm:$0xff] }
  0x95   : > { %24913 = vmatprep.mubr.msk.f32.mxu1 %vm204_vm0, %v30124_v61  ;;  %34771 = vst [vmem:[#allocation16_spill] sm:$0xff] %v30172_v11  ;;  %34772 = vst [vmem:[#allocation17_spill] sm:$0xff] %v30180_v12  ;;  %v30184_v13 = vld [vmem:[#allocation2 + $0x171] sm:$0xff]  ;;  %v30204_v25 = vld [vmem:[#allocation2 + $0x20] sm:$0xff] }
  0x96   : > { %24626 = vmatmul.mubr.msk.f32.gmra.mrb[8].mxu0 %vm204_vm0, %v30132_v0  ;;  %34773 = vst [vmem:[#allocation18_spill] sm:$0xff] %v30184_v13  ;;  %v30197_v20 = vld [vmem:[#allocation2 + $0x18] sm:$0xff]  ;;  %v30210_v26 = vld [vmem:[#allocation2 + $0xe0] sm:$0xff]  ;;  %v30214_v28 = vld [vmem:[#allocation2 + $0xf0] sm:$0xff] }
  0x97   : > { %24628 = vmatprep.mubr.msk.f32.mxu0 %vm204_vm0, %v30138_v2  ;;  %v30199_v21 = vld [vmem:[#allocation2 + $0xd8] sm:$0xff]  ;;  %v30231_v33 = vld [vmem:[#allocation2 + $0x48] sm:$0xff]  ;;  %v30246_v36 = vld [vmem:[#allocation2 + $0x50] sm:$0xff] }
  0x98   : > { %24914 = vmatmul.mubr.msk.f32.gmra.mrb[8].mxu1 %vm204_vm0, %v30136_v1  ;;  %v30224_v30 = vld [vmem:[#allocation2 + $0x38] sm:$0xff]  ;;  %v30235_v35 = vld [vmem:[#allocation2 + $0x108] sm:$0xff]  ;;  %v30250_v37 = vld [vmem:[#allocation2 + $0x110] sm:$0xff] }
  0x99   : > { %24916 = vmatprep.mubr.msk.f32.mxu1 %vm204_vm0, %v30140_v3  ;;  %v30229_v32 = vld [vmem:[#allocation2 + $0xf8] sm:$0xff]  ;;  %v30252_v38 = vld [vmem:[#allocation2 + $0x60] sm:$0xff]  ;;  %v30262_v47 = vld [vmem:[#allocation2 + $0x68] sm:$0xff] }
  0x9a   : > { %24629 = vmatmul.mubr.msk.f32.gmra.mrb[10].mxu0 %vm204_vm0, %v30148_v4  ;;  %v318_v34 = vld [vmem:[%s29856_s26 + $0xf8] sm:$0xff]  ;;  %v30254_v46 = vld [vmem:[#allocation2 + $0x120] sm:$0xff]  ;;  %v30266_v50 = vld [vmem:[#allocation2 + $0x128] sm:$0xff]  ;;  %s29605_s26 = scalar_lea.vmem %s34474_s30, 4096 }
  0x9b   : > { %24631 = vmatprep.mubr.msk.f32.mxu0 %vm204_vm0, %v30154_v6  ;;  %350 = vst.msk [vmem:[#allocation2 + $0x189] sm:$0xff] %vm204_vm0, %v318_v34  ;;  %v30268_v52 = vld [vmem:[#allocation2 + $0x78] sm:$0xff]  ;;  %v30278_v54 = vld [vmem:[#allocation2 + $0x80] sm:$0xff]  ;;  %v30284_v57 = vld [vmem:[#allocation2 + $0x90] sm:$0xff]  ;;  %p29606_p4 = scmp.ne.s32.totalorder %s34474_s30, %s29605_s26  ;;  %p29613_p13 = scmp.lt.s32.totalorder %s29611_s8, %s29605_s26 }
  0x9c   : > { %24917 = vmatmul.mubr.msk.f32.gmra.mrb[10].mxu1 %vm204_vm0, %v30152_v5  ;;  %v30270_v53 = vld [vmem:[#allocation2 + $0x138] sm:$0xff]  ;;  %v30282_v56 = vld [vmem:[#allocation2 + $0x140] sm:$0xff]  ;;  %v30286_v60 = vld [vmem:[#allocation2 + $0x150] sm:$0xff] }
  0x9d   : > { %24919 = vmatprep.mubr.msk.f32.mxu1 %vm204_vm0, %v30156_v7  ;;  %v30294_v62 = vld [vmem:[#allocation2 + $0x98] sm:$0xff]  ;;  %v30302_v16 = vld [vmem:[#allocation2 + $0x168] sm:$0xff]  ;;  %v30310_v17 = vld [vmem:[#allocation2 + $0xb0] sm:$0xff]  ;;  %p29607_p6 = pnand %p29606_p4, %p29799_p12  ;;  %p29614_p3 = por %p29613_p13, %p29612_p10 }
  0x9e   : > { %24632 = vmatmul.mubr.msk.f32.gmra.mrb[12].mxu0 %vm204_vm0, %v30164_v8  ;;  %v30316_v23 = vld [vmem:[#allocation2 + $0xc2] sm:$0xff]  ;;  %v1028_v31 = vld [vmem:[#allocation7 + $0x78] sm:$0xff]  ;;  %v779_v34 = vld [vmem:[#allocation2 + $0xa] sm:$0xff] }
  0x9f   : > { %24634 = vmatprep.mubr.msk.f32.mxu0 %vm204_vm0, %v30170_v10  ;;  %34774 = vst [vmem:[#allocation19_spill] sm:$0xff] %v30316_v23  ;;  %v27513_v10 = vpack.c.bf16 %v1028_v31, %v1027_v24  ;;  %v1256_v8 = vld [vmem:[#allocation7 + $0x88] sm:$0xff]  ;;  %v30343_v24 = vld [vmem:[#allocation2 + $0x32] sm:$0xff]  ;;  %p29608_p8 = pneg %p29607_p6 }
  0xa0   : > { %24920 = vmatmul.mubr.msk.f32.gmra.mrb[12].mxu1 %vm204_vm0, %v30168_v9  ;;  %v1255_v9 = vld [vmem:[#allocation7 + $0x80] sm:$0xff]  ;;  %34777 = vst [vmem:[#allocation22_spill] sm:$0xff] %v30343_v24  ;;  %v30345_v31 = vld [vmem:[#allocation2 + $0xf2] sm:$0xff] }
  0xa1   : > { %24922 = vmatprep.mubr.msk.f32.mxu1 %vm204_vm0, %v30172_v11  ;;  %v30329_v11 = vld [vmem:[#allocation2 + $0xda] sm:$0xff]  ;;  %34778 = vst [vmem:[#allocation23_spill] sm:$0xff] %v30345_v31  ;;  %p29615_p7 = pnand %p29614_p3, %p29608_p8 }
  0xa2   : > { %24635 = vmatmul.mubr.msk.f32.gmra.mrb[14].mxu0 %vm204_vm0, %v30180_v12  ;;  %v30327_v12 = vld [vmem:[#allocation2 + $0x1a] sm:$0xff]  ;;  %34776 = vst [vmem:[#allocation21_spill] sm:$0xff] %v30329_v11 }
  0xa3   : > { %24645 = vmatprep.mubr.msk.f32.mxu0 %vm204_vm0, %v351_v14  ;;  %v30300_v14 = vld [vmem:[#allocation2 + $0xa8] sm:$0xff] }
  0xa4   : > { %24923 = vmatmul.mubr.msk.f32.gmra.mrb[14].mxu1 %vm204_vm0, %v30184_v13  ;;  %v30325_v13 = vld [vmem:[#allocation2 + $0xca] sm:$0xff] }
  0xa5   : > { %24933 = vmatprep.mubr.msk.f32.mxu1 %vm204_vm0, %v30186_v15  ;;  %34775 = vst [vmem:[#allocation20_spill] sm:$0xff] %v30325_v13 }
  0xa6   : > { %24646 = vmatmul.mubr.msk.f32.vlgmr.msra.gmra.mrb[0].mxu0 %vm204_vm0, %v352_v18  ;;  %v30314_v18 = vld [vmem:[#allocation2 + $0x170] sm:$0xff] }
  0xa7   : > { %27504 = vmatpush3.bf16.msra.mxu0 %v27501_v63  ;;  %24648 = vmatprep.mubr.msk.f32.mxu0 %vm204_vm0, %v30197_v20 }
  0xa8   : > { %24934 = vmatmul.mubr.msk.f32.vlgmr.msra.gmra.mrb[0].mxu1 %vm204_vm0, %v30195_v19  ;;  %27506 = vmatprep.subr.bf16.mxu0 %v27505_v22 }
  0xa9   : > { %24936 = vmatprep.mubr.msk.f32.mxu1 %vm204_vm0, %v30199_v21  ;;  %27576 = vmatpush3.bf16.msra.mxu1 %v27501_v63  ;;  %v30298_v63 = vld [vmem:[#allocation2 + $0x158] sm:$0xff] }
  0xaa   : > { %24649 = vmatmul.mubr.msk.f32.gmra.mrb[2].mxu0 %vm204_vm0, %v30204_v25  ;;  %27578 = vmatprep.subr.bf16.mxu1 %v27505_v22 }
  0xab   : > { %24651 = vmatprep.mubr.msk.f32.mxu0 %vm204_vm0, %v30212_v27  ;;  %27508 = vmatpush3.bf16.msra.mxu0 %v27505_v22 }
  0xac   : > { %24937 = vmatmul.mubr.msk.f32.gmra.mrb[2].mxu1 %vm204_vm0, %v30210_v26  ;;  %27510 = vmatprep.subr.bf16.mxu0 %v30216_v29 }
  0xad   : > { %24939 = vmatprep.mubr.msk.f32.mxu1 %vm204_vm0, %v30214_v28  ;;  %27580 = vmatpush3.bf16.msra.mxu1 %v27505_v22  ;;  %v778_v22 = vld [vmem:[#allocation2 + $0x2] sm:$0xff] }
  0xae   : > { %24652 = vmatmul.mubr.msk.f32.gmra.mrb[4].mxu0 %vm204_vm0, %v30224_v30  ;;  %27582 = vmatprep.subr.bf16.mxu1 %v30216_v29 }
  0xaf   : > { %24654 = vmatprep.mubr.msk.f32.mxu0 %vm204_vm0, %v30231_v33 }
  0xb0   : > { %24940 = vmatmul.mubr.msk.f32.gmra.mrb[4].mxu1 %vm204_vm0, %v30229_v32 }
  0xb1   : > { %24942 = vmatprep.mubr.msk.f32.mxu1 %vm204_vm0, %v30235_v35 }
  0xb2   : > { %24655 = vmatmul.mubr.msk.f32.gmra.mrb[6].mxu0 %vm204_vm0, %v30246_v36 }
  0xb3   : > { %24657 = vmatprep.mubr.msk.f32.mxu0 %vm204_vm0, %v30252_v38 }
  0xb4   : > { %24943 = vmatmul.mubr.msk.f32.gmra.mrb[6].mxu1 %vm204_vm0, %v30250_v37 }
  0xb5   : > { %24945 = vmatprep.mubr.msk.f32.mxu1 %vm204_vm0, %v30254_v46 }
  0xb6   : > { %24658 = vmatmul.mubr.msk.f32.gmra.mrb[8].mxu0 %vm204_vm0, %v30262_v47 }
  0xb7   : > { %24660 = vmatprep.mubr.msk.f32.mxu0 %vm204_vm0, %v30268_v52 }
  0xb8   : > { %24946 = vmatmul.mubr.msk.f32.gmra.mrb[8].mxu1 %vm204_vm0, %v30266_v50 }
  0xb9   : > { %24948 = vmatprep.mubr.msk.f32.mxu1 %vm204_vm0, %v30270_v53 }
  0xba   : > { %24661 = vmatmul.mubr.msk.f32.gmra.mrb[10].mxu0 %vm204_vm0, %v30278_v54 }
  0xbb   : > { %24663 = vmatprep.mubr.msk.f32.mxu0 %vm204_vm0, %v30284_v57 }
  0xbc   : > { %24949 = vmatmul.mubr.msk.f32.gmra.mrb[10].mxu1 %vm204_vm0, %v30282_v56 }
  0xbd   : > { %24951 = vmatprep.mubr.msk.f32.mxu1 %vm204_vm0, %v30286_v60 }
  0xbe   : > { %24664 = vmatmul.mubr.msk.f32.gmra.mrb[12].mxu0 %vm204_vm0, %v30294_v62 }
  0xbf   : > { %24666 = vmatprep.mubr.msk.f32.mxu0 %vm204_vm0, %v30300_v14 }
  0xc0   : > { %24952 = vmatmul.mubr.msk.f32.gmra.mrb[12].mxu1 %vm204_vm0, %v30298_v63 }
  0xc1   : > { %24954 = vmatprep.mubr.msk.f32.mxu1 %vm204_vm0, %v30302_v16 }
  0xc2   : > { %24667 = vmatmul.mubr.msk.f32.gmra.mrb[14].mxu0 %vm204_vm0, %v30310_v17 }
  0xc3   : > { %24677 = vmatprep.mubr.msk.f32.mxu0 %vm204_vm0, %v778_v22  ;;  %v30335_v22 = vld [vmem:[#allocation2 + $0x22] sm:$0xff] }
  0xc4   : > { %24955 = vmatmul.mubr.msk.f32.gmra.mrb[14].mxu1 %vm204_vm0, %v30314_v18 }
  0xc5   : > { %24965 = vmatprep.mubr.msk.f32.mxu1 %vm204_vm0, %v30316_v23  ;;  %v30341_v23 = vld [vmem:[#allocation2 + $0xe2] sm:$0xff] }
  0xc6   : > { %24678 = vmatmul.mubr.msk.f32.vlgmr.msra.gmra.mrb[0].mxu0 %vm204_vm0, %v779_v34  ;;  %v30348_v34 = vpack.c.bf16 %v1256_v8, %v1255_v9  ;;  %v30364_v8 = vld [vmem:[#allocation2 + $0x10a] sm:$0xff]  ;;  %v30374_v9 = vld [vmem:[#allocation2 + $0x52] sm:$0xff] }
  0xc7   : > { %27512 = vmatpush3.bf16.msra.mxu0 %v30216_v29  ;;  %24680 = vmatprep.mubr.msk.f32.mxu0 %vm204_vm0, %v30327_v12  ;;  %34782 = vst [vmem:[#allocation27_spill] sm:$0xff] %v30364_v8  ;;  %34783 = vst [vmem:[#allocation28_spill] sm:$0xff] %v30374_v9 }
  0xc8   : > { %24966 = vmatmul.mubr.msk.f32.vlgmr.msra.gmra.mrb[0].mxu1 %vm204_vm0, %v30325_v13  ;;  %27514 = vmatprep.subr.bf16.mxu0 %v27513_v10  ;;  %v30356_v13 = vld [vmem:[#allocation2 + $0x3a] sm:$0xff] }
  0xc9   : > { %24968 = vmatprep.mubr.msk.f32.mxu1 %vm204_vm0, %v30329_v11  ;;  %27584 = vmatpush3.bf16.msra.mxu1 %v30216_v29  ;;  %34779 = vst [vmem:[#allocation24_spill] sm:$0xff] %v30356_v13  ;;  %v30360_v11 = vld [vmem:[#allocation2 + $0xfa] sm:$0xff]  ;;  %v30362_v29 = vld [vmem:[#allocation2 + $0x4a] sm:$0xff] }
  0xca   : > { %24681 = vmatmul.mubr.msk.f32.gmra.mrb[2].mxu0 %vm204_vm0, %v30335_v22  ;;  %27586 = vmatprep.subr.bf16.mxu1 %v27513_v10  ;;  %34780 = vst [vmem:[#allocation25_spill] sm:$0xff] %v30360_v11  ;;  %34781 = vst [vmem:[#allocation26_spill] sm:$0xff] %v30362_v29 }
  0xcb   : > { %24683 = vmatprep.mubr.msk.f32.mxu0 %vm204_vm0, %v30343_v24  ;;  %27516 = vmatpush3.bf16.msra.mxu0 %v27513_v10  ;;  %v30382_v24 = vld [vmem:[#allocation2 + $0x122] sm:$0xff] }
  0xcc   : > { %24969 = vmatmul.mubr.msk.f32.gmra.mrb[2].mxu1 %vm204_vm0, %v30341_v23  ;;  %27518 = vmatprep.subr.bf16.mxu0 %v30348_v34  ;;  %34786 = vst [vmem:[#allocation31_spill] sm:$0xff] %v30382_v24 }
  0xcd   : > { %24971 = vmatprep.mubr.msk.f32.mxu1 %vm204_vm0, %v30345_v31  ;;  %27588 = vmatpush3.bf16.msra.mxu1 %v27513_v10  ;;  %v30378_v31 = vld [vmem:[#allocation2 + $0x112] sm:$0xff]  ;;  %v30380_v10 = vld [vmem:[#allocation2 + $0x62] sm:$0xff] }
  0xce   : > { %24684 = vmatmul.mubr.msk.f32.gmra.mrb[4].mxu0 %vm204_vm0, %v30356_v13  ;;  %27590 = vmatprep.subr.bf16.mxu1 %v30348_v34  ;;  %34784 = vst [vmem:[#allocation29_spill] sm:$0xff] %v30378_v31  ;;  %34785 = vst [vmem:[#allocation30_spill] sm:$0xff] %v30380_v10  ;;  %v30398_v13 = vld [vmem:[#allocation2 + $0x13a] sm:$0xff] }
  0xcf   : > { %24686 = vmatprep.mubr.msk.f32.mxu0 %vm204_vm0, %v30362_v29  ;;  %v30390_v29 = vld [vmem:[#allocation2 + $0x6a] sm:$0xff]  ;;  %34790 = vst [vmem:[#allocation35_spill] sm:$0xff] %v30398_v13 }
  0xd0   : > { %24972 = vmatmul.mubr.msk.f32.gmra.mrb[4].mxu1 %vm204_vm0, %v30360_v11  ;;  %34787 = vst [vmem:[#allocation32_spill] sm:$0xff] %v30390_v29  ;;  %v30396_v11 = vld [vmem:[#allocation2 + $0x7a] sm:$0xff] }
  0xd1   : > { %24974 = vmatprep.mubr.msk.f32.mxu1 %vm204_vm0, %v30364_v8  ;;  %v30394_v8 = vld [vmem:[#allocation2 + $0x12a] sm:$0xff]  ;;  %34789 = vst [vmem:[#allocation34_spill] sm:$0xff] %v30396_v11 }
  0xd2   : > { %24687 = vmatmul.mubr.msk.f32.gmra.mrb[6].mxu0 %vm204_vm0, %v30374_v9  ;;  %34788 = vst [vmem:[#allocation33_spill] sm:$0xff] %v30394_v8  ;;  %v30414_v9 = vld [vmem:[#allocation2 + $0x152] sm:$0xff] }
  0xd3   : > { %24689 = vmatprep.mubr.msk.f32.mxu0 %vm204_vm0, %v30380_v10  ;;  %v30406_v10 = vld [vmem:[#allocation2 + $0x82] sm:$0xff]  ;;  %34794 = vst [vmem:[#allocation39_spill] sm:$0xff] %v30414_v9 }
  0xd4   : > { %24975 = vmatmul.mubr.msk.f32.gmra.mrb[6].mxu1 %vm204_vm0, %v30378_v31  ;;  %34791 = vst [vmem:[#allocation36_spill] sm:$0xff] %v30406_v10  ;;  %v30412_v31 = vld [vmem:[#allocation2 + $0x92] sm:$0xff] }
  0xd5   : > { %24977 = vmatprep.mubr.msk.f32.mxu1 %vm204_vm0, %v30382_v24  ;;  %v30410_v24 = vld [vmem:[#allocation2 + $0x142] sm:$0xff]  ;;  %34793 = vst [vmem:[#allocation38_spill] sm:$0xff] %v30412_v31 }
  0xd6   : > { %24690 = vmatmul.mubr.msk.f32.gmra.mrb[8].mxu0 %vm204_vm0, %v30390_v29  ;;  %34792 = vst [vmem:[#allocation37_spill] sm:$0xff] %v30410_v24  ;;  %v30430_v29 = vld [vmem:[#allocation2 + $0x16a] sm:$0xff] }
  0xd7   : > { %24692 = vmatprep.mubr.msk.f32.mxu0 %vm204_vm0, %v30396_v11  ;;  %v30422_v11 = vld [vmem:[#allocation2 + $0x9a] sm:$0xff]  ;;  %34797 = vst [vmem:[#allocation42_spill] sm:$0xff] %v30430_v29 }
  0xd8   : > { %24978 = vmatmul.mubr.msk.f32.gmra.mrb[8].mxu1 %vm204_vm0, %v30394_v8  ;;  %v30428_v8 = vld [vmem:[#allocation2 + $0xaa] sm:$0xff] }
  0xd9   : > { %24980 = vmatprep.mubr.msk.f32.mxu1 %vm204_vm0, %v30398_v13  ;;  %v30426_v13 = vld [vmem:[#allocation2 + $0x15a] sm:$0xff]  ;;  %34796 = vst [vmem:[#allocation41_spill] sm:$0xff] %v30428_v8 }
  0xda   : > { %24693 = vmatmul.mubr.msk.f32.gmra.mrb[10].mxu0 %vm204_vm0, %v30406_v10  ;;  %34795 = vst [vmem:[#allocation40_spill] sm:$0xff] %v30426_v13  ;;  %v1258_v10 = vld [vmem:[#allocation7 + $0x98] sm:$0xff] }
  0xdb   : > { %24695 = vmatprep.mubr.msk.f32.mxu0 %vm204_vm0, %v30412_v31  ;;  %v30438_v31 = vld [vmem:[#allocation2 + $0xb2] sm:$0xff] }
  0xdc   : > { %24981 = vmatmul.mubr.msk.f32.gmra.mrb[10].mxu1 %vm204_vm0, %v30410_v24  ;;  %v1257_v24 = vld [vmem:[#allocation7 + $0x90] sm:$0xff] }
  0xdd   : > { %24983 = vmatprep.mubr.msk.f32.mxu1 %vm204_vm0, %v30414_v9  ;;  %v30442_v9 = vld [vmem:[#allocation2 + $0x172] sm:$0xff] }
  0xde   : > { %24696 = vmatmul.mubr.msk.f32.gmra.mrb[12].mxu0 %vm204_vm0, %v30422_v11  ;;  %34798 = vst [vmem:[#allocation43_spill] sm:$0xff] %v30442_v9 }
  0xdf   : > { %24698 = vmatprep.mubr.msk.f32.mxu0 %vm204_vm0, %v30428_v8  ;;  %v27521_v8 = vpack.c.bf16 %v1258_v10, %v1257_v24  ;;  %v1487_v24 = vld [vmem:[#allocation7 + $0xb0] sm:$0xff]  ;;  %v34813_v10 = vld [vmem:[#allocation29_spill] sm:$0xff] }
  0xe0   : > { %24984 = vmatmul.mubr.msk.f32.gmra.mrb[12].mxu1 %vm204_vm0, %v30426_v13  ;;  %v1486_v13 = vld [vmem:[#allocation7 + $0xa8] sm:$0xff] }
  0xe1   : > { %24986 = vmatprep.mubr.msk.f32.mxu1 %vm204_vm0, %v30430_v29  ;;  %v1485_v29 = vld [vmem:[#allocation7 + $0xa0] sm:$0xff] }
  0xe2   : > { %24699 = vmatmul.mubr.msk.f32.gmra.mrb[14].mxu0 %vm204_vm0, %v30438_v31 }
  0xe3   : > { %24709 = vmatprep.mubr.msk.f32.mxu0 %vm204_vm0, %v30197_v20  ;;  %v27525_v20 = vpack.c.bf16 %v1486_v13, %v1485_v29  ;;  %v30502_v13 = vld [vmem:[#allocation2 + $0x180] sm:$0xff] }
  0xe4   : > { %24987 = vmatmul.mubr.msk.f32.gmra.mrb[14].mxu1 %vm204_vm0, %v30442_v9  ;;  %v1716_v29 = vld [vmem:[#allocation7 + $0xc0] sm:$0xff] }
  0xe5   : > { %24997 = vmatprep.mubr.msk.f32.mxu1 %vm204_vm0, %v30199_v21 }
  0xe6   : > { %24710 = vmatmul.mubr.msk.f32.vlgmr.msra.gmra.mrb[0].mxu0 %vm204_vm0, %v30204_v25  ;;  %v30512_v25 = vld [vmem:[#allocation2 + $0x188] sm:$0xff] }
  0xe7   : > { %27520 = vmatpush3.bf16.msra.mxu0 %v30348_v34  ;;  %24712 = vmatprep.mubr.msk.f32.mxu0 %vm204_vm0, %v30212_v27 }
  0xe8   : > { %24998 = vmatmul.mubr.msk.f32.vlgmr.msra.gmra.mrb[0].mxu1 %vm204_vm0, %v30210_v26  ;;  %27522 = vmatprep.subr.bf16.mxu0 %v27521_v8 }
  0xe9   : > { %25000 = vmatprep.mubr.msk.f32.mxu1 %vm204_vm0, %v30214_v28  ;;  %27592 = vmatpush3.bf16.msra.mxu1 %v30348_v34  ;;  %v1488_v34 = vld [vmem:[#allocation7 + $0xb8] sm:$0xff] }
  0xea   : > { %24713 = vmatmul.mubr.msk.f32.gmra.mrb[2].mxu0 %vm204_vm0, %v30224_v30  ;;  %27594 = vmatprep.subr.bf16.mxu1 %v27521_v8 }
  0xeb   : > { %24715 = vmatprep.mubr.msk.f32.mxu0 %vm204_vm0, %v30231_v33  ;;  %27524 = vmatpush3.bf16.msra.mxu0 %v27521_v8 }
  0xec   : > { %25001 = vmatmul.mubr.msk.f32.gmra.mrb[2].mxu1 %vm204_vm0, %v30229_v32  ;;  %27526 = vmatprep.subr.bf16.mxu0 %v27525_v20 }
  0xed   : > { %25003 = vmatprep.mubr.msk.f32.mxu1 %vm204_vm0, %v30235_v35  ;;  %27596 = vmatpush3.bf16.msra.mxu1 %v27521_v8  ;;  %v1717_v8 = vld [vmem:[#allocation7 + $0xc8] sm:$0xff] }
  0xee   : > { %24716 = vmatmul.mubr.msk.f32.gmra.mrb[4].mxu0 %vm204_vm0, %v30246_v36  ;;  %27598 = vmatprep.subr.bf16.mxu1 %v27525_v20 }
  0xef   : > { %24718 = vmatprep.mubr.msk.f32.mxu0 %vm204_vm0, %v30252_v38 }
  0xf0   : > { %25004 = vmatmul.mubr.msk.f32.gmra.mrb[4].mxu1 %vm204_vm0, %v30250_v37 }
  0xf1   : > { %25006 = vmatprep.mubr.msk.f32.mxu1 %vm204_vm0, %v30254_v46 }
  0xf2   : > { %24719 = vmatmul.mubr.msk.f32.gmra.mrb[6].mxu0 %vm204_vm0, %v30262_v47 }
  0xf3   : > { %24721 = vmatprep.mubr.msk.f32.mxu0 %vm204_vm0, %v30268_v52 }
  0xf4   : > { %25007 = vmatmul.mubr.msk.f32.gmra.mrb[6].mxu1 %vm204_vm0, %v30266_v50 }
  0xf5   : > { %25009 = vmatprep.mubr.msk.f32.mxu1 %vm204_vm0, %v30270_v53 }
  0xf6   : > { %24722 = vmatmul.mubr.msk.f32.gmra.mrb[8].mxu0 %vm204_vm0, %v30278_v54 }
  0xf7   : > { %24724 = vmatprep.mubr.msk.f32.mxu0 %vm204_vm0, %v30284_v57 }
  0xf8   : > { %25010 = vmatmul.mubr.msk.f32.gmra.mrb[8].mxu1 %vm204_vm0, %v30282_v56 }
  0xf9   : > { %25012 = vmatprep.mubr.msk.f32.mxu1 %vm204_vm0, %v30286_v60 }
  0xfa   : > { %24725 = vmatmul.mubr.msk.f32.gmra.mrb[10].mxu0 %vm204_vm0, %v30294_v62 }
  0xfb   : > { %24727 = vmatprep.mubr.msk.f32.mxu0 %vm204_vm0, %v30300_v14 }
  0xfc   : > { %25013 = vmatmul.mubr.msk.f32.gmra.mrb[10].mxu1 %vm204_vm0, %v30298_v63 }
  0xfd   : > { %25015 = vmatprep.mubr.msk.f32.mxu1 %vm204_vm0, %v30302_v16 }
  0xfe   : > { %24728 = vmatmul.mubr.msk.f32.gmra.mrb[12].mxu0 %vm204_vm0, %v30310_v17 }
  0xff   : > { %24730 = vmatprep.mubr.msk.f32.mxu0 %vm204_vm0, %v30186_v15  ;;  %v27529_v15 = vpack.c.bf16 %v1488_v34, %v1487_v24  ;;  %v34815_v24 = vld [vmem:[#allocation31_spill] sm:$0xff]  ;;  %v34816_v34 = vld [vmem:[#allocation32_spill] sm:$0xff] }
 0x100   : > { %25016 = vmatmul.mubr.msk.f32.gmra.mrb[12].mxu1 %vm204_vm0, %v30314_v18 }
 0x101   : > { %25018 = vmatprep.mubr.msk.f32.mxu1 %vm204_vm0, %v30502_v13 }
 0x102   : > { %24731 = vmatmul.mubr.msk.f32.gmra.mrb[14].mxu0 %vm204_vm0, %v30195_v19 }
 0x103   : > { %24741 = vmatprep.mubr.msk.f32.mxu0 %vm204_vm0, %v30058_v39  ;;  %v27533_v39 = vpack.c.bf16 %v1717_v8, %v1716_v29  ;;  %v34818_v29 = vld [vmem:[#allocation34_spill] sm:$0xff]  ;;  %v34819_v8 = vld [vmem:[#allocation35_spill] sm:$0xff] }
 0x104   : > { %25019 = vmatmul.mubr.msk.f32.gmra.mrb[14].mxu1 %vm204_vm0, %v30512_v25 }
 0x105   : > { %25029 = vmatprep.mubr.msk.f32.mxu1 %vm204_vm0, %v30060_v40  ;;  %v34799_v40 = vld [vmem:[#allocation13_spill] sm:$0xff] }
 0x106   : > { %24742 = vmatmul.mubr.msk.f32.vlgmr.msra.gmra.mrb[0].mxu0 %vm204_vm0, %v30066_v41  ;;  %v34800_v41 = vld [vmem:[#allocation14_spill] sm:$0xff] }
 0x107   : > { %27528 = vmatpush3.bf16.msra.mxu0 %v27525_v20  ;;  %24744 = vmatprep.mubr.msk.f32.mxu0 %vm204_vm0, %v30074_v43  ;;  %v34802_v43 = vld [vmem:[#allocation16_spill] sm:$0xff] }
 0x108   : > { %25030 = vmatmul.mubr.msk.f32.vlgmr.msra.gmra.mrb[0].mxu1 %vm204_vm0, %v30072_v42  ;;  %27530 = vmatprep.subr.bf16.mxu0 %v27529_v15  ;;  %v34801_v42 = vld [vmem:[#allocation15_spill] sm:$0xff] }
 0x109   : > { %25032 = vmatprep.mubr.msk.f32.mxu1 %vm204_vm0, %v30076_v44  ;;  %27600 = vmatpush3.bf16.msra.mxu1 %v27525_v20  ;;  %v30570_v44 = vld [vmem:[#allocation2 + $0xc1] sm:$0xff] }
 0x10a   : > { %24745 = vmatmul.mubr.msk.f32.gmra.mrb[2].mxu0 %vm204_vm0, %v30084_v45  ;;  %27602 = vmatprep.subr.bf16.mxu1 %v27529_v15  ;;  %v30572_v45 = vld [vmem:[#allocation2 + $0x181] sm:$0xff] }
 0x10b   : > { %24747 = vmatprep.mubr.msk.f32.mxu0 %vm204_vm0, %v30092_v49  ;;  %27532 = vmatpush3.bf16.msra.mxu0 %v27529_v15  ;;  %v34804_v49 = vld [vmem:[#allocation18_spill] sm:$0xff] }
 0x10c   : > { %25033 = vmatmul.mubr.msk.f32.gmra.mrb[2].mxu1 %vm204_vm0, %v30090_v48  ;;  %27534 = vmatprep.subr.bf16.mxu0 %v27533_v39  ;;  %v34803_v48 = vld [vmem:[#allocation17_spill] sm:$0xff]  ;;  %v34814_v20 = vld [vmem:[#allocation30_spill] sm:$0xff] }
 0x10d   : > { %25035 = vmatprep.mubr.msk.f32.mxu1 %vm204_vm0, %v30097_v51  ;;  %27604 = vmatpush3.bf16.msra.mxu1 %v27529_v15  ;;  %v30580_v51 = vld [vmem:[#allocation2 + $0xc9] sm:$0xff]  ;;  %v34817_v15 = vld [vmem:[#allocation33_spill] sm:$0xff] }
 0x10e   : > { %24748 = vmatmul.mubr.msk.f32.gmra.mrb[4].mxu0 %vm204_vm0, %v30109_v55  ;;  %27606 = vmatprep.subr.bf16.mxu1 %v27533_v39  ;;  %v30584_v55 = vld [vmem:[#allocation2 + $0x189] sm:$0xff] }
 0x10f   : > { %24750 = vmatprep.mubr.msk.f32.mxu0 %vm204_vm0, %v30120_v59  ;;  %v1719_v59 = vld [vmem:[#allocation7 + $0xd8] sm:$0xff] }
 0x110   : > { %25036 = vmatmul.mubr.msk.f32.gmra.mrb[4].mxu1 %vm204_vm0, %v30118_v58  ;;  %v1718_v58 = vld [vmem:[#allocation7 + $0xd0] sm:$0xff] }
 0x111   : > { %25038 = vmatprep.mubr.msk.f32.mxu1 %vm204_vm0, %v30124_v61  ;;  %v34805_v61 = vld [vmem:[#allocation21_spill] sm:$0xff] }
 0x112   : > { %24751 = vmatmul.mubr.msk.f32.gmra.mrb[6].mxu0 %vm204_vm0, %v30132_v0  ;;  %v27537_v0 = vpack.c.bf16 %v1719_v59, %v1718_v58  ;;  %v30642_v58 = vld [vmem:[#allocation2 + $0x182] sm:$0xff]  ;;  %v34828_v59 = vld [vmem:[#allocation19_spill] sm:$0xff] }
 0x113   : > { %24753 = vmatprep.mubr.msk.f32.mxu0 %vm204_vm0, %v30138_v2  ;;  %v1947_v2 = vld [vmem:[#allocation7 + $0xe8] sm:$0xff]  ;;  %34827 = vst [vmem:[#allocation13_spill] sm:$0xff] %v30642_v58 }
 0x114   : > { %25039 = vmatmul.mubr.msk.f32.gmra.mrb[6].mxu1 %vm204_vm0, %v30136_v1  ;;  %v1946_v1 = vld [vmem:[#allocation7 + $0xe0] sm:$0xff] }
 0x115   : > { %25041 = vmatprep.mubr.msk.f32.mxu1 %vm204_vm0, %v30140_v3  ;;  %v34806_v3 = vld [vmem:[#allocation22_spill] sm:$0xff] }
 0x116   : > { %24754 = vmatmul.mubr.msk.f32.gmra.mrb[8].mxu0 %vm204_vm0, %v30148_v4  ;;  %v34807_v4 = vld [vmem:[#allocation23_spill] sm:$0xff] }
 0x117   : > { %24756 = vmatprep.mubr.msk.f32.mxu0 %vm204_vm0, %v30154_v6  ;;  %v34808_v6 = vld [vmem:[#allocation24_spill] sm:$0xff] }
 0x118   : > { %25042 = vmatmul.mubr.msk.f32.gmra.mrb[8].mxu1 %vm204_vm0, %v30152_v5  ;;  %v27541_v5 = vpack.c.bf16 %v1947_v2, %v1946_v1  ;;  %v1948_v1 = vld [vmem:[#allocation7 + $0xf0] sm:$0xff]  ;;  %v1949_v2 = vld [vmem:[#allocation7 + $0xf8] sm:$0xff] }
 0x119   : > { %25044 = vmatprep.mubr.msk.f32.mxu1 %vm204_vm0, %v30156_v7  ;;  %v34809_v7 = vld [vmem:[#allocation25_spill] sm:$0xff] }
 0x11a   : > { %24757 = vmatmul.mubr.msk.f32.gmra.mrb[10].mxu0 %vm204_vm0, %v34799_v40  ;;  %v34821_v40 = vld [vmem:[#allocation37_spill] sm:$0xff] }
 0x11b   : > { %24759 = vmatprep.mubr.msk.f32.mxu0 %vm204_vm0, %v34801_v42  ;;  %v34823_v42 = vld [vmem:[#allocation39_spill] sm:$0xff] }
 0x11c   : > { %25045 = vmatmul.mubr.msk.f32.gmra.mrb[10].mxu1 %vm204_vm0, %v34800_v41  ;;  %v34822_v41 = vld [vmem:[#allocation38_spill] sm:$0xff] }
 0x11d   : > { %25047 = vmatprep.mubr.msk.f32.mxu1 %vm204_vm0, %v34802_v43  ;;  %v34824_v43 = vld [vmem:[#allocation40_spill] sm:$0xff] }
 0x11e   : > { %24760 = vmatmul.mubr.msk.f32.gmra.mrb[12].mxu0 %vm204_vm0, %v34803_v48  ;;  %v34825_v48 = vld [vmem:[#allocation41_spill] sm:$0xff] }
 0x11f   : > { %24762 = vmatprep.mubr.msk.f32.mxu0 %vm204_vm0, %v30570_v44 }
 0x120   : > { %25048 = vmatmul.mubr.msk.f32.gmra.mrb[12].mxu1 %vm204_vm0, %v34804_v49  ;;  %v34826_v49 = vld [vmem:[#allocation42_spill] sm:$0xff] }
 0x121   : > { %25050 = vmatprep.mubr.msk.f32.mxu1 %vm204_vm0, %v30572_v45 }
 0x122   : > { %24763 = vmatmul.mubr.msk.f32.gmra.mrb[14].mxu0 %vm204_vm0, %v30580_v51 }
 0x123   : > { %24773 = vmatprep.mubr.msk.f32.mxu0 %vm204_vm0, %v30327_v12  ;;  %v34810_v12 = vld [vmem:[#allocation26_spill] sm:$0xff] }
 0x124   : > { %25051 = vmatmul.mubr.msk.f32.gmra.mrb[14].mxu1 %vm204_vm0, %v30584_v55 }
 0x125   : > { %25061 = vmatprep.mubr.msk.f32.mxu1 %vm204_vm0, %v34805_v61  ;;  %v30652_v61 = vld [vmem:[#allocation2 + $0x18a] sm:$0xff] }
 0x126   : > { %24774 = vmatmul.mubr.msk.f32.vlgmr.msra.gmra.mrb[0].mxu0 %vm204_vm0, %v30335_v22  ;;  %v34812_v22 = vld [vmem:[#allocation28_spill] sm:$0xff] }
 0x127   : > { %27536 = vmatpush3.bf16.msra.mxu0 %v27533_v39  ;;  %24776 = vmatprep.mubr.msk.f32.mxu0 %vm204_vm0, %v34806_v3 }
 0x128   : > { %25062 = vmatmul.mubr.msk.f32.vlgmr.msra.gmra.mrb[0].mxu1 %vm204_vm0, %v30341_v23  ;;  %27538 = vmatprep.subr.bf16.mxu0 %v27537_v0  ;;  %v34811_v23 = vld [vmem:[#allocation27_spill] sm:$0xff] }
 0x129   : > { %25064 = vmatprep.mubr.msk.f32.mxu1 %vm204_vm0, %v34807_v4  ;;  %27608 = vmatpush3.bf16.msra.mxu1 %v27533_v39  ;;  %v34820_v39 = vld [vmem:[#allocation36_spill] sm:$0xff] }
 0x12a   : > { %24777 = vmatmul.mubr.msk.f32.gmra.mrb[2].mxu0 %vm204_vm0, %v34808_v6  ;;  %27610 = vmatprep.subr.bf16.mxu1 %v27537_v0 }
 0x12b   : > { %24779 = vmatprep.mubr.msk.f32.mxu0 %vm204_vm0, %v34810_v12  ;;  %27540 = vmatpush3.bf16.msra.mxu0 %v27537_v0 }
 0x12c   : > { %25065 = vmatmul.mubr.msk.f32.gmra.mrb[2].mxu1 %vm204_vm0, %v34809_v7  ;;  %27542 = vmatprep.subr.bf16.mxu0 %v27541_v5 }
 0x12d   : > { %25067 = vmatprep.mubr.msk.f32.mxu1 %vm204_vm0, %v34811_v23  ;;  %27612 = vmatpush3.bf16.msra.mxu1 %v27537_v0  ;;  %v34829_v0 = vld [vmem:[#allocation20_spill] sm:$0xff] }
 0x12e   : > { %24780 = vmatmul.mubr.msk.f32.gmra.mrb[4].mxu0 %vm204_vm0, %v34812_v22  ;;  %27614 = vmatprep.subr.bf16.mxu1 %v27541_v5 }
 0x12f   : > { %24782 = vmatprep.mubr.msk.f32.mxu0 %vm204_vm0, %v34814_v20 }
 0x130   : > { %25068 = vmatmul.mubr.msk.f32.gmra.mrb[4].mxu1 %vm204_vm0, %v34813_v10 }
 0x131   : > { %25070 = vmatprep.mubr.msk.f32.mxu1 %vm204_vm0, %v34815_v24 }
 0x132   : > { %24783 = vmatmul.mubr.msk.f32.gmra.mrb[6].mxu0 %vm204_vm0, %v34816_v34 }
 0x133   : > { %24785 = vmatprep.mubr.msk.f32.mxu0 %vm204_vm0, %v34818_v29 }
 0x134   : > { %25071 = vmatmul.mubr.msk.f32.gmra.mrb[6].mxu1 %vm204_vm0, %v34817_v15 }
 0x135   : > { %25073 = vmatprep.mubr.msk.f32.mxu1 %vm204_vm0, %v34819_v8 }
 0x136   : > { %24786 = vmatmul.mubr.msk.f32.gmra.mrb[8].mxu0 %vm204_vm0, %v34820_v39 }
 0x137   : > { %24788 = vmatprep.mubr.msk.f32.mxu0 %vm204_vm0, %v34822_v41 }
 0x138   : > { %25074 = vmatmul.mubr.msk.f32.gmra.mrb[8].mxu1 %vm204_vm0, %v34821_v40 }
 0x139   : > { %25076 = vmatprep.mubr.msk.f32.mxu1 %vm204_vm0, %v34823_v42 }
 0x13a   : > { %24789 = vmatmul.mubr.msk.f32.gmra.mrb[10].mxu0 %vm204_vm0, %v30422_v11 }
 0x13b   : > { %24791 = vmatprep.mubr.msk.f32.mxu0 %vm204_vm0, %v34825_v48 }
 0x13c   : > { %25077 = vmatmul.mubr.msk.f32.gmra.mrb[10].mxu1 %vm204_vm0, %v34824_v43 }
 0x13d   : > { %25079 = vmatprep.mubr.msk.f32.mxu1 %vm204_vm0, %v34826_v49 }
 0x13e   : > { %24792 = vmatmul.mubr.msk.f32.gmra.mrb[12].mxu0 %vm204_vm0, %v30438_v31 }
 0x13f   : > { %24794 = vmatprep.mubr.msk.f32.mxu0 %vm204_vm0, %v34828_v59  ;;  %v27545_v59 = vpack.c.bf16 %v1949_v2, %v1948_v1  ;;  %v4029_v1 = vld [vmem:[#allocation2 + $0x171] sm:$0xff]  ;;  %v1943_v2 = vld [vmem:[#allocation2 + $0xd9] sm:$0xff] }
 0x140   : > { %25080 = vmatmul.mubr.msk.f32.gmra.mrb[12].mxu1 %vm204_vm0, %v30442_v9  ;;  %v2177_v9 = vld [vmem:[#allocation7 + $0x108] sm:$0xff] }
 0x141   : > { %25082 = vmatprep.mubr.msk.f32.mxu1 %vm204_vm0, %v30642_v58  ;;  %v2176_v58 = vld [vmem:[#allocation7 + $0x100] sm:$0xff] }
 0x142   : > { %24795 = vmatmul.mubr.msk.f32.gmra.mrb[14].mxu0 %vm204_vm0, %v34829_v0  ;;  %v1940_v0 = vld [vmem:[#allocation2 + $0xb1] sm:$0xff] }
 0x143   : > { %24805 = vmatprep.mubr.msk.f32.mxu0 %vm204_vm0, %v30212_v27  ;;  %v27549_v27 = vpack.c.bf16 %v2177_v9, %v2176_v58  ;;  %v4026_v9 = vld [vmem:[#allocation2 + $0x151] sm:$0xff]  ;;  %v4028_v58 = vld [vmem:[#allocation2 + $0x169] sm:$0xff] }
 0x144   : > { %25083 = vmatmul.mubr.msk.f32.gmra.mrb[14].mxu1 %vm204_vm0, %v30652_v61 }
 0x145   : > { %25093 = vmatprep.mubr.msk.f32.mxu1 %vm204_vm0, %v30214_v28  ;;  %v1711_v28 = vld [vmem:[#allocation2 + $0xc0] sm:$0xff] }
 0x146   : > { %24806 = vmatmul.mubr.msk.f32.vlgmr.msra.gmra.mrb[0].mxu0 %vm204_vm0, %v30224_v30  ;;  %v3803_v30 = vld [vmem:[#allocation2 + $0x198] sm:$0xff] }
 0x147   : > { %27544 = vmatpush3.bf16.msra.mxu0 %v27541_v5  ;;  %24808 = vmatprep.mubr.msk.f32.mxu0 %vm204_vm0, %v30231_v33  ;;  %v1929_v33 = vld [vmem:[#allocation2 + $0x31] sm:$0xff] }
 0x148   : > { %25094 = vmatmul.mubr.msk.f32.vlgmr.msra.gmra.mrb[0].mxu1 %vm204_vm0, %v30229_v32  ;;  %27546 = vmatprep.subr.bf16.mxu0 %v27545_v59  ;;  %v3804_v32 = vld [vmem:[#allocation2 + $0x1a0] sm:$0xff] }
 0x149   : > { %25096 = vmatprep.mubr.msk.f32.mxu1 %vm204_vm0, %v30235_v35  ;;  %27616 = vmatpush3.bf16.msra.mxu1 %v27541_v5  ;;  %v4018_v35 = vld [vmem:[#allocation2 + $0xf1] sm:$0xff]  ;;  %v1939_v5 = vld [vmem:[#allocation2 + $0xa9] sm:$0xff] }
 0x14a   : > { %24809 = vmatmul.mubr.msk.f32.gmra.mrb[2].mxu0 %vm204_vm0, %v30246_v36  ;;  %27618 = vmatprep.subr.bf16.mxu1 %v27545_v59  ;;  %v2178_v36 = vld [vmem:[#allocation7 + $0x110] sm:$0xff] }
 0x14b   : > { %24811 = vmatprep.mubr.msk.f32.mxu0 %vm204_vm0, %v30252_v38  ;;  %27548 = vmatpush3.bf16.msra.mxu0 %v27545_v59  ;;  %v4019_v38 = vld [vmem:[#allocation2 + $0xf9] sm:$0xff] }
 0x14c   : > { %25097 = vmatmul.mubr.msk.f32.gmra.mrb[2].mxu1 %vm204_vm0, %v30250_v37  ;;  %27550 = vmatprep.subr.bf16.mxu0 %v27549_v27  ;;  %v2179_v37 = vld [vmem:[#allocation7 + $0x118] sm:$0xff] }
 0x14d   : > { %25099 = vmatprep.mubr.msk.f32.mxu1 %vm204_vm0, %v30254_v46  ;;  %27620 = vmatpush3.bf16.msra.mxu1 %v27545_v59  ;;  %v1931_v46 = vld [vmem:[#allocation2 + $0x49] sm:$0xff]  ;;  %v4032_v59 = vld [vmem:[#allocation2 + $0x199] sm:$0xff] }
 0x14e   : > { %24812 = vmatmul.mubr.msk.f32.gmra.mrb[4].mxu0 %vm204_vm0, %v30262_v47  ;;  %27622 = vmatprep.subr.bf16.mxu1 %v27549_v27  ;;  %v27553_v47 = vpack.c.bf16 %v2179_v37, %v2178_v36 }
 0x14f   : > { %24814 = vmatprep.mubr.msk.f32.mxu0 %vm204_vm0, %v30268_v52  ;;  %v4571_v52 = vld [vmem:[#allocation7 + $0x148] sm:$0xff] }
 0x150   : > { %25100 = vmatmul.mubr.msk.f32.gmra.mrb[4].mxu1 %vm204_vm0, %v30266_v50  ;;  %v4570_v50 = vld [vmem:[#allocation7 + $0x140] sm:$0xff] }
 0x151   : > { %25102 = vmatprep.mubr.msk.f32.mxu1 %vm204_vm0, %v30270_v53  ;;  %v4021_v53 = vld [vmem:[#allocation2 + $0x111] sm:$0xff] }
 0x152   : > { %24815 = vmatmul.mubr.msk.f32.gmra.mrb[6].mxu0 %vm204_vm0, %v30278_v54  ;;  %v1933_v54 = vld [vmem:[#allocation2 + $0x61] sm:$0xff] }
 0x153   : > { %24817 = vmatprep.mubr.msk.f32.mxu0 %vm204_vm0, %v30284_v57  ;;  %v27629_v57 = vpack.c.bf16 %v4571_v52, %v4570_v50 }
 0x154   : > { %25103 = vmatmul.mubr.msk.f32.gmra.mrb[6].mxu1 %vm204_vm0, %v30282_v56  ;;  %v4022_v56 = vld [vmem:[#allocation2 + $0x121] sm:$0xff] }
 0x155   : > { %25105 = vmatprep.mubr.msk.f32.mxu1 %vm204_vm0, %v30286_v60  ;;  %v1934_v60 = vld [vmem:[#allocation2 + $0x69] sm:$0xff] }
 0x156   : > { %24818 = vmatmul.mubr.msk.f32.gmra.mrb[8].mxu0 %vm204_vm0, %v30294_v62  ;;  %v4023_v62 = vld [vmem:[#allocation2 + $0x129] sm:$0xff] }
 0x157   : > { %24820 = vmatprep.mubr.msk.f32.mxu0 %vm204_vm0, %v30300_v14  ;;  %v4024_v14 = vld [vmem:[#allocation2 + $0x139] sm:$0xff] }
 0x158   : > { %25106 = vmatmul.mubr.msk.f32.gmra.mrb[8].mxu1 %vm204_vm0, %v30298_v63  ;;  %v1935_v63 = vld [vmem:[#allocation2 + $0x79] sm:$0xff] }
 0x159   : > { %25108 = vmatprep.mubr.msk.f32.mxu1 %vm204_vm0, %v30302_v16  ;;  %v1936_v16 = vld [vmem:[#allocation2 + $0x81] sm:$0xff] }
 0x15a   : > { %24821 = vmatmul.mubr.msk.f32.gmra.mrb[10].mxu0 %vm204_vm0, %v30310_v17  ;;  %v4025_v17 = vld [vmem:[#allocation2 + $0x141] sm:$0xff] }
 0x15b   : > { %24823 = vmatprep.mubr.msk.f32.mxu0 %vm204_vm0, %v1711_v28  ;;  %v4033_v28 = vld [vmem:[#allocation2 + $0x1a1] sm:$0xff] }
 0x15c   : > { %25109 = vmatmul.mubr.msk.f32.gmra.mrb[10].mxu1 %vm204_vm0, %v30314_v18  ;;  %v1937_v18 = vld [vmem:[#allocation2 + $0x91] sm:$0xff] }
 0x15d   : > { %25111 = vmatprep.mubr.msk.f32.mxu1 %vm204_vm0, %v30502_v13  ;;  %v1938_v13 = vld [vmem:[#allocation2 + $0x99] sm:$0xff] }
 0x15e   : > { %24824 = vmatmul.mubr.msk.f32.gmra.mrb[12].mxu0 %vm204_vm0, %v30195_v19  ;;  %v1930_v19 = vld [vmem:[#allocation2 + $0x39] sm:$0xff] }
 0x15f   : > { %24826 = vmatprep.mubr.msk.f32.mxu0 %vm204_vm0, %v30199_v21  ;;  %v4020_v21 = vld [vmem:[#allocation2 + $0x109] sm:$0xff] }
 0x160   : > { %25112 = vmatmul.mubr.msk.f32.gmra.mrb[12].mxu1 %vm204_vm0, %v30512_v25  ;;  %v4027_v25 = vld [vmem:[#allocation2 + $0x159] sm:$0xff] }
 0x161   : > { %25114 = vmatprep.mubr.msk.f32.mxu1 %vm204_vm0, %v3803_v30  ;;  %v4573_v30 = vld [vmem:[#allocation7 + $0x158] sm:$0xff] }
 0x162   : > { %24827 = vmatmul.mubr.msk.f32.gmra.mrb[14].mxu0 %vm204_vm0, %v30210_v26  ;;  %v1932_v26 = vld [vmem:[#allocation2 + $0x51] sm:$0xff] }
 0x163   : > { %24837 = vmatprep.mubr.msk.f32.mxu0 %vm204_vm0, %v1929_v33 }
 0x164   : > { %25115 = vmatmul.mubr.msk.f32.gmra.mrb[14].mxu1 %vm204_vm0, %v3804_v32 }
 0x165   : > { %25125 = vmatprep.mubr.msk.f32.mxu1 %vm204_vm0, %v4018_v35 }
 0x166   : > { %24838 = vmatmul.mubr.msk.f32.vlgmr.msra.gmra.mrb[0].mxu0 %vm204_vm0, %v1930_v19 }
 0x167   : > { %27552 = vmatpush3.bf16.msra.mxu0 %v27549_v27  ;;  %24840 = vmatprep.mubr.msk.f32.mxu0 %vm204_vm0, %v1931_v46 }
 0x168   : > { %25126 = vmatmul.mubr.msk.f32.vlgmr.msra.gmra.mrb[0].mxu1 %vm204_vm0, %v4019_v38  ;;  %27554 = vmatprep.subr.bf16.mxu0 %v27553_v47 }
 0x169   : > { %25128 = vmatprep.mubr.msk.f32.mxu1 %vm204_vm0, %v4020_v21  ;;  %27624 = vmatpush3.bf16.msra.mxu1 %v27549_v27  ;;  %v1944_v27 = vld [vmem:[#allocation2 + $0xe1] sm:$0xff] }
 0x16a   : > { %24841 = vmatmul.mubr.msk.f32.gmra.mrb[2].mxu0 %vm204_vm0, %v1932_v26  ;;  %27626 = vmatprep.subr.bf16.mxu1 %v27553_v47 }
 0x16b   : > { %24843 = vmatprep.mubr.msk.f32.mxu0 %vm204_vm0, %v1933_v54  ;;  %27556 = vmatpush3.bf16.msra.mxu0 %v27553_v47 }
 0x16c   : > { %25129 = vmatmul.mubr.msk.f32.gmra.mrb[2].mxu1 %vm204_vm0, %v4021_v53  ;;  %27630 = vmatprep.subr.bf16.mxu0 %v27629_v57 }
 0x16d   : > { %25131 = vmatprep.mubr.msk.f32.mxu1 %vm204_vm0, %v4022_v56  ;;  %27628 = vmatpush3.bf16.msra.mxu1 %v27553_v47 }
 0x16e   : > { %24844 = vmatmul.mubr.msk.f32.gmra.mrb[4].mxu0 %vm204_vm0, %v1934_v60  ;;  %27702 = vmatprep.subr.bf16.mxu1 %v27629_v57 }
 0x16f   : > { %24846 = vmatprep.mubr.msk.f32.mxu0 %vm204_vm0, %v1935_v63 }
 0x170   : > { %25132 = vmatmul.mubr.msk.f32.gmra.mrb[4].mxu1 %vm204_vm0, %v4023_v62 }
 0x171   : > { %25134 = vmatprep.mubr.msk.f32.mxu1 %vm204_vm0, %v4024_v14 }
 0x172   : > { %24847 = vmatmul.mubr.msk.f32.gmra.mrb[6].mxu0 %vm204_vm0, %v1936_v16 }
 0x173   : > { %24849 = vmatprep.mubr.msk.f32.mxu0 %vm204_vm0, %v1937_v18 }
 0x174   : > { %25135 = vmatmul.mubr.msk.f32.gmra.mrb[6].mxu1 %vm204_vm0, %v4025_v17 }
 0x175   : > { %25137 = vmatprep.mubr.msk.f32.mxu1 %vm204_vm0, %v4026_v9 }
 0x176   : > { %24850 = vmatmul.mubr.msk.f32.gmra.mrb[8].mxu0 %vm204_vm0, %v1938_v13 }
 0x177   : > { %24852 = vmatprep.mubr.msk.f32.mxu0 %vm204_vm0, %v1939_v5 }
 0x178   : > { %25138 = vmatmul.mubr.msk.f32.gmra.mrb[8].mxu1 %vm204_vm0, %v4027_v25 }
 0x179   : > { %25140 = vmatprep.mubr.msk.f32.mxu1 %vm204_vm0, %v4028_v58 }
 0x17a   : > { %24853 = vmatmul.mubr.msk.f32.gmra.mrb[10].mxu0 %vm204_vm0, %v1940_v0 }
 0x17b   : > { %24855 = vmatprep.mubr.msk.f32.mxu0 %vm204_vm0, %v30570_v44  ;;  %v4572_v44 = vld [vmem:[#allocation7 + $0x150] sm:$0xff] }
 0x17c   : > { %25141 = vmatmul.mubr.msk.f32.gmra.mrb[10].mxu1 %vm204_vm0, %v4029_v1 }
 0x17d   : > { %25143 = vmatprep.mubr.msk.f32.mxu1 %vm204_vm0, %v30572_v45  ;;  %v27633_v45 = vpack.c.bf16 %v4573_v30, %v4572_v44 }
 0x17e   : > { %24856 = vmatmul.mubr.msk.f32.gmra.mrb[12].mxu0 %vm204_vm0, %v30580_v51  ;;  %v2171_v51 = vld [vmem:[#allocation2 + $0xc2] sm:$0xff] }
 0x17f   : > { %24858 = vmatprep.mubr.msk.f32.mxu0 %vm204_vm0, %v1943_v2 }
 0x180   : > { %25144 = vmatmul.mubr.msk.f32.gmra.mrb[12].mxu1 %vm204_vm0, %v30584_v55  ;;  %v34830_v55 = vld [vmem:[#allocation43_spill] sm:$0xff] }
 0x181   : > { %25146 = vmatprep.mubr.msk.f32.mxu1 %vm204_vm0, %v4032_v59 }
 0x182   : > { %24859 = vmatmul.mubr.msk.f32.gmra.mrb[14].mxu0 %vm204_vm0, %v1944_v27 }
 0x183   : > { %24869 = vmatprep.mubr.msk.f32.mxu0 %vm204_vm0, %v34806_v3  ;;  %v2172_v3 = vld [vmem:[#allocation2 + $0xca] sm:$0xff] }
 0x184   : > { %25147 = vmatmul.mubr.msk.f32.gmra.mrb[14].mxu1 %vm204_vm0, %v4033_v28 }
 0x185   : > { %25157 = vmatprep.mubr.msk.f32.mxu1 %vm204_vm0, %v34807_v4  ;;  %v2173_v4 = vld [vmem:[#allocation2 + $0xda] sm:$0xff] }
 0x186   : > { %24870 = vmatmul.mubr.msk.f32.vlgmr.msra.gmra.mrb[0].mxu0 %vm204_vm0, %v34808_v6  ;;  %v4261_v6 = vld [vmem:[#allocation2 + $0x19a] sm:$0xff] }
 0x187   : > { %24872 = vmatprep.mubr.msk.f32.mxu0 %vm204_vm0, %v34810_v12  ;;  %27632 = vmatpush3.bf16.msra.mxu0 %v27629_v57  ;;  %v4553_v12 = vld [vmem:[#allocation3 + $0x1] sm:$0xff] }
 0x188   : > { %25158 = vmatmul.mubr.msk.f32.vlgmr.msra.gmra.mrb[0].mxu1 %vm204_vm0, %v34809_v7  ;;  %27634 = vmatprep.subr.bf16.mxu0 %v27633_v45  ;;  %v2174_v7 = vld [vmem:[#allocation2 + $0xe2] sm:$0xff] }
 0x189   : > { %25160 = vmatprep.mubr.msk.f32.mxu1 %vm204_vm0, %v34811_v23  ;;  %27704 = vmatpush3.bf16.msra.mxu1 %v27629_v57  ;;  %v4554_v23 = vld [vmem:[#allocation3 + $0x9] sm:$0xff] }
 0x18a   : > { %24873 = vmatmul.mubr.msk.f32.gmra.mrb[2].mxu0 %vm204_vm0, %v34812_v22  ;;  %27706 = vmatprep.subr.bf16.mxu1 %v27633_v45  ;;  %v4549_v22 = vld [vmem:[#allocation7 + $0x120] sm:$0xff] }
 0x18b   : > { %24875 = vmatprep.mubr.msk.f32.mxu0 %vm204_vm0, %v34814_v20  ;;  %27636 = vmatpush3.bf16.msra.mxu0 %v27633_v45 }
 0x18c   : > { %25161 = vmatmul.mubr.msk.f32.gmra.mrb[2].mxu1 %vm204_vm0, %v34813_v10  ;;  %v4550_v10 = vld [vmem:[#allocation7 + $0x128] sm:$0xff] }
 0x18d   : > { %25163 = vmatprep.mubr.msk.f32.mxu1 %vm204_vm0, %v34815_v24  ;;  %27708 = vmatpush3.bf16.msra.mxu1 %v27633_v45  ;;  %v30815_v20 = vpack.c.bf16 %v4550_v10, %v4549_v22  ;;  %v4551_v24 = vld [vmem:[#allocation7 + $0x130] sm:$0xff] }
 0x18e   : > { %24876 = vmatmul.mubr.msk.f32.gmra.mrb[4].mxu0 %vm204_vm0, %v34816_v34  ;;  %v4552_v34 = vld [vmem:[#allocation7 + $0x138] sm:$0xff] }
 0x18f   : > { %24878 = vmatprep.mubr.msk.f32.mxu0 %vm204_vm0, %v34818_v29  ;;  %27638 = vmatprep.subr.bf16.mxu0 %v30815_v20  ;;  %v4977_v29 = vld [vmem:[#allocation7 + $0x160] sm:$0xff] }
 0x190   : > { %25164 = vmatmul.mubr.msk.f32.gmra.mrb[4].mxu1 %vm204_vm0, %v34817_v15  ;;  %27710 = vmatprep.subr.bf16.mxu1 %v30815_v20  ;;  %v30820_v15 = vpack.c.bf16 %v4552_v34, %v4551_v24 }
 0x191   : > { %25166 = vmatprep.mubr.msk.f32.mxu1 %vm204_vm0, %v34819_v8  ;;  %v4978_v8 = vld [vmem:[#allocation7 + $0x168] sm:$0xff] }
 0x192   : > { %24879 = vmatmul.mubr.msk.f32.gmra.mrb[6].mxu0 %vm204_vm0, %v34820_v39  ;;  %v30824_v39 = vpack.c.bf16 %v4978_v8, %v4977_v29 }
 0x193   : > { %24881 = vmatprep.mubr.msk.f32.mxu0 %vm204_vm0, %v34822_v41 }
 0x194   : > { %25167 = vmatmul.mubr.msk.f32.gmra.mrb[6].mxu1 %vm204_vm0, %v34821_v40  ;;  %v30830_v40 = vld [vmem:[%s34523_s2] ss:$0 sm:$0xff] }
 0x195   : > { %25169 = vmatprep.mubr.msk.f32.mxu1 %vm204_vm0, %v34823_v42 }
 0x196   : > { %24882 = vmatmul.mubr.msk.f32.gmra.mrb[8].mxu0 %vm204_vm0, %v30422_v11  ;;  %v34831_v11 = vld [vmem:[#allocation13_spill] sm:$0xff] }
 0x197   : > { %24884 = vmatprep.mubr.msk.f32.mxu0 %vm204_vm0, %v34825_v48 }
 0x198   : > { %25170 = vmatmul.mubr.msk.f32.gmra.mrb[8].mxu1 %vm204_vm0, %v34824_v43 }
 0x199   : > { %25172 = vmatprep.mubr.msk.f32.mxu1 %vm204_vm0, %v34826_v49 }
 0x19a   : > { %24885 = vmatmul.mubr.msk.f32.gmra.mrb[10].mxu0 %vm204_vm0, %v30438_v31  ;;  %v4262_v31 = vld [vmem:[#allocation2 + $0x1a2] sm:$0xff] }
 0x19b   : > { %24887 = vmatprep.mubr.msk.f32.mxu0 %vm204_vm0, %v2171_v51 }
 0x19c   : > { %25173 = vmatmul.mubr.msk.f32.gmra.mrb[10].mxu1 %vm204_vm0, %v34830_v55 }
 0x19d   : > { %25175 = vmatprep.mubr.msk.f32.mxu1 %vm204_vm0, %v34831_v11 }
 0x19e   : > { %24888 = vmatmul.mubr.msk.f32.gmra.mrb[12].mxu0 %vm204_vm0, %v2172_v3 }
 0x19f   : > { %24890 = vmatprep.mubr.msk.f32.mxu0 %vm204_vm0, %v2173_v4 }
 0x1a0   : > { %25176 = vmatmul.mubr.msk.f32.gmra.mrb[12].mxu1 %vm204_vm0, %v30652_v61 }
 0x1a1   : > { %25178 = vmatprep.mubr.msk.f32.mxu1 %vm204_vm0, %v4261_v6 }
 0x1a2   : > { %24891 = vmatmul.mubr.msk.f32.gmra.mrb[14].mxu0 %vm204_vm0, %v2174_v7 }
 0x1a3   : > { %25189 = vmatprep.mubr.msk.f32.mxu0 %vm204_vm0, %v4553_v12 }
 0x1a4   : > { %25179 = vmatmul.mubr.msk.f32.gmra.mrb[14].mxu1 %vm204_vm0, %v4262_v31 }
 0x1a6   : > { %25190 = vmatmul.mubr.msk.f32.vlgmr.msra.gmra.mrb[16].mxu0 %vm204_vm0, %v4554_v23 }
 0x1a7   : > { %27640 = vmatpush3.bf16.msra.mxu0 %v30815_v20 }
 0x1a8   : > { %27642 = vmatprep.subr.bf16.mxu0 %v30820_v15 }
 0x1ab   : > { %27644 = vmatpush3.bf16.msra.mxu0 %v30820_v15 }
 0x1ac   : > { %27646 = vmatprep.subr.bf16.mxu0 %v30824_v39 }
 0x259   : > { %v24871_v41 = vpop.f32.mrb[0].mxu0 }
 0x25a   : > { %v2397_v42 = vadd.f32 %v24871_v41, %v30830_v40  ;;  %v2294_v48 = vpop.f32.mrb[1].mxu0 }
 0x25b   : > { %v25159_v43 = vpop.f32.mrb[0].mxu1  ;;  %v2396_v61 = vadd.f32 %v30830_v40, %v2294_v48 }
 0x25c   : > { %v4484_v49 = vadd.f32 %v25159_v43, %v30830_v40  ;;  %v4381_v32 = vpop.f32.mrb[1].mxu1  ;;  %v2413_v33 = vmax.f32 %v2397_v42, 0.0 }
 0x25d   : > { %v4483_v35 = vadd.f32 %v30830_v40, %v4381_v32  ;;  %v2412_v37 = vmax.f32 %v2396_v61, 0.0  ;;  %v24874_v19 = vpop.f32.mrb[2].mxu0 }
 0x25e   : > { %v4500_v36 = vmax.f32 %v4484_v49, 0.0  ;;  %2429 = vst.msk [vmem:[#allocation3 + $0x21] sm:$0xff] %vm204_vm0, %v2413_v33  ;;  %v2399_v46 = vadd.f32 %v24874_v19, %v30830_v40  ;;  %v2304_v47 = vpop.f32.mrb[3].mxu0 }
 0x25f   : > { %v4499_v38 = vmax.f32 %v4483_v35, 0.0  ;;  %v25162_v21 = vpop.f32.mrb[2].mxu1  ;;  %2428 = vst.msk [vmem:[#allocation3 + $0x19] sm:$0xff] %vm204_vm0, %v2412_v37  ;;  %v2398_v52 = vadd.f32 %v30830_v40, %v2304_v47 }
 0x260   : > { %4517 = vst.msk [vmem:[#allocation3 + $0xe1] sm:$0xff] %vm204_vm0, %v4500_v36  ;;  %v4486_v50 = vadd.f32 %v25162_v21, %v30830_v40  ;;  %v4391_v26 = vpop.f32.mrb[3].mxu1  ;;  %v2415_v53 = vmax.f32 %v2399_v46, 0.0 }
 0x261   : > { %4516 = vst.msk [vmem:[#allocation3 + $0xd9] sm:$0xff] %vm204_vm0, %v4499_v38  ;;  %v4485_v54 = vadd.f32 %v30830_v40, %v4391_v26  ;;  %v2414_v57 = vmax.f32 %v2398_v52, 0.0  ;;  %v24877_v60 = vpop.f32.mrb[4].mxu0 }
 0x262   : > { %v4502_v56 = vmax.f32 %v4486_v50, 0.0  ;;  %2431 = vst.msk [vmem:[#allocation3 + $0x39] sm:$0xff] %vm204_vm0, %v2415_v53  ;;  %v2401_v63 = vadd.f32 %v24877_v60, %v30830_v40  ;;  %v2314_v16 = vpop.f32.mrb[5].mxu0 }
 0x263   : > { %v4501_v62 = vmax.f32 %v4485_v54, 0.0  ;;  %v25165_v14 = vpop.f32.mrb[4].mxu1  ;;  %2430 = vst.msk [vmem:[#allocation3 + $0x31] sm:$0xff] %vm204_vm0, %v2414_v57  ;;  %v2400_v18 = vadd.f32 %v30830_v40, %v2314_v16 }
 0x264   : > { %4519 = vst.msk [vmem:[#allocation3 + $0xf9] sm:$0xff] %vm204_vm0, %v4502_v56  ;;  %v4488_v17 = vadd.f32 %v25165_v14, %v30830_v40  ;;  %v4401_v9 = vpop.f32.mrb[5].mxu1  ;;  %v2417_v13 = vmax.f32 %v2401_v63, 0.0 }
 0x265   : > { %4518 = vst.msk [vmem:[#allocation3 + $0xf1] sm:$0xff] %vm204_vm0, %v4501_v62  ;;  %v4487_v25 = vadd.f32 %v30830_v40, %v4401_v9  ;;  %v2416_v58 = vmax.f32 %v2400_v18, 0.0  ;;  %v24880_v0 = vpop.f32.mrb[6].mxu0  ;;  %v30862_v51 = vld [vmem:[#allocation3 + $0x21] sm:$0xff] }
 0x266   : > { %v4504_v5 = vmax.f32 %v4488_v17, 0.0  ;;  %2433 = vst.msk [vmem:[#allocation3 + $0x51] sm:$0xff] %vm204_vm0, %v2417_v13  ;;  %v2403_v2 = vadd.f32 %v24880_v0, %v30830_v40  ;;  %v2324_v27 = vpop.f32.mrb[7].mxu0  ;;  %v30854_v28 = vld [vmem:[#allocation3 + $0x19] sm:$0xff] }
 0x267   : > { %v4503_v1 = vmax.f32 %v4487_v25, 0.0  ;;  %v25168_v59 = vpop.f32.mrb[6].mxu1  ;;  %2432 = vst.msk [vmem:[#allocation3 + $0x49] sm:$0xff] %vm204_vm0, %v2416_v58  ;;  %v2402_v30 = vadd.f32 %v30830_v40, %v2324_v27  ;;  %25192 = vmatprep.mubr.msk.f32.mxu0 %vm204_vm0, %v30854_v28 }
 0x268   : > { %4521 = vst.msk [vmem:[#allocation3 + $0x111] sm:$0xff] %vm204_vm0, %v4504_v5  ;;  %v4490_v44 = vadd.f32 %v25168_v59, %v30830_v40  ;;  %v4411_v45 = vpop.f32.mrb[7].mxu1  ;;  %v2419_v55 = vmax.f32 %v2403_v2, 0.0  ;;  %25193 = vmatmul.mubr.msk.f32.gmra.mrb[18].mxu0 %vm204_vm0, %v30862_v51 }
 0x269   : > { %4520 = vst.msk [vmem:[#allocation3 + $0x109] sm:$0xff] %vm204_vm0, %v4503_v1  ;;  %v4489_v3 = vadd.f32 %v30830_v40, %v4411_v45  ;;  %v2418_v4 = vmax.f32 %v2402_v30, 0.0  ;;  %v24883_v6 = vpop.f32.mrb[8].mxu0  ;;  %v30878_v29 = vld [vmem:[#allocation3 + $0x39] sm:$0xff] }
 0x26a   : > { %v4506_v11 = vmax.f32 %v4490_v44, 0.0  ;;  %2435 = vst.msk [vmem:[#allocation3 + $0x69] sm:$0xff] %vm204_vm0, %v2419_v55  ;;  %v2405_v31 = vadd.f32 %v24883_v6, %v30830_v40  ;;  %v2334_v23 = vpop.f32.mrb[9].mxu0  ;;  %v30870_v22 = vld [vmem:[#allocation3 + $0x31] sm:$0xff] }
 0x26b   : > { %v4505_v7 = vmax.f32 %v4489_v3, 0.0  ;;  %v25171_v12 = vpop.f32.mrb[8].mxu1  ;;  %2434 = vst.msk [vmem:[#allocation3 + $0x61] sm:$0xff] %vm204_vm0, %v2418_v4  ;;  %v2404_v24 = vadd.f32 %v30830_v40, %v2334_v23  ;;  %25195 = vmatprep.mubr.msk.f32.mxu0 %vm204_vm0, %v30870_v22  ;;  %v4980_v23 = vld [vmem:[#allocation7 + $0x178] sm:$0xff] }
 0x26c   : > { %4523 = vst.msk [vmem:[#allocation3 + $0x129] sm:$0xff] %vm204_vm0, %v4506_v11  ;;  %v4492_v10 = vadd.f32 %v25171_v12, %v30830_v40  ;;  %v4421_v34 = vpop.f32.mrb[9].mxu1  ;;  %v2421_v8 = vmax.f32 %v2405_v31, 0.0  ;;  %25196 = vmatmul.mubr.msk.f32.gmra.mrb[20].mxu0 %vm204_vm0, %v30878_v29  ;;  %v4979_v12 = vld [vmem:[#allocation7 + $0x170] sm:$0xff] }
 0x26d   : > { %4522 = vst.msk [vmem:[#allocation3 + $0x121] sm:$0xff] %vm204_vm0, %v4505_v7  ;;  %v4491_v41 = vadd.f32 %v30830_v40, %v4421_v34  ;;  %v2420_v43 = vmax.f32 %v2404_v24, 0.0  ;;  %v24886_v48 = vpop.f32.mrb[10].mxu0  ;;  %v30894_v38 = vld [vmem:[#allocation3 + $0x51] sm:$0xff]  ;;  %v4532_v7 = vld [vmem:[#allocation3] sm:$0xff] }
 0x26e   : > { %v4508_v42 = vmax.f32 %v4492_v10, 0.0  ;;  %2437 = vst.msk [vmem:[#allocation3 + $0x81] sm:$0xff] %vm204_vm0, %v2421_v8  ;;  %v2407_v61 = vadd.f32 %v24886_v48, %v30830_v40  ;;  %v2344_v33 = vpop.f32.mrb[11].mxu0  ;;  %v30886_v35 = vld [vmem:[#allocation3 + $0x49] sm:$0xff]  ;;  %v30959_v8 = vpack.c.bf16 %v4980_v23, %v4979_v12  ;;  %v30969_v48 = vld [vmem:[#allocation3 + $0xd9] sm:$0xff] }
 0x26f   : > { %v4507_v49 = vmax.f32 %v4491_v41, 0.0  ;;  %v25174_v32 = vpop.f32.mrb[10].mxu1  ;;  %2436 = vst.msk [vmem:[#allocation3 + $0x79] sm:$0xff] %vm204_vm0, %v2420_v43  ;;  %v2406_v37 = vadd.f32 %v30830_v40, %v2344_v33  ;;  %25198 = vmatprep.mubr.msk.f32.mxu0 %vm204_vm0, %v30886_v35  ;;  %v4533_v10 = vld [vmem:[#allocation3 + $0x8] sm:$0xff]  ;;  %v30964_v41 = vld [vmem:[#allocation3 + $0x18] sm:$0xff]  ;;  %v30986_v33 = vld [vmem:[#allocation3 + $0x30] sm:$0xff] }
 0x270   : > { %4525 = vst.msk [vmem:[#allocation3 + $0x141] sm:$0xff] %vm204_vm0, %v4508_v42  ;;  %v4494_v36 = vadd.f32 %v25174_v32, %v30830_v40  ;;  %v4431_v19 = vpop.f32.mrb[11].mxu1  ;;  %v2423_v46 = vmax.f32 %v2407_v61, 0.0  ;;  %25199 = vmatmul.mubr.msk.f32.gmra.mrb[22].mxu0 %vm204_vm0, %v30894_v38  ;;  %v5207_v42 = vld [vmem:[#allocation7 + $0x180] sm:$0xff]  ;;  %v5208_v43 = vld [vmem:[#allocation7 + $0x188] sm:$0xff]  ;;  %v30976_v61 = vld [vmem:[#allocation3 + $0xe1] sm:$0xff] }
 0x271   : > { %4524 = vst.msk [vmem:[#allocation3 + $0x139] sm:$0xff] %vm204_vm0, %v4507_v49  ;;  %v4493_v21 = vadd.f32 %v30830_v40, %v4431_v19  ;;  %v2422_v50 = vmax.f32 %v2406_v37, 0.0  ;;  %v24889_v52 = vpop.f32.mrb[12].mxu0  ;;  %v30910_v14 = vld [vmem:[#allocation3 + $0x69] sm:$0xff]  ;;  %v30974_v49 = vld [vmem:[#allocation3 + $0x20] sm:$0xff]  ;;  %v30980_v32 = vpack.c.bf16 %v5208_v43, %v5207_v42  ;;  %v31132_v43 = vld [vmem:[#allocation3 + $0xf8] sm:$0xff] }
 0x272   : > { %v4510_v47 = vmax.f32 %v4494_v36, 0.0  ;;  %2439 = vst.msk [vmem:[#allocation3 + $0x99] sm:$0xff] %vm204_vm0, %v2423_v46  ;;  %v2409_v53 = vadd.f32 %v24889_v52, %v30830_v40  ;;  %v2354_v56 = vpop.f32.mrb[13].mxu0  ;;  %v30902_v57 = vld [vmem:[#allocation3 + $0x61] sm:$0xff]  ;;  %v30988_v36 = vld [vmem:[#allocation3 + $0xf1] sm:$0xff]  ;;  %v30998_v37 = vld [vmem:[#allocation3 + $0xf9] sm:$0xff] }
 0x273   : > { %v4509_v26 = vmax.f32 %v4493_v21, 0.0  ;;  %v25177_v54 = vpop.f32.mrb[12].mxu1  ;;  %2438 = vst.msk [vmem:[#allocation3 + $0x91] sm:$0xff] %vm204_vm0, %v2422_v50  ;;  %v2408_v62 = vadd.f32 %v30830_v40, %v2354_v56  ;;  %25201 = vmatprep.mubr.msk.f32.mxu0 %vm204_vm0, %v30902_v57  ;;  %v31006_v19 = vld [vmem:[#allocation3 + $0x48] sm:$0xff]  ;;  %v31016_v21 = vld [vmem:[#allocation3 + $0x111] sm:$0xff]  ;;  %v31110_v12 = vld [vmem:[#allocation3 + $0xe0] sm:$0xff] }
 0x274   : > { %4527 = vst.msk [vmem:[#allocation3 + $0x159] sm:$0xff] %vm204_vm0, %v4510_v47  ;;  %v4496_v60 = vadd.f32 %v25177_v54, %v30830_v40  ;;  %v4441_v63 = vpop.f32.mrb[13].mxu1  ;;  %v2425_v16 = vmax.f32 %v2409_v53, 0.0  ;;  %25202 = vmatmul.mubr.msk.f32.gmra.mrb[24].mxu0 %vm204_vm0, %v30910_v14  ;;  %v31008_v46 = vld [vmem:[#allocation3 + $0x109] sm:$0xff]  ;;  %34833 = vst [vmem:[#allocation15_spill] sm:$0xff] %v31016_v21  ;;  %v31022_v47 = vld [vmem:[#allocation3 + $0x60] sm:$0xff] }
 0x275   : > { %4526 = vst.msk [vmem:[#allocation3 + $0x151] sm:$0xff] %vm204_vm0, %v4509_v26  ;;  %v4495_v17 = vadd.f32 %v30830_v40, %v4441_v63  ;;  %v2424_v9 = vmax.f32 %v2408_v62, 0.0  ;;  %v24892_v13 = vpop.f32.mrb[14].mxu0  ;;  %v30926_v44 = vld [vmem:[#allocation3 + $0x81] sm:$0xff]  ;;  %34832 = vst [vmem:[#allocation14_spill] sm:$0xff] %v31008_v46  ;;  %v31032_v26 = vld [vmem:[#allocation3 + $0x129] sm:$0xff] }
 0x276   : > { %v4512_v18 = vmax.f32 %v4496_v60, 0.0  ;;  %2441 = vst.msk [vmem:[#allocation3 + $0xb1] sm:$0xff] %vm204_vm0, %v2425_v16  ;;  %v2411_v5 = vadd.f32 %v24892_v13, %v30830_v40  ;;  %v2364_v0 = vpop.f32.mrb[15].mxu0  ;;  %v30918_v1 = vld [vmem:[#allocation3 + $0x79] sm:$0xff]  ;;  %34834 = vst [vmem:[#allocation16_spill] sm:$0xff] %v31022_v47  ;;  %v31024_v50 = vld [vmem:[#allocation3 + $0x121] sm:$0xff] }
 0x277   : > { %v4511_v25 = vmax.f32 %v4495_v17, 0.0  ;;  %v25180_v58 = vpop.f32.mrb[14].mxu1  ;;  %2440 = vst.msk [vmem:[#allocation3 + $0xa9] sm:$0xff] %vm204_vm0, %v2424_v9  ;;  %v2410_v59 = vadd.f32 %v30830_v40, %v2364_v0  ;;  %25204 = vmatprep.mubr.msk.f32.mxu0 %vm204_vm0, %v30918_v1  ;;  %34835 = vst [vmem:[#allocation17_spill] sm:$0xff] %v31024_v50  ;;  %v31030_v52 = vld [vmem:[#allocation3 + $0x68] sm:$0xff]  ;;  %v31038_v53 = vld [vmem:[#allocation3 + $0x78] sm:$0xff] }
 0x278   : > { %4529 = vst.msk [vmem:[#allocation3 + $0x171] sm:$0xff] %vm204_vm0, %v4512_v18  ;;  %v4498_v2 = vadd.f32 %v25180_v58, %v30830_v40  ;;  %v4451_v27 = vpop.f32.mrb[15].mxu1  ;;  %v2427_v30 = vmax.f32 %v2411_v5, 0.0  ;;  %25205 = vmatmul.mubr.msk.f32.gmra.mrb[26].mxu0 %vm204_vm0, %v30926_v44  ;;  %34836 = vst [vmem:[#allocation18_spill] sm:$0xff] %v31030_v52  ;;  %v31040_v54 = vld [vmem:[#allocation3 + $0x139] sm:$0xff]  ;;  %v31048_v60 = vld [vmem:[#allocation3 + $0x141] sm:$0xff] }
 0x279   : > { %4528 = vst.msk [vmem:[#allocation3 + $0x169] sm:$0xff] %vm204_vm0, %v4511_v25  ;;  %v4497_v45 = vadd.f32 %v30830_v40, %v4451_v27  ;;  %v2426_v3 = vmax.f32 %v2410_v59, 0.0  ;;  %v30939_v6 = vld [vmem:[#allocation3 + $0x99] sm:$0xff]  ;;  %34837 = vst [vmem:[#allocation21_spill] sm:$0xff] %v31032_v26  ;;  %v4960_v13 = vld [vmem:[#allocation3 + $0x2] sm:$0xff] }
 0x27a   : > { %v4514_v55 = vmax.f32 %v4498_v2, 0.0  ;;  %2443 = vst.msk [vmem:[#allocation3 + $0xc9] sm:$0xff] %vm204_vm0, %v2427_v30  ;;  %v30933_v4 = vld [vmem:[#allocation3 + $0x91] sm:$0xff]  ;;  %34838 = vst [vmem:[#allocation22_spill] sm:$0xff] %v31038_v53  ;;  %v31046_v56 = vld [vmem:[#allocation3 + $0x80] sm:$0xff] }
 0x27b   : > { %v4513_v11 = vmax.f32 %v4497_v45, 0.0  ;;  %2442 = vst.msk [vmem:[#allocation3 + $0xc1] sm:$0xff] %vm204_vm0, %v2426_v3  ;;  %25207 = vmatprep.mubr.msk.f32.mxu0 %vm204_vm0, %v30933_v4  ;;  %34839 = vst [vmem:[#allocation23_spill] sm:$0xff] %v31040_v54  ;;  %v31054_v62 = vld [vmem:[#allocation3 + $0x90] sm:$0xff]  ;;  %v31062_v16 = vld [vmem:[#allocation3 + $0x98] sm:$0xff] }
 0x27c   : > { %4531 = vst.msk [vmem:[#allocation3 + $0x189] sm:$0xff] %vm204_vm0, %v4514_v55  ;;  %25208 = vmatmul.mubr.msk.f32.gmra.mrb[28].mxu0 %vm204_vm0, %v30939_v6  ;;  %34840 = vst [vmem:[#allocation24_spill] sm:$0xff] %v31046_v56  ;;  %v31056_v63 = vld [vmem:[#allocation3 + $0x151] sm:$0xff]  ;;  %v31064_v17 = vld [vmem:[#allocation3 + $0x159] sm:$0xff] }
 0x27d   : > { %4530 = vst.msk [vmem:[#allocation3 + $0x181] sm:$0xff] %vm204_vm0, %v4513_v11  ;;  %v30948_v31 = vld [vmem:[#allocation3 + $0xb1] sm:$0xff]  ;;  %34841 = vst [vmem:[#allocation25_spill] sm:$0xff] %v31048_v60  ;;  %v5209_v0 = vld [vmem:[#allocation7 + $0x190] sm:$0xff] }
 0x27e   : > { %v30944_v40 = vld [vmem:[#allocation3 + $0xa9] sm:$0xff]  ;;  %34842 = vst [vmem:[#allocation26_spill] sm:$0xff] %v31054_v62  ;;  %34843 = vst [vmem:[#allocation27_spill] sm:$0xff] %v31056_v63  ;;  %v31098_v45 = vld [vmem:[#allocation3 + $0x1a] sm:$0xff] }
 0x27f   : > { %25210 = vmatprep.mubr.msk.f32.mxu0 %vm204_vm0, %v30944_v40  ;;  %34844 = vst [vmem:[#allocation28_spill] sm:$0xff] %v31062_v16  ;;  %34845 = vst [vmem:[#allocation29_spill] sm:$0xff] %v31064_v17  ;;  %v31070_v18 = vld [vmem:[#allocation3 + $0xa8] sm:$0xff]  ;;  %v31078_v25 = vld [vmem:[#allocation3 + $0xb0] sm:$0xff] }
 0x280   : > { %25211 = vmatmul.mubr.msk.f32.gmra.mrb[30].mxu0 %vm204_vm0, %v30948_v31  ;;  %34846 = vst [vmem:[#allocation30_spill] sm:$0xff] %v31070_v18  ;;  %v31072_v9 = vld [vmem:[#allocation3 + $0x169] sm:$0xff]  ;;  %34848 = vst [vmem:[#allocation32_spill] sm:$0xff] %v31078_v25  ;;  %v31080_v5 = vld [vmem:[#allocation3 + $0x171] sm:$0xff] }
 0x281   : > { %25221 = vmatprep.mubr.msk.f32.mxu0 %vm204_vm0, %v4532_v7  ;;  %v30957_v34 = vld [vmem:[#allocation3 + $0xc9] sm:$0xff]  ;;  %34847 = vst [vmem:[#allocation31_spill] sm:$0xff] %v31072_v9  ;;  %34849 = vst [vmem:[#allocation33_spill] sm:$0xff] %v31080_v5  ;;  %v5438_v3 = vld [vmem:[#allocation7 + $0x1a8] sm:$0xff] }
 0x282   : > { %v30953_v24 = vld [vmem:[#allocation3 + $0xc1] sm:$0xff]  ;;  %v4961_v59 = vld [vmem:[#allocation3 + $0xa] sm:$0xff]  ;;  %v31103_v11 = vld [vmem:[#allocation3 + $0xd8] sm:$0xff] }
 0x283   : > { %25477 = vmatprep.mubr.msk.f32.mxu1 %vm204_vm0, %v30953_v24  ;;  %v31086_v58 = vld [vmem:[#allocation3 + $0xc0] sm:$0xff]  ;;  %v5210_v2 = vld [vmem:[#allocation7 + $0x198] sm:$0xff]  ;;  %v5437_v55 = vld [vmem:[#allocation7 + $0x1a0] sm:$0xff] }
 0x284   : > { %25222 = vmatmul.mubr.msk.f32.vlgmr.msra.gmra.mrb[16].mxu0 %vm204_vm0, %v4533_v10  ;;  %25478 = vmatmul.mubr.msk.f32.vlgmr.msra.gmra.mrb[16].mxu1 %vm204_vm0, %v30957_v34  ;;  %34850 = vst [vmem:[#allocation34_spill] sm:$0xff] %v31086_v58  ;;  %v31091_v27 = vld [vmem:[#allocation3 + $0xc8] sm:$0xff]  ;;  %v31093_v30 = vpack.c.bf16 %v5210_v2, %v5209_v0  ;;  %v31114_v23 = vpack.c.bf16 %v5438_v3, %v5437_v55  ;;  %v31120_v10 = vld [vmem:[#allocation3 + $0x32] sm:$0xff]  ;;  %v31158_v55 = vld [vmem:[#allocation3 + $0x120] sm:$0xff] }
 0x285   : > { %25224 = vmatprep.mubr.msk.f32.mxu0 %vm204_vm0, %v30964_v41  ;;  %27648 = vmatpush3.bf16.msra.mxu0 %v30824_v39  ;;  %34851 = vst [vmem:[#allocation35_spill] sm:$0xff] %v31091_v27  ;;  %v31108_v7 = vld [vmem:[#allocation3 + $0x22] sm:$0xff]  ;;  %v31122_v42 = vld [vmem:[#allocation3 + $0xf0] sm:$0xff] }
 0x286   : > { %25480 = vmatprep.mubr.msk.f32.mxu1 %vm204_vm0, %v30969_v48  ;;  %27712 = vmatpush3.bf16.msra.mxu1 %v30815_v20  ;;  %v30996_v20 = vld [vmem:[#allocation3 + $0x38] sm:$0xff]  ;;  %v31142_v0 = vld [vmem:[#allocation3 + $0x108] sm:$0xff]  ;;  %v31150_v2 = vld [vmem:[#allocation3 + $0x110] sm:$0xff] }
 0x287   : > { %27650 = vmatprep.subr.bf16.mxu0 %v30959_v8  ;;  %27714 = vmatprep.subr.bf16.mxu1 %v30820_v15  ;;  %v31164_v3 = vld [vmem:[#allocation3 + $0x6a] sm:$0xff] }
 0x288   : > { %25225 = vmatmul.mubr.msk.f32.gmra.mrb[18].mxu0 %vm204_vm0, %v30974_v49  ;;  %25481 = vmatmul.mubr.msk.f32.gmra.mrb[18].mxu1 %vm204_vm0, %v30976_v61  ;;  %34855 = vst [vmem:[#allocation39_spill] sm:$0xff] %v31164_v3 }
 0x289   : > { %25227 = vmatprep.mubr.msk.f32.mxu0 %vm204_vm0, %v30986_v33  ;;  %25483 = vmatprep.mubr.msk.f32.mxu1 %vm204_vm0, %v30988_v36 }
 0x28a   : > { %27652 = vmatpush3.bf16.msra.mxu0 %v30959_v8  ;;  %27716 = vmatpush3.bf16.msra.mxu1 %v30820_v15  ;;  %v31014_v15 = vld [vmem:[#allocation3 + $0x50] sm:$0xff] }
 0x28b   : > { %27654 = vmatprep.subr.bf16.mxu0 %v30980_v32  ;;  %27718 = vmatprep.subr.bf16.mxu1 %v30824_v39 }
 0x28c   : > { %25228 = vmatmul.mubr.msk.f32.gmra.mrb[20].mxu0 %vm204_vm0, %v30996_v20  ;;  %25484 = vmatmul.mubr.msk.f32.gmra.mrb[20].mxu1 %vm204_vm0, %v30998_v37 }
 0x28d   : > { %25230 = vmatprep.mubr.msk.f32.mxu0 %vm204_vm0, %v31006_v19  ;;  %25486 = vmatprep.mubr.msk.f32.mxu1 %vm204_vm0, %v31008_v46 }
 0x290   : > { %25231 = vmatmul.mubr.msk.f32.gmra.mrb[22].mxu0 %vm204_vm0, %v31014_v15  ;;  %25487 = vmatmul.mubr.msk.f32.gmra.mrb[22].mxu1 %vm204_vm0, %v31016_v21  ;;  %v5439_v21 = vld [vmem:[#allocation7 + $0x1b0] sm:$0xff] }
 0x291   : > { %25233 = vmatprep.mubr.msk.f32.mxu0 %vm204_vm0, %v31022_v47  ;;  %25489 = vmatprep.mubr.msk.f32.mxu1 %vm204_vm0, %v31024_v50  ;;  %v31206_v50 = vld [vmem:[#allocation3 + $0x168] sm:$0xff] }
 0x294   : > { %25234 = vmatmul.mubr.msk.f32.gmra.mrb[24].mxu0 %vm204_vm0, %v31030_v52  ;;  %25490 = vmatmul.mubr.msk.f32.gmra.mrb[24].mxu1 %vm204_vm0, %v31032_v26  ;;  %v31190_v26 = vld [vmem:[#allocation3 + $0x150] sm:$0xff] }
 0x295   : > { %25236 = vmatprep.mubr.msk.f32.mxu0 %vm204_vm0, %v31038_v53  ;;  %25492 = vmatprep.mubr.msk.f32.mxu1 %vm204_vm0, %v31040_v54  ;;  %v31188_v54 = vld [vmem:[#allocation3 + $0x92] sm:$0xff] }
 0x296   : > { %34858 = vst [vmem:[#allocation42_spill] sm:$0xff] %v31188_v54 }
 0x298   : > { %25237 = vmatmul.mubr.msk.f32.gmra.mrb[26].mxu0 %vm204_vm0, %v31046_v56  ;;  %25493 = vmatmul.mubr.msk.f32.gmra.mrb[26].mxu1 %vm204_vm0, %v31048_v60  ;;  %v31182_v60 = vld [vmem:[#allocation3 + $0x140] sm:$0xff] }
 0x299   : > { %25239 = vmatprep.mubr.msk.f32.mxu0 %vm204_vm0, %v31054_v62  ;;  %25495 = vmatprep.mubr.msk.f32.mxu1 %vm204_vm0, %v31056_v63  ;;  %v31180_v63 = vld [vmem:[#allocation3 + $0x82] sm:$0xff] }
 0x29a   : > { %34857 = vst [vmem:[#allocation41_spill] sm:$0xff] %v31180_v63 }
 0x29c   : > { %25240 = vmatmul.mubr.msk.f32.gmra.mrb[28].mxu0 %vm204_vm0, %v31062_v16  ;;  %25496 = vmatmul.mubr.msk.f32.gmra.mrb[28].mxu1 %vm204_vm0, %v31064_v17  ;;  %v31174_v17 = vld [vmem:[#allocation3 + $0x138] sm:$0xff] }
 0x29d   : > { %25242 = vmatprep.mubr.msk.f32.mxu0 %vm204_vm0, %v31070_v18  ;;  %25498 = vmatprep.mubr.msk.f32.mxu1 %vm204_vm0, %v31072_v9  ;;  %v31172_v9 = vld [vmem:[#allocation3 + $0x7a] sm:$0xff] }
 0x29e   : > { %34856 = vst [vmem:[#allocation40_spill] sm:$0xff] %v31172_v9 }
 0x2a0   : > { %25243 = vmatmul.mubr.msk.f32.gmra.mrb[30].mxu0 %vm204_vm0, %v31078_v25  ;;  %25499 = vmatmul.mubr.msk.f32.gmra.mrb[30].mxu1 %vm204_vm0, %v31080_v5  ;;  %v31166_v5 = vld [vmem:[#allocation3 + $0x128] sm:$0xff] }
 0x2a1   : > { %25509 = vmatprep.mubr.msk.f32.mxu1 %vm204_vm0, %v31086_v58  ;;  %25253 = vmatprep.mubr.msk.f32.mxu0 %vm204_vm0, %v4960_v13  ;;  %v31140_v13 = vld [vmem:[#allocation3 + $0x4a] sm:$0xff] }
 0x2a2   : > { %34852 = vst [vmem:[#allocation36_spill] sm:$0xff] %v31140_v13 }
 0x2a4   : > { %25254 = vmatmul.mubr.msk.f32.vlgmr.msra.gmra.mrb[16].mxu0 %vm204_vm0, %v4961_v59  ;;  %25510 = vmatmul.mubr.msk.f32.vlgmr.msra.gmra.mrb[16].mxu1 %vm204_vm0, %v31091_v27  ;;  %v31156_v59 = vld [vmem:[#allocation3 + $0x62] sm:$0xff] }
 0x2a5   : > { %25256 = vmatprep.mubr.msk.f32.mxu0 %vm204_vm0, %v31098_v45  ;;  %27656 = vmatpush3.bf16.msra.mxu0 %v30980_v32  ;;  %34854 = vst [vmem:[#allocation38_spill] sm:$0xff] %v31156_v59 }
 0x2a6   : > { %25512 = vmatprep.mubr.msk.f32.mxu1 %vm204_vm0, %v31103_v11  ;;  %27720 = vmatpush3.bf16.msra.mxu1 %v30824_v39  ;;  %v31130_v39 = vld [vmem:[#allocation3 + $0x3a] sm:$0xff] }
 0x2a7   : > { %27658 = vmatprep.subr.bf16.mxu0 %v31093_v30  ;;  %27722 = vmatprep.subr.bf16.mxu1 %v30959_v8 }
 0x2a8   : > { %25257 = vmatmul.mubr.msk.f32.gmra.mrb[18].mxu0 %vm204_vm0, %v31108_v7  ;;  %25513 = vmatmul.mubr.msk.f32.gmra.mrb[18].mxu1 %vm204_vm0, %v31110_v12 }
 0x2a9   : > { %25259 = vmatprep.mubr.msk.f32.mxu0 %vm204_vm0, %v31120_v10  ;;  %25515 = vmatprep.mubr.msk.f32.mxu1 %vm204_vm0, %v31122_v42 }
 0x2aa   : > { %27660 = vmatpush3.bf16.msra.mxu0 %v31093_v30  ;;  %27724 = vmatpush3.bf16.msra.mxu1 %v30959_v8  ;;  %v31148_v8 = vld [vmem:[#allocation3 + $0x52] sm:$0xff] }
 0x2ab   : > { %27662 = vmatprep.subr.bf16.mxu0 %v31114_v23  ;;  %27726 = vmatprep.subr.bf16.mxu1 %v30980_v32  ;;  %34853 = vst [vmem:[#allocation37_spill] sm:$0xff] %v31148_v8 }
 0x2ac   : > { %25260 = vmatmul.mubr.msk.f32.gmra.mrb[20].mxu0 %vm204_vm0, %v31130_v39  ;;  %25516 = vmatmul.mubr.msk.f32.gmra.mrb[20].mxu1 %vm204_vm0, %v31132_v43 }
 0x2ad   : > { %25262 = vmatprep.mubr.msk.f32.mxu0 %vm204_vm0, %v31140_v13  ;;  %25518 = vmatprep.mubr.msk.f32.mxu1 %vm204_vm0, %v31142_v0  ;;  %v5668_v13 = vld [vmem:[#allocation7 + $0x1c8] sm:$0xff] }
 0x2b0   : > { %25263 = vmatmul.mubr.msk.f32.gmra.mrb[22].mxu0 %vm204_vm0, %v31148_v8  ;;  %25519 = vmatmul.mubr.msk.f32.gmra.mrb[22].mxu1 %vm204_vm0, %v31150_v2  ;;  %v5440_v8 = vld [vmem:[#allocation7 + $0x1b8] sm:$0xff] }
 0x2b1   : > { %25265 = vmatprep.mubr.msk.f32.mxu0 %vm204_vm0, %v31156_v59  ;;  %25521 = vmatprep.mubr.msk.f32.mxu1 %vm204_vm0, %v31158_v55  ;;  %v31214_v59 = vld [vmem:[#allocation3 + $0x170] sm:$0xff]  ;;  %v31228_v46 = vpack.c.bf16 %v5440_v8, %v5439_v21  ;;  %v31242_v21 = vld [vmem:[#allocation3 + $0xe2] sm:$0xff] }
 0x2b2   : > { %v31252_v8 = vld [vmem:[#allocation3 + $0xf2] sm:$0xff] }
 0x2b4   : > { %25266 = vmatmul.mubr.msk.f32.gmra.mrb[24].mxu0 %vm204_vm0, %v31164_v3  ;;  %25522 = vmatmul.mubr.msk.f32.gmra.mrb[24].mxu1 %vm204_vm0, %v31166_v5  ;;  %v31198_v3 = vld [vmem:[#allocation3 + $0x158] sm:$0xff] }
 0x2b5   : > { %25268 = vmatprep.mubr.msk.f32.mxu0 %vm204_vm0, %v31172_v9  ;;  %25524 = vmatprep.mubr.msk.f32.mxu1 %vm204_vm0, %v31174_v17  ;;  %v31196_v9 = vld [vmem:[#allocation3 + $0x9a] sm:$0xff] }
 0x2b6   : > { %34859 = vst [vmem:[#allocation19_spill] sm:$0xff] %v31196_v9 }
 0x2b8   : > { %25269 = vmatmul.mubr.msk.f32.gmra.mrb[26].mxu0 %vm204_vm0, %v31180_v63  ;;  %25525 = vmatmul.mubr.msk.f32.gmra.mrb[26].mxu1 %vm204_vm0, %v31182_v60  ;;  %v31204_v63 = vld [vmem:[#allocation3 + $0xaa] sm:$0xff] }
 0x2b9   : > { %25271 = vmatprep.mubr.msk.f32.mxu0 %vm204_vm0, %v31188_v54  ;;  %25527 = vmatprep.mubr.msk.f32.mxu1 %vm204_vm0, %v31190_v26  ;;  %34860 = vst [vmem:[#allocation20_spill] sm:$0xff] %v31204_v63  ;;  %v31212_v54 = vld [vmem:[#allocation3 + $0xb2] sm:$0xff] }
 0x2ba   : > { %34861 = vst [vmem:[#allocation43_spill] sm:$0xff] %v31212_v54 }
 0x2bc   : > { %25272 = vmatmul.mubr.msk.f32.gmra.mrb[28].mxu0 %vm204_vm0, %v31196_v9  ;;  %25528 = vmatmul.mubr.msk.f32.gmra.mrb[28].mxu1 %vm204_vm0, %v31198_v3  ;;  %v31220_v9 = vld [vmem:[#allocation3 + $0xc2] sm:$0xff] }
 0x2bd   : > { %25274 = vmatprep.mubr.msk.f32.mxu0 %vm204_vm0, %v31204_v63  ;;  %25530 = vmatprep.mubr.msk.f32.mxu1 %vm204_vm0, %v31206_v50  ;;  %v31226_v63 = vld [vmem:[#allocation3 + $0xca] sm:$0xff] }
 0x2c0   : > { %25275 = vmatmul.mubr.msk.f32.gmra.mrb[30].mxu0 %vm204_vm0, %v31212_v54  ;;  %25531 = vmatmul.mubr.msk.f32.gmra.mrb[30].mxu1 %vm204_vm0, %v31214_v59  ;;  %v5667_v54 = vld [vmem:[#allocation7 + $0x1c0] sm:$0xff] }
 0x2c1   : > { %25285 = vmatprep.mubr.msk.f32.mxu0 %vm204_vm0, %v30964_v41  ;;  %25541 = vmatprep.mubr.msk.f32.mxu1 %vm204_vm0, %v31220_v9  ;;  %v31237_v41 = vld [vmem:[#allocation3 + $0xda] sm:$0xff] }
 0x2c4   : > { %25286 = vmatmul.mubr.msk.f32.vlgmr.msra.gmra.mrb[16].mxu0 %vm204_vm0, %v30974_v49  ;;  %25542 = vmatmul.mubr.msk.f32.vlgmr.msra.gmra.mrb[16].mxu1 %vm204_vm0, %v31226_v63  ;;  %v31246_v49 = vpack.c.bf16 %v5668_v13, %v5667_v54  ;;  %v31268_v54 = vld [vmem:[#allocation3 + $0x10a] sm:$0xff]  ;;  %v31280_v13 = vld [vmem:[#allocation3 + $0x122] sm:$0xff] }
 0x2c5   : > { %25288 = vmatprep.mubr.msk.f32.mxu0 %vm204_vm0, %v30986_v33  ;;  %27664 = vmatpush3.bf16.msra.mxu0 %v31114_v23 }
 0x2c6   : > { %25544 = vmatprep.mubr.msk.f32.mxu1 %vm204_vm0, %v31237_v41  ;;  %27728 = vmatpush3.bf16.msra.mxu1 %v30980_v32  ;;  %v31260_v32 = vld [vmem:[#allocation3 + $0xfa] sm:$0xff] }
 0x2c7   : > { %27666 = vmatprep.subr.bf16.mxu0 %v31228_v46  ;;  %27730 = vmatprep.subr.bf16.mxu1 %v31093_v30 }
 0x2c8   : > { %25289 = vmatmul.mubr.msk.f32.gmra.mrb[18].mxu0 %vm204_vm0, %v30996_v20  ;;  %25545 = vmatmul.mubr.msk.f32.gmra.mrb[18].mxu1 %vm204_vm0, %v31242_v21 }
 0x2c9   : > { %25291 = vmatprep.mubr.msk.f32.mxu0 %vm204_vm0, %v31006_v19  ;;  %25547 = vmatprep.mubr.msk.f32.mxu1 %vm204_vm0, %v31252_v8 }
 0x2ca   : > { %27668 = vmatpush3.bf16.msra.mxu0 %v31228_v46  ;;  %27732 = vmatpush3.bf16.msra.mxu1 %v31093_v30  ;;  %v31274_v30 = vld [vmem:[#allocation3 + $0x112] sm:$0xff] }
 0x2cb   : > { %27670 = vmatprep.subr.bf16.mxu0 %v31246_v49  ;;  %27734 = vmatprep.subr.bf16.mxu1 %v31114_v23 }
 0x2cc   : > { %25292 = vmatmul.mubr.msk.f32.gmra.mrb[20].mxu0 %vm204_vm0, %v31014_v15  ;;  %25548 = vmatmul.mubr.msk.f32.gmra.mrb[20].mxu1 %vm204_vm0, %v31260_v32 }
 0x2cd   : > { %25294 = vmatprep.mubr.msk.f32.mxu0 %vm204_vm0, %v31022_v47  ;;  %25550 = vmatprep.mubr.msk.f32.mxu1 %vm204_vm0, %v31268_v54  ;;  %v31286_v47 = vld [vmem:[#allocation3 + $0x12a] sm:$0xff] }
 0x2d0   : > { %25295 = vmatmul.mubr.msk.f32.gmra.mrb[22].mxu0 %vm204_vm0, %v31030_v52  ;;  %25551 = vmatmul.mubr.msk.f32.gmra.mrb[22].mxu1 %vm204_vm0, %v31274_v30  ;;  %v31292_v52 = vld [vmem:[#allocation3 + $0x13a] sm:$0xff] }
 0x2d1   : > { %25297 = vmatprep.mubr.msk.f32.mxu0 %vm204_vm0, %v31038_v53  ;;  %25553 = vmatprep.mubr.msk.f32.mxu1 %vm204_vm0, %v31280_v13  ;;  %v31298_v53 = vld [vmem:[#allocation3 + $0x142] sm:$0xff] }
 0x2d4   : > { %25298 = vmatmul.mubr.msk.f32.gmra.mrb[24].mxu0 %vm204_vm0, %v31046_v56  ;;  %25554 = vmatmul.mubr.msk.f32.gmra.mrb[24].mxu1 %vm204_vm0, %v31286_v47  ;;  %v31304_v56 = vld [vmem:[#allocation3 + $0x152] sm:$0xff] }
 0x2d5   : > { %25300 = vmatprep.mubr.msk.f32.mxu0 %vm204_vm0, %v31054_v62  ;;  %25556 = vmatprep.mubr.msk.f32.mxu1 %vm204_vm0, %v31292_v52  ;;  %34862 = vst [vmem:[#allocation13_spill] sm:$0xff] %v31304_v56  ;;  %v31310_v62 = vld [vmem:[#allocation3 + $0x15a] sm:$0xff] }
 0x2d8   : > { %25301 = vmatmul.mubr.msk.f32.gmra.mrb[26].mxu0 %vm204_vm0, %v31062_v16  ;;  %25557 = vmatmul.mubr.msk.f32.gmra.mrb[26].mxu1 %vm204_vm0, %v31298_v53  ;;  %v31316_v16 = vld [vmem:[#allocation3 + $0x16a] sm:$0xff] }
 0x2d9   : > { %25303 = vmatprep.mubr.msk.f32.mxu0 %vm204_vm0, %v31070_v18  ;;  %25559 = vmatprep.mubr.msk.f32.mxu1 %vm204_vm0, %v31304_v56  ;;  %34863 = vst [vmem:[#allocation44_spill] sm:$0xff] %v31316_v16  ;;  %v31322_v18 = vld [vmem:[#allocation3 + $0x172] sm:$0xff]  ;;  %v5670_v56 = vld [vmem:[#allocation7 + $0x1d8] sm:$0xff] }
 0x2dc   : > { %25304 = vmatmul.mubr.msk.f32.gmra.mrb[28].mxu0 %vm204_vm0, %v31078_v25  ;;  %25560 = vmatmul.mubr.msk.f32.gmra.mrb[28].mxu1 %vm204_vm0, %v31310_v62  ;;  %v5669_v25 = vld [vmem:[#allocation7 + $0x1d0] sm:$0xff] }
 0x2dd   : > { %25306 = vmatprep.mubr.msk.f32.mxu0 %vm204_vm0, %v31086_v58  ;;  %25562 = vmatprep.mubr.msk.f32.mxu1 %vm204_vm0, %v31316_v16  ;;  %v31332_v58 = vpack.c.bf16 %v5670_v56, %v5669_v25  ;;  %v5899_v16 = vld [vmem:[#allocation7 + $0x1e8] sm:$0xff]  ;;  %v34878_v25 = vld [vmem:[#allocation19_spill] sm:$0xff] }
 0x2de   : > { %v34876_v56 = vld [vmem:[#allocation42_spill] sm:$0xff] }
 0x2e0   : > { %25307 = vmatmul.mubr.msk.f32.gmra.mrb[30].mxu0 %vm204_vm0, %v31091_v27  ;;  %25563 = vmatmul.mubr.msk.f32.gmra.mrb[30].mxu1 %vm204_vm0, %v31322_v18  ;;  %v5898_v27 = vld [vmem:[#allocation7 + $0x1e0] sm:$0xff] }
 0x2e1   : > { %25317 = vmatprep.mubr.msk.f32.mxu0 %vm204_vm0, %v30854_v28  ;;  %25573 = vmatprep.mubr.msk.f32.mxu1 %vm204_vm0, %v31103_v11  ;;  %v31346_v28 = vpack.c.bf16 %v5899_v16, %v5898_v27  ;;  %v34877_v16 = vld [vmem:[#allocation27_spill] sm:$0xff]  ;;  %v34880_v27 = vld [vmem:[#allocation20_spill] sm:$0xff] }
 0x2e4   : > { %25318 = vmatmul.mubr.msk.f32.vlgmr.msra.gmra.mrb[16].mxu0 %vm204_vm0, %v30862_v51  ;;  %25574 = vmatmul.mubr.msk.f32.vlgmr.msra.gmra.mrb[16].mxu1 %vm204_vm0, %v31110_v12  ;;  %v31396_v51 = vld [vmem:[#allocation3 + $0x180] sm:$0xff] }
 0x2e5   : > { %25320 = vmatprep.mubr.msk.f32.mxu0 %vm204_vm0, %v30870_v22  ;;  %27672 = vmatpush3.bf16.msra.mxu0 %v31246_v49  ;;  %v31402_v22 = vld [vmem:[#allocation3 + $0x188] sm:$0xff] }
 0x2e6   : > { %25576 = vmatprep.mubr.msk.f32.mxu1 %vm204_vm0, %v31122_v42  ;;  %27736 = vmatpush3.bf16.msra.mxu1 %v31114_v23  ;;  %v34883_v23 = vld [vmem:[#allocation33_spill] sm:$0xff] }
 0x2e7   : > { %27674 = vmatprep.subr.bf16.mxu0 %v31332_v58  ;;  %27738 = vmatprep.subr.bf16.mxu1 %v31228_v46 }
 0x2e8   : > { %25321 = vmatmul.mubr.msk.f32.gmra.mrb[18].mxu0 %vm204_vm0, %v30878_v29  ;;  %25577 = vmatmul.mubr.msk.f32.gmra.mrb[18].mxu1 %vm204_vm0, %v31132_v43  ;;  %v5900_v29 = vld [vmem:[#allocation7 + $0x1f0] sm:$0xff] }
 0x2e9   : > { %25323 = vmatprep.mubr.msk.f32.mxu0 %vm204_vm0, %v30886_v35  ;;  %25579 = vmatprep.mubr.msk.f32.mxu1 %vm204_vm0, %v31142_v0  ;;  %v5901_v35 = vld [vmem:[#allocation7 + $0x1f8] sm:$0xff] }
 0x2ea   : > { %27676 = vmatpush3.bf16.msra.mxu0 %v31332_v58  ;;  %27740 = vmatpush3.bf16.msra.mxu1 %v31228_v46  ;;  %v34875_v46 = vld [vmem:[#allocation25_spill] sm:$0xff] }
 0x2eb   : > { %27678 = vmatprep.subr.bf16.mxu0 %v31346_v28  ;;  %27742 = vmatprep.subr.bf16.mxu1 %v31246_v49 }
 0x2ec   : > { %25324 = vmatmul.mubr.msk.f32.gmra.mrb[20].mxu0 %vm204_vm0, %v30894_v38  ;;  %25580 = vmatmul.mubr.msk.f32.gmra.mrb[20].mxu1 %vm204_vm0, %v31150_v2  ;;  %v31412_v38 = vpack.c.bf16 %v5901_v35, %v5900_v29  ;;  %v31482_v29 = vld [vmem:[#allocation3 + $0x189] sm:$0xff]  ;;  %v6130_v35 = vld [vmem:[#allocation7 + $0x210] sm:$0xff] }
 0x2ed   : > { %25326 = vmatprep.mubr.msk.f32.mxu0 %vm204_vm0, %v30902_v57  ;;  %25582 = vmatprep.mubr.msk.f32.mxu1 %vm204_vm0, %v31158_v55  ;;  %v6128_v57 = vld [vmem:[#allocation7 + $0x200] sm:$0xff] }
 0x2f0   : > { %25327 = vmatmul.mubr.msk.f32.gmra.mrb[22].mxu0 %vm204_vm0, %v30910_v14  ;;  %25583 = vmatmul.mubr.msk.f32.gmra.mrb[22].mxu1 %vm204_vm0, %v31166_v5  ;;  %v6129_v14 = vld [vmem:[#allocation7 + $0x208] sm:$0xff] }
 0x2f1   : > { %25329 = vmatprep.mubr.msk.f32.mxu0 %vm204_vm0, %v30918_v1  ;;  %25585 = vmatprep.mubr.msk.f32.mxu1 %vm204_vm0, %v31174_v17  ;;  %v31426_v1 = vpack.c.bf16 %v6129_v14, %v6128_v57  ;;  %v6131_v57 = vld [vmem:[#allocation7 + $0x218] sm:$0xff] }
 0x2f2   : > { %v31492_v14 = vpack.c.bf16 %v6131_v57, %v6130_v35  ;;  %v31562_v35 = vld [vmem:[#allocation3 + $0x18a] sm:$0xff] }
 0x2f3   : > { %v6111_v57 = vld [vmem:[#allocation3 + $0x31] sm:$0xff] }
 0x2f4   : > { %25330 = vmatmul.mubr.msk.f32.gmra.mrb[24].mxu0 %vm204_vm0, %v30926_v44  ;;  %25586 = vmatmul.mubr.msk.f32.gmra.mrb[24].mxu1 %vm204_vm0, %v31182_v60  ;;  %v34864_v44 = vld [vmem:[#allocation36_spill] sm:$0xff] }
 0x2f5   : > { %25332 = vmatprep.mubr.msk.f32.mxu0 %vm204_vm0, %v30933_v4  ;;  %25588 = vmatprep.mubr.msk.f32.mxu1 %vm204_vm0, %v31190_v26  ;;  %v34865_v4 = vld [vmem:[#allocation14_spill] sm:$0xff] }
 0x2f8   : > { %25333 = vmatmul.mubr.msk.f32.gmra.mrb[26].mxu0 %vm204_vm0, %v30939_v6  ;;  %25589 = vmatmul.mubr.msk.f32.gmra.mrb[26].mxu1 %vm204_vm0, %v31198_v3  ;;  %v34866_v6 = vld [vmem:[#allocation37_spill] sm:$0xff] }
 0x2f9   : > { %25335 = vmatprep.mubr.msk.f32.mxu0 %vm204_vm0, %v30944_v40  ;;  %25591 = vmatprep.mubr.msk.f32.mxu1 %vm204_vm0, %v31206_v50  ;;  %v34867_v40 = vld [vmem:[#allocation15_spill] sm:$0xff] }
 0x2fc   : > { %25336 = vmatmul.mubr.msk.f32.gmra.mrb[28].mxu0 %vm204_vm0, %v30948_v31  ;;  %25592 = vmatmul.mubr.msk.f32.gmra.mrb[28].mxu1 %vm204_vm0, %v31214_v59  ;;  %v34868_v31 = vld [vmem:[#allocation38_spill] sm:$0xff] }
 0x2fd   : > { %25338 = vmatprep.mubr.msk.f32.mxu0 %vm204_vm0, %v30953_v24  ;;  %25594 = vmatprep.mubr.msk.f32.mxu1 %vm204_vm0, %v31396_v51  ;;  %v34869_v24 = vld [vmem:[#allocation17_spill] sm:$0xff] }
 0x300   : > { %25339 = vmatmul.mubr.msk.f32.gmra.mrb[30].mxu0 %vm204_vm0, %v30957_v34  ;;  %25595 = vmatmul.mubr.msk.f32.gmra.mrb[30].mxu1 %vm204_vm0, %v31402_v22  ;;  %v34870_v34 = vld [vmem:[#allocation39_spill] sm:$0xff] }
 0x301   : > { %25349 = vmatprep.mubr.msk.f32.mxu0 %vm204_vm0, %v31098_v45  ;;  %25605 = vmatprep.mubr.msk.f32.mxu1 %vm204_vm0, %v30969_v48  ;;  %v34871_v48 = vld [vmem:[#allocation21_spill] sm:$0xff]  ;;  %v34881_v45 = vld [vmem:[#allocation31_spill] sm:$0xff] }
 0x304   : > { %25350 = vmatmul.mubr.msk.f32.vlgmr.msra.gmra.mrb[16].mxu0 %vm204_vm0, %v31108_v7  ;;  %25606 = vmatmul.mubr.msk.f32.vlgmr.msra.gmra.mrb[16].mxu1 %vm204_vm0, %v30976_v61  ;;  %v34872_v61 = vld [vmem:[#allocation40_spill] sm:$0xff]  ;;  %v34882_v7 = vld [vmem:[#allocation43_spill] sm:$0xff] }
 0x305   : > { %25352 = vmatprep.mubr.msk.f32.mxu0 %vm204_vm0, %v31120_v10  ;;  %27680 = vmatpush3.bf16.msra.mxu0 %v31346_v28 }
 0x306   : > { %25608 = vmatprep.mubr.msk.f32.mxu1 %vm204_vm0, %v30988_v36  ;;  %27744 = vmatpush3.bf16.msra.mxu1 %v31246_v49  ;;  %v34873_v36 = vld [vmem:[#allocation23_spill] sm:$0xff] }
 0x307   : > { %27682 = vmatprep.subr.bf16.mxu0 %v31412_v38  ;;  %27746 = vmatprep.subr.bf16.mxu1 %v31332_v58  ;;  %v31476_v49 = vld [vmem:[#allocation3 + $0x181] sm:$0xff] }
 0x308   : > { %25353 = vmatmul.mubr.msk.f32.gmra.mrb[18].mxu0 %vm204_vm0, %v31130_v39  ;;  %25609 = vmatmul.mubr.msk.f32.gmra.mrb[18].mxu1 %vm204_vm0, %v30998_v37  ;;  %v34874_v37 = vld [vmem:[#allocation41_spill] sm:$0xff] }
 0x309   : > { %25355 = vmatprep.mubr.msk.f32.mxu0 %vm204_vm0, %v34864_v44  ;;  %25611 = vmatprep.mubr.msk.f32.mxu1 %vm204_vm0, %v34865_v4  ;;  %v6358_v4 = vld [vmem:[#allocation7 + $0x220] sm:$0xff] }
 0x30a   : > { %27684 = vmatpush3.bf16.msra.mxu0 %v31412_v38  ;;  %27748 = vmatpush3.bf16.msra.mxu1 %v31332_v58  ;;  %v34879_v58 = vld [vmem:[#allocation29_spill] sm:$0xff] }
 0x30b   : > { %27686 = vmatprep.subr.bf16.mxu0 %v31426_v1  ;;  %27750 = vmatprep.subr.bf16.mxu1 %v31346_v28 }
 0x30c   : > { %25356 = vmatmul.mubr.msk.f32.gmra.mrb[20].mxu0 %vm204_vm0, %v34866_v6  ;;  %25612 = vmatmul.mubr.msk.f32.gmra.mrb[20].mxu1 %vm204_vm0, %v34867_v40  ;;  %v6359_v40 = vld [vmem:[#allocation7 + $0x228] sm:$0xff] }
 0x30d   : > { %25358 = vmatprep.mubr.msk.f32.mxu0 %vm204_vm0, %v34868_v31  ;;  %25614 = vmatprep.mubr.msk.f32.mxu1 %vm204_vm0, %v34869_v24  ;;  %v34889_v24 = vld [vmem:[#allocation28_spill] sm:$0xff] }
 0x310   : > { %25359 = vmatmul.mubr.msk.f32.gmra.mrb[22].mxu0 %vm204_vm0, %v34870_v34  ;;  %25615 = vmatmul.mubr.msk.f32.gmra.mrb[22].mxu1 %vm204_vm0, %v34871_v48  ;;  %v34890_v48 = vld [vmem:[#allocation30_spill] sm:$0xff] }
 0x311   : > { %25361 = vmatprep.mubr.msk.f32.mxu0 %vm204_vm0, %v34872_v61  ;;  %25617 = vmatprep.mubr.msk.f32.mxu1 %vm204_vm0, %v34873_v36  ;;  %v34891_v36 = vld [vmem:[#allocation13_spill] sm:$0xff] }
 0x314   : > { %25362 = vmatmul.mubr.msk.f32.gmra.mrb[24].mxu0 %vm204_vm0, %v34874_v37  ;;  %25618 = vmatmul.mubr.msk.f32.gmra.mrb[24].mxu1 %vm204_vm0, %v34875_v46  ;;  %v34892_v46 = vld [vmem:[#allocation32_spill] sm:$0xff] }
 0x315   : > { %25364 = vmatprep.mubr.msk.f32.mxu0 %vm204_vm0, %v34876_v56  ;;  %25620 = vmatprep.mubr.msk.f32.mxu1 %vm204_vm0, %v34877_v16  ;;  %v34893_v16 = vld [vmem:[#allocation34_spill] sm:$0xff] }
 0x318   : > { %25365 = vmatmul.mubr.msk.f32.gmra.mrb[26].mxu0 %vm204_vm0, %v34878_v25  ;;  %25621 = vmatmul.mubr.msk.f32.gmra.mrb[26].mxu1 %vm204_vm0, %v34879_v58  ;;  %v34894_v58 = vld [vmem:[#allocation44_spill] sm:$0xff] }
 0x319   : > { %25367 = vmatprep.mubr.msk.f32.mxu0 %vm204_vm0, %v34880_v27  ;;  %25623 = vmatprep.mubr.msk.f32.mxu1 %vm204_vm0, %v34881_v45  ;;  %v34895_v45 = vld [vmem:[#allocation35_spill] sm:$0xff] }
 0x31c   : > { %25368 = vmatmul.mubr.msk.f32.gmra.mrb[28].mxu0 %vm204_vm0, %v34882_v7  ;;  %25624 = vmatmul.mubr.msk.f32.gmra.mrb[28].mxu1 %vm204_vm0, %v34883_v23  ;;  %v31556_v23 = vld [vmem:[#allocation3 + $0x182] sm:$0xff] }
 0x31d   : > { %25370 = vmatprep.mubr.msk.f32.mxu0 %vm204_vm0, %v31220_v9  ;;  %25626 = vmatprep.mubr.msk.f32.mxu1 %vm204_vm0, %v31476_v49 }
 0x320   : > { %25371 = vmatmul.mubr.msk.f32.gmra.mrb[30].mxu0 %vm204_vm0, %v31226_v63  ;;  %25627 = vmatmul.mubr.msk.f32.gmra.mrb[30].mxu1 %vm204_vm0, %v31482_v29 }
 0x321   : > { %25381 = vmatprep.mubr.msk.f32.mxu0 %vm204_vm0, %v30986_v33  ;;  %25637 = vmatprep.mubr.msk.f32.mxu1 %vm204_vm0, %v31237_v41  ;;  %v31506_v33 = vpack.c.bf16 %v6359_v40, %v6358_v4  ;;  %v6360_v4 = vld [vmem:[#allocation7 + $0x230] sm:$0xff]  ;;  %v6361_v40 = vld [vmem:[#allocation7 + $0x238] sm:$0xff] }
 0x324   : > { %25382 = vmatmul.mubr.msk.f32.vlgmr.msra.gmra.mrb[16].mxu0 %vm204_vm0, %v30996_v20  ;;  %25638 = vmatmul.mubr.msk.f32.vlgmr.msra.gmra.mrb[16].mxu1 %vm204_vm0, %v31242_v21  ;;  %v34884_v20 = vld [vmem:[#allocation16_spill] sm:$0xff] }
 0x325   : > { %25384 = vmatprep.mubr.msk.f32.mxu0 %vm204_vm0, %v31006_v19  ;;  %27688 = vmatpush3.bf16.msra.mxu0 %v31426_v1  ;;  %v34885_v19 = vld [vmem:[#allocation18_spill] sm:$0xff] }
 0x326   : > { %25640 = vmatprep.mubr.msk.f32.mxu1 %vm204_vm0, %v31252_v8  ;;  %27752 = vmatpush3.bf16.msra.mxu1 %v31346_v28  ;;  %v34887_v28 = vld [vmem:[#allocation24_spill] sm:$0xff] }
 0x327   : > { %27690 = vmatprep.subr.bf16.mxu0 %v31492_v14  ;;  %27754 = vmatprep.subr.bf16.mxu1 %v31412_v38 }
 0x328   : > { %25385 = vmatmul.mubr.msk.f32.gmra.mrb[18].mxu0 %vm204_vm0, %v31014_v15  ;;  %25641 = vmatmul.mubr.msk.f32.gmra.mrb[18].mxu1 %vm204_vm0, %v31260_v32  ;;  %v34886_v15 = vld [vmem:[#allocation22_spill] sm:$0xff] }
 0x329   : > { %25387 = vmatprep.mubr.msk.f32.mxu0 %vm204_vm0, %v34884_v20  ;;  %25643 = vmatprep.mubr.msk.f32.mxu1 %vm204_vm0, %v31268_v54  ;;  %v31571_v20 = vpack.c.bf16 %v6361_v40, %v6360_v4 }
 0x32a   : > { %27692 = vmatpush3.bf16.msra.mxu0 %v31492_v14  ;;  %27756 = vmatpush3.bf16.msra.mxu1 %v31412_v38  ;;  %v34888_v38 = vld [vmem:[#allocation26_spill] sm:$0xff] }
 0x32b   : > { %27694 = vmatprep.subr.bf16.mxu0 %v31506_v33  ;;  %27758 = vmatprep.subr.bf16.mxu1 %v31426_v1 }
 0x32c   : > { %25388 = vmatmul.mubr.msk.f32.gmra.mrb[20].mxu0 %vm204_vm0, %v34885_v19  ;;  %25644 = vmatmul.mubr.msk.f32.gmra.mrb[20].mxu1 %vm204_vm0, %v31274_v30  ;;  %v8751_v19 = vld [vmem:[#allocation7 + $0x260] sm:$0xff] }
 0x32d   : > { %25390 = vmatprep.mubr.msk.f32.mxu0 %vm204_vm0, %v34886_v15  ;;  %25646 = vmatprep.mubr.msk.f32.mxu1 %vm204_vm0, %v31280_v13  ;;  %v8752_v15 = vld [vmem:[#allocation7 + $0x268] sm:$0xff] }
 0x330   : > { %25391 = vmatmul.mubr.msk.f32.gmra.mrb[22].mxu0 %vm204_vm0, %v34887_v28  ;;  %25647 = vmatmul.mubr.msk.f32.gmra.mrb[22].mxu1 %vm204_vm0, %v31286_v47  ;;  %v31583_v28 = vpack.c.bf16 %v8752_v15, %v8751_v19 }
 0x331   : > { %25393 = vmatprep.mubr.msk.f32.mxu0 %vm204_vm0, %v34888_v38  ;;  %25649 = vmatprep.mubr.msk.f32.mxu1 %vm204_vm0, %v31292_v52  ;;  %v7986_v38 = vld [vmem:[#allocation3 + $0x1a0] sm:$0xff] }
 0x334   : > { %25394 = vmatmul.mubr.msk.f32.gmra.mrb[24].mxu0 %vm204_vm0, %v34889_v24  ;;  %25650 = vmatmul.mubr.msk.f32.gmra.mrb[24].mxu1 %vm204_vm0, %v31298_v53  ;;  %v8200_v24 = vld [vmem:[#allocation3 + $0xf1] sm:$0xff] }
 0x335   : > { %25396 = vmatprep.mubr.msk.f32.mxu0 %vm204_vm0, %v34890_v48  ;;  %25652 = vmatprep.mubr.msk.f32.mxu1 %vm204_vm0, %v34891_v36  ;;  %v8754_v48 = vld [vmem:[#allocation7 + $0x278] sm:$0xff] }
 0x338   : > { %25397 = vmatmul.mubr.msk.f32.gmra.mrb[26].mxu0 %vm204_vm0, %v34892_v46  ;;  %25653 = vmatmul.mubr.msk.f32.gmra.mrb[26].mxu1 %vm204_vm0, %v31310_v62 }
 0x339   : > { %25399 = vmatprep.mubr.msk.f32.mxu0 %vm204_vm0, %v34893_v16  ;;  %25655 = vmatprep.mubr.msk.f32.mxu1 %vm204_vm0, %v34894_v58  ;;  %v8202_v16 = vld [vmem:[#allocation3 + $0x109] sm:$0xff] }
 0x33c   : > { %25400 = vmatmul.mubr.msk.f32.gmra.mrb[28].mxu0 %vm204_vm0, %v34895_v45  ;;  %25656 = vmatmul.mubr.msk.f32.gmra.mrb[28].mxu1 %vm204_vm0, %v31322_v18 }
 0x33d   : > { %25402 = vmatprep.mubr.msk.f32.mxu0 %vm204_vm0, %v31103_v11  ;;  %25658 = vmatprep.mubr.msk.f32.mxu1 %vm204_vm0, %v31556_v23  ;;  %v6112_v11 = vld [vmem:[#allocation3 + $0x39] sm:$0xff] }
 0x340   : > { %25403 = vmatmul.mubr.msk.f32.gmra.mrb[30].mxu0 %vm204_vm0, %v31110_v12  ;;  %25659 = vmatmul.mubr.msk.f32.gmra.mrb[30].mxu1 %vm204_vm0, %v31562_v35  ;;  %v6113_v12 = vld [vmem:[#allocation3 + $0x49] sm:$0xff] }
 0x341   : > { %25413 = vmatprep.mubr.msk.f32.mxu0 %vm204_vm0, %v6111_v57  ;;  %25669 = vmatprep.mubr.msk.f32.mxu1 %vm204_vm0, %v31122_v42  ;;  %v6114_v42 = vld [vmem:[#allocation3 + $0x51] sm:$0xff] }
 0x344   : > { %25414 = vmatmul.mubr.msk.f32.vlgmr.msra.gmra.mrb[16].mxu0 %vm204_vm0, %v6112_v11  ;;  %25670 = vmatmul.mubr.msk.f32.vlgmr.msra.gmra.mrb[16].mxu1 %vm204_vm0, %v31132_v43  ;;  %v6115_v43 = vld [vmem:[#allocation3 + $0x61] sm:$0xff] }
 0x345   : > { %25416 = vmatprep.mubr.msk.f32.mxu0 %vm204_vm0, %v6113_v12  ;;  %27696 = vmatpush3.bf16.msra.mxu0 %v31506_v33 }
 0x346   : > { %25672 = vmatprep.mubr.msk.f32.mxu1 %vm204_vm0, %v31142_v0  ;;  %27760 = vmatpush3.bf16.msra.mxu1 %v31426_v1  ;;  %v6116_v0 = vld [vmem:[#allocation3 + $0x69] sm:$0xff]  ;;  %v6119_v1 = vld [vmem:[#allocation3 + $0x91] sm:$0xff] }
 0x347   : > { %27698 = vmatprep.subr.bf16.mxu0 %v31571_v20  ;;  %27762 = vmatprep.subr.bf16.mxu1 %v31492_v14 }
 0x348   : > { %25417 = vmatmul.mubr.msk.f32.gmra.mrb[18].mxu0 %vm204_vm0, %v6114_v42  ;;  %25673 = vmatmul.mubr.msk.f32.gmra.mrb[18].mxu1 %vm204_vm0, %v31150_v2  ;;  %v6117_v2 = vld [vmem:[#allocation3 + $0x79] sm:$0xff] }
 0x349   : > { %25419 = vmatprep.mubr.msk.f32.mxu0 %vm204_vm0, %v6115_v43  ;;  %25675 = vmatprep.mubr.msk.f32.mxu1 %vm204_vm0, %v31158_v55  ;;  %v6118_v55 = vld [vmem:[#allocation3 + $0x81] sm:$0xff] }
 0x34a   : > { %27700 = vmatpush3.bf16.msra.mxu0 %v31571_v20  ;;  %27764 = vmatpush3.bf16.msra.mxu1 %v31492_v14  ;;  %v6120_v14 = vld [vmem:[#allocation3 + $0x99] sm:$0xff] }
 0x34b   : > { %27766 = vmatprep.subr.bf16.mxu1 %v31506_v33  ;;  %27774 = vmatprep.subr.bf16.mxu0 %v31583_v28 }
 0x34c   : > { %25420 = vmatmul.mubr.msk.f32.gmra.mrb[20].mxu0 %vm204_vm0, %v6116_v0  ;;  %25676 = vmatmul.mubr.msk.f32.gmra.mrb[20].mxu1 %vm204_vm0, %v31166_v5  ;;  %v6121_v5 = vld [vmem:[#allocation3 + $0xa9] sm:$0xff] }
 0x34d   : > { %25422 = vmatprep.mubr.msk.f32.mxu0 %vm204_vm0, %v6117_v2  ;;  %25678 = vmatprep.mubr.msk.f32.mxu1 %vm204_vm0, %v31174_v17  ;;  %v6122_v17 = vld [vmem:[#allocation3 + $0xb1] sm:$0xff] }
 0x350   : > { %25423 = vmatmul.mubr.msk.f32.gmra.mrb[22].mxu0 %vm204_vm0, %v6118_v55  ;;  %25679 = vmatmul.mubr.msk.f32.gmra.mrb[22].mxu1 %vm204_vm0, %v31182_v60  ;;  %v6123_v60 = vld [vmem:[#allocation3 + $0xc1] sm:$0xff] }
 0x351   : > { %25425 = vmatprep.mubr.msk.f32.mxu0 %vm204_vm0, %v6119_v1  ;;  %25681 = vmatprep.mubr.msk.f32.mxu1 %vm204_vm0, %v31190_v26  ;;  %v7985_v26 = vld [vmem:[#allocation3 + $0x198] sm:$0xff] }
 0x354   : > { %25426 = vmatmul.mubr.msk.f32.gmra.mrb[24].mxu0 %vm204_vm0, %v6120_v14  ;;  %25682 = vmatmul.mubr.msk.f32.gmra.mrb[24].mxu1 %vm204_vm0, %v31198_v3  ;;  %v6124_v3 = vld [vmem:[#allocation3 + $0xc9] sm:$0xff] }
 0x355   : > { %25428 = vmatprep.mubr.msk.f32.mxu0 %vm204_vm0, %v6121_v5  ;;  %25684 = vmatprep.mubr.msk.f32.mxu1 %vm204_vm0, %v31206_v50  ;;  %v6125_v50 = vld [vmem:[#allocation3 + $0xd9] sm:$0xff] }
 0x358   : > { %25429 = vmatmul.mubr.msk.f32.gmra.mrb[26].mxu0 %vm204_vm0, %v6122_v17  ;;  %25685 = vmatmul.mubr.msk.f32.gmra.mrb[26].mxu1 %vm204_vm0, %v31214_v59  ;;  %v6126_v59 = vld [vmem:[#allocation3 + $0xe1] sm:$0xff] }
 0x359   : > { %25431 = vmatprep.mubr.msk.f32.mxu0 %vm204_vm0, %v6123_v60  ;;  %25687 = vmatprep.mubr.msk.f32.mxu1 %vm204_vm0, %v31396_v51  ;;  %v8753_v51 = vld [vmem:[#allocation7 + $0x270] sm:$0xff] }
 0x35a   : > { %v27777_v46 = vpack.c.bf16 %v8754_v48, %v8753_v51 }
 0x35c   : > { %25432 = vmatmul.mubr.msk.f32.gmra.mrb[28].mxu0 %vm204_vm0, %v6124_v3  ;;  %25688 = vmatmul.mubr.msk.f32.gmra.mrb[28].mxu1 %vm204_vm0, %v31402_v22  ;;  %v8201_v22 = vld [vmem:[#allocation3 + $0xf9] sm:$0xff] }
 0x35d   : > { %25434 = vmatprep.mubr.msk.f32.mxu0 %vm204_vm0, %v6125_v50  ;;  %25690 = vmatprep.mubr.msk.f32.mxu1 %vm204_vm0, %v7985_v26 }
 0x360   : > { %25435 = vmatmul.mubr.msk.f32.gmra.mrb[30].mxu0 %vm204_vm0, %v6126_v59  ;;  %25691 = vmatmul.mubr.msk.f32.gmra.mrb[30].mxu1 %vm204_vm0, %v7986_v38 }
 0x361   : > { %25445 = vmatprep.mubr.msk.f32.mxu0 %vm204_vm0, %v31120_v10  ;;  %25701 = vmatprep.mubr.msk.f32.mxu1 %vm204_vm0, %v8200_v24  ;;  %v8203_v10 = vld [vmem:[#allocation3 + $0x111] sm:$0xff] }
 0x364   : > { %25446 = vmatmul.mubr.msk.f32.vlgmr.msra.gmra.mrb[16].mxu0 %vm204_vm0, %v31130_v39  ;;  %25702 = vmatmul.mubr.msk.f32.vlgmr.msra.gmra.mrb[16].mxu1 %vm204_vm0, %v8201_v22  ;;  %v8204_v39 = vld [vmem:[#allocation3 + $0x121] sm:$0xff] }
 0x365   : > { %25448 = vmatprep.mubr.msk.f32.mxu0 %vm204_vm0, %v34864_v44  ;;  %25704 = vmatprep.mubr.msk.f32.mxu1 %vm204_vm0, %v8202_v16  ;;  %v8205_v44 = vld [vmem:[#allocation3 + $0x129] sm:$0xff] }
 0x366   : > { %27768 = vmatpush3.bf16.msra.mxu1 %v31506_v33  ;;  %27776 = vmatpush3.bf16.msra.mxu0 %v31583_v28  ;;  %v8208_v33 = vld [vmem:[#allocation3 + $0x151] sm:$0xff] }
 0x367   : > { %27770 = vmatprep.subr.bf16.mxu1 %v31571_v20  ;;  %27778 = vmatprep.subr.bf16.mxu0 %v27777_v46 }
 0x368   : > { %25449 = vmatmul.mubr.msk.f32.gmra.mrb[18].mxu0 %vm204_vm0, %v34866_v6  ;;  %25705 = vmatmul.mubr.msk.f32.gmra.mrb[18].mxu1 %vm204_vm0, %v8203_v10  ;;  %v8206_v6 = vld [vmem:[#allocation3 + $0x139] sm:$0xff] }
 0x369   : > { %25451 = vmatprep.mubr.msk.f32.mxu0 %vm204_vm0, %v34868_v31  ;;  %25707 = vmatprep.mubr.msk.f32.mxu1 %vm204_vm0, %v8204_v39  ;;  %v8207_v31 = vld [vmem:[#allocation3 + $0x141] sm:$0xff] }
 0x36a   : > { %27772 = vmatpush3.bf16.msra.mxu1 %v31571_v20  ;;  %27780 = vmatpush3.bf16.msra.mxu0 %v27777_v46 }
 0x36b   : > { %27846 = vmatprep.subr.bf16.mxu1 %v31583_v28 }
 0x36c   : > { %25452 = vmatmul.mubr.msk.f32.gmra.mrb[20].mxu0 %vm204_vm0, %v34870_v34  ;;  %25708 = vmatmul.mubr.msk.f32.gmra.mrb[20].mxu1 %vm204_vm0, %v8205_v44  ;;  %v8209_v34 = vld [vmem:[#allocation3 + $0x159] sm:$0xff] }
 0x36d   : > { %25454 = vmatprep.mubr.msk.f32.mxu0 %vm204_vm0, %v34872_v61  ;;  %25710 = vmatprep.mubr.msk.f32.mxu1 %vm204_vm0, %v8206_v6  ;;  %v8210_v61 = vld [vmem:[#allocation3 + $0x169] sm:$0xff] }
 0x370   : > { %25455 = vmatmul.mubr.msk.f32.gmra.mrb[22].mxu0 %vm204_vm0, %v34874_v37  ;;  %25711 = vmatmul.mubr.msk.f32.gmra.mrb[22].mxu1 %vm204_vm0, %v8207_v31  ;;  %v8211_v37 = vld [vmem:[#allocation3 + $0x171] sm:$0xff] }
 0x371   : > { %25457 = vmatprep.mubr.msk.f32.mxu0 %vm204_vm0, %v34876_v56  ;;  %25713 = vmatprep.mubr.msk.f32.mxu1 %vm204_vm0, %v8208_v33  ;;  %v8214_v56 = vld [vmem:[#allocation3 + $0x199] sm:$0xff] }
 0x374   : > { %25458 = vmatmul.mubr.msk.f32.gmra.mrb[24].mxu0 %vm204_vm0, %v34878_v25  ;;  %25714 = vmatmul.mubr.msk.f32.gmra.mrb[24].mxu1 %vm204_vm0, %v8209_v34  ;;  %v8215_v25 = vld [vmem:[#allocation3 + $0x1a1] sm:$0xff] }
 0x375   : > { %25460 = vmatprep.mubr.msk.f32.mxu0 %vm204_vm0, %v34880_v27  ;;  %25716 = vmatprep.mubr.msk.f32.mxu1 %vm204_vm0, %v8210_v61 }
 0x378   : > { %25461 = vmatmul.mubr.msk.f32.gmra.mrb[26].mxu0 %vm204_vm0, %v34882_v7  ;;  %25717 = vmatmul.mubr.msk.f32.gmra.mrb[26].mxu1 %vm204_vm0, %v8211_v37 }
 0x379   : > { %25463 = vmatprep.mubr.msk.f32.mxu0 %vm204_vm0, %v31220_v9  ;;  %25719 = vmatprep.mubr.msk.f32.mxu1 %vm204_vm0, %v31476_v49  ;;  %v8731_v9 = vld [vmem:[#allocation7 + $0x248] sm:$0xff] }
 0x37c   : > { %25464 = vmatmul.mubr.msk.f32.gmra.mrb[28].mxu0 %vm204_vm0, %v31226_v63  ;;  %25720 = vmatmul.mubr.msk.f32.gmra.mrb[28].mxu1 %vm204_vm0, %v31482_v29  ;;  %v8730_v63 = vld [vmem:[#allocation7 + $0x240] sm:$0xff] }
 0x37d   : > { %25466 = vmatprep.mubr.msk.f32.mxu0 %vm204_vm0, %v31237_v41  ;;  %25722 = vmatprep.mubr.msk.f32.mxu1 %vm204_vm0, %v8214_v56  ;;  %v8732_v41 = vld [vmem:[#allocation7 + $0x250] sm:$0xff] }
 0x380   : > { %25467 = vmatmul.mubr.msk.f32.gmra.mrb[30].mxu0 %vm204_vm0, %v31242_v21  ;;  %25723 = vmatmul.mubr.msk.f32.gmra.mrb[30].mxu1 %vm204_vm0, %v8215_v25  ;;  %v8733_v21 = vld [vmem:[#allocation7 + $0x258] sm:$0xff] }
 0x381   : > { %25733 = vmatprep.mubr.msk.f32.mxu1 %vm204_vm0, %v31252_v8  ;;  %v31719_v8 = vpack.c.bf16 %v8733_v21, %v8732_v41 }
 0x384   : > { %25734 = vmatmul.mubr.msk.f32.vlgmr.msra.gmra.mrb[16].mxu1 %vm204_vm0, %v31260_v32  ;;  %v9158_v32 = vld [vmem:[#allocation7 + $0x280] sm:$0xff] }
 0x385   : > { %25736 = vmatprep.mubr.msk.f32.mxu1 %vm204_vm0, %v31268_v54  ;;  %27848 = vmatpush3.bf16.msra.mxu1 %v31583_v28  ;;  %v9159_v54 = vld [vmem:[#allocation7 + $0x288] sm:$0xff] }
 0x386   : > { %27850 = vmatprep.subr.bf16.mxu1 %v27777_v46 }
 0x388   : > { %25737 = vmatmul.mubr.msk.f32.gmra.mrb[18].mxu1 %vm204_vm0, %v31274_v30  ;;  %v31723_v30 = vpack.c.bf16 %v9159_v54, %v9158_v32 }
 0x389   : > { %25739 = vmatprep.mubr.msk.f32.mxu1 %vm204_vm0, %v31280_v13  ;;  %27852 = vmatpush3.bf16.msra.mxu1 %v27777_v46  ;;  %v31729_v13 = vld [vmem:[%s34523_s2 + $0x1] ss:$0 sm:$0xff] }
 0x38c   : > { %25740 = vmatmul.mubr.msk.f32.gmra.mrb[20].mxu1 %vm204_vm0, %v31286_v47  ;;  %v8443_v47 = vld [vmem:[#allocation3 + $0x19a] sm:$0xff] }
 0x38d   : > { %25742 = vmatprep.mubr.msk.f32.mxu1 %vm204_vm0, %v31292_v52  ;;  %v8444_v52 = vld [vmem:[#allocation3 + $0x1a2] sm:$0xff] }
 0x390   : > { %25743 = vmatmul.mubr.msk.f32.gmra.mrb[22].mxu1 %vm204_vm0, %v31298_v53  ;;  %v8734_v53 = vld [vmem:[#allocation2 + $0x1] sm:$0xff] }
 0x391   : > { %25745 = vmatprep.mubr.msk.f32.mxu1 %vm204_vm0, %v34891_v36  ;;  %25765 = vmatprep.mubr.msk.f32.mxu0 %vm204_vm0, %v8734_v53 }
 0x394   : > { %25746 = vmatmul.mubr.msk.f32.gmra.mrb[24].mxu1 %vm204_vm0, %v31310_v62  ;;  %v8735_v62 = vld [vmem:[#allocation2 + $0x9] sm:$0xff] }
 0x395   : > { %25748 = vmatprep.mubr.msk.f32.mxu1 %vm204_vm0, %v34894_v58  ;;  %25766 = vmatmul.mubr.msk.f32.vlgmr.msra.gmra.mrb[32].mxu0 %vm204_vm0, %v8735_v62 }
 0x398   : > { %25749 = vmatmul.mubr.msk.f32.gmra.mrb[26].mxu1 %vm204_vm0, %v31322_v18  ;;  %v31714_v18 = vpack.c.bf16 %v8731_v9, %v8730_v63 }
 0x399   : > { %25751 = vmatprep.mubr.msk.f32.mxu1 %vm204_vm0, %v31556_v23 }
 0x39a   : > { %27782 = vmatprep.subr.bf16.mxu0 %v31714_v18  ;;  %27854 = vmatprep.subr.bf16.mxu1 %v31714_v18 }
 0x39b   : > { %27784 = vmatpush3.bf16.msra.mxu0 %v31714_v18 }
 0x39c   : > { %25752 = vmatmul.mubr.msk.f32.gmra.mrb[28].mxu1 %vm204_vm0, %v31562_v35  ;;  %27786 = vmatprep.subr.bf16.mxu0 %v31719_v8 }
 0x39d   : > { %25754 = vmatprep.mubr.msk.f32.mxu1 %vm204_vm0, %v8443_v47 }
 0x39f   : > { %27788 = vmatpush3.bf16.msra.mxu0 %v31719_v8 }
 0x3a0   : > { %25755 = vmatmul.mubr.msk.f32.gmra.mrb[30].mxu1 %vm204_vm0, %v8444_v52  ;;  %27790 = vmatprep.subr.bf16.mxu0 %v31723_v30 }
 0x437   : > { %v25447_v27 = vpop.f32.mrb[16].mxu0 }
 0x438   : > { %v6580_v7 = vadd.f32 %v25447_v27, %v31729_v13  ;;  %v6476_v49 = vpop.f32.mrb[17].mxu0 }
 0x439   : > { %v6579_v29 = vadd.f32 %v31729_v13, %v6476_v49 }
 0x43a   : > { %v6596_v36 = vmax.f32 %v6580_v7, 0.0 }
 0x43b   : > { %v6595_v58 = vmax.f32 %v6579_v29, 0.0  ;;  %v25450_v45 = vpop.f32.mrb[18].mxu0 }
 0x43c   : > { %6612 = vst.msk [vmem:[#allocation2 + $0x21] sm:$0xff] %vm204_vm0, %v6596_v36  ;;  %v6582_v23 = vadd.f32 %v25450_v45, %v31729_v13  ;;  %v6486_v35 = vpop.f32.mrb[19].mxu0 }
 0x43d   : > { %6611 = vst.msk [vmem:[#allocation2 + $0x19] sm:$0xff] %vm204_vm0, %v6595_v58  ;;  %v6581_v57 = vadd.f32 %v31729_v13, %v6486_v35 }
 0x43e   : > { %v6598_v4 = vmax.f32 %v6582_v23, 0.0 }
 0x43f   : > { %v6597_v40 = vmax.f32 %v6581_v57, 0.0  ;;  %v25453_v11 = vpop.f32.mrb[20].mxu0 }
 0x440   : > { %6614 = vst.msk [vmem:[#allocation2 + $0x39] sm:$0xff] %vm204_vm0, %v6598_v4  ;;  %v6584_v20 = vadd.f32 %v25453_v11, %v31729_v13  ;;  %v6496_v12 = vpop.f32.mrb[21].mxu0  ;;  %v8713_v4 = vld [vmem:[#allocation2] sm:$0xff] }
 0x441   : > { %6613 = vst.msk [vmem:[#allocation2 + $0x31] sm:$0xff] %vm204_vm0, %v6597_v40  ;;  %v6583_v19 = vadd.f32 %v31729_v13, %v6496_v12  ;;  %v9161_v12 = vld [vmem:[#allocation7 + $0x298] sm:$0xff] }
 0x442   : > { %v6600_v15 = vmax.f32 %v6584_v20, 0.0  ;;  %v9160_v20 = vld [vmem:[#allocation7 + $0x290] sm:$0xff] }
 0x443   : > { %v6599_v42 = vmax.f32 %v6583_v19, 0.0  ;;  %v25456_v28 = vpop.f32.mrb[22].mxu0  ;;  %v31749_v1 = vld [vmem:[#allocation2 + $0x21] sm:$0xff] }
 0x444   : > { %6616 = vst.msk [vmem:[#allocation2 + $0x51] sm:$0xff] %vm204_vm0, %v6600_v15  ;;  %v6586_v43 = vadd.f32 %v25456_v28, %v31729_v13  ;;  %v6506_v0 = vpop.f32.mrb[23].mxu0  ;;  %v31743_v2 = vld [vmem:[#allocation2 + $0x19] sm:$0xff]  ;;  %v8714_v28 = vld [vmem:[#allocation2 + $0x8] sm:$0xff] }
 0x445   : > { %6615 = vst.msk [vmem:[#allocation2 + $0x49] sm:$0xff] %vm204_vm0, %v6599_v42  ;;  %v6585_v55 = vadd.f32 %v31729_v13, %v6506_v0  ;;  %25768 = vmatprep.mubr.msk.f32.mxu0 %vm204_vm0, %v31743_v2 }
 0x446   : > { %v6602_v14 = vmax.f32 %v6586_v43, 0.0  ;;  %25769 = vmatmul.mubr.msk.f32.gmra.mrb[34].mxu0 %vm204_vm0, %v31749_v1 }
 0x447   : > { %v6601_v5 = vmax.f32 %v6585_v55, 0.0  ;;  %v25459_v17 = vpop.f32.mrb[24].mxu0  ;;  %v31761_v38 = vld [vmem:[#allocation2 + $0x39] sm:$0xff] }
 0x448   : > { %6618 = vst.msk [vmem:[#allocation2 + $0x69] sm:$0xff] %vm204_vm0, %v6602_v14  ;;  %v6588_v60 = vadd.f32 %v25459_v17, %v31729_v13  ;;  %v6516_v26 = vpop.f32.mrb[25].mxu0  ;;  %v31755_v3 = vld [vmem:[#allocation2 + $0x31] sm:$0xff]  ;;  %v31830_v14 = vpack.c.bf16 %v9161_v12, %v9160_v20 }
 0x449   : > { %6617 = vst.msk [vmem:[#allocation2 + $0x61] sm:$0xff] %vm204_vm0, %v6601_v5  ;;  %v6587_v50 = vadd.f32 %v31729_v13, %v6516_v26  ;;  %25771 = vmatprep.mubr.msk.f32.mxu0 %vm204_vm0, %v31755_v3  ;;  %v9389_v26 = vld [vmem:[#allocation7 + $0x2a8] sm:$0xff] }
 0x44a   : > { %v6604_v59 = vmax.f32 %v6588_v60, 0.0  ;;  %25772 = vmatmul.mubr.msk.f32.gmra.mrb[36].mxu0 %vm204_vm0, %v31761_v38  ;;  %v9388_v60 = vld [vmem:[#allocation7 + $0x2a0] sm:$0xff] }
 0x44b   : > { %v6603_v24 = vmax.f32 %v6587_v50, 0.0  ;;  %v25462_v51 = vpop.f32.mrb[26].mxu0  ;;  %v31773_v10 = vld [vmem:[#allocation2 + $0x51] sm:$0xff] }
 0x44c   : > { %6620 = vst.msk [vmem:[#allocation2 + $0x81] sm:$0xff] %vm204_vm0, %v6604_v59  ;;  %v6590_v48 = vadd.f32 %v25462_v51, %v31729_v13  ;;  %v6526_v22 = vpop.f32.mrb[27].mxu0  ;;  %v31767_v46 = vld [vmem:[#allocation2 + $0x49] sm:$0xff]  ;;  %v31841_v59 = vld [vmem:[#allocation2 + $0x18] sm:$0xff] }
 0x44d   : > { %6619 = vst.msk [vmem:[#allocation2 + $0x79] sm:$0xff] %vm204_vm0, %v6603_v24  ;;  %v6589_v16 = vadd.f32 %v31729_v13, %v6526_v22  ;;  %25774 = vmatprep.mubr.msk.f32.mxu0 %vm204_vm0, %v31767_v46 }
 0x44e   : > { %v6606_v39 = vmax.f32 %v6590_v48, 0.0  ;;  %25775 = vmatmul.mubr.msk.f32.gmra.mrb[38].mxu0 %vm204_vm0, %v31773_v10 }
 0x44f   : > { %v6605_v44 = vmax.f32 %v6589_v16, 0.0  ;;  %v25465_v6 = vpop.f32.mrb[28].mxu0  ;;  %v31785_v37 = vld [vmem:[#allocation2 + $0x69] sm:$0xff] }
 0x450   : > { %6622 = vst.msk [vmem:[#allocation2 + $0x99] sm:$0xff] %vm204_vm0, %v6606_v39  ;;  %v6592_v31 = vadd.f32 %v25465_v6, %v31729_v13  ;;  %v6536_v33 = vpop.f32.mrb[29].mxu0  ;;  %v31779_v34 = vld [vmem:[#allocation2 + $0x61] sm:$0xff]  ;;  %v31852_v39 = vpack.c.bf16 %v9389_v26, %v9388_v60 }
 0x451   : > { %6621 = vst.msk [vmem:[#allocation2 + $0x91] sm:$0xff] %vm204_vm0, %v6605_v44  ;;  %v6591_v61 = vadd.f32 %v31729_v13, %v6536_v33  ;;  %25777 = vmatprep.mubr.msk.f32.mxu0 %vm204_vm0, %v31779_v34  ;;  %v31858_v6 = vld [vmem:[#allocation2 + $0x20] sm:$0xff]  ;;  %v31867_v33 = vld [vmem:[#allocation2 + $0x30] sm:$0xff] }
 0x452   : > { %v6608_v56 = vmax.f32 %v6592_v31, 0.0  ;;  %25778 = vmatmul.mubr.msk.f32.gmra.mrb[40].mxu0 %vm204_vm0, %v31785_v37 }
 0x453   : > { %v6607_v25 = vmax.f32 %v6591_v61, 0.0  ;;  %v25468_v47 = vpop.f32.mrb[30].mxu0  ;;  %v31797_v9 = vld [vmem:[#allocation2 + $0x81] sm:$0xff] }
 0x454   : > { %6624 = vst.msk [vmem:[#allocation2 + $0xb1] sm:$0xff] %vm204_vm0, %v6608_v56  ;;  %v6594_v52 = vadd.f32 %v25468_v47, %v31729_v13  ;;  %v6546_v53 = vpop.f32.mrb[31].mxu0  ;;  %v31791_v62 = vld [vmem:[#allocation2 + $0x79] sm:$0xff] }
 0x455   : > { %6623 = vst.msk [vmem:[#allocation2 + $0xa9] sm:$0xff] %vm204_vm0, %v6607_v25  ;;  %v6593_v63 = vadd.f32 %v31729_v13, %v6546_v53  ;;  %25780 = vmatprep.mubr.msk.f32.mxu0 %vm204_vm0, %v31791_v62 }
 0x456   : > { %v6610_v41 = vmax.f32 %v6594_v52, 0.0  ;;  %25781 = vmatmul.mubr.msk.f32.gmra.mrb[42].mxu0 %vm204_vm0, %v31797_v9 }
 0x457   : > { %v6609_v21 = vmax.f32 %v6593_v63, 0.0  ;;  %v25735_v32 = vpop.f32.mrb[16].mxu1  ;;  %v31809_v29 = vld [vmem:[#allocation2 + $0x99] sm:$0xff] }
 0x458   : > { %6626 = vst.msk [vmem:[#allocation2 + $0xc9] sm:$0xff] %vm204_vm0, %v6610_v41  ;;  %v8666_v54 = vadd.f32 %v25735_v32, %v31729_v13  ;;  %v8563_v27 = vpop.f32.mrb[17].mxu1  ;;  %v31803_v7 = vld [vmem:[#allocation2 + $0x91] sm:$0xff] }
 0x459   : > { %6625 = vst.msk [vmem:[#allocation2 + $0xc1] sm:$0xff] %vm204_vm0, %v6609_v21  ;;  %v8665_v49 = vadd.f32 %v31729_v13, %v8563_v27  ;;  %25783 = vmatprep.mubr.msk.f32.mxu0 %vm204_vm0, %v31803_v7  ;;  %v31882_v63 = vld [vmem:[#allocation2 + $0x38] sm:$0xff] }
 0x45a   : > { %v8682_v36 = vmax.f32 %v8666_v54, 0.0  ;;  %25784 = vmatmul.mubr.msk.f32.gmra.mrb[44].mxu0 %vm204_vm0, %v31809_v29 }
 0x45b   : > { %v8681_v58 = vmax.f32 %v8665_v49, 0.0  ;;  %v25738_v45 = vpop.f32.mrb[18].mxu1  ;;  %v31821_v11 = vld [vmem:[#allocation2 + $0xb1] sm:$0xff] }
 0x45c   : > { %8698 = vst.msk [vmem:[#allocation2 + $0xe1] sm:$0xff] %vm204_vm0, %v8682_v36  ;;  %v8668_v23 = vadd.f32 %v25738_v45, %v31729_v13  ;;  %v8573_v35 = vpop.f32.mrb[19].mxu1  ;;  %v31815_v57 = vld [vmem:[#allocation2 + $0xa9] sm:$0xff] }
 0x45d   : > { %8697 = vst.msk [vmem:[#allocation2 + $0xd9] sm:$0xff] %vm204_vm0, %v8681_v58  ;;  %v8667_v40 = vadd.f32 %v31729_v13, %v8573_v35  ;;  %25786 = vmatprep.mubr.msk.f32.mxu0 %vm204_vm0, %v31815_v57  ;;  %v31903_v45 = vld [vmem:[#allocation2 + $0x50] sm:$0xff] }
 0x45e   : > { %v8684_v19 = vmax.f32 %v8668_v23, 0.0  ;;  %25787 = vmatmul.mubr.msk.f32.gmra.mrb[46].mxu0 %vm204_vm0, %v31821_v11 }
 0x45f   : > { %v8683_v15 = vmax.f32 %v8667_v40, 0.0  ;;  %v25741_v42 = vpop.f32.mrb[20].mxu1  ;;  %25797 = vmatprep.mubr.msk.f32.mxu0 %vm204_vm0, %v8713_v4  ;;  %v31836_v17 = vld [vmem:[#allocation2 + $0xc9] sm:$0xff]  ;;  %v31911_v4 = vld [vmem:[#allocation2 + $0x60] sm:$0xff] }
 0x460   : > { %8700 = vst.msk [vmem:[#allocation2 + $0xf9] sm:$0xff] %vm204_vm0, %v8684_v19  ;;  %v8670_v43 = vadd.f32 %v25741_v42, %v31729_v13  ;;  %v8583_v0 = vpop.f32.mrb[21].mxu1  ;;  %v31828_v55 = vld [vmem:[#allocation2 + $0xc1] sm:$0xff]  ;;  %34898 = vst [vmem:[#allocation37_spill] sm:$0xff] %v31911_v4 }
 0x461   : > { %8699 = vst.msk [vmem:[#allocation2 + $0xf1] sm:$0xff] %vm204_vm0, %v8683_v15  ;;  %v8669_v5 = vadd.f32 %v31729_v13, %v8583_v0  ;;  %26053 = vmatprep.mubr.msk.f32.mxu1 %vm204_vm0, %v31828_v55 }
 0x462   : > { %v8686_v50 = vmax.f32 %v8670_v43, 0.0  ;;  %25798 = vmatmul.mubr.msk.f32.vlgmr.msra.gmra.mrb[32].mxu0 %vm204_vm0, %v8714_v28  ;;  %26054 = vmatmul.mubr.msk.f32.vlgmr.msra.gmra.mrb[32].mxu1 %vm204_vm0, %v31836_v17  ;;  %v31923_v28 = vld [vmem:[#allocation2 + $0x68] sm:$0xff] }
 0x463   : > { %v8685_v24 = vmax.f32 %v8669_v5, 0.0  ;;  %v25744_v51 = vpop.f32.mrb[22].mxu1  ;;  %25800 = vmatprep.mubr.msk.f32.mxu0 %vm204_vm0, %v31841_v59  ;;  %27792 = vmatpush3.bf16.msra.mxu0 %v31723_v30  ;;  %v31860_v31 = vld [vmem:[#allocation2 + $0xe1] sm:$0xff]  ;;  %34900 = vst [vmem:[#allocation38_spill] sm:$0xff] %v31923_v28  ;;  %v31931_v5 = vld [vmem:[#allocation2 + $0x78] sm:$0xff] }
 0x464   : > { %8702 = vst.msk [vmem:[#allocation2 + $0x111] sm:$0xff] %vm204_vm0, %v8686_v50  ;;  %v8672_v48 = vadd.f32 %v25744_v51, %v31729_v13  ;;  %27856 = vmatpush3.bf16.msra.mxu1 %v31714_v18  ;;  %v8593_v22 = vpop.f32.mrb[23].mxu1  ;;  %v31849_v16 = vld [vmem:[#allocation2 + $0xd9] sm:$0xff]  ;;  %27794 = vmatprep.subr.bf16.mxu0 %v31830_v14  ;;  %34902 = vst [vmem:[#allocation39_spill] sm:$0xff] %v31931_v5 }
 0x465   : > { %8701 = vst.msk [vmem:[#allocation2 + $0x109] sm:$0xff] %vm204_vm0, %v8685_v24  ;;  %v8671_v44 = vadd.f32 %v31729_v13, %v8593_v22  ;;  %26056 = vmatprep.mubr.msk.f32.mxu1 %vm204_vm0, %v31849_v16  ;;  %27858 = vmatprep.subr.bf16.mxu1 %v31719_v8  ;;  %v31943_v22 = vld [vmem:[#allocation2 + $0x80] sm:$0xff] }
 0x466   : > { %v8688_v18 = vmax.f32 %v8672_v48, 0.0  ;;  %25801 = vmatmul.mubr.msk.f32.gmra.mrb[34].mxu0 %vm204_vm0, %v31858_v6  ;;  %26057 = vmatmul.mubr.msk.f32.gmra.mrb[34].mxu1 %vm204_vm0, %v31860_v31  ;;  %34904 = vst [vmem:[#allocation40_spill] sm:$0xff] %v31943_v22 }
 0x467   : > { %v8687_v61 = vmax.f32 %v8671_v44, 0.0  ;;  %v25747_v56 = vpop.f32.mrb[24].mxu1  ;;  %25803 = vmatprep.mubr.msk.f32.mxu0 %vm204_vm0, %v31867_v33  ;;  %27796 = vmatpush3.bf16.msra.mxu0 %v31830_v14  ;;  %v31884_v41 = vld [vmem:[#allocation2 + $0xf9] sm:$0xff] }
 0x468   : > { %8704 = vst.msk [vmem:[#allocation2 + $0x129] sm:$0xff] %vm204_vm0, %v8688_v18  ;;  %v8674_v25 = vadd.f32 %v25747_v56, %v31729_v13  ;;  %v8603_v47 = vpop.f32.mrb[25].mxu1  ;;  %v31874_v52 = vld [vmem:[#allocation2 + $0xf1] sm:$0xff]  ;;  %27860 = vmatpush3.bf16.msra.mxu1 %v31719_v8  ;;  %27798 = vmatprep.subr.bf16.mxu0 %v31852_v39  ;;  %v31891_v8 = vld [vmem:[#allocation2 + $0x48] sm:$0xff] }
 0x469   : > { %8703 = vst.msk [vmem:[#allocation2 + $0x121] sm:$0xff] %vm204_vm0, %v8687_v61  ;;  %v8673_v53 = vadd.f32 %v31729_v13, %v8603_v47  ;;  %26059 = vmatprep.mubr.msk.f32.mxu1 %vm204_vm0, %v31874_v52  ;;  %27862 = vmatprep.subr.bf16.mxu1 %v31723_v30  ;;  %v31951_v61 = vld [vmem:[#allocation2 + $0x90] sm:$0xff] }
 0x46a   : > { %v8690_v21 = vmax.f32 %v8674_v25, 0.0  ;;  %25804 = vmatmul.mubr.msk.f32.gmra.mrb[36].mxu0 %vm204_vm0, %v31882_v63  ;;  %26060 = vmatmul.mubr.msk.f32.gmra.mrb[36].mxu1 %vm204_vm0, %v31884_v41  ;;  %34906 = vst [vmem:[#allocation41_spill] sm:$0xff] %v31951_v61  ;;  %v31961_v25 = vld [vmem:[#allocation2 + $0x98] sm:$0xff] }
 0x46b   : > { %v8689_v32 = vmax.f32 %v8673_v53, 0.0  ;;  %v25750_v54 = vpop.f32.mrb[26].mxu1  ;;  %25806 = vmatprep.mubr.msk.f32.mxu0 %vm204_vm0, %v31891_v8  ;;  %v31905_v23 = vld [vmem:[#allocation2 + $0x111] sm:$0xff]  ;;  %34908 = vst [vmem:[#allocation42_spill] sm:$0xff] %v31961_v25  ;;  %v31969_v53 = vld [vmem:[#allocation2 + $0xa8] sm:$0xff] }
 0x46c   : > { %8706 = vst.msk [vmem:[#allocation2 + $0x141] sm:$0xff] %vm204_vm0, %v8690_v21  ;;  %v8676_v27 = vadd.f32 %v25750_v54, %v31729_v13  ;;  %v8613_v49 = vpop.f32.mrb[27].mxu1  ;;  %v31897_v36 = vld [vmem:[#allocation2 + $0x109] sm:$0xff]  ;;  %34897 = vst [vmem:[#allocation14_spill] sm:$0xff] %v31905_v23 }
 0x46d   : > { %34896 = vst [vmem:[#allocation36_spill] sm:$0xff] %v31897_v36  ;;  %8705 = vst.msk [vmem:[#allocation2 + $0x139] sm:$0xff] %vm204_vm0, %v8689_v32  ;;  %v8675_v58 = vadd.f32 %v31729_v13, %v8613_v49  ;;  %26062 = vmatprep.mubr.msk.f32.mxu1 %vm204_vm0, %v31897_v36  ;;  %v9141_v32 = vld [vmem:[#allocation2 + $0x2] sm:$0xff]  ;;  %v31977_v54 = vld [vmem:[#allocation2 + $0xb0] sm:$0xff] }
 0x46e   : > { %v8692_v35 = vmax.f32 %v8676_v27, 0.0  ;;  %25807 = vmatmul.mubr.msk.f32.gmra.mrb[38].mxu0 %vm204_vm0, %v31903_v45  ;;  %26063 = vmatmul.mubr.msk.f32.gmra.mrb[38].mxu1 %vm204_vm0, %v31905_v23  ;;  %34910 = vst [vmem:[#allocation19_spill] sm:$0xff] %v31969_v53  ;;  %34912 = vst [vmem:[#allocation20_spill] sm:$0xff] %v31977_v54  ;;  %v31985_v49 = vld [vmem:[#allocation2 + $0xc0] sm:$0xff]  ;;  %v9620_v23 = vld [vmem:[#allocation7 + $0x2d0] sm:$0xff] }
 0x46f   : > { %v8691_v40 = vmax.f32 %v8675_v58, 0.0  ;;  %v25753_v20 = vpop.f32.mrb[28].mxu1  ;;  %25809 = vmatprep.mubr.msk.f32.mxu0 %vm204_vm0, %v31911_v4  ;;  %v31925_v43 = vld [vmem:[#allocation2 + $0x129] sm:$0xff]  ;;  %34914 = vst [vmem:[#allocation43_spill] sm:$0xff] %v31985_v49 }
 0x470   : > { %8708 = vst.msk [vmem:[#allocation2 + $0x159] sm:$0xff] %vm204_vm0, %v8692_v35  ;;  %v8678_v12 = vadd.f32 %v25753_v20, %v31729_v13  ;;  %v8623_v19 = vpop.f32.mrb[29].mxu1  ;;  %v31917_v15 = vld [vmem:[#allocation2 + $0x121] sm:$0xff]  ;;  %34901 = vst [vmem:[#allocation17_spill] sm:$0xff] %v31925_v43  ;;  %v9390_v58 = vld [vmem:[#allocation7 + $0x2b0] sm:$0xff] }
 0x471   : > { %34899 = vst [vmem:[#allocation15_spill] sm:$0xff] %v31917_v15  ;;  %8707 = vst.msk [vmem:[#allocation2 + $0x151] sm:$0xff] %vm204_vm0, %v8691_v40  ;;  %v8677_v42 = vadd.f32 %v31729_v13, %v8623_v19  ;;  %26065 = vmatprep.mubr.msk.f32.mxu1 %vm204_vm0, %v31917_v15  ;;  %v9391_v35 = vld [vmem:[#allocation7 + $0x2b8] sm:$0xff]  ;;  %v9142_v40 = vld [vmem:[#allocation2 + $0xa] sm:$0xff] }
 0x472   : > { %v8694_v0 = vmax.f32 %v8678_v12, 0.0  ;;  %25810 = vmatmul.mubr.msk.f32.gmra.mrb[40].mxu0 %vm204_vm0, %v31923_v28  ;;  %26066 = vmatmul.mubr.msk.f32.gmra.mrb[40].mxu1 %vm204_vm0, %v31925_v43  ;;  %v31990_v20 = vld [vmem:[#allocation2 + $0xc8] sm:$0xff]  ;;  %v31992_v12 = vpack.c.bf16 %v9391_v35, %v9390_v58  ;;  %v31997_v19 = vld [vmem:[#allocation2 + $0x1a] sm:$0xff]  ;;  %v32049_v35 = vld [vmem:[#allocation2 + $0x110] sm:$0xff] }
 0x473   : > { %v8693_v60 = vmax.f32 %v8677_v42, 0.0  ;;  %v25756_v26 = vpop.f32.mrb[30].mxu1  ;;  %25812 = vmatprep.mubr.msk.f32.mxu0 %vm204_vm0, %v31931_v5  ;;  %v31945_v44 = vld [vmem:[#allocation2 + $0x141] sm:$0xff]  ;;  %34915 = vst [vmem:[#allocation33_spill] sm:$0xff] %v31990_v20 }
 0x474   : > { %8710 = vst.msk [vmem:[#allocation2 + $0x171] sm:$0xff] %vm204_vm0, %v8694_v0  ;;  %v8680_v50 = vadd.f32 %v25756_v26, %v31729_v13  ;;  %v8633_v24 = vpop.f32.mrb[31].mxu1  ;;  %v31937_v51 = vld [vmem:[#allocation2 + $0x139] sm:$0xff]  ;;  %34905 = vst [vmem:[#allocation23_spill] sm:$0xff] %v31945_v44  ;;  %v9619_v0 = vld [vmem:[#allocation7 + $0x2c8] sm:$0xff] }
 0x475   : > { %34903 = vst [vmem:[#allocation21_spill] sm:$0xff] %v31937_v51  ;;  %8709 = vst.msk [vmem:[#allocation2 + $0x169] sm:$0xff] %vm204_vm0, %v8693_v60  ;;  %v8679_v48 = vadd.f32 %v31729_v13, %v8633_v24  ;;  %26068 = vmatprep.mubr.msk.f32.mxu1 %vm204_vm0, %v31937_v51  ;;  %v9618_v42 = vld [vmem:[#allocation7 + $0x2c0] sm:$0xff]  ;;  %v32002_v60 = vld [vmem:[#allocation2 + $0xd8] sm:$0xff] }
 0x476   : > { %v8696_v18 = vmax.f32 %v8680_v50, 0.0  ;;  %25813 = vmatmul.mubr.msk.f32.gmra.mrb[42].mxu0 %vm204_vm0, %v31943_v22  ;;  %26069 = vmatmul.mubr.msk.f32.gmra.mrb[42].mxu1 %vm204_vm0, %v31945_v44  ;;  %v32007_v26 = vld [vmem:[#allocation2 + $0x22] sm:$0xff]  ;;  %v32013_v24 = vpack.c.bf16 %v9619_v0, %v9618_v42  ;;  %v32063_v0 = vld [vmem:[#allocation2 + $0x6a] sm:$0xff]  ;;  %v32087_v51 = vld [vmem:[#allocation2 + $0x92] sm:$0xff] }
 0x477   : > { %v8695_v56 = vmax.f32 %v8679_v48, 0.0  ;;  %25815 = vmatprep.mubr.msk.f32.mxu0 %vm204_vm0, %v31951_v61  ;;  %v31963_v47 = vld [vmem:[#allocation2 + $0x159] sm:$0xff]  ;;  %v32041_v58 = vld [vmem:[#allocation2 + $0x108] sm:$0xff]  ;;  %34919 = vst [vmem:[#allocation24_spill] sm:$0xff] %v32063_v0  ;;  %34922 = vst [vmem:[#allocation30_spill] sm:$0xff] %v32087_v51 }
 0x478   : > { %8712 = vst.msk [vmem:[#allocation2 + $0x189] sm:$0xff] %vm204_vm0, %v8696_v18  ;;  %v31956_v13 = vld [vmem:[#allocation2 + $0x151] sm:$0xff]  ;;  %34909 = vst [vmem:[#allocation27_spill] sm:$0xff] %v31963_v47  ;;  %v32009_v50 = vld [vmem:[#allocation2 + $0xe0] sm:$0xff] }
 0x479   : > { %34907 = vst [vmem:[#allocation25_spill] sm:$0xff] %v31956_v13  ;;  %8711 = vst.msk [vmem:[#allocation2 + $0x181] sm:$0xff] %vm204_vm0, %v8695_v56  ;;  %26071 = vmatprep.mubr.msk.f32.mxu1 %vm204_vm0, %v31956_v13  ;;  %v32019_v48 = vld [vmem:[#allocation2 + $0x32] sm:$0xff]  ;;  %v32057_v42 = vld [vmem:[#allocation2 + $0x120] sm:$0xff] }
 0x47a   : > { %25816 = vmatmul.mubr.msk.f32.gmra.mrb[44].mxu0 %vm204_vm0, %v31961_v25  ;;  %26072 = vmatmul.mubr.msk.f32.gmra.mrb[44].mxu1 %vm204_vm0, %v31963_v47  ;;  %v32021_v18 = vld [vmem:[#allocation2 + $0xf0] sm:$0xff]  ;;  %v32031_v56 = vld [vmem:[#allocation2 + $0xf8] sm:$0xff]  ;;  %v32079_v13 = vld [vmem:[#allocation2 + $0x82] sm:$0xff] }
 0x47b   : > { %25818 = vmatprep.mubr.msk.f32.mxu0 %vm204_vm0, %v31969_v53  ;;  %v31979_v27 = vld [vmem:[#allocation2 + $0x171] sm:$0xff]  ;;  %34921 = vst [vmem:[#allocation28_spill] sm:$0xff] %v32079_v13  ;;  %v32081_v44 = vld [vmem:[#allocation2 + $0x140] sm:$0xff] }
 0x47c   : > { %v31973_v21 = vld [vmem:[#allocation2 + $0x169] sm:$0xff]  ;;  %34913 = vst [vmem:[#allocation31_spill] sm:$0xff] %v31979_v27  ;;  %v32073_v47 = vld [vmem:[#allocation2 + $0x138] sm:$0xff] }
 0x47d   : > { %34911 = vst [vmem:[#allocation29_spill] sm:$0xff] %v31973_v21  ;;  %26074 = vmatprep.mubr.msk.f32.mxu1 %vm204_vm0, %v31973_v21  ;;  %v32071_v21 = vld [vmem:[#allocation2 + $0x7a] sm:$0xff]  ;;  %v32089_v43 = vld [vmem:[#allocation2 + $0x150] sm:$0xff]  ;;  %v32105_v15 = vld [vmem:[#allocation2 + $0x168] sm:$0xff] }
 0x47e   : > { %25819 = vmatmul.mubr.msk.f32.gmra.mrb[46].mxu0 %vm204_vm0, %v31977_v54  ;;  %26075 = vmatmul.mubr.msk.f32.gmra.mrb[46].mxu1 %vm204_vm0, %v31979_v27  ;;  %v32065_v27 = vld [vmem:[#allocation2 + $0x128] sm:$0xff]  ;;  %34920 = vst [vmem:[#allocation26_spill] sm:$0xff] %v32071_v21 }
 0x47f   : > { %26085 = vmatprep.mubr.msk.f32.mxu1 %vm204_vm0, %v31985_v49  ;;  %25829 = vmatprep.mubr.msk.f32.mxu0 %vm204_vm0, %v9141_v32  ;;  %v32039_v32 = vld [vmem:[#allocation2 + $0x4a] sm:$0xff] }
 0x480   : > { %34916 = vst [vmem:[#allocation16_spill] sm:$0xff] %v32039_v32 }
 0x482   : > { %25830 = vmatmul.mubr.msk.f32.vlgmr.msra.gmra.mrb[32].mxu0 %vm204_vm0, %v9142_v40  ;;  %26086 = vmatmul.mubr.msk.f32.vlgmr.msra.gmra.mrb[32].mxu1 %vm204_vm0, %v31990_v20  ;;  %v32055_v40 = vld [vmem:[#allocation2 + $0x62] sm:$0xff] }
 0x483   : > { %25832 = vmatprep.mubr.msk.f32.mxu0 %vm204_vm0, %v31997_v19  ;;  %27800 = vmatpush3.bf16.msra.mxu0 %v31852_v39  ;;  %34918 = vst [vmem:[#allocation22_spill] sm:$0xff] %v32055_v40 }
 0x484   : > { %26088 = vmatprep.mubr.msk.f32.mxu1 %vm204_vm0, %v32002_v60  ;;  %27864 = vmatpush3.bf16.msra.mxu1 %v31723_v30  ;;  %v32029_v30 = vld [vmem:[#allocation2 + $0x3a] sm:$0xff] }
 0x485   : > { %27802 = vmatprep.subr.bf16.mxu0 %v31992_v12  ;;  %27866 = vmatprep.subr.bf16.mxu1 %v31830_v14 }
 0x486   : > { %25833 = vmatmul.mubr.msk.f32.gmra.mrb[34].mxu0 %vm204_vm0, %v32007_v26  ;;  %26089 = vmatmul.mubr.msk.f32.gmra.mrb[34].mxu1 %vm204_vm0, %v32009_v50 }
 0x487   : > { %25835 = vmatprep.mubr.msk.f32.mxu0 %vm204_vm0, %v32019_v48  ;;  %26091 = vmatprep.mubr.msk.f32.mxu1 %vm204_vm0, %v32021_v18 }
 0x488   : > { %27804 = vmatpush3.bf16.msra.mxu0 %v31992_v12  ;;  %27868 = vmatpush3.bf16.msra.mxu1 %v31830_v14  ;;  %v32047_v14 = vld [vmem:[#allocation2 + $0x52] sm:$0xff] }
 0x489   : > { %27806 = vmatprep.subr.bf16.mxu0 %v32013_v24  ;;  %27870 = vmatprep.subr.bf16.mxu1 %v31852_v39  ;;  %34917 = vst [vmem:[#allocation18_spill] sm:$0xff] %v32047_v14 }
 0x48a   : > { %25836 = vmatmul.mubr.msk.f32.gmra.mrb[36].mxu0 %vm204_vm0, %v32029_v30  ;;  %26092 = vmatmul.mubr.msk.f32.gmra.mrb[36].mxu1 %vm204_vm0, %v32031_v56 }
 0x48b   : > { %25838 = vmatprep.mubr.msk.f32.mxu0 %vm204_vm0, %v32039_v32  ;;  %26094 = vmatprep.mubr.msk.f32.mxu1 %vm204_vm0, %v32041_v58  ;;  %v9849_v32 = vld [vmem:[#allocation7 + $0x2e8] sm:$0xff] }
 0x48e   : > { %25839 = vmatmul.mubr.msk.f32.gmra.mrb[38].mxu0 %vm204_vm0, %v32047_v14  ;;  %26095 = vmatmul.mubr.msk.f32.gmra.mrb[38].mxu1 %vm204_vm0, %v32049_v35  ;;  %v9621_v14 = vld [vmem:[#allocation7 + $0x2d8] sm:$0xff] }
 0x48f   : > { %25841 = vmatprep.mubr.msk.f32.mxu0 %vm204_vm0, %v32055_v40  ;;  %26097 = vmatprep.mubr.msk.f32.mxu1 %vm204_vm0, %v32057_v42  ;;  %v32113_v40 = vld [vmem:[#allocation2 + $0x170] sm:$0xff]  ;;  %v32127_v36 = vpack.c.bf16 %v9621_v14, %v9620_v23  ;;  %v32141_v23 = vld [vmem:[#allocation2 + $0xe2] sm:$0xff] }
 0x490   : > { %v32151_v14 = vld [vmem:[#allocation2 + $0xf2] sm:$0xff] }
 0x492   : > { %25842 = vmatmul.mubr.msk.f32.gmra.mrb[40].mxu0 %vm204_vm0, %v32063_v0  ;;  %26098 = vmatmul.mubr.msk.f32.gmra.mrb[40].mxu1 %vm204_vm0, %v32065_v27  ;;  %v32097_v0 = vld [vmem:[#allocation2 + $0x158] sm:$0xff] }
 0x493   : > { %25844 = vmatprep.mubr.msk.f32.mxu0 %vm204_vm0, %v32071_v21  ;;  %26100 = vmatprep.mubr.msk.f32.mxu1 %vm204_vm0, %v32073_v47  ;;  %v32095_v21 = vld [vmem:[#allocation2 + $0x9a] sm:$0xff] }
 0x494   : > { %34923 = vst [vmem:[#allocation13_spill] sm:$0xff] %v32095_v21 }
 0x496   : > { %25845 = vmatmul.mubr.msk.f32.gmra.mrb[42].mxu0 %vm204_vm0, %v32079_v13  ;;  %26101 = vmatmul.mubr.msk.f32.gmra.mrb[42].mxu1 %vm204_vm0, %v32081_v44  ;;  %v32103_v13 = vld [vmem:[#allocation2 + $0xaa] sm:$0xff] }
 0x497   : > { %25847 = vmatprep.mubr.msk.f32.mxu0 %vm204_vm0, %v32087_v51  ;;  %26103 = vmatprep.mubr.msk.f32.mxu1 %vm204_vm0, %v32089_v43  ;;  %34924 = vst [vmem:[#allocation32_spill] sm:$0xff] %v32103_v13  ;;  %v32111_v51 = vld [vmem:[#allocation2 + $0xb2] sm:$0xff] }
 0x498   : > { %34925 = vst [vmem:[#allocation34_spill] sm:$0xff] %v32111_v51 }
 0x49a   : > { %25848 = vmatmul.mubr.msk.f32.gmra.mrb[44].mxu0 %vm204_vm0, %v32095_v21  ;;  %26104 = vmatmul.mubr.msk.f32.gmra.mrb[44].mxu1 %vm204_vm0, %v32097_v0  ;;  %v32119_v21 = vld [vmem:[#allocation2 + $0xc2] sm:$0xff] }
 0x49b   : > { %25850 = vmatprep.mubr.msk.f32.mxu0 %vm204_vm0, %v32103_v13  ;;  %26106 = vmatprep.mubr.msk.f32.mxu1 %vm204_vm0, %v32105_v15  ;;  %v32125_v13 = vld [vmem:[#allocation2 + $0xca] sm:$0xff] }
 0x49e   : > { %25851 = vmatmul.mubr.msk.f32.gmra.mrb[46].mxu0 %vm204_vm0, %v32111_v51  ;;  %26107 = vmatmul.mubr.msk.f32.gmra.mrb[46].mxu1 %vm204_vm0, %v32113_v40  ;;  %v9848_v51 = vld [vmem:[#allocation7 + $0x2e0] sm:$0xff] }
 0x49f   : > { %25861 = vmatprep.mubr.msk.f32.mxu0 %vm204_vm0, %v31841_v59  ;;  %26117 = vmatprep.mubr.msk.f32.mxu1 %vm204_vm0, %v32119_v21  ;;  %v32136_v59 = vld [vmem:[#allocation2 + $0xda] sm:$0xff] }
 0x4a2   : > { %25862 = vmatmul.mubr.msk.f32.vlgmr.msra.gmra.mrb[32].mxu0 %vm204_vm0, %v31858_v6  ;;  %26118 = vmatmul.mubr.msk.f32.vlgmr.msra.gmra.mrb[32].mxu1 %vm204_vm0, %v32125_v13  ;;  %v32145_v6 = vpack.c.bf16 %v9849_v32, %v9848_v51  ;;  %v32167_v51 = vld [vmem:[#allocation2 + $0x10a] sm:$0xff]  ;;  %v32179_v32 = vld [vmem:[#allocation2 + $0x122] sm:$0xff] }
 0x4a3   : > { %25864 = vmatprep.mubr.msk.f32.mxu0 %vm204_vm0, %v31867_v33  ;;  %27808 = vmatpush3.bf16.msra.mxu0 %v32013_v24 }
 0x4a4   : > { %26120 = vmatprep.mubr.msk.f32.mxu1 %vm204_vm0, %v32136_v59  ;;  %27872 = vmatpush3.bf16.msra.mxu1 %v31852_v39  ;;  %v32159_v39 = vld [vmem:[#allocation2 + $0xfa] sm:$0xff] }
 0x4a5   : > { %27810 = vmatprep.subr.bf16.mxu0 %v32127_v36  ;;  %27874 = vmatprep.subr.bf16.mxu1 %v31992_v12 }
 0x4a6   : > { %25865 = vmatmul.mubr.msk.f32.gmra.mrb[34].mxu0 %vm204_vm0, %v31882_v63  ;;  %26121 = vmatmul.mubr.msk.f32.gmra.mrb[34].mxu1 %vm204_vm0, %v32141_v23 }
 0x4a7   : > { %25867 = vmatprep.mubr.msk.f32.mxu0 %vm204_vm0, %v31891_v8  ;;  %26123 = vmatprep.mubr.msk.f32.mxu1 %vm204_vm0, %v32151_v14 }
 0x4a8   : > { %27812 = vmatpush3.bf16.msra.mxu0 %v32127_v36  ;;  %27876 = vmatpush3.bf16.msra.mxu1 %v31992_v12  ;;  %v32173_v12 = vld [vmem:[#allocation2 + $0x112] sm:$0xff] }
 0x4a9   : > { %27814 = vmatprep.subr.bf16.mxu0 %v32145_v6  ;;  %27878 = vmatprep.subr.bf16.mxu1 %v32013_v24 }
 0x4aa   : > { %25868 = vmatmul.mubr.msk.f32.gmra.mrb[36].mxu0 %vm204_vm0, %v31903_v45  ;;  %26124 = vmatmul.mubr.msk.f32.gmra.mrb[36].mxu1 %vm204_vm0, %v32159_v39 }
 0x4ab   : > { %25870 = vmatprep.mubr.msk.f32.mxu0 %vm204_vm0, %v31911_v4  ;;  %26126 = vmatprep.mubr.msk.f32.mxu1 %vm204_vm0, %v32167_v51  ;;  %v32185_v4 = vld [vmem:[#allocation2 + $0x12a] sm:$0xff] }
 0x4ae   : > { %25871 = vmatmul.mubr.msk.f32.gmra.mrb[38].mxu0 %vm204_vm0, %v31923_v28  ;;  %26127 = vmatmul.mubr.msk.f32.gmra.mrb[38].mxu1 %vm204_vm0, %v32173_v12  ;;  %v32191_v28 = vld [vmem:[#allocation2 + $0x13a] sm:$0xff] }
 0x4af   : > { %25873 = vmatprep.mubr.msk.f32.mxu0 %vm204_vm0, %v31931_v5  ;;  %26129 = vmatprep.mubr.msk.f32.mxu1 %vm204_vm0, %v32179_v32  ;;  %v32197_v5 = vld [vmem:[#allocation2 + $0x142] sm:$0xff] }
 0x4b2   : > { %25874 = vmatmul.mubr.msk.f32.gmra.mrb[40].mxu0 %vm204_vm0, %v31943_v22  ;;  %26130 = vmatmul.mubr.msk.f32.gmra.mrb[40].mxu1 %vm204_vm0, %v32185_v4  ;;  %v32203_v22 = vld [vmem:[#allocation2 + $0x152] sm:$0xff] }
 0x4b3   : > { %25876 = vmatprep.mubr.msk.f32.mxu0 %vm204_vm0, %v31951_v61  ;;  %26132 = vmatprep.mubr.msk.f32.mxu1 %vm204_vm0, %v32191_v28  ;;  %34926 = vst [vmem:[#allocation44_spill] sm:$0xff] %v32203_v22  ;;  %v32209_v61 = vld [vmem:[#allocation2 + $0x15a] sm:$0xff] }
 0x4b6   : > { %25877 = vmatmul.mubr.msk.f32.gmra.mrb[42].mxu0 %vm204_vm0, %v31961_v25  ;;  %26133 = vmatmul.mubr.msk.f32.gmra.mrb[42].mxu1 %vm204_vm0, %v32197_v5  ;;  %v32215_v25 = vld [vmem:[#allocation2 + $0x16a] sm:$0xff] }
 0x4b7   : > { %25879 = vmatprep.mubr.msk.f32.mxu0 %vm204_vm0, %v31969_v53  ;;  %26135 = vmatprep.mubr.msk.f32.mxu1 %vm204_vm0, %v32203_v22  ;;  %34927 = vst [vmem:[#allocation35_spill] sm:$0xff] %v32215_v25  ;;  %v32221_v53 = vld [vmem:[#allocation2 + $0x172] sm:$0xff] }
 0x4b8   : > { %v9851_v22 = vld [vmem:[#allocation7 + $0x2f8] sm:$0xff] }
 0x4ba   : > { %25880 = vmatmul.mubr.msk.f32.gmra.mrb[44].mxu0 %vm204_vm0, %v31977_v54  ;;  %26136 = vmatmul.mubr.msk.f32.gmra.mrb[44].mxu1 %vm204_vm0, %v32209_v61  ;;  %v9850_v54 = vld [vmem:[#allocation7 + $0x2f0] sm:$0xff] }
 0x4bb   : > { %25882 = vmatprep.mubr.msk.f32.mxu0 %vm204_vm0, %v31985_v49  ;;  %26138 = vmatprep.mubr.msk.f32.mxu1 %vm204_vm0, %v32215_v25  ;;  %v32231_v49 = vpack.c.bf16 %v9851_v22, %v9850_v54  ;;  %v10079_v25 = vld [vmem:[#allocation7 + $0x308] sm:$0xff]  ;;  %v34942_v54 = vld [vmem:[#allocation13_spill] sm:$0xff] }
 0x4bc   : > { %v34940_v22 = vld [vmem:[#allocation30_spill] sm:$0xff] }
 0x4be   : > { %25883 = vmatmul.mubr.msk.f32.gmra.mrb[46].mxu0 %vm204_vm0, %v31990_v20  ;;  %26139 = vmatmul.mubr.msk.f32.gmra.mrb[46].mxu1 %vm204_vm0, %v32221_v53  ;;  %v10078_v20 = vld [vmem:[#allocation7 + $0x300] sm:$0xff] }
 0x4bf   : > { %25893 = vmatprep.mubr.msk.f32.mxu0 %vm204_vm0, %v31743_v2  ;;  %26149 = vmatprep.mubr.msk.f32.mxu1 %vm204_vm0, %v32002_v60  ;;  %v32245_v2 = vpack.c.bf16 %v10079_v25, %v10078_v20  ;;  %v34941_v25 = vld [vmem:[#allocation25_spill] sm:$0xff]  ;;  %v34944_v20 = vld [vmem:[#allocation32_spill] sm:$0xff] }
 0x4c2   : > { %25894 = vmatmul.mubr.msk.f32.vlgmr.msra.gmra.mrb[32].mxu0 %vm204_vm0, %v31749_v1  ;;  %26150 = vmatmul.mubr.msk.f32.vlgmr.msra.gmra.mrb[32].mxu1 %vm204_vm0, %v32009_v50  ;;  %v32295_v1 = vld [vmem:[#allocation2 + $0x180] sm:$0xff] }
 0x4c3   : > { %25896 = vmatprep.mubr.msk.f32.mxu0 %vm204_vm0, %v31755_v3  ;;  %27816 = vmatpush3.bf16.msra.mxu0 %v32145_v6  ;;  %v32301_v3 = vld [vmem:[#allocation2 + $0x188] sm:$0xff] }
 0x4c4   : > { %26152 = vmatprep.mubr.msk.f32.mxu1 %vm204_vm0, %v32021_v18  ;;  %27880 = vmatpush3.bf16.msra.mxu1 %v32013_v24  ;;  %v34947_v24 = vld [vmem:[#allocation31_spill] sm:$0xff] }
 0x4c5   : > { %27818 = vmatprep.subr.bf16.mxu0 %v32231_v49  ;;  %27882 = vmatprep.subr.bf16.mxu1 %v32127_v36 }
 0x4c6   : > { %25897 = vmatmul.mubr.msk.f32.gmra.mrb[34].mxu0 %vm204_vm0, %v31761_v38  ;;  %26153 = vmatmul.mubr.msk.f32.gmra.mrb[34].mxu1 %vm204_vm0, %v32031_v56  ;;  %v10080_v38 = vld [vmem:[#allocation7 + $0x310] sm:$0xff] }
 0x4c7   : > { %25899 = vmatprep.mubr.msk.f32.mxu0 %vm204_vm0, %v31767_v46  ;;  %26155 = vmatprep.mubr.msk.f32.mxu1 %vm204_vm0, %v32041_v58  ;;  %v10081_v46 = vld [vmem:[#allocation7 + $0x318] sm:$0xff] }
 0x4c8   : > { %27820 = vmatpush3.bf16.msra.mxu0 %v32231_v49  ;;  %27884 = vmatpush3.bf16.msra.mxu1 %v32127_v36  ;;  %v34939_v36 = vld [vmem:[#allocation23_spill] sm:$0xff] }
 0x4c9   : > { %27822 = vmatprep.subr.bf16.mxu0 %v32245_v2  ;;  %27886 = vmatprep.subr.bf16.mxu1 %v32145_v6 }
 0x4ca   : > { %25900 = vmatmul.mubr.msk.f32.gmra.mrb[36].mxu0 %vm204_vm0, %v31773_v10  ;;  %26156 = vmatmul.mubr.msk.f32.gmra.mrb[36].mxu1 %vm204_vm0, %v32049_v35  ;;  %v32311_v10 = vpack.c.bf16 %v10081_v46, %v10080_v38  ;;  %v32381_v38 = vld [vmem:[#allocation2 + $0x189] sm:$0xff] }
 0x4cb   : > { %25902 = vmatprep.mubr.msk.f32.mxu0 %vm204_vm0, %v31779_v34  ;;  %26158 = vmatprep.mubr.msk.f32.mxu1 %vm204_vm0, %v32057_v42  ;;  %v10308_v34 = vld [vmem:[#allocation7 + $0x320] sm:$0xff]  ;;  %v10310_v46 = vld [vmem:[#allocation7 + $0x330] sm:$0xff] }
 0x4ce   : > { %25903 = vmatmul.mubr.msk.f32.gmra.mrb[38].mxu0 %vm204_vm0, %v31785_v37  ;;  %26159 = vmatmul.mubr.msk.f32.gmra.mrb[38].mxu1 %vm204_vm0, %v32065_v27  ;;  %v10309_v37 = vld [vmem:[#allocation7 + $0x328] sm:$0xff] }
 0x4cf   : > { %25905 = vmatprep.mubr.msk.f32.mxu0 %vm204_vm0, %v31791_v62  ;;  %26161 = vmatprep.mubr.msk.f32.mxu1 %vm204_vm0, %v32073_v47  ;;  %v32325_v62 = vpack.c.bf16 %v10309_v37, %v10308_v34  ;;  %v10311_v34 = vld [vmem:[#allocation7 + $0x338] sm:$0xff] }
 0x4d0   : > { %v32391_v37 = vpack.c.bf16 %v10311_v34, %v10310_v46  ;;  %v32461_v46 = vld [vmem:[#allocation2 + $0x18a] sm:$0xff] }
 0x4d1   : > { %v10291_v34 = vld [vmem:[#allocation2 + $0x31] sm:$0xff] }
 0x4d2   : > { %25906 = vmatmul.mubr.msk.f32.gmra.mrb[40].mxu0 %vm204_vm0, %v31797_v9  ;;  %26162 = vmatmul.mubr.msk.f32.gmra.mrb[40].mxu1 %vm204_vm0, %v32081_v44  ;;  %v34928_v9 = vld [vmem:[#allocation16_spill] sm:$0xff] }
 0x4d3   : > { %25908 = vmatprep.mubr.msk.f32.mxu0 %vm204_vm0, %v31803_v7  ;;  %26164 = vmatprep.mubr.msk.f32.mxu1 %vm204_vm0, %v32089_v43  ;;  %v34929_v7 = vld [vmem:[#allocation36_spill] sm:$0xff] }
 0x4d6   : > { %25909 = vmatmul.mubr.msk.f32.gmra.mrb[42].mxu0 %vm204_vm0, %v31809_v29  ;;  %26165 = vmatmul.mubr.msk.f32.gmra.mrb[42].mxu1 %vm204_vm0, %v32097_v0  ;;  %v34930_v29 = vld [vmem:[#allocation18_spill] sm:$0xff] }
 0x4d7   : > { %25911 = vmatprep.mubr.msk.f32.mxu0 %vm204_vm0, %v31815_v57  ;;  %26167 = vmatprep.mubr.msk.f32.mxu1 %vm204_vm0, %v32105_v15  ;;  %v34931_v57 = vld [vmem:[#allocation14_spill] sm:$0xff] }
 0x4da   : > { %25912 = vmatmul.mubr.msk.f32.gmra.mrb[44].mxu0 %vm204_vm0, %v31821_v11  ;;  %26168 = vmatmul.mubr.msk.f32.gmra.mrb[44].mxu1 %vm204_vm0, %v32113_v40  ;;  %v34932_v11 = vld [vmem:[#allocation22_spill] sm:$0xff] }
 0x4db   : > { %25914 = vmatprep.mubr.msk.f32.mxu0 %vm204_vm0, %v31828_v55  ;;  %26170 = vmatprep.mubr.msk.f32.mxu1 %vm204_vm0, %v32295_v1  ;;  %v34933_v55 = vld [vmem:[#allocation15_spill] sm:$0xff] }
 0x4de   : > { %25915 = vmatmul.mubr.msk.f32.gmra.mrb[46].mxu0 %vm204_vm0, %v31836_v17  ;;  %26171 = vmatmul.mubr.msk.f32.gmra.mrb[46].mxu1 %vm204_vm0, %v32301_v3  ;;  %v34934_v17 = vld [vmem:[#allocation24_spill] sm:$0xff] }
 0x4df   : > { %25925 = vmatprep.mubr.msk.f32.mxu0 %vm204_vm0, %v31997_v19  ;;  %26181 = vmatprep.mubr.msk.f32.mxu1 %vm204_vm0, %v31849_v16  ;;  %v34935_v16 = vld [vmem:[#allocation17_spill] sm:$0xff] }
 0x4e0   : > { %v34945_v19 = vld [vmem:[#allocation29_spill] sm:$0xff] }
 0x4e2   : > { %25926 = vmatmul.mubr.msk.f32.vlgmr.msra.gmra.mrb[32].mxu0 %vm204_vm0, %v32007_v26  ;;  %26182 = vmatmul.mubr.msk.f32.vlgmr.msra.gmra.mrb[32].mxu1 %vm204_vm0, %v31860_v31  ;;  %v34936_v31 = vld [vmem:[#allocation26_spill] sm:$0xff] }
 0x4e3   : > { %25928 = vmatprep.mubr.msk.f32.mxu0 %vm204_vm0, %v32019_v48  ;;  %27824 = vmatpush3.bf16.msra.mxu0 %v32245_v2  ;;  %v34946_v26 = vld [vmem:[#allocation34_spill] sm:$0xff] }
 0x4e4   : > { %26184 = vmatprep.mubr.msk.f32.mxu1 %vm204_vm0, %v31874_v52  ;;  %27888 = vmatpush3.bf16.msra.mxu1 %v32145_v6  ;;  %v34937_v52 = vld [vmem:[#allocation21_spill] sm:$0xff] }
 0x4e5   : > { %27826 = vmatprep.subr.bf16.mxu0 %v32311_v10  ;;  %27890 = vmatprep.subr.bf16.mxu1 %v32231_v49  ;;  %v32375_v6 = vld [vmem:[#allocation2 + $0x181] sm:$0xff] }
 0x4e6   : > { %25929 = vmatmul.mubr.msk.f32.gmra.mrb[34].mxu0 %vm204_vm0, %v32029_v30  ;;  %26185 = vmatmul.mubr.msk.f32.gmra.mrb[34].mxu1 %vm204_vm0, %v31884_v41  ;;  %v34938_v41 = vld [vmem:[#allocation28_spill] sm:$0xff] }
 0x4e7   : > { %25931 = vmatprep.mubr.msk.f32.mxu0 %vm204_vm0, %v34928_v9  ;;  %26187 = vmatprep.mubr.msk.f32.mxu1 %vm204_vm0, %v34929_v7  ;;  %v10538_v7 = vld [vmem:[#allocation7 + $0x340] sm:$0xff] }
 0x4e8   : > { %27828 = vmatpush3.bf16.msra.mxu0 %v32311_v10  ;;  %27892 = vmatpush3.bf16.msra.mxu1 %v32231_v49  ;;  %v34943_v49 = vld [vmem:[#allocation27_spill] sm:$0xff] }
 0x4e9   : > { %27830 = vmatprep.subr.bf16.mxu0 %v32325_v62  ;;  %27894 = vmatprep.subr.bf16.mxu1 %v32245_v2 }
 0x4ea   : > { %25932 = vmatmul.mubr.msk.f32.gmra.mrb[36].mxu0 %vm204_vm0, %v34930_v29  ;;  %26188 = vmatmul.mubr.msk.f32.gmra.mrb[36].mxu1 %vm204_vm0, %v34931_v57  ;;  %v10539_v57 = vld [vmem:[#allocation7 + $0x348] sm:$0xff] }
 0x4eb   : > { %25934 = vmatprep.mubr.msk.f32.mxu0 %vm204_vm0, %v34932_v11  ;;  %26190 = vmatprep.mubr.msk.f32.mxu1 %vm204_vm0, %v34933_v55  ;;  %v34953_v55 = vld [vmem:[#allocation42_spill] sm:$0xff] }
 0x4ee   : > { %25935 = vmatmul.mubr.msk.f32.gmra.mrb[38].mxu0 %vm204_vm0, %v34934_v17  ;;  %26191 = vmatmul.mubr.msk.f32.gmra.mrb[38].mxu1 %vm204_vm0, %v34935_v16  ;;  %v34954_v16 = vld [vmem:[#allocation19_spill] sm:$0xff] }
 0x4ef   : > { %25937 = vmatprep.mubr.msk.f32.mxu0 %vm204_vm0, %v34936_v31  ;;  %26193 = vmatprep.mubr.msk.f32.mxu1 %vm204_vm0, %v34937_v52  ;;  %v34955_v52 = vld [vmem:[#allocation44_spill] sm:$0xff] }
 0x4f2   : > { %25938 = vmatmul.mubr.msk.f32.gmra.mrb[40].mxu0 %vm204_vm0, %v34938_v41  ;;  %26194 = vmatmul.mubr.msk.f32.gmra.mrb[40].mxu1 %vm204_vm0, %v34939_v36  ;;  %v34956_v36 = vld [vmem:[#allocation20_spill] sm:$0xff] }
 0x4f3   : > { %25940 = vmatprep.mubr.msk.f32.mxu0 %vm204_vm0, %v34940_v22  ;;  %26196 = vmatprep.mubr.msk.f32.mxu1 %vm204_vm0, %v34941_v25  ;;  %v34957_v25 = vld [vmem:[#allocation43_spill] sm:$0xff] }
 0x4f6   : > { %25941 = vmatmul.mubr.msk.f32.gmra.mrb[42].mxu0 %vm204_vm0, %v34942_v54  ;;  %26197 = vmatmul.mubr.msk.f32.gmra.mrb[42].mxu1 %vm204_vm0, %v34943_v49  ;;  %v34958_v49 = vld [vmem:[#allocation35_spill] sm:$0xff] }
 0x4f7   : > { %25943 = vmatprep.mubr.msk.f32.mxu0 %vm204_vm0, %v34944_v20  ;;  %26199 = vmatprep.mubr.msk.f32.mxu1 %vm204_vm0, %v34945_v19  ;;  %v34959_v19 = vld [vmem:[#allocation33_spill] sm:$0xff] }
 0x4fa   : > { %25944 = vmatmul.mubr.msk.f32.gmra.mrb[44].mxu0 %vm204_vm0, %v34946_v26  ;;  %26200 = vmatmul.mubr.msk.f32.gmra.mrb[44].mxu1 %vm204_vm0, %v34947_v24  ;;  %v32455_v24 = vld [vmem:[#allocation2 + $0x182] sm:$0xff] }
 0x4fb   : > { %25946 = vmatprep.mubr.msk.f32.mxu0 %vm204_vm0, %v32119_v21  ;;  %26202 = vmatprep.mubr.msk.f32.mxu1 %vm204_vm0, %v32375_v6 }
 0x4fe   : > { %25947 = vmatmul.mubr.msk.f32.gmra.mrb[46].mxu0 %vm204_vm0, %v32125_v13  ;;  %26203 = vmatmul.mubr.msk.f32.gmra.mrb[46].mxu1 %vm204_vm0, %v32381_v38 }
 0x4ff   : > { %25957 = vmatprep.mubr.msk.f32.mxu0 %vm204_vm0, %v31867_v33  ;;  %26213 = vmatprep.mubr.msk.f32.mxu1 %vm204_vm0, %v32136_v59  ;;  %v32405_v33 = vpack.c.bf16 %v10539_v57, %v10538_v7  ;;  %v10540_v7 = vld [vmem:[#allocation7 + $0x350] sm:$0xff]  ;;  %v10541_v57 = vld [vmem:[#allocation7 + $0x358] sm:$0xff] }
 0x502   : > { %25958 = vmatmul.mubr.msk.f32.vlgmr.msra.gmra.mrb[32].mxu0 %vm204_vm0, %v31882_v63  ;;  %26214 = vmatmul.mubr.msk.f32.vlgmr.msra.gmra.mrb[32].mxu1 %vm204_vm0, %v32141_v23  ;;  %v34948_v63 = vld [vmem:[#allocation37_spill] sm:$0xff] }
 0x503   : > { %25960 = vmatprep.mubr.msk.f32.mxu0 %vm204_vm0, %v31891_v8  ;;  %27832 = vmatpush3.bf16.msra.mxu0 %v32325_v62  ;;  %v34949_v8 = vld [vmem:[#allocation38_spill] sm:$0xff] }
 0x504   : > { %26216 = vmatprep.mubr.msk.f32.mxu1 %vm204_vm0, %v32151_v14  ;;  %27896 = vmatpush3.bf16.msra.mxu1 %v32245_v2  ;;  %v34951_v2 = vld [vmem:[#allocation40_spill] sm:$0xff] }
 0x505   : > { %27834 = vmatprep.subr.bf16.mxu0 %v32391_v37  ;;  %27898 = vmatprep.subr.bf16.mxu1 %v32311_v10 }
 0x506   : > { %25961 = vmatmul.mubr.msk.f32.gmra.mrb[34].mxu0 %vm204_vm0, %v31903_v45  ;;  %26217 = vmatmul.mubr.msk.f32.gmra.mrb[34].mxu1 %vm204_vm0, %v32159_v39  ;;  %v34950_v45 = vld [vmem:[#allocation39_spill] sm:$0xff] }
 0x507   : > { %25963 = vmatprep.mubr.msk.f32.mxu0 %vm204_vm0, %v34948_v63  ;;  %26219 = vmatprep.mubr.msk.f32.mxu1 %vm204_vm0, %v32167_v51  ;;  %v32470_v63 = vpack.c.bf16 %v10541_v57, %v10540_v7 }
 0x508   : > { %27836 = vmatpush3.bf16.msra.mxu0 %v32391_v37  ;;  %27900 = vmatpush3.bf16.msra.mxu1 %v32311_v10  ;;  %v34952_v10 = vld [vmem:[#allocation41_spill] sm:$0xff] }
 0x509   : > { %27838 = vmatprep.subr.bf16.mxu0 %v32405_v33  ;;  %27902 = vmatprep.subr.bf16.mxu1 %v32325_v62 }
 0x50a   : > { %25964 = vmatmul.mubr.msk.f32.gmra.mrb[36].mxu0 %vm204_vm0, %v34949_v8  ;;  %26220 = vmatmul.mubr.msk.f32.gmra.mrb[36].mxu1 %vm204_vm0, %v32173_v12  ;;  %v12929_v8 = vld [vmem:[#allocation7 + $0x380] sm:$0xff] }
 0x50b   : > { %25966 = vmatprep.mubr.msk.f32.mxu0 %vm204_vm0, %v34950_v45  ;;  %26222 = vmatprep.mubr.msk.f32.mxu1 %vm204_vm0, %v32179_v32  ;;  %v12930_v45 = vld [vmem:[#allocation7 + $0x388] sm:$0xff] }
 0x50e   : > { %25967 = vmatmul.mubr.msk.f32.gmra.mrb[38].mxu0 %vm204_vm0, %v34951_v2  ;;  %26223 = vmatmul.mubr.msk.f32.gmra.mrb[38].mxu1 %vm204_vm0, %v32185_v4  ;;  %v32482_v2 = vpack.c.bf16 %v12930_v45, %v12929_v8 }
 0x50f   : > { %25969 = vmatprep.mubr.msk.f32.mxu0 %vm204_vm0, %v34952_v10  ;;  %26225 = vmatprep.mubr.msk.f32.mxu1 %vm204_vm0, %v32191_v28  ;;  %v12164_v10 = vld [vmem:[#allocation2 + $0x1a0] sm:$0xff] }
 0x512   : > { %25970 = vmatmul.mubr.msk.f32.gmra.mrb[40].mxu0 %vm204_vm0, %v34953_v55  ;;  %26226 = vmatmul.mubr.msk.f32.gmra.mrb[40].mxu1 %vm204_vm0, %v32197_v5  ;;  %v12378_v55 = vld [vmem:[#allocation2 + $0xf1] sm:$0xff] }
 0x513   : > { %25972 = vmatprep.mubr.msk.f32.mxu0 %vm204_vm0, %v34954_v16  ;;  %26228 = vmatprep.mubr.msk.f32.mxu1 %vm204_vm0, %v34955_v52  ;;  %v12932_v16 = vld [vmem:[#allocation7 + $0x398] sm:$0xff] }
 0x516   : > { %25973 = vmatmul.mubr.msk.f32.gmra.mrb[42].mxu0 %vm204_vm0, %v34956_v36  ;;  %26229 = vmatmul.mubr.msk.f32.gmra.mrb[42].mxu1 %vm204_vm0, %v32209_v61 }
 0x517   : > { %25975 = vmatprep.mubr.msk.f32.mxu0 %vm204_vm0, %v34957_v25  ;;  %26231 = vmatprep.mubr.msk.f32.mxu1 %vm204_vm0, %v34958_v49  ;;  %v12380_v25 = vld [vmem:[#allocation2 + $0x109] sm:$0xff] }
 0x51a   : > { %25976 = vmatmul.mubr.msk.f32.gmra.mrb[44].mxu0 %vm204_vm0, %v34959_v19  ;;  %26232 = vmatmul.mubr.msk.f32.gmra.mrb[44].mxu1 %vm204_vm0, %v32221_v53 }
 0x51b   : > { %25978 = vmatprep.mubr.msk.f32.mxu0 %vm204_vm0, %v32002_v60  ;;  %26234 = vmatprep.mubr.msk.f32.mxu1 %vm204_vm0, %v32455_v24  ;;  %v10292_v60 = vld [vmem:[#allocation2 + $0x39] sm:$0xff] }
 0x51e   : > { %25979 = vmatmul.mubr.msk.f32.gmra.mrb[46].mxu0 %vm204_vm0, %v32009_v50  ;;  %26235 = vmatmul.mubr.msk.f32.gmra.mrb[46].mxu1 %vm204_vm0, %v32461_v46  ;;  %v10293_v50 = vld [vmem:[#allocation2 + $0x49] sm:$0xff] }
 0x51f   : > { %25989 = vmatprep.mubr.msk.f32.mxu0 %vm204_vm0, %v10291_v34  ;;  %26245 = vmatprep.mubr.msk.f32.mxu1 %vm204_vm0, %v32021_v18  ;;  %v10294_v18 = vld [vmem:[#allocation2 + $0x51] sm:$0xff] }
 0x522   : > { %25990 = vmatmul.mubr.msk.f32.vlgmr.msra.gmra.mrb[32].mxu0 %vm204_vm0, %v10292_v60  ;;  %26246 = vmatmul.mubr.msk.f32.vlgmr.msra.gmra.mrb[32].mxu1 %vm204_vm0, %v32031_v56  ;;  %v10295_v56 = vld [vmem:[#allocation2 + $0x61] sm:$0xff] }
 0x523   : > { %25992 = vmatprep.mubr.msk.f32.mxu0 %vm204_vm0, %v10293_v50  ;;  %27840 = vmatpush3.bf16.msra.mxu0 %v32405_v33 }
 0x524   : > { %26248 = vmatprep.mubr.msk.f32.mxu1 %vm204_vm0, %v32041_v58  ;;  %27904 = vmatpush3.bf16.msra.mxu1 %v32325_v62  ;;  %v10296_v58 = vld [vmem:[#allocation2 + $0x69] sm:$0xff]  ;;  %v10299_v62 = vld [vmem:[#allocation2 + $0x91] sm:$0xff] }
 0x525   : > { %27842 = vmatprep.subr.bf16.mxu0 %v32470_v63  ;;  %27906 = vmatprep.subr.bf16.mxu1 %v32391_v37 }
 0x526   : > { %25993 = vmatmul.mubr.msk.f32.gmra.mrb[34].mxu0 %vm204_vm0, %v10294_v18  ;;  %26249 = vmatmul.mubr.msk.f32.gmra.mrb[34].mxu1 %vm204_vm0, %v32049_v35  ;;  %v10297_v35 = vld [vmem:[#allocation2 + $0x79] sm:$0xff] }
 0x527   : > { %25995 = vmatprep.mubr.msk.f32.mxu0 %vm204_vm0, %v10295_v56  ;;  %26251 = vmatprep.mubr.msk.f32.mxu1 %vm204_vm0, %v32057_v42  ;;  %v10298_v42 = vld [vmem:[#allocation2 + $0x81] sm:$0xff] }
 0x528   : > { %27844 = vmatpush3.bf16.msra.mxu0 %v32470_v63  ;;  %27908 = vmatpush3.bf16.msra.mxu1 %v32391_v37  ;;  %v10300_v37 = vld [vmem:[#allocation2 + $0x99] sm:$0xff] }
 0x529   : > { %27910 = vmatprep.subr.bf16.mxu1 %v32405_v33  ;;  %27918 = vmatprep.subr.bf16.mxu0 %v32482_v2 }
 0x52a   : > { %25996 = vmatmul.mubr.msk.f32.gmra.mrb[36].mxu0 %vm204_vm0, %v10296_v58  ;;  %26252 = vmatmul.mubr.msk.f32.gmra.mrb[36].mxu1 %vm204_vm0, %v32065_v27  ;;  %v10301_v27 = vld [vmem:[#allocation2 + $0xa9] sm:$0xff] }
 0x52b   : > { %25998 = vmatprep.mubr.msk.f32.mxu0 %vm204_vm0, %v10297_v35  ;;  %26254 = vmatprep.mubr.msk.f32.mxu1 %vm204_vm0, %v32073_v47  ;;  %v10302_v47 = vld [vmem:[#allocation2 + $0xb1] sm:$0xff] }
 0x52e   : > { %25999 = vmatmul.mubr.msk.f32.gmra.mrb[38].mxu0 %vm204_vm0, %v10298_v42  ;;  %26255 = vmatmul.mubr.msk.f32.gmra.mrb[38].mxu1 %vm204_vm0, %v32081_v44  ;;  %v10303_v44 = vld [vmem:[#allocation2 + $0xc1] sm:$0xff] }
 0x52f   : > { %26001 = vmatprep.mubr.msk.f32.mxu0 %vm204_vm0, %v10299_v62  ;;  %26257 = vmatprep.mubr.msk.f32.mxu1 %vm204_vm0, %v32089_v43  ;;  %v12163_v43 = vld [vmem:[#allocation2 + $0x198] sm:$0xff] }
 0x532   : > { %26002 = vmatmul.mubr.msk.f32.gmra.mrb[40].mxu0 %vm204_vm0, %v10300_v37  ;;  %26258 = vmatmul.mubr.msk.f32.gmra.mrb[40].mxu1 %vm204_vm0, %v32097_v0  ;;  %v10304_v0 = vld [vmem:[#allocation2 + $0xc9] sm:$0xff] }
 0x533   : > { %26004 = vmatprep.mubr.msk.f32.mxu0 %vm204_vm0, %v10301_v27  ;;  %26260 = vmatprep.mubr.msk.f32.mxu1 %vm204_vm0, %v32105_v15  ;;  %v10305_v15 = vld [vmem:[#allocation2 + $0xd9] sm:$0xff] }
 0x536   : > { %26005 = vmatmul.mubr.msk.f32.gmra.mrb[42].mxu0 %vm204_vm0, %v10302_v47  ;;  %26261 = vmatmul.mubr.msk.f32.gmra.mrb[42].mxu1 %vm204_vm0, %v32113_v40  ;;  %v10306_v40 = vld [vmem:[#allocation2 + $0xe1] sm:$0xff] }
 0x537   : > { %26007 = vmatprep.mubr.msk.f32.mxu0 %vm204_vm0, %v10303_v44  ;;  %26263 = vmatprep.mubr.msk.f32.mxu1 %vm204_vm0, %v32295_v1  ;;  %v12931_v1 = vld [vmem:[#allocation7 + $0x390] sm:$0xff] }
 0x538   : > { %v27921_v36 = vpack.c.bf16 %v12932_v16, %v12931_v1 }
 0x53a   : > { %26008 = vmatmul.mubr.msk.f32.gmra.mrb[44].mxu0 %vm204_vm0, %v10304_v0  ;;  %26264 = vmatmul.mubr.msk.f32.gmra.mrb[44].mxu1 %vm204_vm0, %v32301_v3  ;;  %v12379_v3 = vld [vmem:[#allocation2 + $0xf9] sm:$0xff] }
 0x53b   : > { %26010 = vmatprep.mubr.msk.f32.mxu0 %vm204_vm0, %v10305_v15  ;;  %26266 = vmatprep.mubr.msk.f32.mxu1 %vm204_vm0, %v12163_v43 }
 0x53e   : > { %26011 = vmatmul.mubr.msk.f32.gmra.mrb[46].mxu0 %vm204_vm0, %v10306_v40  ;;  %26267 = vmatmul.mubr.msk.f32.gmra.mrb[46].mxu1 %vm204_vm0, %v12164_v10 }
 0x53f   : > { %26021 = vmatprep.mubr.msk.f32.mxu0 %vm204_vm0, %v32019_v48  ;;  %26277 = vmatprep.mubr.msk.f32.mxu1 %vm204_vm0, %v12378_v55  ;;  %v12381_v48 = vld [vmem:[#allocation2 + $0x111] sm:$0xff] }
 0x542   : > { %26022 = vmatmul.mubr.msk.f32.vlgmr.msra.gmra.mrb[32].mxu0 %vm204_vm0, %v32029_v30  ;;  %26278 = vmatmul.mubr.msk.f32.vlgmr.msra.gmra.mrb[32].mxu1 %vm204_vm0, %v12379_v3  ;;  %v12382_v30 = vld [vmem:[#allocation2 + $0x121] sm:$0xff] }
 0x543   : > { %26024 = vmatprep.mubr.msk.f32.mxu0 %vm204_vm0, %v34928_v9  ;;  %26280 = vmatprep.mubr.msk.f32.mxu1 %vm204_vm0, %v12380_v25  ;;  %v12383_v9 = vld [vmem:[#allocation2 + $0x129] sm:$0xff] }
 0x544   : > { %27912 = vmatpush3.bf16.msra.mxu1 %v32405_v33  ;;  %27920 = vmatpush3.bf16.msra.mxu0 %v32482_v2  ;;  %v12386_v33 = vld [vmem:[#allocation2 + $0x151] sm:$0xff] }
 0x545   : > { %27914 = vmatprep.subr.bf16.mxu1 %v32470_v63  ;;  %27922 = vmatprep.subr.bf16.mxu0 %v27921_v36 }
 0x546   : > { %26025 = vmatmul.mubr.msk.f32.gmra.mrb[34].mxu0 %vm204_vm0, %v34930_v29  ;;  %26281 = vmatmul.mubr.msk.f32.gmra.mrb[34].mxu1 %vm204_vm0, %v12381_v48  ;;  %v12384_v29 = vld [vmem:[#allocation2 + $0x139] sm:$0xff] }
 0x547   : > { %26027 = vmatprep.mubr.msk.f32.mxu0 %vm204_vm0, %v34932_v11  ;;  %26283 = vmatprep.mubr.msk.f32.mxu1 %vm204_vm0, %v12382_v30  ;;  %v12385_v11 = vld [vmem:[#allocation2 + $0x141] sm:$0xff] }
 0x548   : > { %27916 = vmatpush3.bf16.msra.mxu1 %v32470_v63  ;;  %27924 = vmatpush3.bf16.msra.mxu0 %v27921_v36 }
 0x549   : > { %27990 = vmatprep.subr.bf16.mxu1 %v32482_v2 }
 0x54a   : > { %26028 = vmatmul.mubr.msk.f32.gmra.mrb[36].mxu0 %vm204_vm0, %v34934_v17  ;;  %26284 = vmatmul.mubr.msk.f32.gmra.mrb[36].mxu1 %vm204_vm0, %v12383_v9  ;;  %v12387_v17 = vld [vmem:[#allocation2 + $0x159] sm:$0xff] }
 0x54b   : > { %26030 = vmatprep.mubr.msk.f32.mxu0 %vm204_vm0, %v34936_v31  ;;  %26286 = vmatprep.mubr.msk.f32.mxu1 %vm204_vm0, %v12384_v29  ;;  %v12388_v31 = vld [vmem:[#allocation2 + $0x169] sm:$0xff] }
 0x54e   : > { %26031 = vmatmul.mubr.msk.f32.gmra.mrb[38].mxu0 %vm204_vm0, %v34938_v41  ;;  %26287 = vmatmul.mubr.msk.f32.gmra.mrb[38].mxu1 %vm204_vm0, %v12385_v11  ;;  %v12389_v41 = vld [vmem:[#allocation2 + $0x171] sm:$0xff] }
 0x54f   : > { %26033 = vmatprep.mubr.msk.f32.mxu0 %vm204_vm0, %v34940_v22  ;;  %26289 = vmatprep.mubr.msk.f32.mxu1 %vm204_vm0, %v12386_v33  ;;  %v12392_v22 = vld [vmem:[#allocation2 + $0x199] sm:$0xff] }
 0x552   : > { %26034 = vmatmul.mubr.msk.f32.gmra.mrb[40].mxu0 %vm204_vm0, %v34942_v54  ;;  %26290 = vmatmul.mubr.msk.f32.gmra.mrb[40].mxu1 %vm204_vm0, %v12387_v17  ;;  %v12393_v54 = vld [vmem:[#allocation2 + $0x1a1] sm:$0xff] }
 0x553   : > { %26036 = vmatprep.mubr.msk.f32.mxu0 %vm204_vm0, %v34944_v20  ;;  %26292 = vmatprep.mubr.msk.f32.mxu1 %vm204_vm0, %v12388_v31 }
 0x556   : > { %26037 = vmatmul.mubr.msk.f32.gmra.mrb[42].mxu0 %vm204_vm0, %v34946_v26  ;;  %26293 = vmatmul.mubr.msk.f32.gmra.mrb[42].mxu1 %vm204_vm0, %v12389_v41 }
 0x557   : > { %26039 = vmatprep.mubr.msk.f32.mxu0 %vm204_vm0, %v32119_v21  ;;  %26295 = vmatprep.mubr.msk.f32.mxu1 %vm204_vm0, %v32375_v6  ;;  %v12909_v21 = vld [vmem:[#allocation7 + $0x368] sm:$0xff] }
 0x55a   : > { %26040 = vmatmul.mubr.msk.f32.gmra.mrb[44].mxu0 %vm204_vm0, %v32125_v13  ;;  %26296 = vmatmul.mubr.msk.f32.gmra.mrb[44].mxu1 %vm204_vm0, %v32381_v38  ;;  %v12908_v13 = vld [vmem:[#allocation7 + $0x360] sm:$0xff] }
 0x55b   : > { %26042 = vmatprep.mubr.msk.f32.mxu0 %vm204_vm0, %v32136_v59  ;;  %26298 = vmatprep.mubr.msk.f32.mxu1 %vm204_vm0, %v12392_v22  ;;  %v12910_v59 = vld [vmem:[#allocation7 + $0x370] sm:$0xff] }
 0x55e   : > { %26043 = vmatmul.mubr.msk.f32.gmra.mrb[46].mxu0 %vm204_vm0, %v32141_v23  ;;  %26299 = vmatmul.mubr.msk.f32.gmra.mrb[46].mxu1 %vm204_vm0, %v12393_v54  ;;  %v12911_v23 = vld [vmem:[#allocation7 + $0x378] sm:$0xff] }
 0x55f   : > { %26309 = vmatprep.mubr.msk.f32.mxu1 %vm204_vm0, %v32151_v14  ;;  %v32618_v14 = vpack.c.bf16 %v12911_v23, %v12910_v59 }
 0x562   : > { %26310 = vmatmul.mubr.msk.f32.vlgmr.msra.gmra.mrb[32].mxu1 %vm204_vm0, %v32159_v39  ;;  %v13336_v39 = vld [vmem:[#allocation7 + $0x3a0] sm:$0xff] }
 0x563   : > { %26312 = vmatprep.mubr.msk.f32.mxu1 %vm204_vm0, %v32167_v51  ;;  %27992 = vmatpush3.bf16.msra.mxu1 %v32482_v2  ;;  %v13337_v51 = vld [vmem:[#allocation7 + $0x3a8] sm:$0xff] }
 0x564   : > { %27994 = vmatprep.subr.bf16.mxu1 %v27921_v36 }
 0x566   : > { %26313 = vmatmul.mubr.msk.f32.gmra.mrb[34].mxu1 %vm204_vm0, %v32173_v12  ;;  %v32622_v12 = vpack.c.bf16 %v13337_v51, %v13336_v39 }
 0x567   : > { %26315 = vmatprep.mubr.msk.f32.mxu1 %vm204_vm0, %v32179_v32  ;;  %27996 = vmatpush3.bf16.msra.mxu1 %v27921_v36  ;;  %v32628_v32 = vld [vmem:[%s34523_s2 + $0x2] ss:$0 sm:$0xff] }
 0x56a   : > { %26316 = vmatmul.mubr.msk.f32.gmra.mrb[36].mxu1 %vm204_vm0, %v32185_v4  ;;  %v12621_v4 = vld [vmem:[#allocation2 + $0x19a] sm:$0xff] }
 0x56b   : > { %26318 = vmatprep.mubr.msk.f32.mxu1 %vm204_vm0, %v32191_v28  ;;  %v12622_v28 = vld [vmem:[#allocation2 + $0x1a2] sm:$0xff] }
 0x56e   : > { %26319 = vmatmul.mubr.msk.f32.gmra.mrb[38].mxu1 %vm204_vm0, %v32197_v5  ;;  %v12912_v5 = vld [vmem:[#allocation3 + $0x1] sm:$0xff] }
 0x56f   : > { %26321 = vmatprep.mubr.msk.f32.mxu1 %vm204_vm0, %v34955_v52  ;;  %26341 = vmatprep.mubr.msk.f32.mxu0 %vm204_vm0, %v12912_v5 }
 0x572   : > { %26322 = vmatmul.mubr.msk.f32.gmra.mrb[40].mxu1 %vm204_vm0, %v32209_v61  ;;  %v12913_v61 = vld [vmem:[#allocation3 + $0x9] sm:$0xff] }
 0x573   : > { %26324 = vmatprep.mubr.msk.f32.mxu1 %vm204_vm0, %v34958_v49  ;;  %26342 = vmatmul.mubr.msk.f32.vlgmr.msra.gmra.mrb[48].mxu0 %vm204_vm0, %v12913_v61 }
 0x576   : > { %26325 = vmatmul.mubr.msk.f32.gmra.mrb[42].mxu1 %vm204_vm0, %v32221_v53  ;;  %v32613_v53 = vpack.c.bf16 %v12909_v21, %v12908_v13 }
 0x577   : > { %26327 = vmatprep.mubr.msk.f32.mxu1 %vm204_vm0, %v32455_v24 }
 0x578   : > { %27926 = vmatprep.subr.bf16.mxu0 %v32613_v53  ;;  %27998 = vmatprep.subr.bf16.mxu1 %v32613_v53 }
 0x579   : > { %27928 = vmatpush3.bf16.msra.mxu0 %v32613_v53 }
 0x57a   : > { %26328 = vmatmul.mubr.msk.f32.gmra.mrb[44].mxu1 %vm204_vm0, %v32461_v46  ;;  %27930 = vmatprep.subr.bf16.mxu0 %v32618_v14 }
 0x57b   : > { %26330 = vmatprep.mubr.msk.f32.mxu1 %vm204_vm0, %v12621_v4 }
 0x57d   : > { %27932 = vmatpush3.bf16.msra.mxu0 %v32618_v14 }
 0x57e   : > { %26331 = vmatmul.mubr.msk.f32.gmra.mrb[46].mxu1 %vm204_vm0, %v12622_v28  ;;  %27934 = vmatprep.subr.bf16.mxu0 %v32622_v12 }
 0x615   : > { %v26023_v20 = vpop.f32.mrb[32].mxu0 }
 0x616   : > { %v10760_v26 = vadd.f32 %v26023_v20, %v32628_v32  ;;  %v10656_v6 = vpop.f32.mrb[33].mxu0 }
 0x617   : > { %v10759_v38 = vadd.f32 %v32628_v32, %v10656_v6 }
 0x618   : > { %v10776_v52 = vmax.f32 %v10760_v26, 0.0 }
 0x619   : > { %v10775_v49 = vmax.f32 %v10759_v38, 0.0  ;;  %v26026_v19 = vpop.f32.mrb[34].mxu0 }
 0x61a   : > { %10792 = vst.msk [vmem:[#allocation3 + $0x21] sm:$0xff] %vm204_vm0, %v10776_v52  ;;  %v10762_v24 = vadd.f32 %v26026_v19, %v32628_v32  ;;  %v10666_v46 = vpop.f32.mrb[35].mxu0 }
 0x61b   : > { %10791 = vst.msk [vmem:[#allocation3 + $0x19] sm:$0xff] %vm204_vm0, %v10775_v49  ;;  %v10761_v34 = vadd.f32 %v32628_v32, %v10666_v46 }
 0x61c   : > { %v10778_v7 = vmax.f32 %v10762_v24, 0.0 }
 0x61d   : > { %v10777_v57 = vmax.f32 %v10761_v34, 0.0  ;;  %v26029_v60 = vpop.f32.mrb[36].mxu0 }
 0x61e   : > { %10794 = vst.msk [vmem:[#allocation3 + $0x39] sm:$0xff] %vm204_vm0, %v10778_v7  ;;  %v10764_v63 = vadd.f32 %v26029_v60, %v32628_v32  ;;  %v10676_v50 = vpop.f32.mrb[37].mxu0  ;;  %v12891_v7 = vld [vmem:[#allocation3] sm:$0xff] }
 0x61f   : > { %10793 = vst.msk [vmem:[#allocation3 + $0x31] sm:$0xff] %vm204_vm0, %v10777_v57  ;;  %v10763_v8 = vadd.f32 %v32628_v32, %v10676_v50  ;;  %v13339_v50 = vld [vmem:[#allocation7 + $0x3b8] sm:$0xff] }
 0x620   : > { %v10780_v45 = vmax.f32 %v10764_v63, 0.0  ;;  %v13338_v63 = vld [vmem:[#allocation7 + $0x3b0] sm:$0xff] }
 0x621   : > { %v10779_v18 = vmax.f32 %v10763_v8, 0.0  ;;  %v26032_v2 = vpop.f32.mrb[38].mxu0  ;;  %v32648_v62 = vld [vmem:[#allocation3 + $0x21] sm:$0xff] }
 0x622   : > { %10796 = vst.msk [vmem:[#allocation3 + $0x51] sm:$0xff] %vm204_vm0, %v10780_v45  ;;  %v10766_v56 = vadd.f32 %v26032_v2, %v32628_v32  ;;  %v10686_v58 = vpop.f32.mrb[39].mxu0  ;;  %v32642_v35 = vld [vmem:[#allocation3 + $0x19] sm:$0xff]  ;;  %v12892_v2 = vld [vmem:[#allocation3 + $0x8] sm:$0xff] }
 0x623   : > { %10795 = vst.msk [vmem:[#allocation3 + $0x49] sm:$0xff] %vm204_vm0, %v10779_v18  ;;  %v10765_v42 = vadd.f32 %v32628_v32, %v10686_v58  ;;  %26344 = vmatprep.mubr.msk.f32.mxu0 %vm204_vm0, %v32642_v35 }
 0x624   : > { %v10782_v37 = vmax.f32 %v10766_v56, 0.0  ;;  %26345 = vmatmul.mubr.msk.f32.gmra.mrb[50].mxu0 %vm204_vm0, %v32648_v62 }
 0x625   : > { %v10781_v27 = vmax.f32 %v10765_v42, 0.0  ;;  %v26035_v47 = vpop.f32.mrb[40].mxu0  ;;  %v32660_v10 = vld [vmem:[#allocation3 + $0x39] sm:$0xff] }
 0x626   : > { %10798 = vst.msk [vmem:[#allocation3 + $0x69] sm:$0xff] %vm204_vm0, %v10782_v37  ;;  %v10768_v44 = vadd.f32 %v26035_v47, %v32628_v32  ;;  %v10696_v43 = vpop.f32.mrb[41].mxu0  ;;  %v32654_v0 = vld [vmem:[#allocation3 + $0x31] sm:$0xff]  ;;  %v32729_v37 = vpack.c.bf16 %v13339_v50, %v13338_v63 }
 0x627   : > { %10797 = vst.msk [vmem:[#allocation3 + $0x61] sm:$0xff] %vm204_vm0, %v10781_v27  ;;  %v10767_v15 = vadd.f32 %v32628_v32, %v10696_v43  ;;  %26347 = vmatprep.mubr.msk.f32.mxu0 %vm204_vm0, %v32654_v0  ;;  %v13567_v43 = vld [vmem:[#allocation7 + $0x3c8] sm:$0xff] }
 0x628   : > { %v10784_v40 = vmax.f32 %v10768_v44, 0.0  ;;  %26348 = vmatmul.mubr.msk.f32.gmra.mrb[52].mxu0 %vm204_vm0, %v32660_v10  ;;  %v13566_v44 = vld [vmem:[#allocation7 + $0x3c0] sm:$0xff] }
 0x629   : > { %v10783_v55 = vmax.f32 %v10767_v15, 0.0  ;;  %v26038_v1 = vpop.f32.mrb[42].mxu0  ;;  %v32672_v48 = vld [vmem:[#allocation3 + $0x51] sm:$0xff] }
 0x62a   : > { %10800 = vst.msk [vmem:[#allocation3 + $0x81] sm:$0xff] %vm204_vm0, %v10784_v40  ;;  %v10770_v16 = vadd.f32 %v26038_v1, %v32628_v32  ;;  %v10706_v3 = vpop.f32.mrb[43].mxu0  ;;  %v32666_v36 = vld [vmem:[#allocation3 + $0x49] sm:$0xff]  ;;  %v32740_v40 = vld [vmem:[#allocation3 + $0x18] sm:$0xff] }
 0x62b   : > { %10799 = vst.msk [vmem:[#allocation3 + $0x79] sm:$0xff] %vm204_vm0, %v10783_v55  ;;  %v10769_v25 = vadd.f32 %v32628_v32, %v10706_v3  ;;  %26350 = vmatprep.mubr.msk.f32.mxu0 %vm204_vm0, %v32666_v36 }
 0x62c   : > { %v10786_v30 = vmax.f32 %v10770_v16, 0.0  ;;  %26351 = vmatmul.mubr.msk.f32.gmra.mrb[54].mxu0 %vm204_vm0, %v32672_v48 }
 0x62d   : > { %v10785_v9 = vmax.f32 %v10769_v25, 0.0  ;;  %v26041_v29 = vpop.f32.mrb[44].mxu0  ;;  %v32684_v41 = vld [vmem:[#allocation3 + $0x69] sm:$0xff] }
 0x62e   : > { %10802 = vst.msk [vmem:[#allocation3 + $0x99] sm:$0xff] %vm204_vm0, %v10786_v30  ;;  %v10772_v11 = vadd.f32 %v26041_v29, %v32628_v32  ;;  %v10716_v33 = vpop.f32.mrb[45].mxu0  ;;  %v32678_v17 = vld [vmem:[#allocation3 + $0x61] sm:$0xff]  ;;  %v32751_v30 = vpack.c.bf16 %v13567_v43, %v13566_v44 }
 0x62f   : > { %10801 = vst.msk [vmem:[#allocation3 + $0x91] sm:$0xff] %vm204_vm0, %v10785_v9  ;;  %v10771_v31 = vadd.f32 %v32628_v32, %v10716_v33  ;;  %26353 = vmatprep.mubr.msk.f32.mxu0 %vm204_vm0, %v32678_v17  ;;  %v32757_v29 = vld [vmem:[#allocation3 + $0x20] sm:$0xff]  ;;  %v32766_v33 = vld [vmem:[#allocation3 + $0x30] sm:$0xff] }
 0x630   : > { %v10788_v22 = vmax.f32 %v10772_v11, 0.0  ;;  %26354 = vmatmul.mubr.msk.f32.gmra.mrb[56].mxu0 %vm204_vm0, %v32684_v41 }
 0x631   : > { %v10787_v54 = vmax.f32 %v10771_v31, 0.0  ;;  %v26044_v4 = vpop.f32.mrb[46].mxu0  ;;  %v32696_v21 = vld [vmem:[#allocation3 + $0x81] sm:$0xff] }
 0x632   : > { %10804 = vst.msk [vmem:[#allocation3 + $0xb1] sm:$0xff] %vm204_vm0, %v10788_v22  ;;  %v10774_v28 = vadd.f32 %v26044_v4, %v32628_v32  ;;  %v10726_v5 = vpop.f32.mrb[47].mxu0  ;;  %v32690_v61 = vld [vmem:[#allocation3 + $0x79] sm:$0xff] }
 0x633   : > { %10803 = vst.msk [vmem:[#allocation3 + $0xa9] sm:$0xff] %vm204_vm0, %v10787_v54  ;;  %v10773_v13 = vadd.f32 %v32628_v32, %v10726_v5  ;;  %26356 = vmatprep.mubr.msk.f32.mxu0 %vm204_vm0, %v32690_v61 }
 0x634   : > { %v10790_v59 = vmax.f32 %v10774_v28, 0.0  ;;  %26357 = vmatmul.mubr.msk.f32.gmra.mrb[58].mxu0 %vm204_vm0, %v32696_v21 }
 0x635   : > { %v10789_v23 = vmax.f32 %v10773_v13, 0.0  ;;  %v26311_v39 = vpop.f32.mrb[32].mxu1  ;;  %v32708_v38 = vld [vmem:[#allocation3 + $0x99] sm:$0xff] }
 0x636   : > { %10806 = vst.msk [vmem:[#allocation3 + $0xc9] sm:$0xff] %vm204_vm0, %v10790_v59  ;;  %v12844_v51 = vadd.f32 %v26311_v39, %v32628_v32  ;;  %v12741_v20 = vpop.f32.mrb[33].mxu1  ;;  %v32702_v26 = vld [vmem:[#allocation3 + $0x91] sm:$0xff] }
 0x637   : > { %10805 = vst.msk [vmem:[#allocation3 + $0xc1] sm:$0xff] %vm204_vm0, %v10789_v23  ;;  %v12843_v6 = vadd.f32 %v32628_v32, %v12741_v20  ;;  %26359 = vmatprep.mubr.msk.f32.mxu0 %vm204_vm0, %v32702_v26  ;;  %v32781_v13 = vld [vmem:[#allocation3 + $0x38] sm:$0xff] }
 0x638   : > { %v12860_v52 = vmax.f32 %v12844_v51, 0.0  ;;  %26360 = vmatmul.mubr.msk.f32.gmra.mrb[60].mxu0 %vm204_vm0, %v32708_v38 }
 0x639   : > { %v12859_v49 = vmax.f32 %v12843_v6, 0.0  ;;  %v26314_v19 = vpop.f32.mrb[34].mxu1  ;;  %v32720_v60 = vld [vmem:[#allocation3 + $0xb1] sm:$0xff] }
 0x63a   : > { %12876 = vst.msk [vmem:[#allocation3 + $0xe1] sm:$0xff] %vm204_vm0, %v12860_v52  ;;  %v12846_v24 = vadd.f32 %v26314_v19, %v32628_v32  ;;  %v12751_v46 = vpop.f32.mrb[35].mxu1  ;;  %v32714_v34 = vld [vmem:[#allocation3 + $0xa9] sm:$0xff] }
 0x63b   : > { %12875 = vst.msk [vmem:[#allocation3 + $0xd9] sm:$0xff] %vm204_vm0, %v12859_v49  ;;  %v12845_v57 = vadd.f32 %v32628_v32, %v12751_v46  ;;  %26362 = vmatprep.mubr.msk.f32.mxu0 %vm204_vm0, %v32714_v34  ;;  %v32802_v19 = vld [vmem:[#allocation3 + $0x50] sm:$0xff] }
 0x63c   : > { %v12862_v8 = vmax.f32 %v12846_v24, 0.0  ;;  %26363 = vmatmul.mubr.msk.f32.gmra.mrb[62].mxu0 %vm204_vm0, %v32720_v60 }
 0x63d   : > { %v12861_v45 = vmax.f32 %v12845_v57, 0.0  ;;  %v26317_v18 = vpop.f32.mrb[36].mxu1  ;;  %26373 = vmatprep.mubr.msk.f32.mxu0 %vm204_vm0, %v12891_v7  ;;  %v32735_v47 = vld [vmem:[#allocation3 + $0xc9] sm:$0xff]  ;;  %v32810_v7 = vld [vmem:[#allocation3 + $0x60] sm:$0xff] }
 0x63e   : > { %12878 = vst.msk [vmem:[#allocation3 + $0xf9] sm:$0xff] %vm204_vm0, %v12862_v8  ;;  %v12848_v56 = vadd.f32 %v26317_v18, %v32628_v32  ;;  %v12761_v58 = vpop.f32.mrb[37].mxu1  ;;  %v32727_v42 = vld [vmem:[#allocation3 + $0xc1] sm:$0xff]  ;;  %34962 = vst [vmem:[#allocation18_spill] sm:$0xff] %v32810_v7 }
 0x63f   : > { %12877 = vst.msk [vmem:[#allocation3 + $0xf1] sm:$0xff] %vm204_vm0, %v12861_v45  ;;  %v12847_v27 = vadd.f32 %v32628_v32, %v12761_v58  ;;  %26629 = vmatprep.mubr.msk.f32.mxu1 %vm204_vm0, %v32727_v42 }
 0x640   : > { %v12864_v15 = vmax.f32 %v12848_v56, 0.0  ;;  %26374 = vmatmul.mubr.msk.f32.vlgmr.msra.gmra.mrb[48].mxu0 %vm204_vm0, %v12892_v2  ;;  %26630 = vmatmul.mubr.msk.f32.vlgmr.msra.gmra.mrb[48].mxu1 %vm204_vm0, %v32735_v47  ;;  %v32822_v2 = vld [vmem:[#allocation3 + $0x68] sm:$0xff] }
 0x641   : > { %v12863_v55 = vmax.f32 %v12847_v27, 0.0  ;;  %v26320_v1 = vpop.f32.mrb[38].mxu1  ;;  %26376 = vmatprep.mubr.msk.f32.mxu0 %vm204_vm0, %v32740_v40  ;;  %27936 = vmatpush3.bf16.msra.mxu0 %v32622_v12  ;;  %v32759_v11 = vld [vmem:[#allocation3 + $0xe1] sm:$0xff]  ;;  %34964 = vst [vmem:[#allocation22_spill] sm:$0xff] %v32822_v2  ;;  %v32830_v27 = vld [vmem:[#allocation3 + $0x78] sm:$0xff] }
 0x642   : > { %12880 = vst.msk [vmem:[#allocation3 + $0x111] sm:$0xff] %vm204_vm0, %v12864_v15  ;;  %v12850_v16 = vadd.f32 %v26320_v1, %v32628_v32  ;;  %28000 = vmatpush3.bf16.msra.mxu1 %v32613_v53  ;;  %v12771_v3 = vpop.f32.mrb[39].mxu1  ;;  %v32748_v25 = vld [vmem:[#allocation3 + $0xd9] sm:$0xff]  ;;  %27938 = vmatprep.subr.bf16.mxu0 %v32729_v37  ;;  %34966 = vst [vmem:[#allocation24_spill] sm:$0xff] %v32830_v27 }
 0x643   : > { %12879 = vst.msk [vmem:[#allocation3 + $0x109] sm:$0xff] %vm204_vm0, %v12863_v55  ;;  %v12849_v9 = vadd.f32 %v32628_v32, %v12771_v3  ;;  %26632 = vmatprep.mubr.msk.f32.mxu1 %vm204_vm0, %v32748_v25  ;;  %28002 = vmatprep.subr.bf16.mxu1 %v32618_v14  ;;  %v32842_v3 = vld [vmem:[#allocation3 + $0x80] sm:$0xff] }
 0x644   : > { %v12866_v53 = vmax.f32 %v12850_v16, 0.0  ;;  %26377 = vmatmul.mubr.msk.f32.gmra.mrb[50].mxu0 %vm204_vm0, %v32757_v29  ;;  %26633 = vmatmul.mubr.msk.f32.gmra.mrb[50].mxu1 %vm204_vm0, %v32759_v11  ;;  %34968 = vst [vmem:[#allocation26_spill] sm:$0xff] %v32842_v3 }
 0x645   : > { %v12865_v31 = vmax.f32 %v12849_v9, 0.0  ;;  %v26323_v22 = vpop.f32.mrb[40].mxu1  ;;  %26379 = vmatprep.mubr.msk.f32.mxu0 %vm204_vm0, %v32766_v33  ;;  %27940 = vmatpush3.bf16.msra.mxu0 %v32729_v37  ;;  %v32783_v59 = vld [vmem:[#allocation3 + $0xf9] sm:$0xff] }
 0x646   : > { %12882 = vst.msk [vmem:[#allocation3 + $0x129] sm:$0xff] %vm204_vm0, %v12866_v53  ;;  %v12852_v54 = vadd.f32 %v26323_v22, %v32628_v32  ;;  %v12781_v4 = vpop.f32.mrb[41].mxu1  ;;  %v32773_v28 = vld [vmem:[#allocation3 + $0xf1] sm:$0xff]  ;;  %28004 = vmatpush3.bf16.msra.mxu1 %v32618_v14  ;;  %27942 = vmatprep.subr.bf16.mxu0 %v32751_v30  ;;  %v32790_v14 = vld [vmem:[#allocation3 + $0x48] sm:$0xff] }
 0x647   : > { %12881 = vst.msk [vmem:[#allocation3 + $0x121] sm:$0xff] %vm204_vm0, %v12865_v31  ;;  %v12851_v5 = vadd.f32 %v32628_v32, %v12781_v4  ;;  %26635 = vmatprep.mubr.msk.f32.mxu1 %vm204_vm0, %v32773_v28  ;;  %28006 = vmatprep.subr.bf16.mxu1 %v32622_v12  ;;  %v32850_v31 = vld [vmem:[#allocation3 + $0x90] sm:$0xff] }
 0x648   : > { %v12868_v23 = vmax.f32 %v12852_v54, 0.0  ;;  %26380 = vmatmul.mubr.msk.f32.gmra.mrb[52].mxu0 %vm204_vm0, %v32781_v13  ;;  %26636 = vmatmul.mubr.msk.f32.gmra.mrb[52].mxu1 %vm204_vm0, %v32783_v59  ;;  %34970 = vst [vmem:[#allocation28_spill] sm:$0xff] %v32850_v31  ;;  %v32860_v54 = vld [vmem:[#allocation3 + $0x98] sm:$0xff] }
 0x649   : > { %v12867_v39 = vmax.f32 %v12851_v5, 0.0  ;;  %v26326_v51 = vpop.f32.mrb[42].mxu1  ;;  %26382 = vmatprep.mubr.msk.f32.mxu0 %vm204_vm0, %v32790_v14  ;;  %v32804_v24 = vld [vmem:[#allocation3 + $0x111] sm:$0xff]  ;;  %34972 = vst [vmem:[#allocation30_spill] sm:$0xff] %v32860_v54  ;;  %v32868_v5 = vld [vmem:[#allocation3 + $0xa8] sm:$0xff] }
 0x64a   : > { %12884 = vst.msk [vmem:[#allocation3 + $0x141] sm:$0xff] %vm204_vm0, %v12868_v23  ;;  %v12854_v20 = vadd.f32 %v26326_v51, %v32628_v32  ;;  %v12791_v6 = vpop.f32.mrb[43].mxu1  ;;  %v32796_v52 = vld [vmem:[#allocation3 + $0x109] sm:$0xff]  ;;  %34961 = vst [vmem:[#allocation36_spill] sm:$0xff] %v32804_v24 }
 0x64b   : > { %34960 = vst [vmem:[#allocation16_spill] sm:$0xff] %v32796_v52  ;;  %12883 = vst.msk [vmem:[#allocation3 + $0x139] sm:$0xff] %vm204_vm0, %v12867_v39  ;;  %v12853_v49 = vadd.f32 %v32628_v32, %v12791_v6  ;;  %26638 = vmatprep.mubr.msk.f32.mxu1 %vm204_vm0, %v32796_v52  ;;  %v13319_v39 = vld [vmem:[#allocation3 + $0x2] sm:$0xff]  ;;  %v32876_v51 = vld [vmem:[#allocation3 + $0xb0] sm:$0xff] }
 0x64c   : > { %v12870_v46 = vmax.f32 %v12854_v20, 0.0  ;;  %26383 = vmatmul.mubr.msk.f32.gmra.mrb[54].mxu0 %vm204_vm0, %v32802_v19  ;;  %26639 = vmatmul.mubr.msk.f32.gmra.mrb[54].mxu1 %vm204_vm0, %v32804_v24  ;;  %34974 = vst [vmem:[#allocation13_spill] sm:$0xff] %v32868_v5  ;;  %34976 = vst [vmem:[#allocation32_spill] sm:$0xff] %v32876_v51  ;;  %v32884_v6 = vld [vmem:[#allocation3 + $0xc0] sm:$0xff] }
 0x64d   : > { %v12869_v57 = vmax.f32 %v12853_v49, 0.0  ;;  %v26329_v63 = vpop.f32.mrb[44].mxu1  ;;  %26385 = vmatprep.mubr.msk.f32.mxu0 %vm204_vm0, %v32810_v7  ;;  %v32824_v56 = vld [vmem:[#allocation3 + $0x129] sm:$0xff]  ;;  %34978 = vst [vmem:[#allocation34_spill] sm:$0xff] %v32884_v6  ;;  %v13568_v49 = vld [vmem:[#allocation7 + $0x3d0] sm:$0xff] }
 0x64e   : > { %12886 = vst.msk [vmem:[#allocation3 + $0x159] sm:$0xff] %vm204_vm0, %v12870_v46  ;;  %v12856_v50 = vadd.f32 %v26329_v63, %v32628_v32  ;;  %v12801_v8 = vpop.f32.mrb[45].mxu1  ;;  %v32816_v45 = vld [vmem:[#allocation3 + $0x121] sm:$0xff]  ;;  %34965 = vst [vmem:[#allocation15_spill] sm:$0xff] %v32824_v56 }
 0x64f   : > { %34963 = vst [vmem:[#allocation14_spill] sm:$0xff] %v32816_v45  ;;  %12885 = vst.msk [vmem:[#allocation3 + $0x151] sm:$0xff] %vm204_vm0, %v12869_v57  ;;  %v12855_v18 = vadd.f32 %v32628_v32, %v12801_v8  ;;  %26641 = vmatprep.mubr.msk.f32.mxu1 %vm204_vm0, %v32816_v45  ;;  %v13569_v46 = vld [vmem:[#allocation7 + $0x3d8] sm:$0xff]  ;;  %v32896_v8 = vld [vmem:[#allocation3 + $0x1a] sm:$0xff] }
 0x650   : > { %v12872_v58 = vmax.f32 %v12856_v50, 0.0  ;;  %26386 = vmatmul.mubr.msk.f32.gmra.mrb[56].mxu0 %vm204_vm0, %v32822_v2  ;;  %26642 = vmatmul.mubr.msk.f32.gmra.mrb[56].mxu1 %vm204_vm0, %v32824_v56  ;;  %v13320_v57 = vld [vmem:[#allocation3 + $0xa] sm:$0xff]  ;;  %v32891_v50 = vpack.c.bf16 %v13569_v46, %v13568_v49  ;;  %v13798_v24 = vld [vmem:[#allocation7 + $0x3f0] sm:$0xff] }
 0x651   : > { %v12871_v44 = vmax.f32 %v12855_v18, 0.0  ;;  %v26332_v43 = vpop.f32.mrb[46].mxu1  ;;  %26388 = vmatprep.mubr.msk.f32.mxu0 %vm204_vm0, %v32830_v27  ;;  %v32844_v9 = vld [vmem:[#allocation3 + $0x141] sm:$0xff]  ;;  %v13796_v18 = vld [vmem:[#allocation7 + $0x3e0] sm:$0xff] }
 0x652   : > { %12888 = vst.msk [vmem:[#allocation3 + $0x171] sm:$0xff] %vm204_vm0, %v12872_v58  ;;  %v12858_v15 = vadd.f32 %v26332_v43, %v32628_v32  ;;  %v12811_v55 = vpop.f32.mrb[47].mxu1  ;;  %v32836_v1 = vld [vmem:[#allocation3 + $0x139] sm:$0xff]  ;;  %34969 = vst [vmem:[#allocation21_spill] sm:$0xff] %v32844_v9  ;;  %v32889_v63 = vld [vmem:[#allocation3 + $0xc8] sm:$0xff] }
 0x653   : > { %34967 = vst [vmem:[#allocation17_spill] sm:$0xff] %v32836_v1  ;;  %12887 = vst.msk [vmem:[#allocation3 + $0x169] sm:$0xff] %vm204_vm0, %v12871_v44  ;;  %v12857_v16 = vadd.f32 %v32628_v32, %v12811_v55  ;;  %26644 = vmatprep.mubr.msk.f32.mxu1 %vm204_vm0, %v32836_v1  ;;  %v13797_v58 = vld [vmem:[#allocation7 + $0x3e8] sm:$0xff]  ;;  %v32906_v43 = vld [vmem:[#allocation3 + $0x22] sm:$0xff] }
 0x654   : > { %v12874_v53 = vmax.f32 %v12858_v15, 0.0  ;;  %26389 = vmatmul.mubr.msk.f32.gmra.mrb[58].mxu0 %vm204_vm0, %v32842_v3  ;;  %26645 = vmatmul.mubr.msk.f32.gmra.mrb[58].mxu1 %vm204_vm0, %v32844_v9  ;;  %34979 = vst [vmem:[#allocation31_spill] sm:$0xff] %v32889_v63  ;;  %v32901_v44 = vld [vmem:[#allocation3 + $0xd8] sm:$0xff]  ;;  %v32908_v15 = vld [vmem:[#allocation3 + $0xe0] sm:$0xff]  ;;  %v32912_v55 = vpack.c.bf16 %v13797_v58, %v13796_v18  ;;  %v32940_v49 = vld [vmem:[#allocation3 + $0x108] sm:$0xff] }
 0x655   : > { %v12873_v22 = vmax.f32 %v12857_v16, 0.0  ;;  %26391 = vmatprep.mubr.msk.f32.mxu0 %vm204_vm0, %v32850_v31  ;;  %v32862_v4 = vld [vmem:[#allocation3 + $0x159] sm:$0xff]  ;;  %v32948_v46 = vld [vmem:[#allocation3 + $0x110] sm:$0xff] }
 0x656   : > { %12890 = vst.msk [vmem:[#allocation3 + $0x189] sm:$0xff] %vm204_vm0, %v12874_v53  ;;  %v32855_v32 = vld [vmem:[#allocation3 + $0x151] sm:$0xff]  ;;  %34973 = vst [vmem:[#allocation25_spill] sm:$0xff] %v32862_v4  ;;  %v32956_v18 = vld [vmem:[#allocation3 + $0x120] sm:$0xff] }
 0x657   : > { %34971 = vst [vmem:[#allocation23_spill] sm:$0xff] %v32855_v32  ;;  %12889 = vst.msk [vmem:[#allocation3 + $0x181] sm:$0xff] %vm204_vm0, %v12873_v22  ;;  %26647 = vmatprep.mubr.msk.f32.mxu1 %vm204_vm0, %v32855_v32  ;;  %v32918_v16 = vld [vmem:[#allocation3 + $0x32] sm:$0xff]  ;;  %v32962_v58 = vld [vmem:[#allocation3 + $0x6a] sm:$0xff] }
 0x658   : > { %26392 = vmatmul.mubr.msk.f32.gmra.mrb[60].mxu0 %vm204_vm0, %v32860_v54  ;;  %26648 = vmatmul.mubr.msk.f32.gmra.mrb[60].mxu1 %vm204_vm0, %v32862_v4  ;;  %v32920_v53 = vld [vmem:[#allocation3 + $0xf0] sm:$0xff]  ;;  %v32930_v22 = vld [vmem:[#allocation3 + $0xf8] sm:$0xff]  ;;  %34983 = vst [vmem:[#allocation40_spill] sm:$0xff] %v32962_v58  ;;  %v32978_v32 = vld [vmem:[#allocation3 + $0x82] sm:$0xff] }
 0x659   : > { %26394 = vmatprep.mubr.msk.f32.mxu0 %vm204_vm0, %v32868_v5  ;;  %v32878_v20 = vld [vmem:[#allocation3 + $0x171] sm:$0xff]  ;;  %34985 = vst [vmem:[#allocation42_spill] sm:$0xff] %v32978_v32  ;;  %v32980_v9 = vld [vmem:[#allocation3 + $0x140] sm:$0xff] }
 0x65a   : > { %v32872_v23 = vld [vmem:[#allocation3 + $0x169] sm:$0xff]  ;;  %34977 = vst [vmem:[#allocation29_spill] sm:$0xff] %v32878_v20  ;;  %v32972_v4 = vld [vmem:[#allocation3 + $0x138] sm:$0xff] }
 0x65b   : > { %34975 = vst [vmem:[#allocation27_spill] sm:$0xff] %v32872_v23  ;;  %26650 = vmatprep.mubr.msk.f32.mxu1 %vm204_vm0, %v32872_v23  ;;  %v32970_v23 = vld [vmem:[#allocation3 + $0x7a] sm:$0xff]  ;;  %v32986_v1 = vld [vmem:[#allocation3 + $0x92] sm:$0xff]  ;;  %v33004_v45 = vld [vmem:[#allocation3 + $0x168] sm:$0xff] }
 0x65c   : > { %26395 = vmatmul.mubr.msk.f32.gmra.mrb[62].mxu0 %vm204_vm0, %v32876_v51  ;;  %26651 = vmatmul.mubr.msk.f32.gmra.mrb[62].mxu1 %vm204_vm0, %v32878_v20  ;;  %v32964_v20 = vld [vmem:[#allocation3 + $0x128] sm:$0xff]  ;;  %34984 = vst [vmem:[#allocation41_spill] sm:$0xff] %v32970_v23  ;;  %34986 = vst [vmem:[#allocation19_spill] sm:$0xff] %v32986_v1  ;;  %v32988_v56 = vld [vmem:[#allocation3 + $0x150] sm:$0xff] }
 0x65d   : > { %26661 = vmatprep.mubr.msk.f32.mxu1 %vm204_vm0, %v32884_v6  ;;  %26405 = vmatprep.mubr.msk.f32.mxu0 %vm204_vm0, %v13319_v39  ;;  %v32938_v39 = vld [vmem:[#allocation3 + $0x4a] sm:$0xff] }
 0x65e   : > { %34980 = vst [vmem:[#allocation37_spill] sm:$0xff] %v32938_v39 }
 0x660   : > { %26406 = vmatmul.mubr.msk.f32.vlgmr.msra.gmra.mrb[48].mxu0 %vm204_vm0, %v13320_v57  ;;  %26662 = vmatmul.mubr.msk.f32.vlgmr.msra.gmra.mrb[48].mxu1 %vm204_vm0, %v32889_v63  ;;  %v32954_v57 = vld [vmem:[#allocation3 + $0x62] sm:$0xff] }
 0x661   : > { %26408 = vmatprep.mubr.msk.f32.mxu0 %vm204_vm0, %v32896_v8  ;;  %27944 = vmatpush3.bf16.msra.mxu0 %v32751_v30  ;;  %34982 = vst [vmem:[#allocation39_spill] sm:$0xff] %v32954_v57 }
 0x662   : > { %26664 = vmatprep.mubr.msk.f32.mxu1 %vm204_vm0, %v32901_v44  ;;  %28008 = vmatpush3.bf16.msra.mxu1 %v32622_v12  ;;  %v32928_v12 = vld [vmem:[#allocation3 + $0x3a] sm:$0xff] }
 0x663   : > { %27946 = vmatprep.subr.bf16.mxu0 %v32891_v50  ;;  %28010 = vmatprep.subr.bf16.mxu1 %v32729_v37 }
 0x664   : > { %26409 = vmatmul.mubr.msk.f32.gmra.mrb[50].mxu0 %vm204_vm0, %v32906_v43  ;;  %26665 = vmatmul.mubr.msk.f32.gmra.mrb[50].mxu1 %vm204_vm0, %v32908_v15 }
 0x665   : > { %26411 = vmatprep.mubr.msk.f32.mxu0 %vm204_vm0, %v32918_v16  ;;  %26667 = vmatprep.mubr.msk.f32.mxu1 %vm204_vm0, %v32920_v53 }
 0x666   : > { %27948 = vmatpush3.bf16.msra.mxu0 %v32891_v50  ;;  %28012 = vmatpush3.bf16.msra.mxu1 %v32729_v37  ;;  %v32946_v37 = vld [vmem:[#allocation3 + $0x52] sm:$0xff] }
 0x667   : > { %27950 = vmatprep.subr.bf16.mxu0 %v32912_v55  ;;  %28014 = vmatprep.subr.bf16.mxu1 %v32751_v30  ;;  %34981 = vst [vmem:[#allocation38_spill] sm:$0xff] %v32946_v37 }
 0x668   : > { %26412 = vmatmul.mubr.msk.f32.gmra.mrb[52].mxu0 %vm204_vm0, %v32928_v12  ;;  %26668 = vmatmul.mubr.msk.f32.gmra.mrb[52].mxu1 %vm204_vm0, %v32930_v22 }
 0x669   : > { %26414 = vmatprep.mubr.msk.f32.mxu0 %vm204_vm0, %v32938_v39  ;;  %26670 = vmatprep.mubr.msk.f32.mxu1 %vm204_vm0, %v32940_v49  ;;  %v14027_v39 = vld [vmem:[#allocation7 + $0x408] sm:$0xff] }
 0x66c   : > { %26415 = vmatmul.mubr.msk.f32.gmra.mrb[54].mxu0 %vm204_vm0, %v32946_v37  ;;  %26671 = vmatmul.mubr.msk.f32.gmra.mrb[54].mxu1 %vm204_vm0, %v32948_v46  ;;  %v13799_v37 = vld [vmem:[#allocation7 + $0x3f8] sm:$0xff] }
 0x66d   : > { %26417 = vmatprep.mubr.msk.f32.mxu0 %vm204_vm0, %v32954_v57  ;;  %26673 = vmatprep.mubr.msk.f32.mxu1 %vm204_vm0, %v32956_v18  ;;  %v33012_v57 = vld [vmem:[#allocation3 + $0x170] sm:$0xff]  ;;  %v33026_v52 = vpack.c.bf16 %v13799_v37, %v13798_v24  ;;  %v33040_v24 = vld [vmem:[#allocation3 + $0xe2] sm:$0xff] }
 0x66e   : > { %v33050_v37 = vld [vmem:[#allocation3 + $0xf2] sm:$0xff] }
 0x670   : > { %26418 = vmatmul.mubr.msk.f32.gmra.mrb[56].mxu0 %vm204_vm0, %v32962_v58  ;;  %26674 = vmatmul.mubr.msk.f32.gmra.mrb[56].mxu1 %vm204_vm0, %v32964_v20  ;;  %v32996_v58 = vld [vmem:[#allocation3 + $0x158] sm:$0xff] }
 0x671   : > { %26420 = vmatprep.mubr.msk.f32.mxu0 %vm204_vm0, %v32970_v23  ;;  %26676 = vmatprep.mubr.msk.f32.mxu1 %vm204_vm0, %v32972_v4  ;;  %v32994_v23 = vld [vmem:[#allocation3 + $0x9a] sm:$0xff] }
 0x672   : > { %34987 = vst [vmem:[#allocation44_spill] sm:$0xff] %v32994_v23 }
 0x674   : > { %26421 = vmatmul.mubr.msk.f32.gmra.mrb[58].mxu0 %vm204_vm0, %v32978_v32  ;;  %26677 = vmatmul.mubr.msk.f32.gmra.mrb[58].mxu1 %vm204_vm0, %v32980_v9  ;;  %v33002_v32 = vld [vmem:[#allocation3 + $0xaa] sm:$0xff] }
 0x675   : > { %26423 = vmatprep.mubr.msk.f32.mxu0 %vm204_vm0, %v32986_v1  ;;  %26679 = vmatprep.mubr.msk.f32.mxu1 %vm204_vm0, %v32988_v56  ;;  %34988 = vst [vmem:[#allocation20_spill] sm:$0xff] %v33002_v32  ;;  %v33010_v1 = vld [vmem:[#allocation3 + $0xb2] sm:$0xff] }
 0x676   : > { %34989 = vst [vmem:[#allocation43_spill] sm:$0xff] %v33010_v1 }
 0x678   : > { %26424 = vmatmul.mubr.msk.f32.gmra.mrb[60].mxu0 %vm204_vm0, %v32994_v23  ;;  %26680 = vmatmul.mubr.msk.f32.gmra.mrb[60].mxu1 %vm204_vm0, %v32996_v58  ;;  %v33018_v23 = vld [vmem:[#allocation3 + $0xc2] sm:$0xff] }
 0x679   : > { %26426 = vmatprep.mubr.msk.f32.mxu0 %vm204_vm0, %v33002_v32  ;;  %26682 = vmatprep.mubr.msk.f32.mxu1 %vm204_vm0, %v33004_v45  ;;  %v33024_v32 = vld [vmem:[#allocation3 + $0xca] sm:$0xff] }
 0x67c   : > { %26427 = vmatmul.mubr.msk.f32.gmra.mrb[62].mxu0 %vm204_vm0, %v33010_v1  ;;  %26683 = vmatmul.mubr.msk.f32.gmra.mrb[62].mxu1 %vm204_vm0, %v33012_v57  ;;  %v14026_v1 = vld [vmem:[#allocation7 + $0x400] sm:$0xff] }
 0x67d   : > { %26437 = vmatprep.mubr.msk.f32.mxu0 %vm204_vm0, %v32740_v40  ;;  %26693 = vmatprep.mubr.msk.f32.mxu1 %vm204_vm0, %v33018_v23  ;;  %v33035_v40 = vld [vmem:[#allocation3 + $0xda] sm:$0xff] }
 0x680   : > { %26438 = vmatmul.mubr.msk.f32.vlgmr.msra.gmra.mrb[48].mxu0 %vm204_vm0, %v32757_v29  ;;  %26694 = vmatmul.mubr.msk.f32.vlgmr.msra.gmra.mrb[48].mxu1 %vm204_vm0, %v33024_v32  ;;  %v33044_v29 = vpack.c.bf16 %v14027_v39, %v14026_v1  ;;  %v33066_v1 = vld [vmem:[#allocation3 + $0x10a] sm:$0xff]  ;;  %v33078_v39 = vld [vmem:[#allocation3 + $0x122] sm:$0xff] }
 0x681   : > { %26440 = vmatprep.mubr.msk.f32.mxu0 %vm204_vm0, %v32766_v33  ;;  %27952 = vmatpush3.bf16.msra.mxu0 %v32912_v55 }
 0x682   : > { %26696 = vmatprep.mubr.msk.f32.mxu1 %vm204_vm0, %v33035_v40  ;;  %28016 = vmatpush3.bf16.msra.mxu1 %v32751_v30  ;;  %v33058_v30 = vld [vmem:[#allocation3 + $0xfa] sm:$0xff] }
 0x683   : > { %27954 = vmatprep.subr.bf16.mxu0 %v33026_v52  ;;  %28018 = vmatprep.subr.bf16.mxu1 %v32891_v50 }
 0x684   : > { %26441 = vmatmul.mubr.msk.f32.gmra.mrb[50].mxu0 %vm204_vm0, %v32781_v13  ;;  %26697 = vmatmul.mubr.msk.f32.gmra.mrb[50].mxu1 %vm204_vm0, %v33040_v24 }
 0x685   : > { %26443 = vmatprep.mubr.msk.f32.mxu0 %vm204_vm0, %v32790_v14  ;;  %26699 = vmatprep.mubr.msk.f32.mxu1 %vm204_vm0, %v33050_v37 }
 0x686   : > { %27956 = vmatpush3.bf16.msra.mxu0 %v33026_v52  ;;  %28020 = vmatpush3.bf16.msra.mxu1 %v32891_v50  ;;  %v33072_v50 = vld [vmem:[#allocation3 + $0x112] sm:$0xff] }
 0x687   : > { %27958 = vmatprep.subr.bf16.mxu0 %v33044_v29  ;;  %28022 = vmatprep.subr.bf16.mxu1 %v32912_v55 }
 0x688   : > { %26444 = vmatmul.mubr.msk.f32.gmra.mrb[52].mxu0 %vm204_vm0, %v32802_v19  ;;  %26700 = vmatmul.mubr.msk.f32.gmra.mrb[52].mxu1 %vm204_vm0, %v33058_v30 }
 0x689   : > { %26446 = vmatprep.mubr.msk.f32.mxu0 %vm204_vm0, %v32810_v7  ;;  %26702 = vmatprep.mubr.msk.f32.mxu1 %vm204_vm0, %v33066_v1  ;;  %v33084_v7 = vld [vmem:[#allocation3 + $0x12a] sm:$0xff] }
 0x68c   : > { %26447 = vmatmul.mubr.msk.f32.gmra.mrb[54].mxu0 %vm204_vm0, %v32822_v2  ;;  %26703 = vmatmul.mubr.msk.f32.gmra.mrb[54].mxu1 %vm204_vm0, %v33072_v50  ;;  %v33090_v2 = vld [vmem:[#allocation3 + $0x13a] sm:$0xff] }
 0x68d   : > { %26449 = vmatprep.mubr.msk.f32.mxu0 %vm204_vm0, %v32830_v27  ;;  %26705 = vmatprep.mubr.msk.f32.mxu1 %vm204_vm0, %v33078_v39  ;;  %v33096_v27 = vld [vmem:[#allocation3 + $0x142] sm:$0xff] }
 0x690   : > { %26450 = vmatmul.mubr.msk.f32.gmra.mrb[56].mxu0 %vm204_vm0, %v32842_v3  ;;  %26706 = vmatmul.mubr.msk.f32.gmra.mrb[56].mxu1 %vm204_vm0, %v33084_v7  ;;  %v33102_v3 = vld [vmem:[#allocation3 + $0x152] sm:$0xff] }
 0x691   : > { %26452 = vmatprep.mubr.msk.f32.mxu0 %vm204_vm0, %v32850_v31  ;;  %26708 = vmatprep.mubr.msk.f32.mxu1 %vm204_vm0, %v33090_v2  ;;  %34990 = vst [vmem:[#allocation35_spill] sm:$0xff] %v33102_v3  ;;  %v33108_v31 = vld [vmem:[#allocation3 + $0x15a] sm:$0xff] }
 0x694   : > { %26453 = vmatmul.mubr.msk.f32.gmra.mrb[58].mxu0 %vm204_vm0, %v32860_v54  ;;  %26709 = vmatmul.mubr.msk.f32.gmra.mrb[58].mxu1 %vm204_vm0, %v33096_v27  ;;  %v33114_v54 = vld [vmem:[#allocation3 + $0x16a] sm:$0xff] }
 0x695   : > { %26455 = vmatprep.mubr.msk.f32.mxu0 %vm204_vm0, %v32868_v5  ;;  %26711 = vmatprep.mubr.msk.f32.mxu1 %vm204_vm0, %v33102_v3  ;;  %34991 = vst [vmem:[#allocation33_spill] sm:$0xff] %v33114_v54  ;;  %v33120_v5 = vld [vmem:[#allocation3 + $0x172] sm:$0xff]  ;;  %v14029_v3 = vld [vmem:[#allocation7 + $0x418] sm:$0xff] }
 0x698   : > { %26456 = vmatmul.mubr.msk.f32.gmra.mrb[60].mxu0 %vm204_vm0, %v32876_v51  ;;  %26712 = vmatmul.mubr.msk.f32.gmra.mrb[60].mxu1 %vm204_vm0, %v33108_v31  ;;  %v14028_v51 = vld [vmem:[#allocation7 + $0x410] sm:$0xff] }
 0x699   : > { %26458 = vmatprep.mubr.msk.f32.mxu0 %vm204_vm0, %v32884_v6  ;;  %26714 = vmatprep.mubr.msk.f32.mxu1 %vm204_vm0, %v33114_v54  ;;  %v33130_v6 = vpack.c.bf16 %v14029_v3, %v14028_v51  ;;  %v14257_v54 = vld [vmem:[#allocation7 + $0x428] sm:$0xff]  ;;  %v35004_v3 = vld [vmem:[#allocation19_spill] sm:$0xff]  ;;  %v35006_v51 = vld [vmem:[#allocation44_spill] sm:$0xff] }
 0x69c   : > { %26459 = vmatmul.mubr.msk.f32.gmra.mrb[62].mxu0 %vm204_vm0, %v32889_v63  ;;  %26715 = vmatmul.mubr.msk.f32.gmra.mrb[62].mxu1 %vm204_vm0, %v33120_v5  ;;  %v14256_v63 = vld [vmem:[#allocation7 + $0x420] sm:$0xff] }
 0x69d   : > { %26469 = vmatprep.mubr.msk.f32.mxu0 %vm204_vm0, %v32642_v35  ;;  %26725 = vmatprep.mubr.msk.f32.mxu1 %vm204_vm0, %v32901_v44  ;;  %v33144_v35 = vpack.c.bf16 %v14257_v54, %v14256_v63  ;;  %v35005_v54 = vld [vmem:[#allocation23_spill] sm:$0xff]  ;;  %v35008_v63 = vld [vmem:[#allocation20_spill] sm:$0xff] }
 0x6a0   : > { %26470 = vmatmul.mubr.msk.f32.vlgmr.msra.gmra.mrb[48].mxu0 %vm204_vm0, %v32648_v62  ;;  %26726 = vmatmul.mubr.msk.f32.vlgmr.msra.gmra.mrb[48].mxu1 %vm204_vm0, %v32908_v15  ;;  %v33194_v62 = vld [vmem:[#allocation3 + $0x180] sm:$0xff] }
 0x6a1   : > { %26472 = vmatprep.mubr.msk.f32.mxu0 %vm204_vm0, %v32654_v0  ;;  %27960 = vmatpush3.bf16.msra.mxu0 %v33044_v29  ;;  %v33200_v0 = vld [vmem:[#allocation3 + $0x188] sm:$0xff] }
 0x6a2   : > { %26728 = vmatprep.mubr.msk.f32.mxu1 %vm204_vm0, %v32920_v53  ;;  %28024 = vmatpush3.bf16.msra.mxu1 %v32912_v55  ;;  %v35011_v55 = vld [vmem:[#allocation29_spill] sm:$0xff] }
 0x6a3   : > { %27962 = vmatprep.subr.bf16.mxu0 %v33130_v6  ;;  %28026 = vmatprep.subr.bf16.mxu1 %v33026_v52 }
 0x6a4   : > { %26473 = vmatmul.mubr.msk.f32.gmra.mrb[50].mxu0 %vm204_vm0, %v32660_v10  ;;  %26729 = vmatmul.mubr.msk.f32.gmra.mrb[50].mxu1 %vm204_vm0, %v32930_v22  ;;  %v14258_v10 = vld [vmem:[#allocation7 + $0x430] sm:$0xff] }
 0x6a5   : > { %26475 = vmatprep.mubr.msk.f32.mxu0 %vm204_vm0, %v32666_v36  ;;  %26731 = vmatprep.mubr.msk.f32.mxu1 %vm204_vm0, %v32940_v49  ;;  %v14259_v36 = vld [vmem:[#allocation7 + $0x438] sm:$0xff] }
 0x6a6   : > { %27964 = vmatpush3.bf16.msra.mxu0 %v33130_v6  ;;  %28028 = vmatpush3.bf16.msra.mxu1 %v33026_v52  ;;  %v35003_v52 = vld [vmem:[#allocation21_spill] sm:$0xff] }
 0x6a7   : > { %27966 = vmatprep.subr.bf16.mxu0 %v33144_v35  ;;  %28030 = vmatprep.subr.bf16.mxu1 %v33044_v29 }
 0x6a8   : > { %26476 = vmatmul.mubr.msk.f32.gmra.mrb[52].mxu0 %vm204_vm0, %v32672_v48  ;;  %26732 = vmatmul.mubr.msk.f32.gmra.mrb[52].mxu1 %vm204_vm0, %v32948_v46  ;;  %v33210_v48 = vpack.c.bf16 %v14259_v36, %v14258_v10  ;;  %v33280_v10 = vld [vmem:[#allocation3 + $0x189] sm:$0xff]  ;;  %v14488_v36 = vld [vmem:[#allocation7 + $0x450] sm:$0xff] }
 0x6a9   : > { %26478 = vmatprep.mubr.msk.f32.mxu0 %vm204_vm0, %v32678_v17  ;;  %26734 = vmatprep.mubr.msk.f32.mxu1 %vm204_vm0, %v32956_v18  ;;  %v14486_v17 = vld [vmem:[#allocation7 + $0x440] sm:$0xff] }
 0x6ac   : > { %26479 = vmatmul.mubr.msk.f32.gmra.mrb[54].mxu0 %vm204_vm0, %v32684_v41  ;;  %26735 = vmatmul.mubr.msk.f32.gmra.mrb[54].mxu1 %vm204_vm0, %v32964_v20  ;;  %v14487_v41 = vld [vmem:[#allocation7 + $0x448] sm:$0xff] }
 0x6ad   : > { %26481 = vmatprep.mubr.msk.f32.mxu0 %vm204_vm0, %v32690_v61  ;;  %26737 = vmatprep.mubr.msk.f32.mxu1 %vm204_vm0, %v32972_v4  ;;  %v33224_v61 = vpack.c.bf16 %v14487_v41, %v14486_v17  ;;  %v14489_v17 = vld [vmem:[#allocation7 + $0x458] sm:$0xff] }
 0x6ae   : > { %v33290_v41 = vpack.c.bf16 %v14489_v17, %v14488_v36  ;;  %v33360_v36 = vld [vmem:[#allocation3 + $0x18a] sm:$0xff] }
 0x6af   : > { %v14469_v17 = vld [vmem:[#allocation3 + $0x31] sm:$0xff] }
 0x6b0   : > { %26482 = vmatmul.mubr.msk.f32.gmra.mrb[56].mxu0 %vm204_vm0, %v32696_v21  ;;  %26738 = vmatmul.mubr.msk.f32.gmra.mrb[56].mxu1 %vm204_vm0, %v32980_v9  ;;  %v34992_v21 = vld [vmem:[#allocation37_spill] sm:$0xff] }
 0x6b1   : > { %26484 = vmatprep.mubr.msk.f32.mxu0 %vm204_vm0, %v32702_v26  ;;  %26740 = vmatprep.mubr.msk.f32.mxu1 %vm204_vm0, %v32988_v56  ;;  %v34993_v26 = vld [vmem:[#allocation16_spill] sm:$0xff] }
 0x6b4   : > { %26485 = vmatmul.mubr.msk.f32.gmra.mrb[58].mxu0 %vm204_vm0, %v32708_v38  ;;  %26741 = vmatmul.mubr.msk.f32.gmra.mrb[58].mxu1 %vm204_vm0, %v32996_v58  ;;  %v34994_v38 = vld [vmem:[#allocation38_spill] sm:$0xff] }
 0x6b5   : > { %26487 = vmatprep.mubr.msk.f32.mxu0 %vm204_vm0, %v32714_v34  ;;  %26743 = vmatprep.mubr.msk.f32.mxu1 %vm204_vm0, %v33004_v45  ;;  %v34995_v34 = vld [vmem:[#allocation36_spill] sm:$0xff] }
 0x6b8   : > { %26488 = vmatmul.mubr.msk.f32.gmra.mrb[60].mxu0 %vm204_vm0, %v32720_v60  ;;  %26744 = vmatmul.mubr.msk.f32.gmra.mrb[60].mxu1 %vm204_vm0, %v33012_v57  ;;  %v34996_v60 = vld [vmem:[#allocation39_spill] sm:$0xff] }
 0x6b9   : > { %26490 = vmatprep.mubr.msk.f32.mxu0 %vm204_vm0, %v32727_v42  ;;  %26746 = vmatprep.mubr.msk.f32.mxu1 %vm204_vm0, %v33194_v62  ;;  %v34997_v42 = vld [vmem:[#allocation14_spill] sm:$0xff] }
 0x6bc   : > { %26491 = vmatmul.mubr.msk.f32.gmra.mrb[62].mxu0 %vm204_vm0, %v32735_v47  ;;  %26747 = vmatmul.mubr.msk.f32.gmra.mrb[62].mxu1 %vm204_vm0, %v33200_v0  ;;  %v34998_v47 = vld [vmem:[#allocation40_spill] sm:$0xff] }
 0x6bd   : > { %26501 = vmatprep.mubr.msk.f32.mxu0 %vm204_vm0, %v32896_v8  ;;  %26757 = vmatprep.mubr.msk.f32.mxu1 %vm204_vm0, %v32748_v25  ;;  %v34999_v25 = vld [vmem:[#allocation15_spill] sm:$0xff] }
 0x6be   : > { %v35009_v8 = vld [vmem:[#allocation27_spill] sm:$0xff] }
 0x6c0   : > { %26502 = vmatmul.mubr.msk.f32.vlgmr.msra.gmra.mrb[48].mxu0 %vm204_vm0, %v32906_v43  ;;  %26758 = vmatmul.mubr.msk.f32.vlgmr.msra.gmra.mrb[48].mxu1 %vm204_vm0, %v32759_v11  ;;  %v35000_v11 = vld [vmem:[#allocation41_spill] sm:$0xff]  ;;  %v35010_v43 = vld [vmem:[#allocation43_spill] sm:$0xff] }
 0x6c1   : > { %26504 = vmatprep.mubr.msk.f32.mxu0 %vm204_vm0, %v32918_v16  ;;  %27968 = vmatpush3.bf16.msra.mxu0 %v33144_v35 }
 0x6c2   : > { %26760 = vmatprep.mubr.msk.f32.mxu1 %vm204_vm0, %v32773_v28  ;;  %28032 = vmatpush3.bf16.msra.mxu1 %v33044_v29  ;;  %v35001_v28 = vld [vmem:[#allocation17_spill] sm:$0xff]  ;;  %v33274_v29 = vld [vmem:[#allocation3 + $0x181] sm:$0xff] }
 0x6c3   : > { %27970 = vmatprep.subr.bf16.mxu0 %v33210_v48  ;;  %28034 = vmatprep.subr.bf16.mxu1 %v33130_v6 }
 0x6c4   : > { %26505 = vmatmul.mubr.msk.f32.gmra.mrb[50].mxu0 %vm204_vm0, %v32928_v12  ;;  %26761 = vmatmul.mubr.msk.f32.gmra.mrb[50].mxu1 %vm204_vm0, %v32783_v59  ;;  %v35002_v59 = vld [vmem:[#allocation42_spill] sm:$0xff] }
 0x6c5   : > { %26507 = vmatprep.mubr.msk.f32.mxu0 %vm204_vm0, %v34992_v21  ;;  %26763 = vmatprep.mubr.msk.f32.mxu1 %vm204_vm0, %v34993_v26  ;;  %v14716_v26 = vld [vmem:[#allocation7 + $0x460] sm:$0xff] }
 0x6c6   : > { %27972 = vmatpush3.bf16.msra.mxu0 %v33210_v48  ;;  %28036 = vmatpush3.bf16.msra.mxu1 %v33130_v6  ;;  %v35007_v6 = vld [vmem:[#allocation25_spill] sm:$0xff] }
 0x6c7   : > { %27974 = vmatprep.subr.bf16.mxu0 %v33224_v61  ;;  %28038 = vmatprep.subr.bf16.mxu1 %v33144_v35 }
 0x6c8   : > { %26508 = vmatmul.mubr.msk.f32.gmra.mrb[52].mxu0 %vm204_vm0, %v34994_v38  ;;  %26764 = vmatmul.mubr.msk.f32.gmra.mrb[52].mxu1 %vm204_vm0, %v34995_v34  ;;  %v14717_v34 = vld [vmem:[#allocation7 + $0x468] sm:$0xff] }
 0x6c9   : > { %26510 = vmatprep.mubr.msk.f32.mxu0 %vm204_vm0, %v34996_v60  ;;  %26766 = vmatprep.mubr.msk.f32.mxu1 %vm204_vm0, %v34997_v42  ;;  %v35017_v42 = vld [vmem:[#allocation30_spill] sm:$0xff] }
 0x6cc   : > { %26511 = vmatmul.mubr.msk.f32.gmra.mrb[54].mxu0 %vm204_vm0, %v34998_v47  ;;  %26767 = vmatmul.mubr.msk.f32.gmra.mrb[54].mxu1 %vm204_vm0, %v34999_v25  ;;  %v35018_v25 = vld [vmem:[#allocation13_spill] sm:$0xff] }
 0x6cd   : > { %26513 = vmatprep.mubr.msk.f32.mxu0 %vm204_vm0, %v35000_v11  ;;  %26769 = vmatprep.mubr.msk.f32.mxu1 %vm204_vm0, %v35001_v28  ;;  %v35019_v28 = vld [vmem:[#allocation35_spill] sm:$0xff] }
 0x6d0   : > { %26514 = vmatmul.mubr.msk.f32.gmra.mrb[56].mxu0 %vm204_vm0, %v35002_v59  ;;  %26770 = vmatmul.mubr.msk.f32.gmra.mrb[56].mxu1 %vm204_vm0, %v35003_v52  ;;  %v35020_v52 = vld [vmem:[#allocation32_spill] sm:$0xff] }
 0x6d1   : > { %26516 = vmatprep.mubr.msk.f32.mxu0 %vm204_vm0, %v35004_v3  ;;  %26772 = vmatprep.mubr.msk.f32.mxu1 %vm204_vm0, %v35005_v54  ;;  %v35021_v54 = vld [vmem:[#allocation34_spill] sm:$0xff] }
 0x6d4   : > { %26517 = vmatmul.mubr.msk.f32.gmra.mrb[58].mxu0 %vm204_vm0, %v35006_v51  ;;  %26773 = vmatmul.mubr.msk.f32.gmra.mrb[58].mxu1 %vm204_vm0, %v35007_v6  ;;  %v35022_v6 = vld [vmem:[#allocation33_spill] sm:$0xff] }
 0x6d5   : > { %26519 = vmatprep.mubr.msk.f32.mxu0 %vm204_vm0, %v35008_v63  ;;  %26775 = vmatprep.mubr.msk.f32.mxu1 %vm204_vm0, %v35009_v8  ;;  %v35023_v8 = vld [vmem:[#allocation31_spill] sm:$0xff] }
 0x6d8   : > { %26520 = vmatmul.mubr.msk.f32.gmra.mrb[60].mxu0 %vm204_vm0, %v35010_v43  ;;  %26776 = vmatmul.mubr.msk.f32.gmra.mrb[60].mxu1 %vm204_vm0, %v35011_v55  ;;  %v33354_v55 = vld [vmem:[#allocation3 + $0x182] sm:$0xff] }
 0x6d9   : > { %26522 = vmatprep.mubr.msk.f32.mxu0 %vm204_vm0, %v33018_v23  ;;  %26778 = vmatprep.mubr.msk.f32.mxu1 %vm204_vm0, %v33274_v29 }
 0x6dc   : > { %26523 = vmatmul.mubr.msk.f32.gmra.mrb[62].mxu0 %vm204_vm0, %v33024_v32  ;;  %26779 = vmatmul.mubr.msk.f32.gmra.mrb[62].mxu1 %vm204_vm0, %v33280_v10 }
 0x6dd   : > { %26533 = vmatprep.mubr.msk.f32.mxu0 %vm204_vm0, %v32766_v33  ;;  %26789 = vmatprep.mubr.msk.f32.mxu1 %vm204_vm0, %v33035_v40  ;;  %v33304_v33 = vpack.c.bf16 %v14717_v34, %v14716_v26  ;;  %v14718_v26 = vld [vmem:[#allocation7 + $0x470] sm:$0xff]  ;;  %v14719_v34 = vld [vmem:[#allocation7 + $0x478] sm:$0xff] }
 0x6e0   : > { %26534 = vmatmul.mubr.msk.f32.vlgmr.msra.gmra.mrb[48].mxu0 %vm204_vm0, %v32781_v13  ;;  %26790 = vmatmul.mubr.msk.f32.vlgmr.msra.gmra.mrb[48].mxu1 %vm204_vm0, %v33040_v24  ;;  %v35012_v13 = vld [vmem:[#allocation18_spill] sm:$0xff] }
 0x6e1   : > { %26536 = vmatprep.mubr.msk.f32.mxu0 %vm204_vm0, %v32790_v14  ;;  %27976 = vmatpush3.bf16.msra.mxu0 %v33224_v61  ;;  %v35013_v14 = vld [vmem:[#allocation22_spill] sm:$0xff] }
 0x6e2   : > { %26792 = vmatprep.mubr.msk.f32.mxu1 %vm204_vm0, %v33050_v37  ;;  %28040 = vmatpush3.bf16.msra.mxu1 %v33144_v35  ;;  %v35015_v35 = vld [vmem:[#allocation26_spill] sm:$0xff] }
 0x6e3   : > { %27978 = vmatprep.subr.bf16.mxu0 %v33290_v41  ;;  %28042 = vmatprep.subr.bf16.mxu1 %v33210_v48 }
 0x6e4   : > { %26537 = vmatmul.mubr.msk.f32.gmra.mrb[50].mxu0 %vm204_vm0, %v32802_v19  ;;  %26793 = vmatmul.mubr.msk.f32.gmra.mrb[50].mxu1 %vm204_vm0, %v33058_v30  ;;  %v35014_v19 = vld [vmem:[#allocation24_spill] sm:$0xff] }
 0x6e5   : > { %26539 = vmatprep.mubr.msk.f32.mxu0 %vm204_vm0, %v35012_v13  ;;  %26795 = vmatprep.mubr.msk.f32.mxu1 %vm204_vm0, %v33066_v1  ;;  %v33369_v13 = vpack.c.bf16 %v14719_v34, %v14718_v26 }
 0x6e6   : > { %27980 = vmatpush3.bf16.msra.mxu0 %v33290_v41  ;;  %28044 = vmatpush3.bf16.msra.mxu1 %v33210_v48  ;;  %v35016_v48 = vld [vmem:[#allocation28_spill] sm:$0xff] }
 0x6e7   : > { %27982 = vmatprep.subr.bf16.mxu0 %v33304_v33  ;;  %28046 = vmatprep.subr.bf16.mxu1 %v33224_v61 }
 0x6e8   : > { %26540 = vmatmul.mubr.msk.f32.gmra.mrb[52].mxu0 %vm204_vm0, %v35013_v14  ;;  %26796 = vmatmul.mubr.msk.f32.gmra.mrb[52].mxu1 %vm204_vm0, %v33072_v50  ;;  %v14472_v14 = vld [vmem:[#allocation3 + $0x51] sm:$0xff] }
 0x6e9   : > { %26542 = vmatprep.mubr.msk.f32.mxu0 %vm204_vm0, %v35014_v19  ;;  %26798 = vmatprep.mubr.msk.f32.mxu1 %vm204_vm0, %v33078_v39  ;;  %v16556_v19 = vld [vmem:[#allocation3 + $0xf1] sm:$0xff] }
 0x6ec   : > { %26543 = vmatmul.mubr.msk.f32.gmra.mrb[54].mxu0 %vm204_vm0, %v35015_v35  ;;  %26799 = vmatmul.mubr.msk.f32.gmra.mrb[54].mxu1 %vm204_vm0, %v33084_v7  ;;  %v16559_v35 = vld [vmem:[#allocation3 + $0x111] sm:$0xff] }
 0x6ed   : > { %26545 = vmatprep.mubr.msk.f32.mxu0 %vm204_vm0, %v35016_v48  ;;  %26801 = vmatprep.mubr.msk.f32.mxu1 %vm204_vm0, %v33090_v2  ;;  %v33521_v48 = vld [vmem:[%s34523_s2 + $0x3] ss:$0 sm:$0xff] }
 0x6f0   : > { %26546 = vmatmul.mubr.msk.f32.gmra.mrb[56].mxu0 %vm204_vm0, %v35017_v42  ;;  %26802 = vmatmul.mubr.msk.f32.gmra.mrb[56].mxu1 %vm204_vm0, %v33096_v27 }
 0x6f1   : > { %26548 = vmatprep.mubr.msk.f32.mxu0 %vm204_vm0, %v35018_v25  ;;  %26804 = vmatprep.mubr.msk.f32.mxu1 %vm204_vm0, %v35019_v28 }
 0x6f4   : > { %26549 = vmatmul.mubr.msk.f32.gmra.mrb[58].mxu0 %vm204_vm0, %v35020_v52  ;;  %26805 = vmatmul.mubr.msk.f32.gmra.mrb[58].mxu1 %vm204_vm0, %v33108_v31 }
 0x6f5   : > { %26551 = vmatprep.mubr.msk.f32.mxu0 %vm204_vm0, %v35021_v54  ;;  %26807 = vmatprep.mubr.msk.f32.mxu1 %vm204_vm0, %v35022_v6 }
 0x6f8   : > { %26552 = vmatmul.mubr.msk.f32.gmra.mrb[60].mxu0 %vm204_vm0, %v35023_v8  ;;  %26808 = vmatmul.mubr.msk.f32.gmra.mrb[60].mxu1 %vm204_vm0, %v33120_v5 }
 0x6f9   : > { %26554 = vmatprep.mubr.msk.f32.mxu0 %vm204_vm0, %v32901_v44  ;;  %26810 = vmatprep.mubr.msk.f32.mxu1 %vm204_vm0, %v33354_v55  ;;  %v14470_v44 = vld [vmem:[#allocation3 + $0x39] sm:$0xff] }
 0x6fc   : > { %26555 = vmatmul.mubr.msk.f32.gmra.mrb[62].mxu0 %vm204_vm0, %v32908_v15  ;;  %26811 = vmatmul.mubr.msk.f32.gmra.mrb[62].mxu1 %vm204_vm0, %v33360_v36  ;;  %v14471_v15 = vld [vmem:[#allocation3 + $0x49] sm:$0xff] }
 0x6fd   : > { %26565 = vmatprep.mubr.msk.f32.mxu0 %vm204_vm0, %v14469_v17  ;;  %26821 = vmatprep.mubr.msk.f32.mxu1 %vm204_vm0, %v32920_v53  ;;  %v14473_v53 = vld [vmem:[#allocation3 + $0x61] sm:$0xff] }
 0x700   : > { %26566 = vmatmul.mubr.msk.f32.vlgmr.msra.gmra.mrb[48].mxu0 %vm204_vm0, %v14470_v44  ;;  %26822 = vmatmul.mubr.msk.f32.vlgmr.msra.gmra.mrb[48].mxu1 %vm204_vm0, %v32930_v22  ;;  %v14474_v22 = vld [vmem:[#allocation3 + $0x69] sm:$0xff] }
 0x701   : > { %26568 = vmatprep.mubr.msk.f32.mxu0 %vm204_vm0, %v14471_v15  ;;  %27984 = vmatpush3.bf16.msra.mxu0 %v33304_v33 }
 0x702   : > { %26824 = vmatprep.mubr.msk.f32.mxu1 %vm204_vm0, %v32940_v49  ;;  %28048 = vmatpush3.bf16.msra.mxu1 %v33224_v61  ;;  %v14475_v49 = vld [vmem:[#allocation3 + $0x79] sm:$0xff] }
 0x703   : > { %27986 = vmatprep.subr.bf16.mxu0 %v33369_v13  ;;  %28050 = vmatprep.subr.bf16.mxu1 %v33290_v41  ;;  %v14478_v61 = vld [vmem:[#allocation3 + $0x99] sm:$0xff] }
 0x704   : > { %26569 = vmatmul.mubr.msk.f32.gmra.mrb[50].mxu0 %vm204_vm0, %v14472_v14  ;;  %26825 = vmatmul.mubr.msk.f32.gmra.mrb[50].mxu1 %vm204_vm0, %v32948_v46  ;;  %v14476_v46 = vld [vmem:[#allocation3 + $0x81] sm:$0xff] }
 0x705   : > { %26571 = vmatprep.mubr.msk.f32.mxu0 %vm204_vm0, %v14473_v53  ;;  %26827 = vmatprep.mubr.msk.f32.mxu1 %vm204_vm0, %v32956_v18  ;;  %v14477_v18 = vld [vmem:[#allocation3 + $0x91] sm:$0xff] }
 0x706   : > { %27988 = vmatpush3.bf16.msra.mxu0 %v33369_v13  ;;  %28052 = vmatpush3.bf16.msra.mxu1 %v33290_v41  ;;  %v16342_v41 = vld [vmem:[#allocation3 + $0x1a0] sm:$0xff] }
 0x707   : > { %28054 = vmatprep.subr.bf16.mxu1 %v33304_v33 }
 0x708   : > { %26572 = vmatmul.mubr.msk.f32.gmra.mrb[52].mxu0 %vm204_vm0, %v14474_v22  ;;  %26828 = vmatmul.mubr.msk.f32.gmra.mrb[52].mxu1 %vm204_vm0, %v32964_v20  ;;  %v14479_v20 = vld [vmem:[#allocation3 + $0xa9] sm:$0xff] }
 0x709   : > { %26574 = vmatprep.mubr.msk.f32.mxu0 %vm204_vm0, %v14475_v49  ;;  %26830 = vmatprep.mubr.msk.f32.mxu1 %vm204_vm0, %v32972_v4  ;;  %v14480_v4 = vld [vmem:[#allocation3 + $0xb1] sm:$0xff] }
 0x70c   : > { %26575 = vmatmul.mubr.msk.f32.gmra.mrb[54].mxu0 %vm204_vm0, %v14476_v46  ;;  %26831 = vmatmul.mubr.msk.f32.gmra.mrb[54].mxu1 %vm204_vm0, %v32980_v9  ;;  %v14481_v9 = vld [vmem:[#allocation3 + $0xc1] sm:$0xff] }
 0x70d   : > { %26577 = vmatprep.mubr.msk.f32.mxu0 %vm204_vm0, %v14477_v18  ;;  %26833 = vmatprep.mubr.msk.f32.mxu1 %vm204_vm0, %v32988_v56  ;;  %v16341_v56 = vld [vmem:[#allocation3 + $0x198] sm:$0xff] }
 0x710   : > { %26578 = vmatmul.mubr.msk.f32.gmra.mrb[56].mxu0 %vm204_vm0, %v14478_v61  ;;  %26834 = vmatmul.mubr.msk.f32.gmra.mrb[56].mxu1 %vm204_vm0, %v32996_v58  ;;  %v14482_v58 = vld [vmem:[#allocation3 + $0xc9] sm:$0xff] }
 0x711   : > { %26580 = vmatprep.mubr.msk.f32.mxu0 %vm204_vm0, %v14479_v20  ;;  %26836 = vmatprep.mubr.msk.f32.mxu1 %vm204_vm0, %v33004_v45  ;;  %v14483_v45 = vld [vmem:[#allocation3 + $0xd9] sm:$0xff] }
 0x714   : > { %26581 = vmatmul.mubr.msk.f32.gmra.mrb[58].mxu0 %vm204_vm0, %v14480_v4  ;;  %26837 = vmatmul.mubr.msk.f32.gmra.mrb[58].mxu1 %vm204_vm0, %v33012_v57  ;;  %v14484_v57 = vld [vmem:[#allocation3 + $0xe1] sm:$0xff] }
 0x715   : > { %26583 = vmatprep.mubr.msk.f32.mxu0 %vm204_vm0, %v14481_v9  ;;  %26839 = vmatprep.mubr.msk.f32.mxu1 %vm204_vm0, %v33194_v62  ;;  %v16557_v62 = vld [vmem:[#allocation3 + $0xf9] sm:$0xff] }
 0x718   : > { %26584 = vmatmul.mubr.msk.f32.gmra.mrb[60].mxu0 %vm204_vm0, %v14482_v58  ;;  %26840 = vmatmul.mubr.msk.f32.gmra.mrb[60].mxu1 %vm204_vm0, %v33200_v0  ;;  %v16558_v0 = vld [vmem:[#allocation3 + $0x109] sm:$0xff] }
 0x719   : > { %26586 = vmatprep.mubr.msk.f32.mxu0 %vm204_vm0, %v14483_v45  ;;  %26842 = vmatprep.mubr.msk.f32.mxu1 %vm204_vm0, %v16341_v56 }
 0x71c   : > { %26587 = vmatmul.mubr.msk.f32.gmra.mrb[62].mxu0 %vm204_vm0, %v14484_v57  ;;  %26843 = vmatmul.mubr.msk.f32.gmra.mrb[62].mxu1 %vm204_vm0, %v16342_v41 }
 0x71d   : > { %26597 = vmatprep.mubr.msk.f32.mxu0 %vm204_vm0, %v32918_v16  ;;  %26853 = vmatprep.mubr.msk.f32.mxu1 %vm204_vm0, %v16556_v19  ;;  %v16560_v16 = vld [vmem:[#allocation3 + $0x121] sm:$0xff] }
 0x720   : > { %26598 = vmatmul.mubr.msk.f32.vlgmr.msra.gmra.mrb[48].mxu0 %vm204_vm0, %v32928_v12  ;;  %26854 = vmatmul.mubr.msk.f32.vlgmr.msra.gmra.mrb[48].mxu1 %vm204_vm0, %v16557_v62  ;;  %v16561_v12 = vld [vmem:[#allocation3 + $0x129] sm:$0xff] }
 0x721   : > { %26600 = vmatprep.mubr.msk.f32.mxu0 %vm204_vm0, %v34992_v21  ;;  %26856 = vmatprep.mubr.msk.f32.mxu1 %vm204_vm0, %v16558_v0  ;;  %v16562_v21 = vld [vmem:[#allocation3 + $0x139] sm:$0xff] }
 0x722   : > { %28056 = vmatpush3.bf16.msra.mxu1 %v33304_v33 }
 0x723   : > { %28058 = vmatprep.subr.bf16.mxu1 %v33369_v13 }
 0x724   : > { %26601 = vmatmul.mubr.msk.f32.gmra.mrb[50].mxu0 %vm204_vm0, %v34994_v38  ;;  %26857 = vmatmul.mubr.msk.f32.gmra.mrb[50].mxu1 %vm204_vm0, %v16559_v35  ;;  %v16563_v38 = vld [vmem:[#allocation3 + $0x141] sm:$0xff] }
 0x725   : > { %26603 = vmatprep.mubr.msk.f32.mxu0 %vm204_vm0, %v34996_v60  ;;  %26859 = vmatprep.mubr.msk.f32.mxu1 %vm204_vm0, %v16560_v16  ;;  %v16564_v60 = vld [vmem:[#allocation3 + $0x151] sm:$0xff] }
 0x726   : > { %28060 = vmatpush3.bf16.msra.mxu1 %v33369_v13 }
 0x728   : > { %26604 = vmatmul.mubr.msk.f32.gmra.mrb[52].mxu0 %vm204_vm0, %v34998_v47  ;;  %26860 = vmatmul.mubr.msk.f32.gmra.mrb[52].mxu1 %vm204_vm0, %v16561_v12  ;;  %v16565_v47 = vld [vmem:[#allocation3 + $0x159] sm:$0xff] }
 0x729   : > { %26606 = vmatprep.mubr.msk.f32.mxu0 %vm204_vm0, %v35000_v11  ;;  %26862 = vmatprep.mubr.msk.f32.mxu1 %vm204_vm0, %v16562_v21  ;;  %v16566_v11 = vld [vmem:[#allocation3 + $0x169] sm:$0xff] }
 0x72c   : > { %26607 = vmatmul.mubr.msk.f32.gmra.mrb[54].mxu0 %vm204_vm0, %v35002_v59  ;;  %26863 = vmatmul.mubr.msk.f32.gmra.mrb[54].mxu1 %vm204_vm0, %v16563_v38  ;;  %v16567_v59 = vld [vmem:[#allocation3 + $0x171] sm:$0xff] }
 0x72d   : > { %26609 = vmatprep.mubr.msk.f32.mxu0 %vm204_vm0, %v35004_v3  ;;  %26865 = vmatprep.mubr.msk.f32.mxu1 %vm204_vm0, %v16564_v60  ;;  %v16570_v3 = vld [vmem:[#allocation3 + $0x199] sm:$0xff] }
 0x730   : > { %26610 = vmatmul.mubr.msk.f32.gmra.mrb[56].mxu0 %vm204_vm0, %v35006_v51  ;;  %26866 = vmatmul.mubr.msk.f32.gmra.mrb[56].mxu1 %vm204_vm0, %v16565_v47  ;;  %v16571_v51 = vld [vmem:[#allocation3 + $0x1a1] sm:$0xff] }
 0x731   : > { %26612 = vmatprep.mubr.msk.f32.mxu0 %vm204_vm0, %v35008_v63  ;;  %26868 = vmatprep.mubr.msk.f32.mxu1 %vm204_vm0, %v16566_v11  ;;  %v17089_v63 = vld [vmem:[#allocation7 + $0x498] sm:$0xff] }
 0x734   : > { %26613 = vmatmul.mubr.msk.f32.gmra.mrb[58].mxu0 %vm204_vm0, %v35010_v43  ;;  %26869 = vmatmul.mubr.msk.f32.gmra.mrb[58].mxu1 %vm204_vm0, %v16567_v59 }
 0x735   : > { %26615 = vmatprep.mubr.msk.f32.mxu0 %vm204_vm0, %v33018_v23  ;;  %26871 = vmatprep.mubr.msk.f32.mxu1 %vm204_vm0, %v33274_v29  ;;  %v17109_v23 = vld [vmem:[#allocation7 + $0x4b0] sm:$0xff]  ;;  %v17514_v29 = vld [vmem:[#allocation7 + $0x4c0] sm:$0xff] }
 0x738   : > { %26616 = vmatmul.mubr.msk.f32.gmra.mrb[60].mxu0 %vm204_vm0, %v33024_v32  ;;  %26872 = vmatmul.mubr.msk.f32.gmra.mrb[60].mxu1 %vm204_vm0, %v33280_v10  ;;  %v17515_v10 = vld [vmem:[#allocation7 + $0x4c8] sm:$0xff] }
 0x739   : > { %26618 = vmatprep.mubr.msk.f32.mxu0 %vm204_vm0, %v33035_v40  ;;  %26874 = vmatprep.mubr.msk.f32.mxu1 %vm204_vm0, %v16570_v3  ;;  %v33515_v33 = vpack.c.bf16 %v17515_v10, %v17514_v29 }
 0x73c   : > { %26619 = vmatmul.mubr.msk.f32.gmra.mrb[62].mxu0 %vm204_vm0, %v33040_v24  ;;  %26875 = vmatmul.mubr.msk.f32.gmra.mrb[62].mxu1 %vm204_vm0, %v16571_v51  ;;  %v17090_v24 = vld [vmem:[#allocation2 + $0x1] sm:$0xff] }
 0x73d   : > { %26885 = vmatprep.mubr.msk.f32.mxu1 %vm204_vm0, %v33050_v37  ;;  %v17091_v37 = vld [vmem:[#allocation2 + $0x9] sm:$0xff]  ;;  %26917 = vmatprep.mubr.msk.f32.mxu0 %vm204_vm0, %v17090_v24 }
 0x740   : > { %26886 = vmatmul.mubr.msk.f32.vlgmr.msra.gmra.mrb[48].mxu1 %vm204_vm0, %v33058_v30  ;;  %v17086_v30 = vld [vmem:[#allocation7 + $0x480] sm:$0xff] }
 0x741   : > { %26888 = vmatprep.mubr.msk.f32.mxu1 %vm204_vm0, %v33066_v1  ;;  %v17087_v1 = vld [vmem:[#allocation7 + $0x488] sm:$0xff] }
 0x744   : > { %26889 = vmatmul.mubr.msk.f32.gmra.mrb[50].mxu1 %vm204_vm0, %v33072_v50  ;;  %v33506_v50 = vpack.c.bf16 %v17087_v1, %v17086_v30 }
 0x745   : > { %26891 = vmatprep.mubr.msk.f32.mxu1 %vm204_vm0, %v33078_v39  ;;  %v17088_v39 = vld [vmem:[#allocation7 + $0x490] sm:$0xff] }
 0x746   : > { %v33511_v43 = vpack.c.bf16 %v17089_v63, %v17088_v39 }
 0x748   : > { %26892 = vmatmul.mubr.msk.f32.gmra.mrb[52].mxu1 %vm204_vm0, %v33084_v7  ;;  %v16799_v7 = vld [vmem:[#allocation3 + $0x19a] sm:$0xff] }
 0x749   : > { %26894 = vmatprep.mubr.msk.f32.mxu1 %vm204_vm0, %v33090_v2  ;;  %v16800_v2 = vld [vmem:[#allocation3 + $0x1a2] sm:$0xff] }
 0x74c   : > { %26895 = vmatmul.mubr.msk.f32.gmra.mrb[54].mxu1 %vm204_vm0, %v33096_v27  ;;  %v17107_v27 = vld [vmem:[#allocation7 + $0x4a0] sm:$0xff] }
 0x74d   : > { %26897 = vmatprep.mubr.msk.f32.mxu1 %vm204_vm0, %v35019_v28 }
 0x750   : > { %26898 = vmatmul.mubr.msk.f32.gmra.mrb[56].mxu1 %vm204_vm0, %v33108_v31  ;;  %v17108_v31 = vld [vmem:[#allocation7 + $0x4a8] sm:$0xff] }
 0x751   : > { %26900 = vmatprep.mubr.msk.f32.mxu1 %vm204_vm0, %v35022_v6  ;;  %v28061_v32 = vpack.c.bf16 %v17108_v31, %v17107_v27 }
 0x753   : > { %28062 = vmatprep.subr.bf16.mxu0 %v28061_v32  ;;  %28134 = vmatprep.subr.bf16.mxu1 %v28061_v32 }
 0x754   : > { %26901 = vmatmul.mubr.msk.f32.gmra.mrb[58].mxu1 %vm204_vm0, %v33120_v5  ;;  %28064 = vmatpush3.bf16.msra.mxu0 %v28061_v32  ;;  %v17110_v5 = vld [vmem:[#allocation7 + $0x4b8] sm:$0xff] }
 0x755   : > { %26903 = vmatprep.mubr.msk.f32.mxu1 %vm204_vm0, %v33354_v55  ;;  %28136 = vmatpush3.bf16.msra.mxu1 %v28061_v32  ;;  %v28065_v40 = vpack.c.bf16 %v17110_v5, %v17109_v23 }
 0x757   : > { %28066 = vmatprep.subr.bf16.mxu0 %v28065_v40  ;;  %28138 = vmatprep.subr.bf16.mxu1 %v28065_v40 }
 0x758   : > { %26904 = vmatmul.mubr.msk.f32.gmra.mrb[60].mxu1 %vm204_vm0, %v33360_v36  ;;  %28068 = vmatpush3.bf16.msra.mxu0 %v28065_v40 }
 0x759   : > { %26906 = vmatprep.mubr.msk.f32.mxu1 %vm204_vm0, %v16799_v7  ;;  %28140 = vmatpush3.bf16.msra.mxu1 %v28065_v40 }
 0x75a   : > { %28070 = vmatprep.subr.bf16.mxu0 %v33506_v50  ;;  %28142 = vmatprep.subr.bf16.mxu1 %v33506_v50 }
 0x75b   : > { %26918 = vmatmul.mubr.msk.f32.vlgmr.msra.gmra.mrb[64].mxu0 %vm204_vm0, %v17091_v37 }
 0x75c   : > { %26907 = vmatmul.mubr.msk.f32.gmra.mrb[62].mxu1 %vm204_vm0, %v16800_v2  ;;  %28072 = vmatpush3.bf16.msra.mxu0 %v33506_v50 }
 0x75d   : > { %28074 = vmatprep.subr.bf16.mxu0 %v33511_v43 }
 0x760   : > { %28076 = vmatpush3.bf16.msra.mxu0 %v33511_v43 }
 0x761   : > { %28078 = vmatprep.subr.bf16.mxu0 %v33515_v33 }
 0x7f3   : > { %v26599_v42 = vpop.f32.mrb[48].mxu0 }
 0x7f4   : > { %v14938_v25 = vadd.f32 %v26599_v42, %v33521_v48  ;;  %v14834_v28 = vpop.f32.mrb[49].mxu0 }
 0x7f5   : > { %v14937_v52 = vadd.f32 %v33521_v48, %v14834_v28 }
 0x7f6   : > { %v14954_v54 = vmax.f32 %v14938_v25, 0.0 }
 0x7f7   : > { %v14953_v6 = vmax.f32 %v14937_v52, 0.0  ;;  %v26602_v8 = vpop.f32.mrb[50].mxu0 }
 0x7f8   : > { %14970 = vst.msk [vmem:[#allocation2 + $0x21] sm:$0xff] %vm204_vm0, %v14954_v54  ;;  %v14940_v55 = vadd.f32 %v26602_v8, %v33521_v48  ;;  %v14844_v36 = vpop.f32.mrb[51].mxu0 }
 0x7f9   : > { %14969 = vst.msk [vmem:[#allocation2 + $0x19] sm:$0xff] %vm204_vm0, %v14953_v6  ;;  %v14939_v17 = vadd.f32 %v33521_v48, %v14844_v36 }
 0x7fa   : > { %v14956_v26 = vmax.f32 %v14940_v55, 0.0 }
 0x7fb   : > { %v14955_v34 = vmax.f32 %v14939_v17, 0.0  ;;  %v26605_v44 = vpop.f32.mrb[52].mxu0 }
 0x7fc   : > { %14972 = vst.msk [vmem:[#allocation2 + $0x39] sm:$0xff] %vm204_vm0, %v14956_v26  ;;  %v14942_v13 = vadd.f32 %v26605_v44, %v33521_v48  ;;  %v14854_v15 = vpop.f32.mrb[53].mxu0  ;;  %v17069_v26 = vld [vmem:[#allocation2] sm:$0xff] }
 0x7fd   : > { %14971 = vst.msk [vmem:[#allocation2 + $0x31] sm:$0xff] %vm204_vm0, %v14955_v34  ;;  %v14941_v14 = vadd.f32 %v33521_v48, %v14854_v15  ;;  %v17516_v15 = vld [vmem:[#allocation7 + $0x4d0] sm:$0xff] }
 0x7fe   : > { %v14958_v53 = vmax.f32 %v14942_v13, 0.0 }
 0x7ff   : > { %v14957_v22 = vmax.f32 %v14941_v14, 0.0  ;;  %v26608_v49 = vpop.f32.mrb[54].mxu0  ;;  %v33541_v4 = vld [vmem:[#allocation2 + $0x21] sm:$0xff]  ;;  %v17517_v14 = vld [vmem:[#allocation7 + $0x4d8] sm:$0xff] }
 0x800   : > { %14974 = vst.msk [vmem:[#allocation2 + $0x51] sm:$0xff] %vm204_vm0, %v14958_v53  ;;  %v14944_v46 = vadd.f32 %v26608_v49, %v33521_v48  ;;  %v14864_v18 = vpop.f32.mrb[55].mxu0  ;;  %v33535_v61 = vld [vmem:[#allocation2 + $0x19] sm:$0xff]  ;;  %v17070_v49 = vld [vmem:[#allocation2 + $0x8] sm:$0xff] }
 0x801   : > { %14973 = vst.msk [vmem:[#allocation2 + $0x49] sm:$0xff] %vm204_vm0, %v14957_v22  ;;  %v14943_v20 = vadd.f32 %v33521_v48, %v14864_v18  ;;  %26920 = vmatprep.mubr.msk.f32.mxu0 %vm204_vm0, %v33535_v61 }
 0x802   : > { %v14960_v9 = vmax.f32 %v14944_v46, 0.0  ;;  %26921 = vmatmul.mubr.msk.f32.gmra.mrb[66].mxu0 %vm204_vm0, %v33541_v4 }
 0x803   : > { %v14959_v56 = vmax.f32 %v14943_v20, 0.0  ;;  %v26611_v58 = vpop.f32.mrb[56].mxu0  ;;  %v33553_v62 = vld [vmem:[#allocation2 + $0x39] sm:$0xff] }
 0x804   : > { %14976 = vst.msk [vmem:[#allocation2 + $0x69] sm:$0xff] %vm204_vm0, %v14960_v9  ;;  %v14946_v45 = vadd.f32 %v26611_v58, %v33521_v48  ;;  %v14874_v41 = vpop.f32.mrb[57].mxu0  ;;  %v33547_v57 = vld [vmem:[#allocation2 + $0x31] sm:$0xff]  ;;  %v33628_v58 = vpack.c.bf16 %v17517_v14, %v17516_v15 }
 0x805   : > { %14975 = vst.msk [vmem:[#allocation2 + $0x61] sm:$0xff] %vm204_vm0, %v14959_v56  ;;  %v14945_v19 = vadd.f32 %v33521_v48, %v14874_v41  ;;  %26923 = vmatprep.mubr.msk.f32.mxu0 %vm204_vm0, %v33547_v57  ;;  %v33633_v41 = vld [vmem:[#allocation2 + $0x18] sm:$0xff] }
 0x806   : > { %v14962_v0 = vmax.f32 %v14946_v45, 0.0  ;;  %26924 = vmatmul.mubr.msk.f32.gmra.mrb[68].mxu0 %vm204_vm0, %v33553_v62 }
 0x807   : > { %v14961_v35 = vmax.f32 %v14945_v19, 0.0  ;;  %v26614_v16 = vpop.f32.mrb[58].mxu0  ;;  %v33565_v47 = vld [vmem:[#allocation2 + $0x51] sm:$0xff]  ;;  %v17744_v19 = vld [vmem:[#allocation7 + $0x4e0] sm:$0xff] }
 0x808   : > { %14978 = vst.msk [vmem:[#allocation2 + $0x81] sm:$0xff] %vm204_vm0, %v14962_v0  ;;  %v14948_v12 = vadd.f32 %v26614_v16, %v33521_v48  ;;  %v14884_v21 = vpop.f32.mrb[59].mxu0  ;;  %v33559_v38 = vld [vmem:[#allocation2 + $0x49] sm:$0xff] }
 0x809   : > { %14977 = vst.msk [vmem:[#allocation2 + $0x79] sm:$0xff] %vm204_vm0, %v14961_v35  ;;  %v14947_v60 = vadd.f32 %v33521_v48, %v14884_v21  ;;  %26926 = vmatprep.mubr.msk.f32.mxu0 %vm204_vm0, %v33559_v38  ;;  %v17745_v0 = vld [vmem:[#allocation7 + $0x4e8] sm:$0xff] }
 0x80a   : > { %v14964_v11 = vmax.f32 %v14948_v12, 0.0  ;;  %26927 = vmatmul.mubr.msk.f32.gmra.mrb[70].mxu0 %vm204_vm0, %v33565_v47 }
 0x80b   : > { %v14963_v59 = vmax.f32 %v14947_v60, 0.0  ;;  %v26617_v3 = vpop.f32.mrb[60].mxu0  ;;  %v33577_v31 = vld [vmem:[#allocation2 + $0x69] sm:$0xff] }
 0x80c   : > { %14980 = vst.msk [vmem:[#allocation2 + $0x99] sm:$0xff] %vm204_vm0, %v14964_v11  ;;  %v14950_v51 = vadd.f32 %v26617_v3, %v33521_v48  ;;  %v14894_v7 = vpop.f32.mrb[61].mxu0  ;;  %v33571_v2 = vld [vmem:[#allocation2 + $0x61] sm:$0xff]  ;;  %v33653_v3 = vpack.c.bf16 %v17745_v0, %v17744_v19 }
 0x80d   : > { %14979 = vst.msk [vmem:[#allocation2 + $0x91] sm:$0xff] %vm204_vm0, %v14963_v59  ;;  %v14949_v27 = vadd.f32 %v33521_v48, %v14894_v7  ;;  %26929 = vmatprep.mubr.msk.f32.mxu0 %vm204_vm0, %v33571_v2  ;;  %v33648_v59 = vld [vmem:[#allocation2 + $0x20] sm:$0xff]  ;;  %v33659_v7 = vld [vmem:[#allocation2 + $0x30] sm:$0xff] }
 0x80e   : > { %v14966_v32 = vmax.f32 %v14950_v51, 0.0  ;;  %26930 = vmatmul.mubr.msk.f32.gmra.mrb[72].mxu0 %vm204_vm0, %v33577_v31 }
 0x80f   : > { %v14965_v23 = vmax.f32 %v14949_v27, 0.0  ;;  %v26620_v5 = vpop.f32.mrb[62].mxu0  ;;  %v33589_v1 = vld [vmem:[#allocation2 + $0x81] sm:$0xff] }
 0x810   : > { %14982 = vst.msk [vmem:[#allocation2 + $0xb1] sm:$0xff] %vm204_vm0, %v14966_v32  ;;  %v14952_v40 = vadd.f32 %v26620_v5, %v33521_v48  ;;  %v14904_v24 = vpop.f32.mrb[63].mxu0  ;;  %v33583_v37 = vld [vmem:[#allocation2 + $0x79] sm:$0xff] }
 0x811   : > { %14981 = vst.msk [vmem:[#allocation2 + $0xa9] sm:$0xff] %vm204_vm0, %v14965_v23  ;;  %v14951_v30 = vadd.f32 %v33521_v48, %v14904_v24  ;;  %26932 = vmatprep.mubr.msk.f32.mxu0 %vm204_vm0, %v33583_v37 }
 0x812   : > { %v14968_v39 = vmax.f32 %v14952_v40, 0.0  ;;  %26933 = vmatmul.mubr.msk.f32.gmra.mrb[74].mxu0 %vm204_vm0, %v33589_v1 }
 0x813   : > { %v14967_v63 = vmax.f32 %v14951_v30, 0.0  ;;  %v26887_v29 = vpop.f32.mrb[48].mxu1  ;;  %v33601_v52 = vld [vmem:[#allocation2 + $0x99] sm:$0xff] }
 0x814   : > { %14984 = vst.msk [vmem:[#allocation2 + $0xc9] sm:$0xff] %vm204_vm0, %v14968_v39  ;;  %v17022_v10 = vadd.f32 %v26887_v29, %v33521_v48  ;;  %v16919_v42 = vpop.f32.mrb[49].mxu1  ;;  %v33595_v25 = vld [vmem:[#allocation2 + $0x91] sm:$0xff] }
 0x815   : > { %14983 = vst.msk [vmem:[#allocation2 + $0xc1] sm:$0xff] %vm204_vm0, %v14967_v63  ;;  %v17021_v28 = vadd.f32 %v33521_v48, %v16919_v42  ;;  %26935 = vmatprep.mubr.msk.f32.mxu0 %vm204_vm0, %v33595_v25  ;;  %v33674_v30 = vld [vmem:[#allocation2 + $0x38] sm:$0xff]  ;;  %v33683_v63 = vld [vmem:[#allocation2 + $0x48] sm:$0xff] }
 0x816   : > { %v17038_v54 = vmax.f32 %v17022_v10, 0.0  ;;  %26936 = vmatmul.mubr.msk.f32.gmra.mrb[76].mxu0 %vm204_vm0, %v33601_v52 }
 0x817   : > { %v17037_v6 = vmax.f32 %v17021_v28, 0.0  ;;  %v26890_v8 = vpop.f32.mrb[50].mxu1  ;;  %v33613_v44 = vld [vmem:[#allocation2 + $0xb1] sm:$0xff] }
 0x818   : > { %17054 = vst.msk [vmem:[#allocation2 + $0xe1] sm:$0xff] %vm204_vm0, %v17038_v54  ;;  %v17024_v55 = vadd.f32 %v26890_v8, %v33521_v48  ;;  %v16929_v36 = vpop.f32.mrb[51].mxu1  ;;  %v33607_v17 = vld [vmem:[#allocation2 + $0xa9] sm:$0xff] }
 0x819   : > { %17053 = vst.msk [vmem:[#allocation2 + $0xd9] sm:$0xff] %vm204_vm0, %v17037_v6  ;;  %v17023_v34 = vadd.f32 %v33521_v48, %v16929_v36  ;;  %26938 = vmatprep.mubr.msk.f32.mxu0 %vm204_vm0, %v33607_v17  ;;  %v33695_v8 = vld [vmem:[#allocation2 + $0x50] sm:$0xff] }
 0x81a   : > { %v17040_v13 = vmax.f32 %v17024_v55, 0.0  ;;  %26939 = vmatmul.mubr.msk.f32.gmra.mrb[78].mxu0 %vm204_vm0, %v33613_v44 }
 0x81b   : > { %v17039_v53 = vmax.f32 %v17023_v34, 0.0  ;;  %v26893_v22 = vpop.f32.mrb[52].mxu1  ;;  %26949 = vmatprep.mubr.msk.f32.mxu0 %vm204_vm0, %v17069_v26  ;;  %v33626_v56 = vld [vmem:[#allocation2 + $0xc9] sm:$0xff]  ;;  %v33703_v26 = vld [vmem:[#allocation2 + $0x60] sm:$0xff] }
 0x81c   : > { %17056 = vst.msk [vmem:[#allocation2 + $0xf9] sm:$0xff] %vm204_vm0, %v17040_v13  ;;  %v17026_v46 = vadd.f32 %v26893_v22, %v33521_v48  ;;  %v16939_v18 = vpop.f32.mrb[53].mxu1  ;;  %v33620_v20 = vld [vmem:[#allocation2 + $0xc1] sm:$0xff] }
 0x81d   : > { %17055 = vst.msk [vmem:[#allocation2 + $0xf1] sm:$0xff] %vm204_vm0, %v17039_v53  ;;  %v17025_v9 = vadd.f32 %v33521_v48, %v16939_v18  ;;  %27205 = vmatprep.mubr.msk.f32.mxu1 %vm204_vm0, %v33620_v20 }
 0x81e   : > { %v17042_v45 = vmax.f32 %v17026_v46, 0.0  ;;  %26950 = vmatmul.mubr.msk.f32.vlgmr.msra.gmra.mrb[64].mxu0 %vm204_vm0, %v17070_v49  ;;  %27206 = vmatmul.mubr.msk.f32.vlgmr.msra.gmra.mrb[64].mxu1 %vm204_vm0, %v33626_v56  ;;  %v33715_v49 = vld [vmem:[#allocation2 + $0x68] sm:$0xff] }
 0x81f   : > { %v17041_v35 = vmax.f32 %v17025_v9, 0.0  ;;  %v26896_v16 = vpop.f32.mrb[54].mxu1  ;;  %26952 = vmatprep.mubr.msk.f32.mxu0 %vm204_vm0, %v33633_v41  ;;  %28144 = vmatpush3.bf16.msra.mxu1 %v33506_v50  ;;  %v33650_v50 = vld [vmem:[#allocation2 + $0xe1] sm:$0xff]  ;;  %35028 = vst [vmem:[#allocation39_spill] sm:$0xff] %v33715_v49  ;;  %v33723_v9 = vld [vmem:[#allocation2 + $0x78] sm:$0xff] }
 0x820   : > { %17058 = vst.msk [vmem:[#allocation2 + $0x111] sm:$0xff] %vm204_vm0, %v17042_v45  ;;  %v17028_v12 = vadd.f32 %v26896_v16, %v33521_v48  ;;  %v16949_v21 = vpop.f32.mrb[55].mxu1  ;;  %v33640_v60 = vld [vmem:[#allocation2 + $0xd9] sm:$0xff]  ;;  %28146 = vmatprep.subr.bf16.mxu1 %v33511_v43  ;;  %28080 = vmatpush3.bf16.msra.mxu0 %v33515_v33  ;;  %35030 = vst [vmem:[#allocation40_spill] sm:$0xff] %v33723_v9 }
 0x821   : > { %17057 = vst.msk [vmem:[#allocation2 + $0x109] sm:$0xff] %vm204_vm0, %v17041_v35  ;;  %v17027_v11 = vadd.f32 %v33521_v48, %v16949_v21  ;;  %27208 = vmatprep.mubr.msk.f32.mxu1 %vm204_vm0, %v33640_v60  ;;  %28082 = vmatprep.subr.bf16.mxu0 %v33628_v58  ;;  %v33735_v21 = vld [vmem:[#allocation2 + $0x80] sm:$0xff] }
 0x822   : > { %v17044_v51 = vmax.f32 %v17028_v12, 0.0  ;;  %26953 = vmatmul.mubr.msk.f32.gmra.mrb[66].mxu0 %vm204_vm0, %v33648_v59  ;;  %27209 = vmatmul.mubr.msk.f32.gmra.mrb[66].mxu1 %vm204_vm0, %v33650_v50  ;;  %35032 = vst [vmem:[#allocation41_spill] sm:$0xff] %v33735_v21 }
 0x823   : > { %v17043_v27 = vmax.f32 %v17027_v11, 0.0  ;;  %v26899_v32 = vpop.f32.mrb[56].mxu1  ;;  %26955 = vmatprep.mubr.msk.f32.mxu0 %vm204_vm0, %v33659_v7  ;;  %28148 = vmatpush3.bf16.msra.mxu1 %v33511_v43  ;;  %v33676_v43 = vld [vmem:[#allocation2 + $0xf9] sm:$0xff] }
 0x824   : > { %17060 = vst.msk [vmem:[#allocation2 + $0x129] sm:$0xff] %vm204_vm0, %v17044_v51  ;;  %v17030_v23 = vadd.f32 %v26899_v32, %v33521_v48  ;;  %v16959_v5 = vpop.f32.mrb[57].mxu1  ;;  %v33666_v40 = vld [vmem:[#allocation2 + $0xf1] sm:$0xff]  ;;  %28084 = vmatpush3.bf16.msra.mxu0 %v33628_v58  ;;  %28150 = vmatprep.subr.bf16.mxu1 %v33515_v33  ;;  %35024 = vst [vmem:[#allocation37_spill] sm:$0xff] %v33676_v43 }
 0x825   : > { %17059 = vst.msk [vmem:[#allocation2 + $0x121] sm:$0xff] %vm204_vm0, %v17043_v27  ;;  %v17029_v24 = vadd.f32 %v33521_v48, %v16959_v5  ;;  %27211 = vmatprep.mubr.msk.f32.mxu1 %vm204_vm0, %v33666_v40  ;;  %28086 = vmatprep.subr.bf16.mxu0 %v33653_v3  ;;  %v33743_v27 = vld [vmem:[#allocation2 + $0x90] sm:$0xff] }
 0x826   : > { %v17046_v39 = vmax.f32 %v17030_v23, 0.0  ;;  %26956 = vmatmul.mubr.msk.f32.gmra.mrb[68].mxu0 %vm204_vm0, %v33674_v30  ;;  %27212 = vmatmul.mubr.msk.f32.gmra.mrb[68].mxu1 %vm204_vm0, %v33676_v43  ;;  %35034 = vst [vmem:[#allocation42_spill] sm:$0xff] %v33743_v27  ;;  %v33753_v23 = vld [vmem:[#allocation2 + $0x98] sm:$0xff]  ;;  %v18205_v43 = vld [vmem:[#allocation7 + $0x528] sm:$0xff] }
 0x827   : > { %v17045_v29 = vmax.f32 %v17029_v24, 0.0  ;;  %v26902_v10 = vpop.f32.mrb[58].mxu1  ;;  %26958 = vmatprep.mubr.msk.f32.mxu0 %vm204_vm0, %v33683_v63  ;;  %v33697_v55 = vld [vmem:[#allocation2 + $0x111] sm:$0xff]  ;;  %35036 = vst [vmem:[#allocation19_spill] sm:$0xff] %v33753_v23  ;;  %v33761_v24 = vld [vmem:[#allocation2 + $0xa8] sm:$0xff] }
 0x828   : > { %17062 = vst.msk [vmem:[#allocation2 + $0x141] sm:$0xff] %vm204_vm0, %v17046_v39  ;;  %v17032_v42 = vadd.f32 %v26902_v10, %v33521_v48  ;;  %v16969_v28 = vpop.f32.mrb[59].mxu1  ;;  %v33689_v54 = vld [vmem:[#allocation2 + $0x109] sm:$0xff]  ;;  %35026 = vst [vmem:[#allocation38_spill] sm:$0xff] %v33697_v55 }
 0x829   : > { %35025 = vst [vmem:[#allocation16_spill] sm:$0xff] %v33689_v54  ;;  %17061 = vst.msk [vmem:[#allocation2 + $0x139] sm:$0xff] %vm204_vm0, %v17045_v29  ;;  %v17031_v6 = vadd.f32 %v33521_v48, %v16969_v28  ;;  %27214 = vmatprep.mubr.msk.f32.mxu1 %vm204_vm0, %v33689_v54  ;;  %v17497_v29 = vld [vmem:[#allocation2 + $0x2] sm:$0xff]  ;;  %v33769_v10 = vld [vmem:[#allocation2 + $0xb0] sm:$0xff] }
 0x82a   : > { %v17048_v36 = vmax.f32 %v17032_v42, 0.0  ;;  %26959 = vmatmul.mubr.msk.f32.gmra.mrb[70].mxu0 %vm204_vm0, %v33695_v8  ;;  %27215 = vmatmul.mubr.msk.f32.gmra.mrb[70].mxu1 %vm204_vm0, %v33697_v55  ;;  %35038 = vst [vmem:[#allocation44_spill] sm:$0xff] %v33761_v24  ;;  %35040 = vst [vmem:[#allocation20_spill] sm:$0xff] %v33769_v10  ;;  %v33777_v28 = vld [vmem:[#allocation2 + $0xc0] sm:$0xff]  ;;  %v17976_v55 = vld [vmem:[#allocation7 + $0x510] sm:$0xff] }
 0x82b   : > { %v17047_v34 = vmax.f32 %v17031_v6, 0.0  ;;  %v26905_v13 = vpop.f32.mrb[60].mxu1  ;;  %26961 = vmatprep.mubr.msk.f32.mxu0 %vm204_vm0, %v33703_v26  ;;  %v33717_v46 = vld [vmem:[#allocation2 + $0x129] sm:$0xff]  ;;  %35042 = vst [vmem:[#allocation43_spill] sm:$0xff] %v33777_v28 }
 0x82c   : > { %17064 = vst.msk [vmem:[#allocation2 + $0x159] sm:$0xff] %vm204_vm0, %v17048_v36  ;;  %v17034_v15 = vadd.f32 %v26905_v13, %v33521_v48  ;;  %v16979_v14 = vpop.f32.mrb[61].mxu1  ;;  %v33709_v53 = vld [vmem:[#allocation2 + $0x121] sm:$0xff]  ;;  %35029 = vst [vmem:[#allocation14_spill] sm:$0xff] %v33717_v46  ;;  %v17746_v6 = vld [vmem:[#allocation7 + $0x4f0] sm:$0xff] }
 0x82d   : > { %35027 = vst [vmem:[#allocation36_spill] sm:$0xff] %v33709_v53  ;;  %17063 = vst.msk [vmem:[#allocation2 + $0x151] sm:$0xff] %vm204_vm0, %v17047_v34  ;;  %v17033_v22 = vadd.f32 %v33521_v48, %v16979_v14  ;;  %27217 = vmatprep.mubr.msk.f32.mxu1 %vm204_vm0, %v33709_v53  ;;  %v17747_v36 = vld [vmem:[#allocation7 + $0x4f8] sm:$0xff]  ;;  %v17498_v34 = vld [vmem:[#allocation2 + $0xa] sm:$0xff] }
 0x82e   : > { %v17050_v18 = vmax.f32 %v17034_v15, 0.0  ;;  %26962 = vmatmul.mubr.msk.f32.gmra.mrb[72].mxu0 %vm204_vm0, %v33715_v49  ;;  %27218 = vmatmul.mubr.msk.f32.gmra.mrb[72].mxu1 %vm204_vm0, %v33717_v46  ;;  %v33782_v13 = vld [vmem:[#allocation2 + $0xc8] sm:$0xff]  ;;  %v33784_v15 = vpack.c.bf16 %v17747_v36, %v17746_v6  ;;  %v17974_v14 = vld [vmem:[#allocation7 + $0x500] sm:$0xff]  ;;  %v33841_v36 = vld [vmem:[#allocation2 + $0x110] sm:$0xff] }
 0x82f   : > { %v17049_v45 = vmax.f32 %v17033_v22, 0.0  ;;  %v26908_v19 = vpop.f32.mrb[62].mxu1  ;;  %26964 = vmatprep.mubr.msk.f32.mxu0 %vm204_vm0, %v33723_v9  ;;  %v33737_v11 = vld [vmem:[#allocation2 + $0x141] sm:$0xff]  ;;  %35043 = vst [vmem:[#allocation29_spill] sm:$0xff] %v33782_v13 }
 0x830   : > { %17066 = vst.msk [vmem:[#allocation2 + $0x171] sm:$0xff] %vm204_vm0, %v17050_v18  ;;  %v17036_v0 = vadd.f32 %v26908_v19, %v33521_v48  ;;  %v16989_v35 = vpop.f32.mrb[63].mxu1  ;;  %v33729_v16 = vld [vmem:[#allocation2 + $0x139] sm:$0xff]  ;;  %35033 = vst [vmem:[#allocation17_spill] sm:$0xff] %v33737_v11  ;;  %v33799_v19 = vld [vmem:[#allocation2 + $0x22] sm:$0xff] }
 0x831   : > { %35031 = vst [vmem:[#allocation15_spill] sm:$0xff] %v33729_v16  ;;  %17065 = vst.msk [vmem:[#allocation2 + $0x169] sm:$0xff] %vm204_vm0, %v17049_v45  ;;  %v17035_v12 = vadd.f32 %v33521_v48, %v16989_v35  ;;  %27220 = vmatprep.mubr.msk.f32.mxu1 %vm204_vm0, %v33729_v16  ;;  %v33789_v22 = vld [vmem:[#allocation2 + $0x1a] sm:$0xff]  ;;  %v17975_v45 = vld [vmem:[#allocation7 + $0x508] sm:$0xff] }
 0x832   : > { %v17052_v51 = vmax.f32 %v17036_v0, 0.0  ;;  %26965 = vmatmul.mubr.msk.f32.gmra.mrb[74].mxu0 %vm204_vm0, %v33735_v21  ;;  %27221 = vmatmul.mubr.msk.f32.gmra.mrb[74].mxu1 %vm204_vm0, %v33737_v11  ;;  %v33791_v18 = vld [vmem:[#allocation2 + $0xd8] sm:$0xff]  ;;  %v33801_v0 = vld [vmem:[#allocation2 + $0xe0] sm:$0xff]  ;;  %v33805_v35 = vpack.c.bf16 %v17975_v45, %v17974_v14  ;;  %v33833_v6 = vld [vmem:[#allocation2 + $0x108] sm:$0xff] }
 0x833   : > { %v17051_v32 = vmax.f32 %v17035_v12, 0.0  ;;  %26967 = vmatprep.mubr.msk.f32.mxu0 %vm204_vm0, %v33743_v27  ;;  %v33755_v5 = vld [vmem:[#allocation2 + $0x159] sm:$0xff]  ;;  %v33855_v45 = vld [vmem:[#allocation2 + $0x6a] sm:$0xff] }
 0x834   : > { %17068 = vst.msk [vmem:[#allocation2 + $0x189] sm:$0xff] %vm204_vm0, %v17052_v51  ;;  %v33748_v48 = vld [vmem:[#allocation2 + $0x151] sm:$0xff]  ;;  %35037 = vst [vmem:[#allocation23_spill] sm:$0xff] %v33755_v5  ;;  %v33821_v51 = vld [vmem:[#allocation2 + $0x3a] sm:$0xff] }
 0x835   : > { %35035 = vst [vmem:[#allocation21_spill] sm:$0xff] %v33748_v48  ;;  %17067 = vst.msk [vmem:[#allocation2 + $0x181] sm:$0xff] %vm204_vm0, %v17051_v32  ;;  %27223 = vmatprep.mubr.msk.f32.mxu1 %vm204_vm0, %v33748_v48  ;;  %v33811_v12 = vld [vmem:[#allocation2 + $0x32] sm:$0xff]  ;;  %v33849_v14 = vld [vmem:[#allocation2 + $0x120] sm:$0xff] }
 0x836   : > { %26968 = vmatmul.mubr.msk.f32.gmra.mrb[76].mxu0 %vm204_vm0, %v33753_v23  ;;  %27224 = vmatmul.mubr.msk.f32.gmra.mrb[76].mxu1 %vm204_vm0, %v33755_v5  ;;  %v33823_v32 = vld [vmem:[#allocation2 + $0xf8] sm:$0xff]  ;;  %35047 = vst [vmem:[#allocation26_spill] sm:$0xff] %v33855_v45  ;;  %v33871_v48 = vld [vmem:[#allocation2 + $0x82] sm:$0xff]  ;;  %v33881_v46 = vld [vmem:[#allocation2 + $0x150] sm:$0xff] }
 0x837   : > { %26970 = vmatprep.mubr.msk.f32.mxu0 %vm204_vm0, %v33761_v24  ;;  %v33771_v42 = vld [vmem:[#allocation2 + $0x171] sm:$0xff]  ;;  %35049 = vst [vmem:[#allocation30_spill] sm:$0xff] %v33871_v48  ;;  %v33873_v11 = vld [vmem:[#allocation2 + $0x140] sm:$0xff] }
 0x838   : > { %v33765_v39 = vld [vmem:[#allocation2 + $0x169] sm:$0xff]  ;;  %35041 = vst [vmem:[#allocation27_spill] sm:$0xff] %v33771_v42  ;;  %v33865_v5 = vld [vmem:[#allocation2 + $0x138] sm:$0xff] }
 0x839   : > { %35039 = vst [vmem:[#allocation25_spill] sm:$0xff] %v33765_v39  ;;  %27226 = vmatprep.mubr.msk.f32.mxu1 %vm204_vm0, %v33765_v39  ;;  %v33863_v39 = vld [vmem:[#allocation2 + $0x7a] sm:$0xff]  ;;  %v33879_v16 = vld [vmem:[#allocation2 + $0x92] sm:$0xff]  ;;  %v33897_v53 = vld [vmem:[#allocation2 + $0x168] sm:$0xff] }
 0x83a   : > { %26971 = vmatmul.mubr.msk.f32.gmra.mrb[78].mxu0 %vm204_vm0, %v33769_v10  ;;  %27227 = vmatmul.mubr.msk.f32.gmra.mrb[78].mxu1 %vm204_vm0, %v33771_v42  ;;  %v33857_v42 = vld [vmem:[#allocation2 + $0x128] sm:$0xff]  ;;  %35048 = vst [vmem:[#allocation28_spill] sm:$0xff] %v33863_v39  ;;  %35050 = vst [vmem:[#allocation13_spill] sm:$0xff] %v33879_v16 }
 0x83b   : > { %27237 = vmatprep.mubr.msk.f32.mxu1 %vm204_vm0, %v33777_v28  ;;  %26981 = vmatprep.mubr.msk.f32.mxu0 %vm204_vm0, %v17497_v29  ;;  %v33831_v29 = vld [vmem:[#allocation2 + $0x4a] sm:$0xff] }
 0x83c   : > { %35044 = vst [vmem:[#allocation18_spill] sm:$0xff] %v33831_v29 }
 0x83e   : > { %26982 = vmatmul.mubr.msk.f32.vlgmr.msra.gmra.mrb[64].mxu0 %vm204_vm0, %v17498_v34  ;;  %27238 = vmatmul.mubr.msk.f32.vlgmr.msra.gmra.mrb[64].mxu1 %vm204_vm0, %v33782_v13  ;;  %v33847_v34 = vld [vmem:[#allocation2 + $0x62] sm:$0xff] }
 0x83f   : > { %26984 = vmatprep.mubr.msk.f32.mxu0 %vm204_vm0, %v33789_v22  ;;  %27240 = vmatprep.mubr.msk.f32.mxu1 %vm204_vm0, %v33791_v18  ;;  %35046 = vst [vmem:[#allocation24_spill] sm:$0xff] %v33847_v34 }
 0x840   : > { %28152 = vmatpush3.bf16.msra.mxu1 %v33515_v33  ;;  %28088 = vmatpush3.bf16.msra.mxu0 %v33653_v3  ;;  %v33813_v33 = vld [vmem:[#allocation2 + $0xf0] sm:$0xff] }
 0x841   : > { %28154 = vmatprep.subr.bf16.mxu1 %v33628_v58  ;;  %28090 = vmatprep.subr.bf16.mxu0 %v33784_v15 }
 0x842   : > { %26985 = vmatmul.mubr.msk.f32.gmra.mrb[66].mxu0 %vm204_vm0, %v33799_v19  ;;  %27241 = vmatmul.mubr.msk.f32.gmra.mrb[66].mxu1 %vm204_vm0, %v33801_v0 }
 0x843   : > { %26987 = vmatprep.mubr.msk.f32.mxu0 %vm204_vm0, %v33811_v12  ;;  %27243 = vmatprep.mubr.msk.f32.mxu1 %vm204_vm0, %v33813_v33 }
 0x844   : > { %28156 = vmatpush3.bf16.msra.mxu1 %v33628_v58  ;;  %28092 = vmatpush3.bf16.msra.mxu0 %v33784_v15  ;;  %v33839_v58 = vld [vmem:[#allocation2 + $0x52] sm:$0xff] }
 0x845   : > { %28158 = vmatprep.subr.bf16.mxu1 %v33653_v3  ;;  %28094 = vmatprep.subr.bf16.mxu0 %v33805_v35  ;;  %35045 = vst [vmem:[#allocation22_spill] sm:$0xff] %v33839_v58 }
 0x846   : > { %26988 = vmatmul.mubr.msk.f32.gmra.mrb[68].mxu0 %vm204_vm0, %v33821_v51  ;;  %27244 = vmatmul.mubr.msk.f32.gmra.mrb[68].mxu1 %vm204_vm0, %v33823_v32 }
 0x847   : > { %26990 = vmatprep.mubr.msk.f32.mxu0 %vm204_vm0, %v33831_v29  ;;  %27246 = vmatprep.mubr.msk.f32.mxu1 %vm204_vm0, %v33833_v6  ;;  %v18204_v29 = vld [vmem:[#allocation7 + $0x520] sm:$0xff] }
 0x84a   : > { %26991 = vmatmul.mubr.msk.f32.gmra.mrb[70].mxu0 %vm204_vm0, %v33839_v58  ;;  %27247 = vmatmul.mubr.msk.f32.gmra.mrb[70].mxu1 %vm204_vm0, %v33841_v36  ;;  %v17977_v58 = vld [vmem:[#allocation7 + $0x518] sm:$0xff] }
 0x84b   : > { %26993 = vmatprep.mubr.msk.f32.mxu0 %vm204_vm0, %v33847_v34  ;;  %27249 = vmatprep.mubr.msk.f32.mxu1 %vm204_vm0, %v33849_v14  ;;  %v33905_v34 = vld [vmem:[#allocation2 + $0x170] sm:$0xff]  ;;  %v33919_v54 = vpack.c.bf16 %v17977_v58, %v17976_v55 }
 0x84c   : > { %v33943_v55 = vld [vmem:[#allocation2 + $0xf2] sm:$0xff]  ;;  %v33977_v58 = vld [vmem:[#allocation2 + $0x12a] sm:$0xff] }
 0x84e   : > { %26994 = vmatmul.mubr.msk.f32.gmra.mrb[72].mxu0 %vm204_vm0, %v33855_v45  ;;  %27250 = vmatmul.mubr.msk.f32.gmra.mrb[72].mxu1 %vm204_vm0, %v33857_v42  ;;  %v33889_v45 = vld [vmem:[#allocation2 + $0x158] sm:$0xff] }
 0x84f   : > { %26996 = vmatprep.mubr.msk.f32.mxu0 %vm204_vm0, %v33863_v39  ;;  %27252 = vmatprep.mubr.msk.f32.mxu1 %vm204_vm0, %v33865_v5  ;;  %v33887_v39 = vld [vmem:[#allocation2 + $0x9a] sm:$0xff] }
 0x850   : > { %35051 = vst [vmem:[#allocation35_spill] sm:$0xff] %v33887_v39 }
 0x852   : > { %26997 = vmatmul.mubr.msk.f32.gmra.mrb[74].mxu0 %vm204_vm0, %v33871_v48  ;;  %27253 = vmatmul.mubr.msk.f32.gmra.mrb[74].mxu1 %vm204_vm0, %v33873_v11  ;;  %v33895_v48 = vld [vmem:[#allocation2 + $0xaa] sm:$0xff] }
 0x853   : > { %26999 = vmatprep.mubr.msk.f32.mxu0 %vm204_vm0, %v33879_v16  ;;  %27255 = vmatprep.mubr.msk.f32.mxu1 %vm204_vm0, %v33881_v46  ;;  %35052 = vst [vmem:[#allocation32_spill] sm:$0xff] %v33895_v48  ;;  %v33903_v16 = vld [vmem:[#allocation2 + $0xb2] sm:$0xff] }
 0x854   : > { %35053 = vst [vmem:[#allocation34_spill] sm:$0xff] %v33903_v16 }
 0x856   : > { %27000 = vmatmul.mubr.msk.f32.gmra.mrb[76].mxu0 %vm204_vm0, %v33887_v39  ;;  %27256 = vmatmul.mubr.msk.f32.gmra.mrb[76].mxu1 %vm204_vm0, %v33889_v45  ;;  %v33911_v39 = vld [vmem:[#allocation2 + $0xc2] sm:$0xff] }
 0x857   : > { %27002 = vmatprep.mubr.msk.f32.mxu0 %vm204_vm0, %v33895_v48  ;;  %27258 = vmatprep.mubr.msk.f32.mxu1 %vm204_vm0, %v33897_v53  ;;  %v33917_v48 = vld [vmem:[#allocation2 + $0xca] sm:$0xff] }
 0x85a   : > { %27003 = vmatmul.mubr.msk.f32.gmra.mrb[78].mxu0 %vm204_vm0, %v33903_v16  ;;  %27259 = vmatmul.mubr.msk.f32.gmra.mrb[78].mxu1 %vm204_vm0, %v33905_v34  ;;  %v33925_v16 = vld [vmem:[#allocation2 + $0xda] sm:$0xff] }
 0x85b   : > { %27013 = vmatprep.mubr.msk.f32.mxu0 %vm204_vm0, %v33633_v41  ;;  %27269 = vmatprep.mubr.msk.f32.mxu1 %vm204_vm0, %v33911_v39  ;;  %v33933_v41 = vld [vmem:[#allocation2 + $0xe2] sm:$0xff] }
 0x85e   : > { %27014 = vmatmul.mubr.msk.f32.vlgmr.msra.gmra.mrb[64].mxu0 %vm204_vm0, %v33648_v59  ;;  %27270 = vmatmul.mubr.msk.f32.vlgmr.msra.gmra.mrb[64].mxu1 %vm204_vm0, %v33917_v48  ;;  %v33937_v59 = vpack.c.bf16 %v18205_v43, %v18204_v29  ;;  %v33959_v43 = vld [vmem:[#allocation2 + $0x10a] sm:$0xff]  ;;  %v33971_v29 = vld [vmem:[#allocation2 + $0x122] sm:$0xff] }
 0x85f   : > { %27016 = vmatprep.mubr.msk.f32.mxu0 %vm204_vm0, %v33659_v7  ;;  %27272 = vmatprep.mubr.msk.f32.mxu1 %vm204_vm0, %v33925_v16 }
 0x860   : > { %28160 = vmatpush3.bf16.msra.mxu1 %v33653_v3  ;;  %28096 = vmatpush3.bf16.msra.mxu0 %v33805_v35  ;;  %v33951_v3 = vld [vmem:[#allocation2 + $0xfa] sm:$0xff] }
 0x861   : > { %28162 = vmatprep.subr.bf16.mxu1 %v33784_v15  ;;  %28098 = vmatprep.subr.bf16.mxu0 %v33919_v54 }
 0x862   : > { %27017 = vmatmul.mubr.msk.f32.gmra.mrb[66].mxu0 %vm204_vm0, %v33674_v30  ;;  %27273 = vmatmul.mubr.msk.f32.gmra.mrb[66].mxu1 %vm204_vm0, %v33933_v41 }
 0x863   : > { %27019 = vmatprep.mubr.msk.f32.mxu0 %vm204_vm0, %v33683_v63  ;;  %27275 = vmatprep.mubr.msk.f32.mxu1 %vm204_vm0, %v33943_v55 }
 0x864   : > { %28164 = vmatpush3.bf16.msra.mxu1 %v33784_v15  ;;  %28100 = vmatpush3.bf16.msra.mxu0 %v33919_v54  ;;  %v33965_v15 = vld [vmem:[#allocation2 + $0x112] sm:$0xff] }
 0x865   : > { %28166 = vmatprep.subr.bf16.mxu1 %v33805_v35  ;;  %28102 = vmatprep.subr.bf16.mxu0 %v33937_v59 }
 0x866   : > { %27020 = vmatmul.mubr.msk.f32.gmra.mrb[68].mxu0 %vm204_vm0, %v33695_v8  ;;  %27276 = vmatmul.mubr.msk.f32.gmra.mrb[68].mxu1 %vm204_vm0, %v33951_v3 }
 0x867   : > { %27022 = vmatprep.mubr.msk.f32.mxu0 %vm204_vm0, %v33703_v26  ;;  %27278 = vmatprep.mubr.msk.f32.mxu1 %vm204_vm0, %v33959_v43 }
 0x86a   : > { %27023 = vmatmul.mubr.msk.f32.gmra.mrb[70].mxu0 %vm204_vm0, %v33715_v49  ;;  %27279 = vmatmul.mubr.msk.f32.gmra.mrb[70].mxu1 %vm204_vm0, %v33965_v15  ;;  %v33983_v49 = vld [vmem:[#allocation2 + $0x13a] sm:$0xff] }
 0x86b   : > { %27025 = vmatprep.mubr.msk.f32.mxu0 %vm204_vm0, %v33723_v9  ;;  %27281 = vmatprep.mubr.msk.f32.mxu1 %vm204_vm0, %v33971_v29  ;;  %v33989_v9 = vld [vmem:[#allocation2 + $0x142] sm:$0xff] }
 0x86e   : > { %27026 = vmatmul.mubr.msk.f32.gmra.mrb[72].mxu0 %vm204_vm0, %v33735_v21  ;;  %27282 = vmatmul.mubr.msk.f32.gmra.mrb[72].mxu1 %vm204_vm0, %v33977_v58  ;;  %v33995_v21 = vld [vmem:[#allocation2 + $0x152] sm:$0xff] }
 0x86f   : > { %27028 = vmatprep.mubr.msk.f32.mxu0 %vm204_vm0, %v33743_v27  ;;  %27284 = vmatprep.mubr.msk.f32.mxu1 %vm204_vm0, %v33983_v49  ;;  %35054 = vst [vmem:[#allocation33_spill] sm:$0xff] %v33995_v21  ;;  %v34001_v27 = vld [vmem:[#allocation2 + $0x15a] sm:$0xff] }
 0x872   : > { %27029 = vmatmul.mubr.msk.f32.gmra.mrb[74].mxu0 %vm204_vm0, %v33753_v23  ;;  %27285 = vmatmul.mubr.msk.f32.gmra.mrb[74].mxu1 %vm204_vm0, %v33989_v9  ;;  %v34007_v23 = vld [vmem:[#allocation2 + $0x16a] sm:$0xff] }
 0x873   : > { %27031 = vmatprep.mubr.msk.f32.mxu0 %vm204_vm0, %v33761_v24  ;;  %27287 = vmatprep.mubr.msk.f32.mxu1 %vm204_vm0, %v33995_v21  ;;  %35055 = vst [vmem:[#allocation31_spill] sm:$0xff] %v34007_v23  ;;  %v34013_v24 = vld [vmem:[#allocation2 + $0x172] sm:$0xff] }
 0x874   : > { %v18207_v21 = vld [vmem:[#allocation7 + $0x538] sm:$0xff] }
 0x876   : > { %27032 = vmatmul.mubr.msk.f32.gmra.mrb[76].mxu0 %vm204_vm0, %v33769_v10  ;;  %27288 = vmatmul.mubr.msk.f32.gmra.mrb[76].mxu1 %vm204_vm0, %v34001_v27  ;;  %v18206_v10 = vld [vmem:[#allocation7 + $0x530] sm:$0xff] }
 0x877   : > { %27034 = vmatprep.mubr.msk.f32.mxu0 %vm204_vm0, %v33777_v28  ;;  %27290 = vmatprep.mubr.msk.f32.mxu1 %vm204_vm0, %v34007_v23  ;;  %v34023_v28 = vpack.c.bf16 %v18207_v21, %v18206_v10  ;;  %v18435_v23 = vld [vmem:[#allocation7 + $0x548] sm:$0xff]  ;;  %v35069_v10 = vld [vmem:[#allocation13_spill] sm:$0xff] }
 0x878   : > { %v35067_v21 = vld [vmem:[#allocation30_spill] sm:$0xff] }
 0x87a   : > { %27035 = vmatmul.mubr.msk.f32.gmra.mrb[78].mxu0 %vm204_vm0, %v33782_v13  ;;  %27291 = vmatmul.mubr.msk.f32.gmra.mrb[78].mxu1 %vm204_vm0, %v34013_v24  ;;  %v18434_v13 = vld [vmem:[#allocation7 + $0x540] sm:$0xff] }
 0x87b   : > { %27045 = vmatprep.mubr.msk.f32.mxu0 %vm204_vm0, %v33535_v61  ;;  %27301 = vmatprep.mubr.msk.f32.mxu1 %vm204_vm0, %v33791_v18  ;;  %v34037_v61 = vpack.c.bf16 %v18435_v23, %v18434_v13  ;;  %v35068_v23 = vld [vmem:[#allocation17_spill] sm:$0xff]  ;;  %v35071_v13 = vld [vmem:[#allocation35_spill] sm:$0xff] }
 0x87e   : > { %27046 = vmatmul.mubr.msk.f32.vlgmr.msra.gmra.mrb[64].mxu0 %vm204_vm0, %v33541_v4  ;;  %27302 = vmatmul.mubr.msk.f32.vlgmr.msra.gmra.mrb[64].mxu1 %vm204_vm0, %v33801_v0  ;;  %v34087_v4 = vld [vmem:[#allocation2 + $0x180] sm:$0xff] }
 0x87f   : > { %27048 = vmatprep.mubr.msk.f32.mxu0 %vm204_vm0, %v33547_v57  ;;  %27304 = vmatprep.mubr.msk.f32.mxu1 %vm204_vm0, %v33813_v33  ;;  %v34093_v57 = vld [vmem:[#allocation2 + $0x188] sm:$0xff] }
 0x880   : > { %28168 = vmatpush3.bf16.msra.mxu1 %v33805_v35  ;;  %28104 = vmatpush3.bf16.msra.mxu0 %v33937_v59  ;;  %v35074_v35 = vld [vmem:[#allocation25_spill] sm:$0xff] }
 0x881   : > { %28170 = vmatprep.subr.bf16.mxu1 %v33919_v54  ;;  %28106 = vmatprep.subr.bf16.mxu0 %v34023_v28 }
 0x882   : > { %27049 = vmatmul.mubr.msk.f32.gmra.mrb[66].mxu0 %vm204_vm0, %v33553_v62  ;;  %27305 = vmatmul.mubr.msk.f32.gmra.mrb[66].mxu1 %vm204_vm0, %v33823_v32  ;;  %v18436_v62 = vld [vmem:[#allocation7 + $0x550] sm:$0xff] }
 0x883   : > { %27051 = vmatprep.mubr.msk.f32.mxu0 %vm204_vm0, %v33559_v38  ;;  %27307 = vmatprep.mubr.msk.f32.mxu1 %vm204_vm0, %v33833_v6  ;;  %v18437_v38 = vld [vmem:[#allocation7 + $0x558] sm:$0xff] }
 0x884   : > { %28172 = vmatpush3.bf16.msra.mxu1 %v33919_v54  ;;  %28108 = vmatpush3.bf16.msra.mxu0 %v34023_v28  ;;  %v35066_v54 = vld [vmem:[#allocation15_spill] sm:$0xff] }
 0x885   : > { %28174 = vmatprep.subr.bf16.mxu1 %v33937_v59  ;;  %28110 = vmatprep.subr.bf16.mxu0 %v34037_v61 }
 0x886   : > { %27052 = vmatmul.mubr.msk.f32.gmra.mrb[68].mxu0 %vm204_vm0, %v33565_v47  ;;  %27308 = vmatmul.mubr.msk.f32.gmra.mrb[68].mxu1 %vm204_vm0, %v33841_v36  ;;  %v34103_v47 = vpack.c.bf16 %v18437_v38, %v18436_v62  ;;  %v35076_v62 = vld [vmem:[#allocation27_spill] sm:$0xff]  ;;  %v34167_v38 = vld [vmem:[#allocation2 + $0x181] sm:$0xff] }
 0x887   : > { %27054 = vmatprep.mubr.msk.f32.mxu0 %vm204_vm0, %v33571_v2  ;;  %27310 = vmatprep.mubr.msk.f32.mxu1 %vm204_vm0, %v33849_v14  ;;  %v18664_v2 = vld [vmem:[#allocation7 + $0x560] sm:$0xff] }
 0x88a   : > { %27055 = vmatmul.mubr.msk.f32.gmra.mrb[70].mxu0 %vm204_vm0, %v33577_v31  ;;  %27311 = vmatmul.mubr.msk.f32.gmra.mrb[70].mxu1 %vm204_vm0, %v33857_v42  ;;  %v18665_v31 = vld [vmem:[#allocation7 + $0x568] sm:$0xff] }
 0x88b   : > { %27057 = vmatprep.mubr.msk.f32.mxu0 %vm204_vm0, %v33583_v37  ;;  %27313 = vmatprep.mubr.msk.f32.mxu1 %vm204_vm0, %v33865_v5  ;;  %v34117_v37 = vpack.c.bf16 %v18665_v31, %v18664_v2  ;;  %v34173_v2 = vld [vmem:[#allocation2 + $0x189] sm:$0xff] }
 0x88c   : > { %v18666_v31 = vld [vmem:[#allocation7 + $0x570] sm:$0xff] }
 0x88e   : > { %27058 = vmatmul.mubr.msk.f32.gmra.mrb[72].mxu0 %vm204_vm0, %v33589_v1  ;;  %27314 = vmatmul.mubr.msk.f32.gmra.mrb[72].mxu1 %vm204_vm0, %v33873_v11  ;;  %v35056_v1 = vld [vmem:[#allocation37_spill] sm:$0xff] }
 0x88f   : > { %27060 = vmatprep.mubr.msk.f32.mxu0 %vm204_vm0, %v33595_v25  ;;  %27316 = vmatprep.mubr.msk.f32.mxu1 %vm204_vm0, %v33881_v46  ;;  %v35057_v25 = vld [vmem:[#allocation18_spill] sm:$0xff] }
 0x892   : > { %27061 = vmatmul.mubr.msk.f32.gmra.mrb[74].mxu0 %vm204_vm0, %v33601_v52  ;;  %27317 = vmatmul.mubr.msk.f32.gmra.mrb[74].mxu1 %vm204_vm0, %v33889_v45  ;;  %v35058_v52 = vld [vmem:[#allocation16_spill] sm:$0xff] }
 0x893   : > { %27063 = vmatprep.mubr.msk.f32.mxu0 %vm204_vm0, %v33607_v17  ;;  %27319 = vmatprep.mubr.msk.f32.mxu1 %vm204_vm0, %v33897_v53  ;;  %v35059_v17 = vld [vmem:[#allocation22_spill] sm:$0xff] }
 0x896   : > { %27064 = vmatmul.mubr.msk.f32.gmra.mrb[76].mxu0 %vm204_vm0, %v33613_v44  ;;  %27320 = vmatmul.mubr.msk.f32.gmra.mrb[76].mxu1 %vm204_vm0, %v33905_v34  ;;  %v35060_v44 = vld [vmem:[#allocation38_spill] sm:$0xff] }
 0x897   : > { %27066 = vmatprep.mubr.msk.f32.mxu0 %vm204_vm0, %v33620_v20  ;;  %27322 = vmatprep.mubr.msk.f32.mxu1 %vm204_vm0, %v34087_v4  ;;  %v35061_v20 = vld [vmem:[#allocation24_spill] sm:$0xff] }
 0x89a   : > { %27067 = vmatmul.mubr.msk.f32.gmra.mrb[78].mxu0 %vm204_vm0, %v33626_v56  ;;  %27323 = vmatmul.mubr.msk.f32.gmra.mrb[78].mxu1 %vm204_vm0, %v34093_v57  ;;  %v35062_v56 = vld [vmem:[#allocation36_spill] sm:$0xff] }
 0x89b   : > { %27077 = vmatprep.mubr.msk.f32.mxu0 %vm204_vm0, %v33789_v22  ;;  %27333 = vmatprep.mubr.msk.f32.mxu1 %vm204_vm0, %v33640_v60  ;;  %v35063_v60 = vld [vmem:[#allocation26_spill] sm:$0xff]  ;;  %v35072_v22 = vld [vmem:[#allocation23_spill] sm:$0xff] }
 0x89e   : > { %27078 = vmatmul.mubr.msk.f32.vlgmr.msra.gmra.mrb[64].mxu0 %vm204_vm0, %v33799_v19  ;;  %27334 = vmatmul.mubr.msk.f32.vlgmr.msra.gmra.mrb[64].mxu1 %vm204_vm0, %v33650_v50  ;;  %v35064_v50 = vld [vmem:[#allocation14_spill] sm:$0xff]  ;;  %v35073_v19 = vld [vmem:[#allocation32_spill] sm:$0xff] }
 0x89f   : > { %27080 = vmatprep.mubr.msk.f32.mxu0 %vm204_vm0, %v33811_v12  ;;  %27336 = vmatprep.mubr.msk.f32.mxu1 %vm204_vm0, %v33666_v40  ;;  %v35065_v40 = vld [vmem:[#allocation28_spill] sm:$0xff] }
 0x8a0   : > { %28176 = vmatpush3.bf16.msra.mxu1 %v33937_v59  ;;  %28112 = vmatpush3.bf16.msra.mxu0 %v34037_v61  ;;  %v35075_v59 = vld [vmem:[#allocation34_spill] sm:$0xff] }
 0x8a1   : > { %28178 = vmatprep.subr.bf16.mxu1 %v34023_v28  ;;  %28114 = vmatprep.subr.bf16.mxu0 %v34103_v47 }
 0x8a2   : > { %27081 = vmatmul.mubr.msk.f32.gmra.mrb[66].mxu0 %vm204_vm0, %v33821_v51  ;;  %27337 = vmatmul.mubr.msk.f32.gmra.mrb[66].mxu1 %vm204_vm0, %v35056_v1  ;;  %v18667_v1 = vld [vmem:[#allocation7 + $0x578] sm:$0xff] }
 0x8a3   : > { %27083 = vmatprep.mubr.msk.f32.mxu0 %vm204_vm0, %v35057_v25  ;;  %27339 = vmatprep.mubr.msk.f32.mxu1 %vm204_vm0, %v35058_v52  ;;  %v34183_v52 = vpack.c.bf16 %v18667_v1, %v18666_v31  ;;  %v18647_v31 = vld [vmem:[#allocation2 + $0x31] sm:$0xff] }
 0x8a4   : > { %28180 = vmatpush3.bf16.msra.mxu1 %v34023_v28  ;;  %28116 = vmatpush3.bf16.msra.mxu0 %v34103_v47  ;;  %v35070_v28 = vld [vmem:[#allocation21_spill] sm:$0xff]  ;;  %v18896_v1 = vld [vmem:[#allocation7 + $0x590] sm:$0xff] }
 0x8a5   : > { %28182 = vmatprep.subr.bf16.mxu1 %v34037_v61  ;;  %28118 = vmatprep.subr.bf16.mxu0 %v34117_v37 }
 0x8a6   : > { %27084 = vmatmul.mubr.msk.f32.gmra.mrb[68].mxu0 %vm204_vm0, %v35059_v17  ;;  %27340 = vmatmul.mubr.msk.f32.gmra.mrb[68].mxu1 %vm204_vm0, %v35060_v44  ;;  %v18894_v44 = vld [vmem:[#allocation7 + $0x580] sm:$0xff] }
 0x8a7   : > { %27086 = vmatprep.mubr.msk.f32.mxu0 %vm204_vm0, %v35061_v20  ;;  %27342 = vmatprep.mubr.msk.f32.mxu1 %vm204_vm0, %v35062_v56  ;;  %v18895_v56 = vld [vmem:[#allocation7 + $0x588] sm:$0xff] }
 0x8aa   : > { %27087 = vmatmul.mubr.msk.f32.gmra.mrb[70].mxu0 %vm204_vm0, %v35063_v60  ;;  %27343 = vmatmul.mubr.msk.f32.gmra.mrb[70].mxu1 %vm204_vm0, %v35064_v50  ;;  %v35083_v50 = vld [vmem:[#allocation33_spill] sm:$0xff] }
 0x8ab   : > { %27089 = vmatprep.mubr.msk.f32.mxu0 %vm204_vm0, %v35065_v40  ;;  %27345 = vmatprep.mubr.msk.f32.mxu1 %vm204_vm0, %v35066_v54  ;;  %v35084_v54 = vld [vmem:[#allocation20_spill] sm:$0xff] }
 0x8ae   : > { %27090 = vmatmul.mubr.msk.f32.gmra.mrb[72].mxu0 %vm204_vm0, %v35067_v21  ;;  %27346 = vmatmul.mubr.msk.f32.gmra.mrb[72].mxu1 %vm204_vm0, %v35068_v23  ;;  %v35085_v23 = vld [vmem:[#allocation43_spill] sm:$0xff] }
 0x8af   : > { %27092 = vmatprep.mubr.msk.f32.mxu0 %vm204_vm0, %v35069_v10  ;;  %27348 = vmatprep.mubr.msk.f32.mxu1 %vm204_vm0, %v35070_v28  ;;  %v35086_v28 = vld [vmem:[#allocation31_spill] sm:$0xff] }
 0x8b2   : > { %27093 = vmatmul.mubr.msk.f32.gmra.mrb[74].mxu0 %vm204_vm0, %v35071_v13  ;;  %27349 = vmatmul.mubr.msk.f32.gmra.mrb[74].mxu1 %vm204_vm0, %v35072_v22  ;;  %v35087_v22 = vld [vmem:[#allocation29_spill] sm:$0xff] }
 0x8b3   : > { %27095 = vmatprep.mubr.msk.f32.mxu0 %vm204_vm0, %v35073_v19  ;;  %27351 = vmatprep.mubr.msk.f32.mxu1 %vm204_vm0, %v35074_v35  ;;  %v34247_v35 = vld [vmem:[#allocation2 + $0x182] sm:$0xff] }
 0x8b6   : > { %27096 = vmatmul.mubr.msk.f32.gmra.mrb[76].mxu0 %vm204_vm0, %v35075_v59  ;;  %27352 = vmatmul.mubr.msk.f32.gmra.mrb[76].mxu1 %vm204_vm0, %v35076_v62  ;;  %v34253_v62 = vld [vmem:[#allocation2 + $0x18a] sm:$0xff] }
 0x8b7   : > { %27098 = vmatprep.mubr.msk.f32.mxu0 %vm204_vm0, %v33911_v39  ;;  %27354 = vmatprep.mubr.msk.f32.mxu1 %vm204_vm0, %v34167_v38 }
 0x8ba   : > { %27099 = vmatmul.mubr.msk.f32.gmra.mrb[78].mxu0 %vm204_vm0, %v33917_v48  ;;  %27355 = vmatmul.mubr.msk.f32.gmra.mrb[78].mxu1 %vm204_vm0, %v34173_v2 }
 0x8bb   : > { %27109 = vmatprep.mubr.msk.f32.mxu0 %vm204_vm0, %v33659_v7  ;;  %27365 = vmatprep.mubr.msk.f32.mxu1 %vm204_vm0, %v33925_v16  ;;  %v34197_v7 = vpack.c.bf16 %v18895_v56, %v18894_v44  ;;  %v18897_v44 = vld [vmem:[#allocation7 + $0x598] sm:$0xff] }
 0x8bc   : > { %v34262_v56 = vpack.c.bf16 %v18897_v44, %v18896_v1 }
 0x8be   : > { %27110 = vmatmul.mubr.msk.f32.vlgmr.msra.gmra.mrb[64].mxu0 %vm204_vm0, %v33674_v30  ;;  %27366 = vmatmul.mubr.msk.f32.vlgmr.msra.gmra.mrb[64].mxu1 %vm204_vm0, %v33933_v41  ;;  %v35077_v30 = vld [vmem:[#allocation39_spill] sm:$0xff] }
 0x8bf   : > { %27112 = vmatprep.mubr.msk.f32.mxu0 %vm204_vm0, %v33683_v63  ;;  %27368 = vmatprep.mubr.msk.f32.mxu1 %vm204_vm0, %v33943_v55  ;;  %v35078_v63 = vld [vmem:[#allocation40_spill] sm:$0xff] }
 0x8c0   : > { %28184 = vmatpush3.bf16.msra.mxu1 %v34037_v61  ;;  %28120 = vmatpush3.bf16.msra.mxu0 %v34117_v37  ;;  %v35081_v61 = vld [vmem:[#allocation19_spill] sm:$0xff] }
 0x8c1   : > { %28186 = vmatprep.subr.bf16.mxu1 %v34103_v47  ;;  %28122 = vmatprep.subr.bf16.mxu0 %v34183_v52 }
 0x8c2   : > { %27113 = vmatmul.mubr.msk.f32.gmra.mrb[66].mxu0 %vm204_vm0, %v33695_v8  ;;  %27369 = vmatmul.mubr.msk.f32.gmra.mrb[66].mxu1 %vm204_vm0, %v33951_v3  ;;  %v35079_v8 = vld [vmem:[#allocation41_spill] sm:$0xff] }
 0x8c3   : > { %27115 = vmatprep.mubr.msk.f32.mxu0 %vm204_vm0, %v33703_v26  ;;  %27371 = vmatprep.mubr.msk.f32.mxu1 %vm204_vm0, %v33959_v43  ;;  %v35080_v26 = vld [vmem:[#allocation42_spill] sm:$0xff] }
 0x8c4   : > { %28188 = vmatpush3.bf16.msra.mxu1 %v34103_v47  ;;  %28124 = vmatpush3.bf16.msra.mxu0 %v34183_v52  ;;  %v35082_v47 = vld [vmem:[#allocation44_spill] sm:$0xff] }
 0x8c5   : > { %28190 = vmatprep.subr.bf16.mxu1 %v34117_v37  ;;  %28126 = vmatprep.subr.bf16.mxu0 %v34197_v7 }
 0x8c6   : > { %27116 = vmatmul.mubr.msk.f32.gmra.mrb[68].mxu0 %vm204_vm0, %v35077_v30  ;;  %27372 = vmatmul.mubr.msk.f32.gmra.mrb[68].mxu1 %vm204_vm0, %v33965_v15  ;;  %v18650_v30 = vld [vmem:[#allocation2 + $0x51] sm:$0xff] }
 0x8c7   : > { %27118 = vmatprep.mubr.msk.f32.mxu0 %vm204_vm0, %v35078_v63  ;;  %27374 = vmatprep.mubr.msk.f32.mxu1 %vm204_vm0, %v33971_v29  ;;  %v20718_v63 = vld [vmem:[#allocation2 + $0xf1] sm:$0xff] }
 0x8ca   : > { %27119 = vmatmul.mubr.msk.f32.gmra.mrb[70].mxu0 %vm204_vm0, %v35079_v8  ;;  %27375 = vmatmul.mubr.msk.f32.gmra.mrb[70].mxu1 %vm204_vm0, %v33977_v58  ;;  %v20721_v8 = vld [vmem:[#allocation2 + $0x111] sm:$0xff] }
 0x8cb   : > { %27121 = vmatprep.mubr.msk.f32.mxu0 %vm204_vm0, %v35080_v26  ;;  %27377 = vmatprep.mubr.msk.f32.mxu1 %vm204_vm0, %v33983_v49 }
 0x8ce   : > { %27122 = vmatmul.mubr.msk.f32.gmra.mrb[72].mxu0 %vm204_vm0, %v35081_v61  ;;  %27378 = vmatmul.mubr.msk.f32.gmra.mrb[72].mxu1 %vm204_vm0, %v33989_v9 }
 0x8cf   : > { %27124 = vmatprep.mubr.msk.f32.mxu0 %vm204_vm0, %v35082_v47  ;;  %27380 = vmatprep.mubr.msk.f32.mxu1 %vm204_vm0, %v35083_v50 }
 0x8d2   : > { %27125 = vmatmul.mubr.msk.f32.gmra.mrb[74].mxu0 %vm204_vm0, %v35084_v54  ;;  %27381 = vmatmul.mubr.msk.f32.gmra.mrb[74].mxu1 %vm204_vm0, %v34001_v27 }
 0x8d3   : > { %27127 = vmatprep.mubr.msk.f32.mxu0 %vm204_vm0, %v35085_v23  ;;  %27383 = vmatprep.mubr.msk.f32.mxu1 %vm204_vm0, %v35086_v28 }
 0x8d6   : > { %27128 = vmatmul.mubr.msk.f32.gmra.mrb[76].mxu0 %vm204_vm0, %v35087_v22  ;;  %27384 = vmatmul.mubr.msk.f32.gmra.mrb[76].mxu1 %vm204_vm0, %v34013_v24 }
 0x8d7   : > { %27130 = vmatprep.mubr.msk.f32.mxu0 %vm204_vm0, %v33791_v18  ;;  %27386 = vmatprep.mubr.msk.f32.mxu1 %vm204_vm0, %v34247_v35  ;;  %v18648_v18 = vld [vmem:[#allocation2 + $0x39] sm:$0xff] }
 0x8da   : > { %27131 = vmatmul.mubr.msk.f32.gmra.mrb[78].mxu0 %vm204_vm0, %v33801_v0  ;;  %27387 = vmatmul.mubr.msk.f32.gmra.mrb[78].mxu1 %vm204_vm0, %v34253_v62  ;;  %v18649_v0 = vld [vmem:[#allocation2 + $0x49] sm:$0xff] }
 0x8db   : > { %27141 = vmatprep.mubr.msk.f32.mxu0 %vm204_vm0, %v18647_v31  ;;  %27397 = vmatprep.mubr.msk.f32.mxu1 %vm204_vm0, %v33813_v33  ;;  %v18651_v33 = vld [vmem:[#allocation2 + $0x61] sm:$0xff] }
 0x8de   : > { %27142 = vmatmul.mubr.msk.f32.vlgmr.msra.gmra.mrb[64].mxu0 %vm204_vm0, %v18648_v18  ;;  %27398 = vmatmul.mubr.msk.f32.vlgmr.msra.gmra.mrb[64].mxu1 %vm204_vm0, %v33823_v32  ;;  %v18652_v32 = vld [vmem:[#allocation2 + $0x69] sm:$0xff] }
 0x8df   : > { %27144 = vmatprep.mubr.msk.f32.mxu0 %vm204_vm0, %v18649_v0  ;;  %27400 = vmatprep.mubr.msk.f32.mxu1 %vm204_vm0, %v33833_v6  ;;  %v18653_v6 = vld [vmem:[#allocation2 + $0x79] sm:$0xff] }
 0x8e0   : > { %28192 = vmatpush3.bf16.msra.mxu1 %v34117_v37  ;;  %28128 = vmatpush3.bf16.msra.mxu0 %v34197_v7  ;;  %v18656_v37 = vld [vmem:[#allocation2 + $0x99] sm:$0xff] }
 0x8e1   : > { %28194 = vmatprep.subr.bf16.mxu1 %v34183_v52  ;;  %28130 = vmatprep.subr.bf16.mxu0 %v34262_v56 }
 0x8e2   : > { %27145 = vmatmul.mubr.msk.f32.gmra.mrb[66].mxu0 %vm204_vm0, %v18650_v30  ;;  %27401 = vmatmul.mubr.msk.f32.gmra.mrb[66].mxu1 %vm204_vm0, %v33841_v36  ;;  %v18654_v36 = vld [vmem:[#allocation2 + $0x81] sm:$0xff] }
 0x8e3   : > { %27147 = vmatprep.mubr.msk.f32.mxu0 %vm204_vm0, %v18651_v33  ;;  %27403 = vmatprep.mubr.msk.f32.mxu1 %vm204_vm0, %v33849_v14  ;;  %v18655_v14 = vld [vmem:[#allocation2 + $0x91] sm:$0xff] }
 0x8e4   : > { %28196 = vmatpush3.bf16.msra.mxu1 %v34183_v52  ;;  %28132 = vmatpush3.bf16.msra.mxu0 %v34262_v56  ;;  %v20504_v52 = vld [vmem:[#allocation2 + $0x1a0] sm:$0xff] }
 0x8e5   : > { %28198 = vmatprep.subr.bf16.mxu1 %v34197_v7 }
 0x8e6   : > { %27148 = vmatmul.mubr.msk.f32.gmra.mrb[68].mxu0 %vm204_vm0, %v18652_v32  ;;  %27404 = vmatmul.mubr.msk.f32.gmra.mrb[68].mxu1 %vm204_vm0, %v33857_v42  ;;  %v18657_v42 = vld [vmem:[#allocation2 + $0xa9] sm:$0xff] }
 0x8e7   : > { %27150 = vmatprep.mubr.msk.f32.mxu0 %vm204_vm0, %v18653_v6  ;;  %27406 = vmatprep.mubr.msk.f32.mxu1 %vm204_vm0, %v33865_v5  ;;  %v18658_v5 = vld [vmem:[#allocation2 + $0xb1] sm:$0xff] }
 0x8ea   : > { %27151 = vmatmul.mubr.msk.f32.gmra.mrb[70].mxu0 %vm204_vm0, %v18654_v36  ;;  %27407 = vmatmul.mubr.msk.f32.gmra.mrb[70].mxu1 %vm204_vm0, %v33873_v11  ;;  %v18659_v11 = vld [vmem:[#allocation2 + $0xc1] sm:$0xff] }
 0x8eb   : > { %27153 = vmatprep.mubr.msk.f32.mxu0 %vm204_vm0, %v18655_v14  ;;  %27409 = vmatprep.mubr.msk.f32.mxu1 %vm204_vm0, %v33881_v46  ;;  %v20503_v46 = vld [vmem:[#allocation2 + $0x198] sm:$0xff] }
 0x8ee   : > { %27154 = vmatmul.mubr.msk.f32.gmra.mrb[72].mxu0 %vm204_vm0, %v18656_v37  ;;  %27410 = vmatmul.mubr.msk.f32.gmra.mrb[72].mxu1 %vm204_vm0, %v33889_v45  ;;  %v18660_v45 = vld [vmem:[#allocation2 + $0xc9] sm:$0xff] }
 0x8ef   : > { %27156 = vmatprep.mubr.msk.f32.mxu0 %vm204_vm0, %v18657_v42  ;;  %27412 = vmatprep.mubr.msk.f32.mxu1 %vm204_vm0, %v33897_v53  ;;  %v18661_v53 = vld [vmem:[#allocation2 + $0xd9] sm:$0xff] }
 0x8f2   : > { %27157 = vmatmul.mubr.msk.f32.gmra.mrb[74].mxu0 %vm204_vm0, %v18658_v5  ;;  %27413 = vmatmul.mubr.msk.f32.gmra.mrb[74].mxu1 %vm204_vm0, %v33905_v34  ;;  %v18662_v34 = vld [vmem:[#allocation2 + $0xe1] sm:$0xff] }
 0x8f3   : > { %27159 = vmatprep.mubr.msk.f32.mxu0 %vm204_vm0, %v18659_v11  ;;  %27415 = vmatprep.mubr.msk.f32.mxu1 %vm204_vm0, %v34087_v4  ;;  %v20719_v4 = vld [vmem:[#allocation2 + $0xf9] sm:$0xff] }
 0x8f6   : > { %27160 = vmatmul.mubr.msk.f32.gmra.mrb[76].mxu0 %vm204_vm0, %v18660_v45  ;;  %27416 = vmatmul.mubr.msk.f32.gmra.mrb[76].mxu1 %vm204_vm0, %v34093_v57  ;;  %v20720_v57 = vld [vmem:[#allocation2 + $0x109] sm:$0xff] }
 0x8f7   : > { %27162 = vmatprep.mubr.msk.f32.mxu0 %vm204_vm0, %v18661_v53  ;;  %27418 = vmatprep.mubr.msk.f32.mxu1 %vm204_vm0, %v20503_v46 }
 0x8fa   : > { %27163 = vmatmul.mubr.msk.f32.gmra.mrb[78].mxu0 %vm204_vm0, %v18662_v34  ;;  %27419 = vmatmul.mubr.msk.f32.gmra.mrb[78].mxu1 %vm204_vm0, %v20504_v52 }
 0x8fb   : > { %27173 = vmatprep.mubr.msk.f32.mxu0 %vm204_vm0, %v33811_v12  ;;  %27429 = vmatprep.mubr.msk.f32.mxu1 %vm204_vm0, %v20718_v63  ;;  %v20722_v12 = vld [vmem:[#allocation2 + $0x121] sm:$0xff] }
 0x8fe   : > { %27174 = vmatmul.mubr.msk.f32.vlgmr.msra.gmra.mrb[64].mxu0 %vm204_vm0, %v33821_v51  ;;  %27430 = vmatmul.mubr.msk.f32.vlgmr.msra.gmra.mrb[64].mxu1 %vm204_vm0, %v20719_v4  ;;  %v20723_v51 = vld [vmem:[#allocation2 + $0x129] sm:$0xff] }
 0x8ff   : > { %27176 = vmatprep.mubr.msk.f32.mxu0 %vm204_vm0, %v35057_v25  ;;  %27432 = vmatprep.mubr.msk.f32.mxu1 %vm204_vm0, %v20720_v57  ;;  %v20724_v25 = vld [vmem:[#allocation2 + $0x139] sm:$0xff] }
 0x900   : > { %28200 = vmatpush3.bf16.msra.mxu1 %v34197_v7 }
 0x901   : > { %28202 = vmatprep.subr.bf16.mxu1 %v34262_v56 }
 0x902   : > { %27177 = vmatmul.mubr.msk.f32.gmra.mrb[66].mxu0 %vm204_vm0, %v35059_v17  ;;  %27433 = vmatmul.mubr.msk.f32.gmra.mrb[66].mxu1 %vm204_vm0, %v20721_v8  ;;  %v20725_v17 = vld [vmem:[#allocation2 + $0x141] sm:$0xff] }
 0x903   : > { %27179 = vmatprep.mubr.msk.f32.mxu0 %vm204_vm0, %v35061_v20  ;;  %27435 = vmatprep.mubr.msk.f32.mxu1 %vm204_vm0, %v20722_v12  ;;  %v20726_v20 = vld [vmem:[#allocation2 + $0x151] sm:$0xff] }
 0x904   : > { %28204 = vmatpush3.bf16.msra.mxu1 %v34262_v56 }
 0x906   : > { %27180 = vmatmul.mubr.msk.f32.gmra.mrb[68].mxu0 %vm204_vm0, %v35063_v60  ;;  %27436 = vmatmul.mubr.msk.f32.gmra.mrb[68].mxu1 %vm204_vm0, %v20723_v51  ;;  %v20727_v60 = vld [vmem:[#allocation2 + $0x159] sm:$0xff] }
 0x907   : > { %27182 = vmatprep.mubr.msk.f32.mxu0 %vm204_vm0, %v35065_v40  ;;  %27438 = vmatprep.mubr.msk.f32.mxu1 %vm204_vm0, %v20724_v25  ;;  %v20728_v40 = vld [vmem:[#allocation2 + $0x169] sm:$0xff] }
 0x90a   : > { %27183 = vmatmul.mubr.msk.f32.gmra.mrb[70].mxu0 %vm204_vm0, %v35067_v21  ;;  %27439 = vmatmul.mubr.msk.f32.gmra.mrb[70].mxu1 %vm204_vm0, %v20725_v17  ;;  %v20729_v21 = vld [vmem:[#allocation2 + $0x171] sm:$0xff] }
 0x90b   : > { %27185 = vmatprep.mubr.msk.f32.mxu0 %vm204_vm0, %v35069_v10  ;;  %27441 = vmatprep.mubr.msk.f32.mxu1 %vm204_vm0, %v20726_v20  ;;  %v20732_v10 = vld [vmem:[#allocation2 + $0x199] sm:$0xff] }
 0x90e   : > { %27186 = vmatmul.mubr.msk.f32.gmra.mrb[72].mxu0 %vm204_vm0, %v35071_v13  ;;  %27442 = vmatmul.mubr.msk.f32.gmra.mrb[72].mxu1 %vm204_vm0, %v20727_v60  ;;  %v20733_v13 = vld [vmem:[#allocation2 + $0x1a1] sm:$0xff] }
 0x90f   : > { %27188 = vmatprep.mubr.msk.f32.mxu0 %vm204_vm0, %v35073_v19  ;;  %27444 = vmatprep.mubr.msk.f32.mxu1 %vm204_vm0, %v20728_v40 }
 0x912   : > { %27189 = vmatmul.mubr.msk.f32.gmra.mrb[74].mxu0 %vm204_vm0, %v35075_v59  ;;  %27445 = vmatmul.mubr.msk.f32.gmra.mrb[74].mxu1 %vm204_vm0, %v20729_v21 }
 0x913   : > { %27191 = vmatprep.mubr.msk.f32.mxu0 %vm204_vm0, %v33911_v39  ;;  %27447 = vmatprep.mubr.msk.f32.mxu1 %vm204_vm0, %v34167_v38 }
 0x916   : > { %27192 = vmatmul.mubr.msk.f32.gmra.mrb[76].mxu0 %vm204_vm0, %v33917_v48  ;;  %27448 = vmatmul.mubr.msk.f32.gmra.mrb[76].mxu1 %vm204_vm0, %v34173_v2 }
 0x917   : > { %27194 = vmatprep.mubr.msk.f32.mxu0 %vm204_vm0, %v33925_v16  ;;  %27450 = vmatprep.mubr.msk.f32.mxu1 %vm204_vm0, %v20732_v10  ;;  %v34400_v16 = vld [vmem:[%s34523_s2 + $0x4] ss:$0 sm:$0xff] }
 0x91a   : > { %27195 = vmatmul.mubr.msk.f32.gmra.mrb[78].mxu0 %vm204_vm0, %v33933_v41  ;;  %27451 = vmatmul.mubr.msk.f32.gmra.mrb[78].mxu1 %vm204_vm0, %v20733_v13 }
 0x91b   : > { %27461 = vmatprep.mubr.msk.f32.mxu1 %vm204_vm0, %v33943_v55 }
 0x91e   : > { %27462 = vmatmul.mubr.msk.f32.vlgmr.msra.gmra.mrb[64].mxu1 %vm204_vm0, %v33951_v3 }
 0x91f   : > { %27464 = vmatprep.mubr.msk.f32.mxu1 %vm204_vm0, %v33959_v43 }
 0x922   : > { %27465 = vmatmul.mubr.msk.f32.gmra.mrb[66].mxu1 %vm204_vm0, %v33965_v15 }
 0x923   : > { %27467 = vmatprep.mubr.msk.f32.mxu1 %vm204_vm0, %v33971_v29 }
 0x926   : > { %27468 = vmatmul.mubr.msk.f32.gmra.mrb[68].mxu1 %vm204_vm0, %v33977_v58 }
 0x927   : > { %27470 = vmatprep.mubr.msk.f32.mxu1 %vm204_vm0, %v33983_v49  ;;  %v20961_v49 = vld [vmem:[#allocation2 + $0x19a] sm:$0xff] }
 0x92a   : > { %27471 = vmatmul.mubr.msk.f32.gmra.mrb[70].mxu1 %vm204_vm0, %v33989_v9  ;;  %v20962_v9 = vld [vmem:[#allocation2 + $0x1a2] sm:$0xff] }
 0x92b   : > { %27473 = vmatprep.mubr.msk.f32.mxu1 %vm204_vm0, %v35083_v50 }
 0x92e   : > { %27474 = vmatmul.mubr.msk.f32.gmra.mrb[72].mxu1 %vm204_vm0, %v34001_v27 }
 0x92f   : > { %27476 = vmatprep.mubr.msk.f32.mxu1 %vm204_vm0, %v35086_v28 }
 0x932   : > { %27477 = vmatmul.mubr.msk.f32.gmra.mrb[74].mxu1 %vm204_vm0, %v34013_v24 }
 0x933   : > { %27479 = vmatprep.mubr.msk.f32.mxu1 %vm204_vm0, %v34247_v35 }
 0x936   : > { %27480 = vmatmul.mubr.msk.f32.gmra.mrb[76].mxu1 %vm204_vm0, %v34253_v62 }
 0x937   : > { %27482 = vmatprep.mubr.msk.f32.mxu1 %vm204_vm0, %v20961_v49 }
 0x93a   : > { %27483 = vmatmul.mubr.msk.f32.gmra.mrb[78].mxu1 %vm204_vm0, %v20962_v9 }
 0x9d1   : > { %v27175_v27 = vpop.f32.mrb[64].mxu0 }
 0x9d2   : > { %v19116_v48 = vadd.f32 %v27175_v27, %v34400_v16  ;;  %v19012_v24 = vpop.f32.mrb[65].mxu0 }
 0x9d3   : > { %v19115_v39 = vadd.f32 %v34400_v16, %v19012_v24 }
 0x9d4   : > { %19132 = vst [vmem:[%s34406_s23 + $0x8] sm:$0xff] %v19116_v48 }
 0x9d5   : > { %19131 = vst [vmem:[%s34406_s23] sm:$0xff] %v19115_v39  ;;  %v27178_v41 = vpop.f32.mrb[66].mxu0 }
 0x9d6   : > { %v19118_v55 = vadd.f32 %v27178_v41, %v34400_v16  ;;  %v19022_v3 = vpop.f32.mrb[67].mxu0 }
 0x9d7   : > { %v19117_v43 = vadd.f32 %v34400_v16, %v19022_v3 }
 0x9d8   : > { %19134 = vst [vmem:[%s34406_s23 + $0x18] sm:$0xff] %v19118_v55 }
 0x9d9   : > { %19133 = vst [vmem:[%s34406_s23 + $0x10] sm:$0xff] %v19117_v43  ;;  %v27181_v15 = vpop.f32.mrb[68].mxu0 }
 0x9da   : > { %v19120_v29 = vadd.f32 %v27181_v15, %v34400_v16  ;;  %v19032_v58 = vpop.f32.mrb[69].mxu0 }
 0x9db   : > { %v19119_v19 = vadd.f32 %v34400_v16, %v19032_v58 }
 0x9dc   : > { %19136 = vst [vmem:[%s34406_s23 + $0x28] sm:$0xff] %v19120_v29 }
 0x9dd   : > { %19135 = vst [vmem:[%s34406_s23 + $0x20] sm:$0xff] %v19119_v19  ;;  %v27184_v59 = vpop.f32.mrb[70].mxu0 }
 0x9de   : > { %v19122_v38 = vadd.f32 %v27184_v59, %v34400_v16  ;;  %v19042_v2 = vpop.f32.mrb[71].mxu0 }
 0x9df   : > { %v19121_v7 = vadd.f32 %v34400_v16, %v19042_v2 }
 0x9e0   : > { %19138 = vst [vmem:[%s34406_s23 + $0x38] sm:$0xff] %v19122_v38 }
 0x9e1   : > { %19137 = vst [vmem:[%s34406_s23 + $0x30] sm:$0xff] %v19121_v7  ;;  %v27187_v26 = vpop.f32.mrb[72].mxu0 }
 0x9e2   : > { %v19124_v61 = vadd.f32 %v27187_v26, %v34400_v16  ;;  %v19052_v47 = vpop.f32.mrb[73].mxu0 }
 0x9e3   : > { %v19123_v50 = vadd.f32 %v34400_v16, %v19052_v47 }
 0x9e4   : > { %19140 = vst [vmem:[%s34406_s23 + $0x48] sm:$0xff] %v19124_v61 }
 0x9e5   : > { %19139 = vst [vmem:[%s34406_s23 + $0x40] sm:$0xff] %v19123_v50  ;;  %v27190_v54 = vpop.f32.mrb[74].mxu0 }
 0x9e6   : > { %v19126_v23 = vadd.f32 %v27190_v54, %v34400_v16  ;;  %v19062_v28 = vpop.f32.mrb[75].mxu0 }
 0x9e7   : > { %v19125_v22 = vadd.f32 %v34400_v16, %v19062_v28 }
 0x9e8   : > { %19142 = vst [vmem:[%s34406_s23 + $0x58] sm:$0xff] %v19126_v23 }
 0x9e9   : > { %19141 = vst [vmem:[%s34406_s23 + $0x50] sm:$0xff] %v19125_v22  ;;  %v27193_v35 = vpop.f32.mrb[76].mxu0 }
 0x9ea   : > { %v19128_v62 = vadd.f32 %v27193_v35, %v34400_v16  ;;  %v19072_v31 = vpop.f32.mrb[77].mxu0 }
 0x9eb   : > { %v19127_v1 = vadd.f32 %v34400_v16, %v19072_v31 }
 0x9ec   : > { %19144 = vst [vmem:[%s34406_s23 + $0x68] sm:$0xff] %v19128_v62 }
 0x9ed   : > { %19143 = vst [vmem:[%s34406_s23 + $0x60] sm:$0xff] %v19127_v1  ;;  %v27196_v44 = vpop.f32.mrb[78].mxu0 }
 0x9ee   : > { %v19130_v18 = vadd.f32 %v27196_v44, %v34400_v16  ;;  %v19082_v56 = vpop.f32.mrb[79].mxu0 }
 0x9ef   : > { %v19129_v0 = vadd.f32 %v34400_v16, %v19082_v56 }
 0x9f0   : > { %19146 = vst [vmem:[%s34406_s23 + $0x78] sm:$0xff] %v19130_v18 }
 0x9f1   : > { %19145 = vst [vmem:[%s34406_s23 + $0x70] sm:$0xff] %v19129_v0  ;;  %v27463_v30 = vpop.f32.mrb[64].mxu1 }
 0x9f2   : > { %v21184_v33 = vadd.f32 %v27463_v30, %v34400_v16  ;;  %v21081_v32 = vpop.f32.mrb[65].mxu1 }
 0x9f3   : > { %v21183_v6 = vadd.f32 %v34400_v16, %v21081_v32 }
 0x9f4   : > { %22783 = vst [vmem:[%s34406_s23 + $0x88] sm:$0xff] %v21184_v33 }
 0x9f5   : > { %22782 = vst [vmem:[%s34406_s23 + $0x80] sm:$0xff] %v21183_v6  ;;  %v27466_v36 = vpop.f32.mrb[66].mxu1 }
 0x9f6   : > { %v21186_v14 = vadd.f32 %v27466_v36, %v34400_v16  ;;  %v21091_v37 = vpop.f32.mrb[67].mxu1 }
 0x9f7   : > { %v21185_v42 = vadd.f32 %v34400_v16, %v21091_v37 }
 0x9f8   : > { %22785 = vst [vmem:[%s34406_s23 + $0x98] sm:$0xff] %v21186_v14 }
 0x9f9   : > { %22784 = vst [vmem:[%s34406_s23 + $0x90] sm:$0xff] %v21185_v42  ;;  %v27469_v5 = vpop.f32.mrb[68].mxu1 }
 0x9fa   : > { %v21188_v11 = vadd.f32 %v27469_v5, %v34400_v16  ;;  %v21101_v46 = vpop.f32.mrb[69].mxu1 }
 0x9fb   : > { %v21187_v45 = vadd.f32 %v34400_v16, %v21101_v46 }
 0x9fc   : > { %22787 = vst [vmem:[%s34406_s23 + $0xa8] sm:$0xff] %v21188_v11 }
 0x9fd   : > { %22786 = vst [vmem:[%s34406_s23 + $0xa0] sm:$0xff] %v21187_v45  ;;  %v27472_v53 = vpop.f32.mrb[70].mxu1 }
 0x9fe   : > { %v21190_v52 = vadd.f32 %v27472_v53, %v34400_v16  ;;  %v21111_v34 = vpop.f32.mrb[71].mxu1 }
 0x9ff   : > { %v21189_v63 = vadd.f32 %v34400_v16, %v21111_v34 }
 0xa00   : > { %22789 = vst [vmem:[%s34406_s23 + $0xb8] sm:$0xff] %v21190_v52 }
 0xa01   : > { %22788 = vst [vmem:[%s34406_s23 + $0xb0] sm:$0xff] %v21189_v63  ;;  %v27475_v4 = vpop.f32.mrb[72].mxu1 }
 0xa02   : > { %v21192_v57 = vadd.f32 %v27475_v4, %v34400_v16  ;;  %v21121_v8 = vpop.f32.mrb[73].mxu1 }
 0xa03   : > { %v21191_v12 = vadd.f32 %v34400_v16, %v21121_v8 }
 0xa04   : > { %22791 = vst [vmem:[%s34406_s23 + $0xc8] sm:$0xff] %v21192_v57 }
 0xa05   : > { %22790 = vst [vmem:[%s34406_s23 + $0xc0] sm:$0xff] %v21191_v12  ;;  %v27478_v51 = vpop.f32.mrb[74].mxu1 }
 0xa06   : > { %v21194_v25 = vadd.f32 %v27478_v51, %v34400_v16  ;;  %v21131_v17 = vpop.f32.mrb[75].mxu1 }
 0xa07   : > { %v21193_v20 = vadd.f32 %v34400_v16, %v21131_v17 }
 0xa08   : > { %22793 = vst [vmem:[%s34406_s23 + $0xd8] sm:$0xff] %v21194_v25 }
 0xa09   : > { %22792 = vst [vmem:[%s34406_s23 + $0xd0] sm:$0xff] %v21193_v20  ;;  %v27481_v60 = vpop.f32.mrb[76].mxu1 }
 0xa0a   : > { %v21196_v40 = vadd.f32 %v27481_v60, %v34400_v16  ;;  %v21141_v21 = vpop.f32.mrb[77].mxu1 }
 0xa0b   : > { %v21195_v10 = vadd.f32 %v34400_v16, %v21141_v21 }
 0xa0c   : > { %22795 = vst [vmem:[%s34406_s23 + $0xe8] sm:$0xff] %v21196_v40 }
 0xa0d   : > { %22794 = vst [vmem:[%s34406_s23 + $0xe0] sm:$0xff] %v21195_v10  ;;  %v27484_v13 = vpop.f32.mrb[78].mxu1 }
 0xa0e   : > { %v21198_v49 = vadd.f32 %v27484_v13, %v34400_v16  ;;  %v21151_v9 = vpop.f32.mrb[79].mxu1 }
 0xa0f   : > { %v21197_v27 = vadd.f32 %v34400_v16, %v21151_v9 }
 0xa10   : > { %22797 = vst [vmem:[%s34406_s23 + $0xf8] sm:$0xff] %v21198_v49 }
 0xa11   : > { %22796 = vst [vmem:[%s34406_s23 + $0xf0] sm:$0xff] %v21197_v27 }
 0xa12   : > { %29618 = shalt.err (!%p29615_p7)
}
 0xa13   : > { %s29619_s9 = scalar_lea.hbm %s34472_s10, 4096  ;;  %s29623_s5 = scalar_lea.hbm %s34524_s3, 8192 }
 0xa14   : > { %p29620_p9 = scmp.ne.s32.totalorder %s34472_s10, %s29619_s9  ;;  %p29624_p5 = scmp.lt.u32.totalorder %s34472_s10, %s34524_s3 }
 0xa15   : > { %p29625_p11 = scmp.lt.u32.totalorder %s29623_s5, %s29619_s9  ;;  %p29627_p4 = scmp.lt.u32.totalorder %s29619_s9, %s34472_s10 }
 0xa16   : > { %p29621_p1 = pnand %p29620_p9, %p29799_p12 }
 0xa17   : > { %p29626_p2 = por %p29625_p11, %p29624_p5 }
 0xa18   : > { %p29622_p0 = pneg %p29621_p1 }
 0xa19   : > { %p29628_p6 = por %p29627_p4, %p29626_p2 }
 0xa1b   : > { %p29629_p8 = pnand %p29628_p6, %p29622_p0 }
 0xa1d   : > { %29632 = shalt.err (!%p29629_p8)
}
 0xa1e   : > { %s29683_s28 = smov 128   ;;  %s29684_s23 = smov 8  }
 0xa1f   : > { %29491 = dma.vmem_to_hbm [thread:$0]  (%p29799_p12), %s34474_s30, 4096, %s34472_s10, %s21217_s16, %s29683_s28, %s29683_s28, %s29684_s23  }
 0xa20 PF: > { %s21245_s29 = sand.u32 1, %s29663_s12   ;;  %p35088_p10 = scmp.ne.s32.totalorder %s34758_s19, 0 }
 0xa21   : > { %p35089_p13 = scmp.ge.s32.totalorder %s29675_s15, 2  ;;  %s21246_s22 = scalar_lea.sflag [#allocation6], %s21245_s29 }
 0xa23   : > { %p29502_p3 = pnand %p35089_p13, %p35088_p10 }
 0xa25   : > { %29658 = dma.done.wait (!%p29502_p3), %s21246_s22, 4096  }
 0xa26   : > { %29660 = vsyncadd (!%p29502_p3), %s21246_s22, 4294963200  ;;  %p17_p7 = scmp.ge.s32.totalorder %s29761_s24, 4   ;;  %s35090_s12 = smov %s29667_s13 }
 0xa27   : > { %s35091_s13 = smov %s29671_s14  ;;  %s35092_s14 = smov %s29795_s17 }
 0xa28   : > { %s35093_s15 = smov %s29761_s24  ;;  %19 = sbr.rel (!%p17_p7) target bundleno = 6 (0x6), region = 142 }
 0xa2f   :  { %21251 = vsyncpa [#allocation5], 1 }
 0xa30   :  { %21253 = vsyncpa [#allocation5 + $0x1], 1 }
 0xa31   :  { %21254 = vsyncpa [#allocation8], 1 }
 0xa32   :  { %21255 = vsyncpa [#allocation6], 1 }
 0xa33   :  { %21257 = vsyncpa [#allocation6 + $0x1], 1 }

</bundles_post_ra>
